<compile_context>
chip_gen: v5e
topology: v5e:2x2
jax: 0.10.0
libtpu: 0.0.40
codegen_flags: <defaults>
</compile_context>

<pallas_src>
import jax
import jax.numpy as jnp
import numpy as np
from jax import lax
from jax.experimental import pallas as pl
from jax.experimental.pallas import tpu as pltpu


# ----------------------------------------------------------------------------
# Fused WaveNet + adaptive-avg-pool kernel (one grid step = NB sequences)
# ----------------------------------------------------------------------------
def make_fused_wavenet_kernel(channels, depths, NB, T, S, kernel_size=3):
    assert kernel_size == 3, "kernel is specialized for kernel_size=3"
    W = NB * T
    nblk = len(channels)
    mm_dtype = jnp.bfloat16  # MXU operand dtype; accumulation stays f32

    def kernel(*refs):
        x_ref, pool_ref = refs[0], refs[1]
        wrefs = refs[2:2 + 6 * nblk]
        o_ref = refs[2 + 6 * nblk]

        # Per-position time index within its own sequence (hoisted, reused by
        # every dilation step).  Positions p = nb*T + t.
        t_idx = lax.broadcasted_iota(jnp.int32, (1, W), 1) % T

        x = x_ref[0]                       # (1, W) f32, NB sequences lane-packed
        h = None
        for b in range(nblk):
            C = channels[b]
            w_in, b_in, wfg, bfg, wp, bp = wrefs[6 * b:6 * b + 6]
            if b == 0:
                # entry 1x1 conv with a single input channel: VPU broadcast MAC
                h = w_in[...] * x + b_in[...]                       # (C, W) f32
            else:
                h = (jnp.dot(w_in[...], h.astype(mm_dtype),
                             preferred_element_type=jnp.float32) + b_in[...])
            res = h
            for i in range(depths[b]):
                d = 2 ** i
                hb = h.astype(mm_dtype)
                # centre tap (k=1); filter+gate rows stacked -> one (2C,*) result
                fg = jnp.dot(wfg[3 * i + 1], hb,
                             preferred_element_type=jnp.float32)
                if d < T:
                    # x_m[t] = x[t-d], x_p[t] = x[t+d] (zero padded per sequence).
                    # The roll runs over the fused NB*T axis; cross-sequence /
                    # wrapped values land exactly where the mask forces zeros.
                    x_m = jnp.where(t_idx >= d,
                                    pltpu.roll(h, shift=d, axis=1), 0.0)
                    x_p = jnp.where(t_idx < T - d,
                                    pltpu.roll(h, shift=W - d, axis=1), 0.0)
                    fg = fg + jnp.dot(wfg[3 * i + 0], x_m.astype(mm_dtype),
                                      preferred_element_type=jnp.float32)
                    fg = fg + jnp.dot(wfg[3 * i + 2], x_p.astype(mm_dtype),
                                      preferred_element_type=jnp.float32)
                # else: both dilated taps fall entirely in the zero padding.
                fg = fg + bfg[i]
                f = jnp.tanh(fg[:C])
                g = 0.5 * jnp.tanh(0.5 * fg[C:]) + 0.5   # sigmoid, single EUP op
                y = (jnp.dot(wp[i], (f * g).astype(mm_dtype),
                             preferred_element_type=jnp.float32) + bp[i])
                h = y
                res = res + y
            h = res

        # Adaptive average pooling, fused in: per-sequence (C_last, T) @ (T, S).
        pool = pool_ref[...]                              # (T, S) f32
        for nb in range(NB):
            seg = h[:, nb * T:(nb + 1) * T]               # static lane slice
            o_ref[nb] = jnp.dot(seg, pool, preferred_element_type=jnp.float32)

    return kernel


# ----------------------------------------------------------------------------
# Glue: parameters, pooling matrix, tiling heuristics, full forward
# ----------------------------------------------------------------------------
def adaptive_avg_pool_matrix(T, S):
    # Exact nn.AdaptiveAvgPool1d windowing: [floor(i*T/S), ceil((i+1)*T/S))
    P = np.zeros((S, T), dtype=np.float32)
    for i in range(S):
        start = (i * T) // S
        end = -(-((i + 1) * T) // S)
        P[i, start:end] = 1.0 / (end - start)
    return jnp.asarray(P.T)  # (T, S)


def _full_spec(shape):
    zeros = (0,) * len(shape)
    return pl.BlockSpec(tuple(shape), lambda g, z=zeros: z)


def _pick_seqs_per_step(N, T, c_max, vmem_budget_bytes=4 << 20):
    """Sequences packed per grid step: lane-dense, >=2 grid steps, VMEM-bounded."""
    cands = [nb for nb in range(1, N + 1)
             if N % nb == 0 and nb * T * c_max * 4 <= vmem_budget_bytes]
    if not cands:
        return 1
    multi_core = [nb for nb in cands if N // nb >= 2]
    pool = multi_core if multi_core else cands
    dense = [nb for nb in pool if (nb * T) % 128 == 0]
    return max(dense) if dense else max(pool)


def init_params(key, in_channels=1, kernel_size=3,
                hidden_channels=(8, 16, 32, 64), dilation_depths=(12, 8, 4, 1)):
    assert kernel_size == 3, "specialized for kernel_size=3"
    blocks = []
    c_prev = in_channels
    for c_out, depth in zip(hidden_channels, dilation_depths):
        key, k1, k2 = jax.random.split(key, 3)
        s_in = 1.0 / float(c_prev) ** 0.5
        w_in = jax.random.normal(k1, (c_out, c_prev), jnp.float32) * s_in
        b_in = jax.random.normal(k2, (c_out, 1), jnp.float32) * s_in
        wfg_taps, bfg_rows, wp_list, bp_list = [], [], [], []
        for _ in range(depth):
            key, kf, kbf, kg, kbg, kp, kbp = jax.random.split(key, 7)
            s_d = 1.0 / float(c_out * kernel_size) ** 0.5
            s_p = 1.0 / float(c_out) ** 0.5
            # PyTorch Conv1d weight layout (C_out, C_in, K); tap k maps to x[t+(k-1)*d]
            wf = jax.random.normal(kf, (c_out, c_out, kernel_size), jnp.float32) * s_d
            wg = jax.random.normal(kg, (c_out, c_out, kernel_size), jnp.float32) * s_d
            bf = jax.random.normal(kbf, (c_out, 1), jnp.float32) * s_d
            bg = jax.random.normal(kbg, (c_out, 1), jnp.float32) * s_d
            for k in range(kernel_size):
                # filter rows on top, gate rows below -> one fused (2C, C) tap matrix
                wfg_taps.append(jnp.concatenate([wf[:, :, k], wg[:, :, k]], axis=0))
            bfg_rows.append(jnp.concatenate([bf, bg], axis=0))
            wp_list.append(jax.random.normal(kp, (c_out, c_out), jnp.float32) * s_p)
            bp_list.append(jax.random.normal(kbp, (c_out, 1), jnp.float32) * s_p)
        blocks.append({
            "w_in": w_in, "b_in": b_in,
            "wfg": jnp.stack(wfg_taps),   # (3*depth, 2C, C), tap-minor
            "bfg": jnp.stack(bfg_rows),   # (depth, 2C, 1)
            "wp": jnp.stack(wp_list),     # (depth, C, C)
            "bp": jnp.stack(bp_list),     # (depth, C, 1)
        })
        c_prev = c_out
    return {"blocks": blocks,
            "hidden": tuple(hidden_channels),
            "depths": tuple(dilation_depths),
            "in_channels": in_channels,
            "kernel_size": kernel_size}


def wavenet_encoder_forward(x, params, output_size):
    """x: [B, Time, ch] (PyTorch convention) -> y: [B, ch, hidden[-1], output_size]."""
    assert params["in_channels"] == 1, "encoder_channel_wise=True path only"
    B, T, Cin = x.shape
    N = B * Cin
    hidden, depths = params["hidden"], params["depths"]
    c_last, S = hidden[-1], output_size

    NB = _pick_seqs_per_step(N, T, max(hidden))
    G = N // NB
    W = NB * T

    # channel-wise encoder: each input channel is an independent 1-channel seq;
    # pack NB of them contiguously along the lane (time) axis per grid step.
    xt = jnp.transpose(x, (0, 2, 1)).reshape(N, T).astype(jnp.float32)
    x_in = xt.reshape(G, 1, W)
    pool_t = adaptive_avg_pool_matrix(T, S)  # (T, S) f32

    args = [x_in, pool_t]
    in_specs = [
        pl.BlockSpec((1, 1, W), lambda g: (g, 0, 0)),
        _full_spec(pool_t.shape),
    ]
    for b, blk in enumerate(params["blocks"]):
        # MXU operands in bf16; VPU path (block-0 entry conv) and biases in f32
        w_in = blk["w_in"] if b == 0 else blk["w_in"].astype(jnp.bfloat16)
        blk_args = [w_in, blk["b_in"],
                    blk["wfg"].astype(jnp.bfloat16), blk["bfg"],
                    blk["wp"].astype(jnp.bfloat16), blk["bp"]]
        args += blk_args
        in_specs += [_full_spec(a.shape) for a in blk_args]

    kernel = make_fused_wavenet_kernel(hidden, depths, NB=NB, T=T, S=S,
                                       kernel_size=params["kernel_size"])

    y_flat = pl.pallas_call(
        kernel,
        out_shape=jax.ShapeDtypeStruct((N, c_last, S), jnp.float32),
        grid=(G,),
        in_specs=in_specs,
        out_specs=pl.BlockSpec((NB, c_last, S), lambda g: (g, 0, 0)),
        compiler_params=pltpu.CompilerParams(
            dimension_semantics=("parallel",)),
    )(*args)

    return y_flat.reshape(B, Cin, c_last, S)


if __name__ == "__main__":
    B, T, CIN = 2, 64, 4          # small [B, Time, ch] example
    OUT_SIZE = 16                 # small stand-in for output_size=320
    HIDDEN = (8, 16, 32, 64)
    DEPTHS = (12, 8, 4, 1)

    key = jax.random.PRNGKey(0)
    kx, kp = jax.random.split(key)
    x = jax.random.normal(kx, (B, T, CIN), jnp.float32)
    params = init_params(kp, hidden_channels=HIDDEN, dilation_depths=DEPTHS)

    y = wavenet_encoder_forward(x, params, output_size=OUT_SIZE)
    y = jax.block_until_ready(y)

    assert y.shape == (B, CIN, HIDDEN[-1], OUT_SIZE), y.shape
    assert bool(jnp.all(jnp.isfinite(y)))
    print("KERNEL_OK")
</pallas_src>

<mosaic_0001>
module attributes {stable_mosaic.version = 11 : i64} {
  func.func @kernel(%arg0: i32, %arg1: memref<1x1x256xf32, #tpu.memory_space<vmem>>, %arg2: memref<64x16xf32, #tpu.memory_space<vmem>>, %arg3: memref<8x1xf32, #tpu.memory_space<vmem>>, %arg4: memref<8x1xf32, #tpu.memory_space<vmem>>, %arg5: memref<36x16x8xbf16, #tpu.memory_space<vmem>>, %arg6: memref<12x16x1xf32, #tpu.memory_space<vmem>>, %arg7: memref<12x8x8xbf16, #tpu.memory_space<vmem>>, %arg8: memref<12x8x1xf32, #tpu.memory_space<vmem>>, %arg9: memref<16x8xbf16, #tpu.memory_space<vmem>>, %arg10: memref<16x1xf32, #tpu.memory_space<vmem>>, %arg11: memref<24x32x16xbf16, #tpu.memory_space<vmem>>, %arg12: memref<8x32x1xf32, #tpu.memory_space<vmem>>, %arg13: memref<8x16x16xbf16, #tpu.memory_space<vmem>>, %arg14: memref<8x16x1xf32, #tpu.memory_space<vmem>>, %arg15: memref<32x16xbf16, #tpu.memory_space<vmem>>, %arg16: memref<32x1xf32, #tpu.memory_space<vmem>>, %arg17: memref<12x64x32xbf16, #tpu.memory_space<vmem>>, %arg18: memref<4x64x1xf32, #tpu.memory_space<vmem>>, %arg19: memref<4x32x32xbf16, #tpu.memory_space<vmem>>, %arg20: memref<4x32x1xf32, #tpu.memory_space<vmem>>, %arg21: memref<64x32xbf16, #tpu.memory_space<vmem>>, %arg22: memref<64x1xf32, #tpu.memory_space<vmem>>, %arg23: memref<3x128x64xbf16, #tpu.memory_space<vmem>>, %arg24: memref<1x128x1xf32, #tpu.memory_space<vmem>>, %arg25: memref<1x64x64xbf16, #tpu.memory_space<vmem>>, %arg26: memref<1x64x1xf32, #tpu.memory_space<vmem>>, %arg27: memref<4x64x16xf32, #tpu.memory_space<vmem>>) attributes {dimension_semantics = [#tpu.dimension_semantics<parallel>], iteration_bounds = array<i64: 2>, scalar_prefetch = 0 : i64, scratch_operands = 0 : i64, tpu.core_type = #tpu.core_type<tc>, window_params = [{transform_indices = @transform_0, window_bounds = array<i64: 1, 1, 256>}, {pipeline_mode = #tpu.pipeline_mode<synchronous>, transform_indices = @transform_1, window_bounds = array<i64: 64, 16>}, {pipeline_mode = #tpu.pipeline_mode<synchronous>, transform_indices = @transform_2, window_bounds = array<i64: 8, 1>}, {pipeline_mode = #tpu.pipeline_mode<synchronous>, transform_indices = @transform_3, window_bounds = array<i64: 8, 1>}, {pipeline_mode = #tpu.pipeline_mode<synchronous>, transform_indices = @transform_4, window_bounds = array<i64: 36, 16, 8>}, {pipeline_mode = #tpu.pipeline_mode<synchronous>, transform_indices = @transform_5, window_bounds = array<i64: 12, 16, 1>}, {pipeline_mode = #tpu.pipeline_mode<synchronous>, transform_indices = @transform_6, window_bounds = array<i64: 12, 8, 8>}, {pipeline_mode = #tpu.pipeline_mode<synchronous>, transform_indices = @transform_7, window_bounds = array<i64: 12, 8, 1>}, {pipeline_mode = #tpu.pipeline_mode<synchronous>, transform_indices = @transform_8, window_bounds = array<i64: 16, 8>}, {pipeline_mode = #tpu.pipeline_mode<synchronous>, transform_indices = @transform_9, window_bounds = array<i64: 16, 1>}, {pipeline_mode = #tpu.pipeline_mode<synchronous>, transform_indices = @transform_10, window_bounds = array<i64: 24, 32, 16>}, {pipeline_mode = #tpu.pipeline_mode<synchronous>, transform_indices = @transform_11, window_bounds = array<i64: 8, 32, 1>}, {pipeline_mode = #tpu.pipeline_mode<synchronous>, transform_indices = @transform_12, window_bounds = array<i64: 8, 16, 16>}, {pipeline_mode = #tpu.pipeline_mode<synchronous>, transform_indices = @transform_13, window_bounds = array<i64: 8, 16, 1>}, {pipeline_mode = #tpu.pipeline_mode<synchronous>, transform_indices = @transform_14, window_bounds = array<i64: 32, 16>}, {pipeline_mode = #tpu.pipeline_mode<synchronous>, transform_indices = @transform_15, window_bounds = array<i64: 32, 1>}, {pipeline_mode = #tpu.pipeline_mode<synchronous>, transform_indices = @transform_16, window_bounds = array<i64: 12, 64, 32>}, {pipeline_mode = #tpu.pipeline_mode<synchronous>, transform_indices = @transform_17, window_bounds = array<i64: 4, 64, 1>}, {pipeline_mode = #tpu.pipeline_mode<synchronous>, transform_indices = @transform_18, window_bounds = array<i64: 4, 32, 32>}, {pipeline_mode = #tpu.pipeline_mode<synchronous>, transform_indices = @transform_19, window_bounds = array<i64: 4, 32, 1>}, {pipeline_mode = #tpu.pipeline_mode<synchronous>, transform_indices = @transform_20, window_bounds = array<i64: 64, 32>}, {pipeline_mode = #tpu.pipeline_mode<synchronous>, transform_indices = @transform_21, window_bounds = array<i64: 64, 1>}, {pipeline_mode = #tpu.pipeline_mode<synchronous>, transform_indices = @transform_22, window_bounds = array<i64: 3, 128, 64>}, {pipeline_mode = #tpu.pipeline_mode<synchronous>, transform_indices = @transform_23, window_bounds = array<i64: 1, 128, 1>}, {pipeline_mode = #tpu.pipeline_mode<synchronous>, transform_indices = @transform_24, window_bounds = array<i64: 1, 64, 64>}, {pipeline_mode = #tpu.pipeline_mode<synchronous>, transform_indices = @transform_25, window_bounds = array<i64: 1, 64, 1>}, {transform_indices = @transform_26, window_bounds = array<i64: 4, 64, 16>}]} {
    %0 = tpu.iota {dimensions = array<i32: 1>} : vector<1x256xi32>
    %c64_i32 = arith.constant 64 : i32
    %c0_i32 = arith.constant 0 : i32
    %1 = arith.cmpi eq, %c64_i32, %c0_i32 : i32
    %c1_i32 = arith.constant 1 : i32
    %2 = arith.select %1, %c1_i32, %c64_i32 : i32
    %3 = vector.broadcast %2 : i32 to vector<1x256xi32>
    %4 = arith.remsi %0, %3 : vector<1x256xi32>
    %c0_i32_0 = arith.constant 0 : i32
    %5 = vector.broadcast %c0_i32_0 : i32 to vector<1x256xi32>
    %6 = arith.cmpi ne, %4, %5 : vector<1x256xi32>
    %c0_i32_1 = arith.constant 0 : i32
    %7 = vector.broadcast %c0_i32_1 : i32 to vector<1x256xi32>
    %8 = arith.cmpi slt, %4, %7 : vector<1x256xi32>
    %c0_i32_2 = arith.constant 0 : i32
    %9 = arith.cmpi slt, %2, %c0_i32_2 : i32
    %10 = vector.broadcast %9 : i1 to vector<1x256xi1>
    %11 = vector.broadcast %10 : vector<1x256xi1> to vector<1x256xi1>
    %12 = arith.xori %8, %11 : vector<1x256xi1>
    %13 = arith.andi %12, %6 : vector<1x256xi1>
    %14 = vector.broadcast %2 : i32 to vector<1x256xi32>
    %15 = arith.addi %4, %14 : vector<1x256xi32>
    %16 = arith.select %13, %15, %4 : vector<1x256xi1>, vector<1x256xi32>
    %c0 = arith.constant 0 : index
    %c0_3 = arith.constant 0 : index
    %c0_4 = arith.constant 0 : index
    %17 = vector.load %arg1[%c0, %c0_3, %c0_4] : memref<1x1x256xf32, #tpu.memory_space<vmem>>, vector<1x1x256xf32>
    %18 = vector.shape_cast %17 : vector<1x1x256xf32> to vector<1x256xf32>
    %c0_5 = arith.constant 0 : index
    %c0_6 = arith.constant 0 : index
    %19 = vector.load %arg3[%c0_5, %c0_6] : memref<8x1xf32, #tpu.memory_space<vmem>>, vector<8x1xf32>
    %20 = vector.broadcast %19 : vector<8x1xf32> to vector<8x256xf32>
    %21 = vector.broadcast %18 : vector<1x256xf32> to vector<8x256xf32>
    %22 = arith.mulf %20, %21 : vector<8x256xf32>
    %c0_7 = arith.constant 0 : index
    %c0_8 = arith.constant 0 : index
    %23 = vector.load %arg4[%c0_7, %c0_8] : memref<8x1xf32, #tpu.memory_space<vmem>>, vector<8x1xf32>
    %24 = vector.broadcast %23 : vector<8x1xf32> to vector<8x256xf32>
    %25 = arith.addf %22, %24 : vector<8x256xf32>
    %26 = arith.truncf %25 : vector<8x256xf32> to vector<8x256xbf16>
    %c1 = arith.constant 1 : index
    %c0_9 = arith.constant 0 : index
    %c0_10 = arith.constant 0 : index
    %27 = vector.load %arg5[%c1, %c0_9, %c0_10] : memref<36x16x8xbf16, #tpu.memory_space<vmem>>, vector<1x16x8xbf16>
    %28 = vector.shape_cast %27 : vector<1x16x8xbf16> to vector<16x8xbf16>
    %cst = arith.constant dense<0.000000e+00> : vector<16x256xf32>
    %29 = tpu.matmul %28, %26, %cst {dimension_numbers = #tpu.dot_dimension_numbers<[1], [0], [0], [1], [0, 0, 1, 1], [], []>} : vector<16x8xbf16>, vector<8x256xbf16>, vector<16x256xf32> -> vector<16x256xf32>
    %c1_i32_11 = arith.constant 1 : i32
    %30 = vector.broadcast %c1_i32_11 : i32 to vector<1x256xi32>
    %31 = arith.cmpi sge, %16, %30 : vector<1x256xi32>
    %c1_i32_12 = arith.constant 1 : i32
    %32 = tpu.dynamic_rotate %25 by %c1_i32_12 dim 1 : vector<8x256xf32>, i32 -> vector<8x256xf32>
    %cst_13 = arith.constant 0.000000e+00 : f32
    %33 = vector.shape_cast %31 : vector<1x256xi1> to vector<1x256xi1>
    %34 = vector.broadcast %33 : vector<1x256xi1> to vector<8x256xi1>
    %35 = vector.broadcast %cst_13 : f32 to vector<8x256xf32>
    %36 = arith.select %34, %32, %35 : vector<8x256xi1>, vector<8x256xf32>
    %c63_i32 = arith.constant 63 : i32
    %37 = vector.broadcast %c63_i32 : i32 to vector<1x256xi32>
    %38 = arith.cmpi slt, %16, %37 : vector<1x256xi32>
    %c255_i32 = arith.constant 255 : i32
    %39 = tpu.dynamic_rotate %25 by %c255_i32 dim 1 : vector<8x256xf32>, i32 -> vector<8x256xf32>
    %cst_14 = arith.constant 0.000000e+00 : f32
    %40 = vector.shape_cast %38 : vector<1x256xi1> to vector<1x256xi1>
    %41 = vector.broadcast %40 : vector<1x256xi1> to vector<8x256xi1>
    %42 = vector.broadcast %cst_14 : f32 to vector<8x256xf32>
    %43 = arith.select %41, %39, %42 : vector<8x256xi1>, vector<8x256xf32>
    %c0_15 = arith.constant 0 : index
    %c0_16 = arith.constant 0 : index
    %c0_17 = arith.constant 0 : index
    %44 = vector.load %arg5[%c0_15, %c0_16, %c0_17] : memref<36x16x8xbf16, #tpu.memory_space<vmem>>, vector<1x16x8xbf16>
    %45 = vector.shape_cast %44 : vector<1x16x8xbf16> to vector<16x8xbf16>
    %46 = arith.truncf %36 : vector<8x256xf32> to vector<8x256xbf16>
    %cst_18 = arith.constant dense<0.000000e+00> : vector<16x256xf32>
    %47 = tpu.matmul %45, %46, %cst_18 {dimension_numbers = #tpu.dot_dimension_numbers<[1], [0], [0], [1], [0, 0, 1, 1], [], []>} : vector<16x8xbf16>, vector<8x256xbf16>, vector<16x256xf32> -> vector<16x256xf32>
    %48 = arith.addf %29, %47 : vector<16x256xf32>
    %c2 = arith.constant 2 : index
    %c0_19 = arith.constant 0 : index
    %c0_20 = arith.constant 0 : index
    %49 = vector.load %arg5[%c2, %c0_19, %c0_20] : memref<36x16x8xbf16, #tpu.memory_space<vmem>>, vector<1x16x8xbf16>
    %50 = vector.shape_cast %49 : vector<1x16x8xbf16> to vector<16x8xbf16>
    %51 = arith.truncf %43 : vector<8x256xf32> to vector<8x256xbf16>
    %cst_21 = arith.constant dense<0.000000e+00> : vector<16x256xf32>
    %52 = tpu.matmul %50, %51, %cst_21 {dimension_numbers = #tpu.dot_dimension_numbers<[1], [0], [0], [1], [0, 0, 1, 1], [], []>} : vector<16x8xbf16>, vector<8x256xbf16>, vector<16x256xf32> -> vector<16x256xf32>
    %53 = arith.addf %48, %52 : vector<16x256xf32>
    %c0_22 = arith.constant 0 : index
    %c0_23 = arith.constant 0 : index
    %c0_24 = arith.constant 0 : index
    %54 = vector.load %arg6[%c0_22, %c0_23, %c0_24] : memref<12x16x1xf32, #tpu.memory_space<vmem>>, vector<1x16x1xf32>
    %55 = vector.shape_cast %54 : vector<1x16x1xf32> to vector<16x1xf32>
    %56 = vector.broadcast %55 : vector<16x1xf32> to vector<16x256xf32>
    %57 = arith.addf %53, %56 : vector<16x256xf32>
    %58 = vector.extract_strided_slice %57 {offsets = [0, 0], sizes = [8, 256], strides = [1, 1]} : vector<16x256xf32> to vector<8x256xf32>
    %59 = math.tanh %58 : vector<8x256xf32>
    %60 = vector.extract_strided_slice %57 {offsets = [8, 0], sizes = [8, 256], strides = [1, 1]} : vector<16x256xf32> to vector<8x256xf32>
    %cst_25 = arith.constant 5.000000e-01 : f32
    %61 = vector.broadcast %cst_25 : f32 to vector<8x256xf32>
    %62 = arith.mulf %61, %60 : vector<8x256xf32>
    %63 = math.tanh %62 : vector<8x256xf32>
    %cst_26 = arith.constant 5.000000e-01 : f32
    %64 = vector.broadcast %cst_26 : f32 to vector<8x256xf32>
    %65 = arith.mulf %64, %63 : vector<8x256xf32>
    %cst_27 = arith.constant 5.000000e-01 : f32
    %66 = vector.broadcast %cst_27 : f32 to vector<8x256xf32>
    %67 = arith.addf %65, %66 : vector<8x256xf32>
    %c0_28 = arith.constant 0 : index
    %c0_29 = arith.constant 0 : index
    %c0_30 = arith.constant 0 : index
    %68 = vector.load %arg7[%c0_28, %c0_29, %c0_30] : memref<12x8x8xbf16, #tpu.memory_space<vmem>>, vector<1x8x8xbf16>
    %69 = vector.shape_cast %68 : vector<1x8x8xbf16> to vector<8x8xbf16>
    %70 = arith.mulf %59, %67 : vector<8x256xf32>
    %71 = arith.truncf %70 : vector<8x256xf32> to vector<8x256xbf16>
    %cst_31 = arith.constant dense<0.000000e+00> : vector<8x256xf32>
    %72 = tpu.matmul %69, %71, %cst_31 {dimension_numbers = #tpu.dot_dimension_numbers<[1], [0], [0], [1], [0, 0, 1, 1], [], []>} : vector<8x8xbf16>, vector<8x256xbf16>, vector<8x256xf32> -> vector<8x256xf32>
    %c0_32 = arith.constant 0 : index
    %c0_33 = arith.constant 0 : index
    %c0_34 = arith.constant 0 : index
    %73 = vector.load %arg8[%c0_32, %c0_33, %c0_34] : memref<12x8x1xf32, #tpu.memory_space<vmem>>, vector<1x8x1xf32>
    %74 = vector.shape_cast %73 : vector<1x8x1xf32> to vector<8x1xf32>
    %75 = vector.broadcast %74 : vector<8x1xf32> to vector<8x256xf32>
    %76 = arith.addf %72, %75 : vector<8x256xf32>
    %77 = arith.addf %25, %76 : vector<8x256xf32>
    %78 = arith.truncf %76 : vector<8x256xf32> to vector<8x256xbf16>
    %c4 = arith.constant 4 : index
    %c0_35 = arith.constant 0 : index
    %c0_36 = arith.constant 0 : index
    %79 = vector.load %arg5[%c4, %c0_35, %c0_36] : memref<36x16x8xbf16, #tpu.memory_space<vmem>>, vector<1x16x8xbf16>
    %80 = vector.shape_cast %79 : vector<1x16x8xbf16> to vector<16x8xbf16>
    %cst_37 = arith.constant dense<0.000000e+00> : vector<16x256xf32>
    %81 = tpu.matmul %80, %78, %cst_37 {dimension_numbers = #tpu.dot_dimension_numbers<[1], [0], [0], [1], [0, 0, 1, 1], [], []>} : vector<16x8xbf16>, vector<8x256xbf16>, vector<16x256xf32> -> vector<16x256xf32>
    %c2_i32 = arith.constant 2 : i32
    %82 = vector.broadcast %c2_i32 : i32 to vector<1x256xi32>
    %83 = arith.cmpi sge, %16, %82 : vector<1x256xi32>
    %c2_i32_38 = arith.constant 2 : i32
    %84 = tpu.dynamic_rotate %76 by %c2_i32_38 dim 1 : vector<8x256xf32>, i32 -> vector<8x256xf32>
    %cst_39 = arith.constant 0.000000e+00 : f32
    %85 = vector.shape_cast %83 : vector<1x256xi1> to vector<1x256xi1>
    %86 = vector.broadcast %85 : vector<1x256xi1> to vector<8x256xi1>
    %87 = vector.broadcast %cst_39 : f32 to vector<8x256xf32>
    %88 = arith.select %86, %84, %87 : vector<8x256xi1>, vector<8x256xf32>
    %c62_i32 = arith.constant 62 : i32
    %89 = vector.broadcast %c62_i32 : i32 to vector<1x256xi32>
    %90 = arith.cmpi slt, %16, %89 : vector<1x256xi32>
    %c254_i32 = arith.constant 254 : i32
    %91 = tpu.dynamic_rotate %76 by %c254_i32 dim 1 : vector<8x256xf32>, i32 -> vector<8x256xf32>
    %cst_40 = arith.constant 0.000000e+00 : f32
    %92 = vector.shape_cast %90 : vector<1x256xi1> to vector<1x256xi1>
    %93 = vector.broadcast %92 : vector<1x256xi1> to vector<8x256xi1>
    %94 = vector.broadcast %cst_40 : f32 to vector<8x256xf32>
    %95 = arith.select %93, %91, %94 : vector<8x256xi1>, vector<8x256xf32>
    %c3 = arith.constant 3 : index
    %c0_41 = arith.constant 0 : index
    %c0_42 = arith.constant 0 : index
    %96 = vector.load %arg5[%c3, %c0_41, %c0_42] : memref<36x16x8xbf16, #tpu.memory_space<vmem>>, vector<1x16x8xbf16>
    %97 = vector.shape_cast %96 : vector<1x16x8xbf16> to vector<16x8xbf16>
    %98 = arith.truncf %88 : vector<8x256xf32> to vector<8x256xbf16>
    %cst_43 = arith.constant dense<0.000000e+00> : vector<16x256xf32>
    %99 = tpu.matmul %97, %98, %cst_43 {dimension_numbers = #tpu.dot_dimension_numbers<[1], [0], [0], [1], [0, 0, 1, 1], [], []>} : vector<16x8xbf16>, vector<8x256xbf16>, vector<16x256xf32> -> vector<16x256xf32>
    %100 = arith.addf %81, %99 : vector<16x256xf32>
    %c5 = arith.constant 5 : index
    %c0_44 = arith.constant 0 : index
    %c0_45 = arith.constant 0 : index
    %101 = vector.load %arg5[%c5, %c0_44, %c0_45] : memref<36x16x8xbf16, #tpu.memory_space<vmem>>, vector<1x16x8xbf16>
    %102 = vector.shape_cast %101 : vector<1x16x8xbf16> to vector<16x8xbf16>
    %103 = arith.truncf %95 : vector<8x256xf32> to vector<8x256xbf16>
    %cst_46 = arith.constant dense<0.000000e+00> : vector<16x256xf32>
    %104 = tpu.matmul %102, %103, %cst_46 {dimension_numbers = #tpu.dot_dimension_numbers<[1], [0], [0], [1], [0, 0, 1, 1], [], []>} : vector<16x8xbf16>, vector<8x256xbf16>, vector<16x256xf32> -> vector<16x256xf32>
    %105 = arith.addf %100, %104 : vector<16x256xf32>
    %c1_47 = arith.constant 1 : index
    %c0_48 = arith.constant 0 : index
    %c0_49 = arith.constant 0 : index
    %106 = vector.load %arg6[%c1_47, %c0_48, %c0_49] : memref<12x16x1xf32, #tpu.memory_space<vmem>>, vector<1x16x1xf32>
    %107 = vector.shape_cast %106 : vector<1x16x1xf32> to vector<16x1xf32>
    %108 = vector.broadcast %107 : vector<16x1xf32> to vector<16x256xf32>
    %109 = arith.addf %105, %108 : vector<16x256xf32>
    %110 = vector.extract_strided_slice %109 {offsets = [0, 0], sizes = [8, 256], strides = [1, 1]} : vector<16x256xf32> to vector<8x256xf32>
    %111 = math.tanh %110 : vector<8x256xf32>
    %112 = vector.extract_strided_slice %109 {offsets = [8, 0], sizes = [8, 256], strides = [1, 1]} : vector<16x256xf32> to vector<8x256xf32>
    %cst_50 = arith.constant 5.000000e-01 : f32
    %113 = vector.broadcast %cst_50 : f32 to vector<8x256xf32>
    %114 = arith.mulf %113, %112 : vector<8x256xf32>
    %115 = math.tanh %114 : vector<8x256xf32>
    %cst_51 = arith.constant 5.000000e-01 : f32
    %116 = vector.broadcast %cst_51 : f32 to vector<8x256xf32>
    %117 = arith.mulf %116, %115 : vector<8x256xf32>
    %cst_52 = arith.constant 5.000000e-01 : f32
    %118 = vector.broadcast %cst_52 : f32 to vector<8x256xf32>
    %119 = arith.addf %117, %118 : vector<8x256xf32>
    %c1_53 = arith.constant 1 : index
    %c0_54 = arith.constant 0 : index
    %c0_55 = arith.constant 0 : index
    %120 = vector.load %arg7[%c1_53, %c0_54, %c0_55] : memref<12x8x8xbf16, #tpu.memory_space<vmem>>, vector<1x8x8xbf16>
    %121 = vector.shape_cast %120 : vector<1x8x8xbf16> to vector<8x8xbf16>
    %122 = arith.mulf %111, %119 : vector<8x256xf32>
    %123 = arith.truncf %122 : vector<8x256xf32> to vector<8x256xbf16>
    %cst_56 = arith.constant dense<0.000000e+00> : vector<8x256xf32>
    %124 = tpu.matmul %121, %123, %cst_56 {dimension_numbers = #tpu.dot_dimension_numbers<[1], [0], [0], [1], [0, 0, 1, 1], [], []>} : vector<8x8xbf16>, vector<8x256xbf16>, vector<8x256xf32> -> vector<8x256xf32>
    %c1_57 = arith.constant 1 : index
    %c0_58 = arith.constant 0 : index
    %c0_59 = arith.constant 0 : index
    %125 = vector.load %arg8[%c1_57, %c0_58, %c0_59] : memref<12x8x1xf32, #tpu.memory_space<vmem>>, vector<1x8x1xf32>
    %126 = vector.shape_cast %125 : vector<1x8x1xf32> to vector<8x1xf32>
    %127 = vector.broadcast %126 : vector<8x1xf32> to vector<8x256xf32>
    %128 = arith.addf %124, %127 : vector<8x256xf32>
    %129 = arith.addf %77, %128 : vector<8x256xf32>
    %130 = arith.truncf %128 : vector<8x256xf32> to vector<8x256xbf16>
    %c7 = arith.constant 7 : index
    %c0_60 = arith.constant 0 : index
    %c0_61 = arith.constant 0 : index
    %131 = vector.load %arg5[%c7, %c0_60, %c0_61] : memref<36x16x8xbf16, #tpu.memory_space<vmem>>, vector<1x16x8xbf16>
    %132 = vector.shape_cast %131 : vector<1x16x8xbf16> to vector<16x8xbf16>
    %cst_62 = arith.constant dense<0.000000e+00> : vector<16x256xf32>
    %133 = tpu.matmul %132, %130, %cst_62 {dimension_numbers = #tpu.dot_dimension_numbers<[1], [0], [0], [1], [0, 0, 1, 1], [], []>} : vector<16x8xbf16>, vector<8x256xbf16>, vector<16x256xf32> -> vector<16x256xf32>
    %c4_i32 = arith.constant 4 : i32
    %134 = vector.broadcast %c4_i32 : i32 to vector<1x256xi32>
    %135 = arith.cmpi sge, %16, %134 : vector<1x256xi32>
    %c4_i32_63 = arith.constant 4 : i32
    %136 = tpu.dynamic_rotate %128 by %c4_i32_63 dim 1 : vector<8x256xf32>, i32 -> vector<8x256xf32>
    %cst_64 = arith.constant 0.000000e+00 : f32
    %137 = vector.shape_cast %135 : vector<1x256xi1> to vector<1x256xi1>
    %138 = vector.broadcast %137 : vector<1x256xi1> to vector<8x256xi1>
    %139 = vector.broadcast %cst_64 : f32 to vector<8x256xf32>
    %140 = arith.select %138, %136, %139 : vector<8x256xi1>, vector<8x256xf32>
    %c60_i32 = arith.constant 60 : i32
    %141 = vector.broadcast %c60_i32 : i32 to vector<1x256xi32>
    %142 = arith.cmpi slt, %16, %141 : vector<1x256xi32>
    %c252_i32 = arith.constant 252 : i32
    %143 = tpu.dynamic_rotate %128 by %c252_i32 dim 1 : vector<8x256xf32>, i32 -> vector<8x256xf32>
    %cst_65 = arith.constant 0.000000e+00 : f32
    %144 = vector.shape_cast %142 : vector<1x256xi1> to vector<1x256xi1>
    %145 = vector.broadcast %144 : vector<1x256xi1> to vector<8x256xi1>
    %146 = vector.broadcast %cst_65 : f32 to vector<8x256xf32>
    %147 = arith.select %145, %143, %146 : vector<8x256xi1>, vector<8x256xf32>
    %c6 = arith.constant 6 : index
    %c0_66 = arith.constant 0 : index
    %c0_67 = arith.constant 0 : index
    %148 = vector.load %arg5[%c6, %c0_66, %c0_67] : memref<36x16x8xbf16, #tpu.memory_space<vmem>>, vector<1x16x8xbf16>
    %149 = vector.shape_cast %148 : vector<1x16x8xbf16> to vector<16x8xbf16>
    %150 = arith.truncf %140 : vector<8x256xf32> to vector<8x256xbf16>
    %cst_68 = arith.constant dense<0.000000e+00> : vector<16x256xf32>
    %151 = tpu.matmul %149, %150, %cst_68 {dimension_numbers = #tpu.dot_dimension_numbers<[1], [0], [0], [1], [0, 0, 1, 1], [], []>} : vector<16x8xbf16>, vector<8x256xbf16>, vector<16x256xf32> -> vector<16x256xf32>
    %152 = arith.addf %133, %151 : vector<16x256xf32>
    %c8 = arith.constant 8 : index
    %c0_69 = arith.constant 0 : index
    %c0_70 = arith.constant 0 : index
    %153 = vector.load %arg5[%c8, %c0_69, %c0_70] : memref<36x16x8xbf16, #tpu.memory_space<vmem>>, vector<1x16x8xbf16>
    %154 = vector.shape_cast %153 : vector<1x16x8xbf16> to vector<16x8xbf16>
    %155 = arith.truncf %147 : vector<8x256xf32> to vector<8x256xbf16>
    %cst_71 = arith.constant dense<0.000000e+00> : vector<16x256xf32>
    %156 = tpu.matmul %154, %155, %cst_71 {dimension_numbers = #tpu.dot_dimension_numbers<[1], [0], [0], [1], [0, 0, 1, 1], [], []>} : vector<16x8xbf16>, vector<8x256xbf16>, vector<16x256xf32> -> vector<16x256xf32>
    %157 = arith.addf %152, %156 : vector<16x256xf32>
    %c2_72 = arith.constant 2 : index
    %c0_73 = arith.constant 0 : index
    %c0_74 = arith.constant 0 : index
    %158 = vector.load %arg6[%c2_72, %c0_73, %c0_74] : memref<12x16x1xf32, #tpu.memory_space<vmem>>, vector<1x16x1xf32>
    %159 = vector.shape_cast %158 : vector<1x16x1xf32> to vector<16x1xf32>
    %160 = vector.broadcast %159 : vector<16x1xf32> to vector<16x256xf32>
    %161 = arith.addf %157, %160 : vector<16x256xf32>
    %162 = vector.extract_strided_slice %161 {offsets = [0, 0], sizes = [8, 256], strides = [1, 1]} : vector<16x256xf32> to vector<8x256xf32>
    %163 = math.tanh %162 : vector<8x256xf32>
    %164 = vector.extract_strided_slice %161 {offsets = [8, 0], sizes = [8, 256], strides = [1, 1]} : vector<16x256xf32> to vector<8x256xf32>
    %cst_75 = arith.constant 5.000000e-01 : f32
    %165 = vector.broadcast %cst_75 : f32 to vector<8x256xf32>
    %166 = arith.mulf %165, %164 : vector<8x256xf32>
    %167 = math.tanh %166 : vector<8x256xf32>
    %cst_76 = arith.constant 5.000000e-01 : f32
    %168 = vector.broadcast %cst_76 : f32 to vector<8x256xf32>
    %169 = arith.mulf %168, %167 : vector<8x256xf32>
    %cst_77 = arith.constant 5.000000e-01 : f32
    %170 = vector.broadcast %cst_77 : f32 to vector<8x256xf32>
    %171 = arith.addf %169, %170 : vector<8x256xf32>
    %c2_78 = arith.constant 2 : index
    %c0_79 = arith.constant 0 : index
    %c0_80 = arith.constant 0 : index
    %172 = vector.load %arg7[%c2_78, %c0_79, %c0_80] : memref<12x8x8xbf16, #tpu.memory_space<vmem>>, vector<1x8x8xbf16>
    %173 = vector.shape_cast %172 : vector<1x8x8xbf16> to vector<8x8xbf16>
    %174 = arith.mulf %163, %171 : vector<8x256xf32>
    %175 = arith.truncf %174 : vector<8x256xf32> to vector<8x256xbf16>
    %cst_81 = arith.constant dense<0.000000e+00> : vector<8x256xf32>
    %176 = tpu.matmul %173, %175, %cst_81 {dimension_numbers = #tpu.dot_dimension_numbers<[1], [0], [0], [1], [0, 0, 1, 1], [], []>} : vector<8x8xbf16>, vector<8x256xbf16>, vector<8x256xf32> -> vector<8x256xf32>
    %c2_82 = arith.constant 2 : index
    %c0_83 = arith.constant 0 : index
    %c0_84 = arith.constant 0 : index
    %177 = vector.load %arg8[%c2_82, %c0_83, %c0_84] : memref<12x8x1xf32, #tpu.memory_space<vmem>>, vector<1x8x1xf32>
    %178 = vector.shape_cast %177 : vector<1x8x1xf32> to vector<8x1xf32>
    %179 = vector.broadcast %178 : vector<8x1xf32> to vector<8x256xf32>
    %180 = arith.addf %176, %179 : vector<8x256xf32>
    %181 = arith.addf %129, %180 : vector<8x256xf32>
    %182 = arith.truncf %180 : vector<8x256xf32> to vector<8x256xbf16>
    %c10 = arith.constant 10 : index
    %c0_85 = arith.constant 0 : index
    %c0_86 = arith.constant 0 : index
    %183 = vector.load %arg5[%c10, %c0_85, %c0_86] : memref<36x16x8xbf16, #tpu.memory_space<vmem>>, vector<1x16x8xbf16>
    %184 = vector.shape_cast %183 : vector<1x16x8xbf16> to vector<16x8xbf16>
    %cst_87 = arith.constant dense<0.000000e+00> : vector<16x256xf32>
    %185 = tpu.matmul %184, %182, %cst_87 {dimension_numbers = #tpu.dot_dimension_numbers<[1], [0], [0], [1], [0, 0, 1, 1], [], []>} : vector<16x8xbf16>, vector<8x256xbf16>, vector<16x256xf32> -> vector<16x256xf32>
    %c8_i32 = arith.constant 8 : i32
    %186 = vector.broadcast %c8_i32 : i32 to vector<1x256xi32>
    %187 = arith.cmpi sge, %16, %186 : vector<1x256xi32>
    %c8_i32_88 = arith.constant 8 : i32
    %188 = tpu.dynamic_rotate %180 by %c8_i32_88 dim 1 : vector<8x256xf32>, i32 -> vector<8x256xf32>
    %cst_89 = arith.constant 0.000000e+00 : f32
    %189 = vector.shape_cast %187 : vector<1x256xi1> to vector<1x256xi1>
    %190 = vector.broadcast %189 : vector<1x256xi1> to vector<8x256xi1>
    %191 = vector.broadcast %cst_89 : f32 to vector<8x256xf32>
    %192 = arith.select %190, %188, %191 : vector<8x256xi1>, vector<8x256xf32>
    %c56_i32 = arith.constant 56 : i32
    %193 = vector.broadcast %c56_i32 : i32 to vector<1x256xi32>
    %194 = arith.cmpi slt, %16, %193 : vector<1x256xi32>
    %c248_i32 = arith.constant 248 : i32
    %195 = tpu.dynamic_rotate %180 by %c248_i32 dim 1 : vector<8x256xf32>, i32 -> vector<8x256xf32>
    %cst_90 = arith.constant 0.000000e+00 : f32
    %196 = vector.shape_cast %194 : vector<1x256xi1> to vector<1x256xi1>
    %197 = vector.broadcast %196 : vector<1x256xi1> to vector<8x256xi1>
    %198 = vector.broadcast %cst_90 : f32 to vector<8x256xf32>
    %199 = arith.select %197, %195, %198 : vector<8x256xi1>, vector<8x256xf32>
    %c9 = arith.constant 9 : index
    %c0_91 = arith.constant 0 : index
    %c0_92 = arith.constant 0 : index
    %200 = vector.load %arg5[%c9, %c0_91, %c0_92] : memref<36x16x8xbf16, #tpu.memory_space<vmem>>, vector<1x16x8xbf16>
    %201 = vector.shape_cast %200 : vector<1x16x8xbf16> to vector<16x8xbf16>
    %202 = arith.truncf %192 : vector<8x256xf32> to vector<8x256xbf16>
    %cst_93 = arith.constant dense<0.000000e+00> : vector<16x256xf32>
    %203 = tpu.matmul %201, %202, %cst_93 {dimension_numbers = #tpu.dot_dimension_numbers<[1], [0], [0], [1], [0, 0, 1, 1], [], []>} : vector<16x8xbf16>, vector<8x256xbf16>, vector<16x256xf32> -> vector<16x256xf32>
    %204 = arith.addf %185, %203 : vector<16x256xf32>
    %c11 = arith.constant 11 : index
    %c0_94 = arith.constant 0 : index
    %c0_95 = arith.constant 0 : index
    %205 = vector.load %arg5[%c11, %c0_94, %c0_95] : memref<36x16x8xbf16, #tpu.memory_space<vmem>>, vector<1x16x8xbf16>
    %206 = vector.shape_cast %205 : vector<1x16x8xbf16> to vector<16x8xbf16>
    %207 = arith.truncf %199 : vector<8x256xf32> to vector<8x256xbf16>
    %cst_96 = arith.constant dense<0.000000e+00> : vector<16x256xf32>
    %208 = tpu.matmul %206, %207, %cst_96 {dimension_numbers = #tpu.dot_dimension_numbers<[1], [0], [0], [1], [0, 0, 1, 1], [], []>} : vector<16x8xbf16>, vector<8x256xbf16>, vector<16x256xf32> -> vector<16x256xf32>
    %209 = arith.addf %204, %208 : vector<16x256xf32>
    %c3_97 = arith.constant 3 : index
    %c0_98 = arith.constant 0 : index
    %c0_99 = arith.constant 0 : index
    %210 = vector.load %arg6[%c3_97, %c0_98, %c0_99] : memref<12x16x1xf32, #tpu.memory_space<vmem>>, vector<1x16x1xf32>
    %211 = vector.shape_cast %210 : vector<1x16x1xf32> to vector<16x1xf32>
    %212 = vector.broadcast %211 : vector<16x1xf32> to vector<16x256xf32>
    %213 = arith.addf %209, %212 : vector<16x256xf32>
    %214 = vector.extract_strided_slice %213 {offsets = [0, 0], sizes = [8, 256], strides = [1, 1]} : vector<16x256xf32> to vector<8x256xf32>
    %215 = math.tanh %214 : vector<8x256xf32>
    %216 = vector.extract_strided_slice %213 {offsets = [8, 0], sizes = [8, 256], strides = [1, 1]} : vector<16x256xf32> to vector<8x256xf32>
    %cst_100 = arith.constant 5.000000e-01 : f32
    %217 = vector.broadcast %cst_100 : f32 to vector<8x256xf32>
    %218 = arith.mulf %217, %216 : vector<8x256xf32>
    %219 = math.tanh %218 : vector<8x256xf32>
    %cst_101 = arith.constant 5.000000e-01 : f32
    %220 = vector.broadcast %cst_101 : f32 to vector<8x256xf32>
    %221 = arith.mulf %220, %219 : vector<8x256xf32>
    %cst_102 = arith.constant 5.000000e-01 : f32
    %222 = vector.broadcast %cst_102 : f32 to vector<8x256xf32>
    %223 = arith.addf %221, %222 : vector<8x256xf32>
    %c3_103 = arith.constant 3 : index
    %c0_104 = arith.constant 0 : index
    %c0_105 = arith.constant 0 : index
    %224 = vector.load %arg7[%c3_103, %c0_104, %c0_105] : memref<12x8x8xbf16, #tpu.memory_space<vmem>>, vector<1x8x8xbf16>
    %225 = vector.shape_cast %224 : vector<1x8x8xbf16> to vector<8x8xbf16>
    %226 = arith.mulf %215, %223 : vector<8x256xf32>
    %227 = arith.truncf %226 : vector<8x256xf32> to vector<8x256xbf16>
    %cst_106 = arith.constant dense<0.000000e+00> : vector<8x256xf32>
    %228 = tpu.matmul %225, %227, %cst_106 {dimension_numbers = #tpu.dot_dimension_numbers<[1], [0], [0], [1], [0, 0, 1, 1], [], []>} : vector<8x8xbf16>, vector<8x256xbf16>, vector<8x256xf32> -> vector<8x256xf32>
    %c3_107 = arith.constant 3 : index
    %c0_108 = arith.constant 0 : index
    %c0_109 = arith.constant 0 : index
    %229 = vector.load %arg8[%c3_107, %c0_108, %c0_109] : memref<12x8x1xf32, #tpu.memory_space<vmem>>, vector<1x8x1xf32>
    %230 = vector.shape_cast %229 : vector<1x8x1xf32> to vector<8x1xf32>
    %231 = vector.broadcast %230 : vector<8x1xf32> to vector<8x256xf32>
    %232 = arith.addf %228, %231 : vector<8x256xf32>
    %233 = arith.addf %181, %232 : vector<8x256xf32>
    %234 = arith.truncf %232 : vector<8x256xf32> to vector<8x256xbf16>
    %c13 = arith.constant 13 : index
    %c0_110 = arith.constant 0 : index
    %c0_111 = arith.constant 0 : index
    %235 = vector.load %arg5[%c13, %c0_110, %c0_111] : memref<36x16x8xbf16, #tpu.memory_space<vmem>>, vector<1x16x8xbf16>
    %236 = vector.shape_cast %235 : vector<1x16x8xbf16> to vector<16x8xbf16>
    %cst_112 = arith.constant dense<0.000000e+00> : vector<16x256xf32>
    %237 = tpu.matmul %236, %234, %cst_112 {dimension_numbers = #tpu.dot_dimension_numbers<[1], [0], [0], [1], [0, 0, 1, 1], [], []>} : vector<16x8xbf16>, vector<8x256xbf16>, vector<16x256xf32> -> vector<16x256xf32>
    %c16_i32 = arith.constant 16 : i32
    %238 = vector.broadcast %c16_i32 : i32 to vector<1x256xi32>
    %239 = arith.cmpi sge, %16, %238 : vector<1x256xi32>
    %c16_i32_113 = arith.constant 16 : i32
    %240 = tpu.dynamic_rotate %232 by %c16_i32_113 dim 1 : vector<8x256xf32>, i32 -> vector<8x256xf32>
    %cst_114 = arith.constant 0.000000e+00 : f32
    %241 = vector.shape_cast %239 : vector<1x256xi1> to vector<1x256xi1>
    %242 = vector.broadcast %241 : vector<1x256xi1> to vector<8x256xi1>
    %243 = vector.broadcast %cst_114 : f32 to vector<8x256xf32>
    %244 = arith.select %242, %240, %243 : vector<8x256xi1>, vector<8x256xf32>
    %c48_i32 = arith.constant 48 : i32
    %245 = vector.broadcast %c48_i32 : i32 to vector<1x256xi32>
    %246 = arith.cmpi slt, %16, %245 : vector<1x256xi32>
    %c240_i32 = arith.constant 240 : i32
    %247 = tpu.dynamic_rotate %232 by %c240_i32 dim 1 : vector<8x256xf32>, i32 -> vector<8x256xf32>
    %cst_115 = arith.constant 0.000000e+00 : f32
    %248 = vector.shape_cast %246 : vector<1x256xi1> to vector<1x256xi1>
    %249 = vector.broadcast %248 : vector<1x256xi1> to vector<8x256xi1>
    %250 = vector.broadcast %cst_115 : f32 to vector<8x256xf32>
    %251 = arith.select %249, %247, %250 : vector<8x256xi1>, vector<8x256xf32>
    %c12 = arith.constant 12 : index
    %c0_116 = arith.constant 0 : index
    %c0_117 = arith.constant 0 : index
    %252 = vector.load %arg5[%c12, %c0_116, %c0_117] : memref<36x16x8xbf16, #tpu.memory_space<vmem>>, vector<1x16x8xbf16>
    %253 = vector.shape_cast %252 : vector<1x16x8xbf16> to vector<16x8xbf16>
    %254 = arith.truncf %244 : vector<8x256xf32> to vector<8x256xbf16>
    %cst_118 = arith.constant dense<0.000000e+00> : vector<16x256xf32>
    %255 = tpu.matmul %253, %254, %cst_118 {dimension_numbers = #tpu.dot_dimension_numbers<[1], [0], [0], [1], [0, 0, 1, 1], [], []>} : vector<16x8xbf16>, vector<8x256xbf16>, vector<16x256xf32> -> vector<16x256xf32>
    %256 = arith.addf %237, %255 : vector<16x256xf32>
    %c14 = arith.constant 14 : index
    %c0_119 = arith.constant 0 : index
    %c0_120 = arith.constant 0 : index
    %257 = vector.load %arg5[%c14, %c0_119, %c0_120] : memref<36x16x8xbf16, #tpu.memory_space<vmem>>, vector<1x16x8xbf16>
    %258 = vector.shape_cast %257 : vector<1x16x8xbf16> to vector<16x8xbf16>
    %259 = arith.truncf %251 : vector<8x256xf32> to vector<8x256xbf16>
    %cst_121 = arith.constant dense<0.000000e+00> : vector<16x256xf32>
    %260 = tpu.matmul %258, %259, %cst_121 {dimension_numbers = #tpu.dot_dimension_numbers<[1], [0], [0], [1], [0, 0, 1, 1], [], []>} : vector<16x8xbf16>, vector<8x256xbf16>, vector<16x256xf32> -> vector<16x256xf32>
    %261 = arith.addf %256, %260 : vector<16x256xf32>
    %c4_122 = arith.constant 4 : index
    %c0_123 = arith.constant 0 : index
    %c0_124 = arith.constant 0 : index
    %262 = vector.load %arg6[%c4_122, %c0_123, %c0_124] : memref<12x16x1xf32, #tpu.memory_space<vmem>>, vector<1x16x1xf32>
    %263 = vector.shape_cast %262 : vector<1x16x1xf32> to vector<16x1xf32>
    %264 = vector.broadcast %263 : vector<16x1xf32> to vector<16x256xf32>
    %265 = arith.addf %261, %264 : vector<16x256xf32>
    %266 = vector.extract_strided_slice %265 {offsets = [0, 0], sizes = [8, 256], strides = [1, 1]} : vector<16x256xf32> to vector<8x256xf32>
    %267 = math.tanh %266 : vector<8x256xf32>
    %268 = vector.extract_strided_slice %265 {offsets = [8, 0], sizes = [8, 256], strides = [1, 1]} : vector<16x256xf32> to vector<8x256xf32>
    %cst_125 = arith.constant 5.000000e-01 : f32
    %269 = vector.broadcast %cst_125 : f32 to vector<8x256xf32>
    %270 = arith.mulf %269, %268 : vector<8x256xf32>
    %271 = math.tanh %270 : vector<8x256xf32>
    %cst_126 = arith.constant 5.000000e-01 : f32
    %272 = vector.broadcast %cst_126 : f32 to vector<8x256xf32>
    %273 = arith.mulf %272, %271 : vector<8x256xf32>
    %cst_127 = arith.constant 5.000000e-01 : f32
    %274 = vector.broadcast %cst_127 : f32 to vector<8x256xf32>
    %275 = arith.addf %273, %274 : vector<8x256xf32>
    %c4_128 = arith.constant 4 : index
    %c0_129 = arith.constant 0 : index
    %c0_130 = arith.constant 0 : index
    %276 = vector.load %arg7[%c4_128, %c0_129, %c0_130] : memref<12x8x8xbf16, #tpu.memory_space<vmem>>, vector<1x8x8xbf16>
    %277 = vector.shape_cast %276 : vector<1x8x8xbf16> to vector<8x8xbf16>
    %278 = arith.mulf %267, %275 : vector<8x256xf32>
    %279 = arith.truncf %278 : vector<8x256xf32> to vector<8x256xbf16>
    %cst_131 = arith.constant dense<0.000000e+00> : vector<8x256xf32>
    %280 = tpu.matmul %277, %279, %cst_131 {dimension_numbers = #tpu.dot_dimension_numbers<[1], [0], [0], [1], [0, 0, 1, 1], [], []>} : vector<8x8xbf16>, vector<8x256xbf16>, vector<8x256xf32> -> vector<8x256xf32>
    %c4_132 = arith.constant 4 : index
    %c0_133 = arith.constant 0 : index
    %c0_134 = arith.constant 0 : index
    %281 = vector.load %arg8[%c4_132, %c0_133, %c0_134] : memref<12x8x1xf32, #tpu.memory_space<vmem>>, vector<1x8x1xf32>
    %282 = vector.shape_cast %281 : vector<1x8x1xf32> to vector<8x1xf32>
    %283 = vector.broadcast %282 : vector<8x1xf32> to vector<8x256xf32>
    %284 = arith.addf %280, %283 : vector<8x256xf32>
    %285 = arith.addf %233, %284 : vector<8x256xf32>
    %286 = arith.truncf %284 : vector<8x256xf32> to vector<8x256xbf16>
    %c16 = arith.constant 16 : index
    %c0_135 = arith.constant 0 : index
    %c0_136 = arith.constant 0 : index
    %287 = vector.load %arg5[%c16, %c0_135, %c0_136] : memref<36x16x8xbf16, #tpu.memory_space<vmem>>, vector<1x16x8xbf16>
    %288 = vector.shape_cast %287 : vector<1x16x8xbf16> to vector<16x8xbf16>
    %cst_137 = arith.constant dense<0.000000e+00> : vector<16x256xf32>
    %289 = tpu.matmul %288, %286, %cst_137 {dimension_numbers = #tpu.dot_dimension_numbers<[1], [0], [0], [1], [0, 0, 1, 1], [], []>} : vector<16x8xbf16>, vector<8x256xbf16>, vector<16x256xf32> -> vector<16x256xf32>
    %c32_i32 = arith.constant 32 : i32
    %290 = vector.broadcast %c32_i32 : i32 to vector<1x256xi32>
    %291 = arith.cmpi sge, %16, %290 : vector<1x256xi32>
    %c32_i32_138 = arith.constant 32 : i32
    %292 = tpu.dynamic_rotate %284 by %c32_i32_138 dim 1 : vector<8x256xf32>, i32 -> vector<8x256xf32>
    %cst_139 = arith.constant 0.000000e+00 : f32
    %293 = vector.shape_cast %291 : vector<1x256xi1> to vector<1x256xi1>
    %294 = vector.broadcast %293 : vector<1x256xi1> to vector<8x256xi1>
    %295 = vector.broadcast %cst_139 : f32 to vector<8x256xf32>
    %296 = arith.select %294, %292, %295 : vector<8x256xi1>, vector<8x256xf32>
    %c32_i32_140 = arith.constant 32 : i32
    %297 = vector.broadcast %c32_i32_140 : i32 to vector<1x256xi32>
    %298 = arith.cmpi slt, %16, %297 : vector<1x256xi32>
    %c224_i32 = arith.constant 224 : i32
    %299 = tpu.dynamic_rotate %284 by %c224_i32 dim 1 : vector<8x256xf32>, i32 -> vector<8x256xf32>
    %cst_141 = arith.constant 0.000000e+00 : f32
    %300 = vector.shape_cast %298 : vector<1x256xi1> to vector<1x256xi1>
    %301 = vector.broadcast %300 : vector<1x256xi1> to vector<8x256xi1>
    %302 = vector.broadcast %cst_141 : f32 to vector<8x256xf32>
    %303 = arith.select %301, %299, %302 : vector<8x256xi1>, vector<8x256xf32>
    %c15 = arith.constant 15 : index
    %c0_142 = arith.constant 0 : index
    %c0_143 = arith.constant 0 : index
    %304 = vector.load %arg5[%c15, %c0_142, %c0_143] : memref<36x16x8xbf16, #tpu.memory_space<vmem>>, vector<1x16x8xbf16>
    %305 = vector.shape_cast %304 : vector<1x16x8xbf16> to vector<16x8xbf16>
    %306 = arith.truncf %296 : vector<8x256xf32> to vector<8x256xbf16>
    %cst_144 = arith.constant dense<0.000000e+00> : vector<16x256xf32>
    %307 = tpu.matmul %305, %306, %cst_144 {dimension_numbers = #tpu.dot_dimension_numbers<[1], [0], [0], [1], [0, 0, 1, 1], [], []>} : vector<16x8xbf16>, vector<8x256xbf16>, vector<16x256xf32> -> vector<16x256xf32>
    %308 = arith.addf %289, %307 : vector<16x256xf32>
    %c17 = arith.constant 17 : index
    %c0_145 = arith.constant 0 : index
    %c0_146 = arith.constant 0 : index
    %309 = vector.load %arg5[%c17, %c0_145, %c0_146] : memref<36x16x8xbf16, #tpu.memory_space<vmem>>, vector<1x16x8xbf16>
    %310 = vector.shape_cast %309 : vector<1x16x8xbf16> to vector<16x8xbf16>
    %311 = arith.truncf %303 : vector<8x256xf32> to vector<8x256xbf16>
    %cst_147 = arith.constant dense<0.000000e+00> : vector<16x256xf32>
    %312 = tpu.matmul %310, %311, %cst_147 {dimension_numbers = #tpu.dot_dimension_numbers<[1], [0], [0], [1], [0, 0, 1, 1], [], []>} : vector<16x8xbf16>, vector<8x256xbf16>, vector<16x256xf32> -> vector<16x256xf32>
    %313 = arith.addf %308, %312 : vector<16x256xf32>
    %c5_148 = arith.constant 5 : index
    %c0_149 = arith.constant 0 : index
    %c0_150 = arith.constant 0 : index
    %314 = vector.load %arg6[%c5_148, %c0_149, %c0_150] : memref<12x16x1xf32, #tpu.memory_space<vmem>>, vector<1x16x1xf32>
    %315 = vector.shape_cast %314 : vector<1x16x1xf32> to vector<16x1xf32>
    %316 = vector.broadcast %315 : vector<16x1xf32> to vector<16x256xf32>
    %317 = arith.addf %313, %316 : vector<16x256xf32>
    %318 = vector.extract_strided_slice %317 {offsets = [0, 0], sizes = [8, 256], strides = [1, 1]} : vector<16x256xf32> to vector<8x256xf32>
    %319 = math.tanh %318 : vector<8x256xf32>
    %320 = vector.extract_strided_slice %317 {offsets = [8, 0], sizes = [8, 256], strides = [1, 1]} : vector<16x256xf32> to vector<8x256xf32>
    %cst_151 = arith.constant 5.000000e-01 : f32
    %321 = vector.broadcast %cst_151 : f32 to vector<8x256xf32>
    %322 = arith.mulf %321, %320 : vector<8x256xf32>
    %323 = math.tanh %322 : vector<8x256xf32>
    %cst_152 = arith.constant 5.000000e-01 : f32
    %324 = vector.broadcast %cst_152 : f32 to vector<8x256xf32>
    %325 = arith.mulf %324, %323 : vector<8x256xf32>
    %cst_153 = arith.constant 5.000000e-01 : f32
    %326 = vector.broadcast %cst_153 : f32 to vector<8x256xf32>
    %327 = arith.addf %325, %326 : vector<8x256xf32>
    %c5_154 = arith.constant 5 : index
    %c0_155 = arith.constant 0 : index
    %c0_156 = arith.constant 0 : index
    %328 = vector.load %arg7[%c5_154, %c0_155, %c0_156] : memref<12x8x8xbf16, #tpu.memory_space<vmem>>, vector<1x8x8xbf16>
    %329 = vector.shape_cast %328 : vector<1x8x8xbf16> to vector<8x8xbf16>
    %330 = arith.mulf %319, %327 : vector<8x256xf32>
    %331 = arith.truncf %330 : vector<8x256xf32> to vector<8x256xbf16>
    %cst_157 = arith.constant dense<0.000000e+00> : vector<8x256xf32>
    %332 = tpu.matmul %329, %331, %cst_157 {dimension_numbers = #tpu.dot_dimension_numbers<[1], [0], [0], [1], [0, 0, 1, 1], [], []>} : vector<8x8xbf16>, vector<8x256xbf16>, vector<8x256xf32> -> vector<8x256xf32>
    %c5_158 = arith.constant 5 : index
    %c0_159 = arith.constant 0 : index
    %c0_160 = arith.constant 0 : index
    %333 = vector.load %arg8[%c5_158, %c0_159, %c0_160] : memref<12x8x1xf32, #tpu.memory_space<vmem>>, vector<1x8x1xf32>
    %334 = vector.shape_cast %333 : vector<1x8x1xf32> to vector<8x1xf32>
    %335 = vector.broadcast %334 : vector<8x1xf32> to vector<8x256xf32>
    %336 = arith.addf %332, %335 : vector<8x256xf32>
    %337 = arith.addf %285, %336 : vector<8x256xf32>
    %338 = arith.truncf %336 : vector<8x256xf32> to vector<8x256xbf16>
    %c19 = arith.constant 19 : index
    %c0_161 = arith.constant 0 : index
    %c0_162 = arith.constant 0 : index
    %339 = vector.load %arg5[%c19, %c0_161, %c0_162] : memref<36x16x8xbf16, #tpu.memory_space<vmem>>, vector<1x16x8xbf16>
    %340 = vector.shape_cast %339 : vector<1x16x8xbf16> to vector<16x8xbf16>
    %cst_163 = arith.constant dense<0.000000e+00> : vector<16x256xf32>
    %341 = tpu.matmul %340, %338, %cst_163 {dimension_numbers = #tpu.dot_dimension_numbers<[1], [0], [0], [1], [0, 0, 1, 1], [], []>} : vector<16x8xbf16>, vector<8x256xbf16>, vector<16x256xf32> -> vector<16x256xf32>
    %c6_164 = arith.constant 6 : index
    %c0_165 = arith.constant 0 : index
    %c0_166 = arith.constant 0 : index
    %342 = vector.load %arg6[%c6_164, %c0_165, %c0_166] : memref<12x16x1xf32, #tpu.memory_space<vmem>>, vector<1x16x1xf32>
    %343 = vector.shape_cast %342 : vector<1x16x1xf32> to vector<16x1xf32>
    %344 = vector.broadcast %343 : vector<16x1xf32> to vector<16x256xf32>
    %345 = arith.addf %341, %344 : vector<16x256xf32>
    %346 = vector.extract_strided_slice %345 {offsets = [0, 0], sizes = [8, 256], strides = [1, 1]} : vector<16x256xf32> to vector<8x256xf32>
    %347 = math.tanh %346 : vector<8x256xf32>
    %348 = vector.extract_strided_slice %345 {offsets = [8, 0], sizes = [8, 256], strides = [1, 1]} : vector<16x256xf32> to vector<8x256xf32>
    %cst_167 = arith.constant 5.000000e-01 : f32
    %349 = vector.broadcast %cst_167 : f32 to vector<8x256xf32>
    %350 = arith.mulf %349, %348 : vector<8x256xf32>
    %351 = math.tanh %350 : vector<8x256xf32>
    %cst_168 = arith.constant 5.000000e-01 : f32
    %352 = vector.broadcast %cst_168 : f32 to vector<8x256xf32>
    %353 = arith.mulf %352, %351 : vector<8x256xf32>
    %cst_169 = arith.constant 5.000000e-01 : f32
    %354 = vector.broadcast %cst_169 : f32 to vector<8x256xf32>
    %355 = arith.addf %353, %354 : vector<8x256xf32>
    %c6_170 = arith.constant 6 : index
    %c0_171 = arith.constant 0 : index
    %c0_172 = arith.constant 0 : index
    %356 = vector.load %arg7[%c6_170, %c0_171, %c0_172] : memref<12x8x8xbf16, #tpu.memory_space<vmem>>, vector<1x8x8xbf16>
    %357 = vector.shape_cast %356 : vector<1x8x8xbf16> to vector<8x8xbf16>
    %358 = arith.mulf %347, %355 : vector<8x256xf32>
    %359 = arith.truncf %358 : vector<8x256xf32> to vector<8x256xbf16>
    %cst_173 = arith.constant dense<0.000000e+00> : vector<8x256xf32>
    %360 = tpu.matmul %357, %359, %cst_173 {dimension_numbers = #tpu.dot_dimension_numbers<[1], [0], [0], [1], [0, 0, 1, 1], [], []>} : vector<8x8xbf16>, vector<8x256xbf16>, vector<8x256xf32> -> vector<8x256xf32>
    %c6_174 = arith.constant 6 : index
    %c0_175 = arith.constant 0 : index
    %c0_176 = arith.constant 0 : index
    %361 = vector.load %arg8[%c6_174, %c0_175, %c0_176] : memref<12x8x1xf32, #tpu.memory_space<vmem>>, vector<1x8x1xf32>
    %362 = vector.shape_cast %361 : vector<1x8x1xf32> to vector<8x1xf32>
    %363 = vector.broadcast %362 : vector<8x1xf32> to vector<8x256xf32>
    %364 = arith.addf %360, %363 : vector<8x256xf32>
    %365 = arith.addf %337, %364 : vector<8x256xf32>
    %366 = arith.truncf %364 : vector<8x256xf32> to vector<8x256xbf16>
    %c22 = arith.constant 22 : index
    %c0_177 = arith.constant 0 : index
    %c0_178 = arith.constant 0 : index
    %367 = vector.load %arg5[%c22, %c0_177, %c0_178] : memref<36x16x8xbf16, #tpu.memory_space<vmem>>, vector<1x16x8xbf16>
    %368 = vector.shape_cast %367 : vector<1x16x8xbf16> to vector<16x8xbf16>
    %cst_179 = arith.constant dense<0.000000e+00> : vector<16x256xf32>
    %369 = tpu.matmul %368, %366, %cst_179 {dimension_numbers = #tpu.dot_dimension_numbers<[1], [0], [0], [1], [0, 0, 1, 1], [], []>} : vector<16x8xbf16>, vector<8x256xbf16>, vector<16x256xf32> -> vector<16x256xf32>
    %c7_180 = arith.constant 7 : index
    %c0_181 = arith.constant 0 : index
    %c0_182 = arith.constant 0 : index
    %370 = vector.load %arg6[%c7_180, %c0_181, %c0_182] : memref<12x16x1xf32, #tpu.memory_space<vmem>>, vector<1x16x1xf32>
    %371 = vector.shape_cast %370 : vector<1x16x1xf32> to vector<16x1xf32>
    %372 = vector.broadcast %371 : vector<16x1xf32> to vector<16x256xf32>
    %373 = arith.addf %369, %372 : vector<16x256xf32>
    %374 = vector.extract_strided_slice %373 {offsets = [0, 0], sizes = [8, 256], strides = [1, 1]} : vector<16x256xf32> to vector<8x256xf32>
    %375 = math.tanh %374 : vector<8x256xf32>
    %376 = vector.extract_strided_slice %373 {offsets = [8, 0], sizes = [8, 256], strides = [1, 1]} : vector<16x256xf32> to vector<8x256xf32>
    %cst_183 = arith.constant 5.000000e-01 : f32
    %377 = vector.broadcast %cst_183 : f32 to vector<8x256xf32>
    %378 = arith.mulf %377, %376 : vector<8x256xf32>
    %379 = math.tanh %378 : vector<8x256xf32>
    %cst_184 = arith.constant 5.000000e-01 : f32
    %380 = vector.broadcast %cst_184 : f32 to vector<8x256xf32>
    %381 = arith.mulf %380, %379 : vector<8x256xf32>
    %cst_185 = arith.constant 5.000000e-01 : f32
    %382 = vector.broadcast %cst_185 : f32 to vector<8x256xf32>
    %383 = arith.addf %381, %382 : vector<8x256xf32>
    %c7_186 = arith.constant 7 : index
    %c0_187 = arith.constant 0 : index
    %c0_188 = arith.constant 0 : index
    %384 = vector.load %arg7[%c7_186, %c0_187, %c0_188] : memref<12x8x8xbf16, #tpu.memory_space<vmem>>, vector<1x8x8xbf16>
    %385 = vector.shape_cast %384 : vector<1x8x8xbf16> to vector<8x8xbf16>
    %386 = arith.mulf %375, %383 : vector<8x256xf32>
    %387 = arith.truncf %386 : vector<8x256xf32> to vector<8x256xbf16>
    %cst_189 = arith.constant dense<0.000000e+00> : vector<8x256xf32>
    %388 = tpu.matmul %385, %387, %cst_189 {dimension_numbers = #tpu.dot_dimension_numbers<[1], [0], [0], [1], [0, 0, 1, 1], [], []>} : vector<8x8xbf16>, vector<8x256xbf16>, vector<8x256xf32> -> vector<8x256xf32>
    %c7_190 = arith.constant 7 : index
    %c0_191 = arith.constant 0 : index
    %c0_192 = arith.constant 0 : index
    %389 = vector.load %arg8[%c7_190, %c0_191, %c0_192] : memref<12x8x1xf32, #tpu.memory_space<vmem>>, vector<1x8x1xf32>
    %390 = vector.shape_cast %389 : vector<1x8x1xf32> to vector<8x1xf32>
    %391 = vector.broadcast %390 : vector<8x1xf32> to vector<8x256xf32>
    %392 = arith.addf %388, %391 : vector<8x256xf32>
    %393 = arith.addf %365, %392 : vector<8x256xf32>
    %394 = arith.truncf %392 : vector<8x256xf32> to vector<8x256xbf16>
    %c25 = arith.constant 25 : index
    %c0_193 = arith.constant 0 : index
    %c0_194 = arith.constant 0 : index
    %395 = vector.load %arg5[%c25, %c0_193, %c0_194] : memref<36x16x8xbf16, #tpu.memory_space<vmem>>, vector<1x16x8xbf16>
    %396 = vector.shape_cast %395 : vector<1x16x8xbf16> to vector<16x8xbf16>
    %cst_195 = arith.constant dense<0.000000e+00> : vector<16x256xf32>
    %397 = tpu.matmul %396, %394, %cst_195 {dimension_numbers = #tpu.dot_dimension_numbers<[1], [0], [0], [1], [0, 0, 1, 1], [], []>} : vector<16x8xbf16>, vector<8x256xbf16>, vector<16x256xf32> -> vector<16x256xf32>
    %c8_196 = arith.constant 8 : index
    %c0_197 = arith.constant 0 : index
    %c0_198 = arith.constant 0 : index
    %398 = vector.load %arg6[%c8_196, %c0_197, %c0_198] : memref<12x16x1xf32, #tpu.memory_space<vmem>>, vector<1x16x1xf32>
    %399 = vector.shape_cast %398 : vector<1x16x1xf32> to vector<16x1xf32>
    %400 = vector.broadcast %399 : vector<16x1xf32> to vector<16x256xf32>
    %401 = arith.addf %397, %400 : vector<16x256xf32>
    %402 = vector.extract_strided_slice %401 {offsets = [0, 0], sizes = [8, 256], strides = [1, 1]} : vector<16x256xf32> to vector<8x256xf32>
    %403 = math.tanh %402 : vector<8x256xf32>
    %404 = vector.extract_strided_slice %401 {offsets = [8, 0], sizes = [8, 256], strides = [1, 1]} : vector<16x256xf32> to vector<8x256xf32>
    %cst_199 = arith.constant 5.000000e-01 : f32
    %405 = vector.broadcast %cst_199 : f32 to vector<8x256xf32>
    %406 = arith.mulf %405, %404 : vector<8x256xf32>
    %407 = math.tanh %406 : vector<8x256xf32>
    %cst_200 = arith.constant 5.000000e-01 : f32
    %408 = vector.broadcast %cst_200 : f32 to vector<8x256xf32>
    %409 = arith.mulf %408, %407 : vector<8x256xf32>
    %cst_201 = arith.constant 5.000000e-01 : f32
    %410 = vector.broadcast %cst_201 : f32 to vector<8x256xf32>
    %411 = arith.addf %409, %410 : vector<8x256xf32>
    %c8_202 = arith.constant 8 : index
    %c0_203 = arith.constant 0 : index
    %c0_204 = arith.constant 0 : index
    %412 = vector.load %arg7[%c8_202, %c0_203, %c0_204] : memref<12x8x8xbf16, #tpu.memory_space<vmem>>, vector<1x8x8xbf16>
    %413 = vector.shape_cast %412 : vector<1x8x8xbf16> to vector<8x8xbf16>
    %414 = arith.mulf %403, %411 : vector<8x256xf32>
    %415 = arith.truncf %414 : vector<8x256xf32> to vector<8x256xbf16>
    %cst_205 = arith.constant dense<0.000000e+00> : vector<8x256xf32>
    %416 = tpu.matmul %413, %415, %cst_205 {dimension_numbers = #tpu.dot_dimension_numbers<[1], [0], [0], [1], [0, 0, 1, 1], [], []>} : vector<8x8xbf16>, vector<8x256xbf16>, vector<8x256xf32> -> vector<8x256xf32>
    %c8_206 = arith.constant 8 : index
    %c0_207 = arith.constant 0 : index
    %c0_208 = arith.constant 0 : index
    %417 = vector.load %arg8[%c8_206, %c0_207, %c0_208] : memref<12x8x1xf32, #tpu.memory_space<vmem>>, vector<1x8x1xf32>
    %418 = vector.shape_cast %417 : vector<1x8x1xf32> to vector<8x1xf32>
    %419 = vector.broadcast %418 : vector<8x1xf32> to vector<8x256xf32>
    %420 = arith.addf %416, %419 : vector<8x256xf32>
    %421 = arith.addf %393, %420 : vector<8x256xf32>
    %422 = arith.truncf %420 : vector<8x256xf32> to vector<8x256xbf16>
    %c28 = arith.constant 28 : index
    %c0_209 = arith.constant 0 : index
    %c0_210 = arith.constant 0 : index
    %423 = vector.load %arg5[%c28, %c0_209, %c0_210] : memref<36x16x8xbf16, #tpu.memory_space<vmem>>, vector<1x16x8xbf16>
    %424 = vector.shape_cast %423 : vector<1x16x8xbf16> to vector<16x8xbf16>
    %cst_211 = arith.constant dense<0.000000e+00> : vector<16x256xf32>
    %425 = tpu.matmul %424, %422, %cst_211 {dimension_numbers = #tpu.dot_dimension_numbers<[1], [0], [0], [1], [0, 0, 1, 1], [], []>} : vector<16x8xbf16>, vector<8x256xbf16>, vector<16x256xf32> -> vector<16x256xf32>
    %c9_212 = arith.constant 9 : index
    %c0_213 = arith.constant 0 : index
    %c0_214 = arith.constant 0 : index
    %426 = vector.load %arg6[%c9_212, %c0_213, %c0_214] : memref<12x16x1xf32, #tpu.memory_space<vmem>>, vector<1x16x1xf32>
    %427 = vector.shape_cast %426 : vector<1x16x1xf32> to vector<16x1xf32>
    %428 = vector.broadcast %427 : vector<16x1xf32> to vector<16x256xf32>
    %429 = arith.addf %425, %428 : vector<16x256xf32>
    %430 = vector.extract_strided_slice %429 {offsets = [0, 0], sizes = [8, 256], strides = [1, 1]} : vector<16x256xf32> to vector<8x256xf32>
    %431 = math.tanh %430 : vector<8x256xf32>
    %432 = vector.extract_strided_slice %429 {offsets = [8, 0], sizes = [8, 256], strides = [1, 1]} : vector<16x256xf32> to vector<8x256xf32>
    %cst_215 = arith.constant 5.000000e-01 : f32
    %433 = vector.broadcast %cst_215 : f32 to vector<8x256xf32>
    %434 = arith.mulf %433, %432 : vector<8x256xf32>
    %435 = math.tanh %434 : vector<8x256xf32>
    %cst_216 = arith.constant 5.000000e-01 : f32
    %436 = vector.broadcast %cst_216 : f32 to vector<8x256xf32>
    %437 = arith.mulf %436, %435 : vector<8x256xf32>
    %cst_217 = arith.constant 5.000000e-01 : f32
    %438 = vector.broadcast %cst_217 : f32 to vector<8x256xf32>
    %439 = arith.addf %437, %438 : vector<8x256xf32>
    %c9_218 = arith.constant 9 : index
    %c0_219 = arith.constant 0 : index
    %c0_220 = arith.constant 0 : index
    %440 = vector.load %arg7[%c9_218, %c0_219, %c0_220] : memref<12x8x8xbf16, #tpu.memory_space<vmem>>, vector<1x8x8xbf16>
    %441 = vector.shape_cast %440 : vector<1x8x8xbf16> to vector<8x8xbf16>
    %442 = arith.mulf %431, %439 : vector<8x256xf32>
    %443 = arith.truncf %442 : vector<8x256xf32> to vector<8x256xbf16>
    %cst_221 = arith.constant dense<0.000000e+00> : vector<8x256xf32>
    %444 = tpu.matmul %441, %443, %cst_221 {dimension_numbers = #tpu.dot_dimension_numbers<[1], [0], [0], [1], [0, 0, 1, 1], [], []>} : vector<8x8xbf16>, vector<8x256xbf16>, vector<8x256xf32> -> vector<8x256xf32>
    %c9_222 = arith.constant 9 : index
    %c0_223 = arith.constant 0 : index
    %c0_224 = arith.constant 0 : index
    %445 = vector.load %arg8[%c9_222, %c0_223, %c0_224] : memref<12x8x1xf32, #tpu.memory_space<vmem>>, vector<1x8x1xf32>
    %446 = vector.shape_cast %445 : vector<1x8x1xf32> to vector<8x1xf32>
    %447 = vector.broadcast %446 : vector<8x1xf32> to vector<8x256xf32>
    %448 = arith.addf %444, %447 : vector<8x256xf32>
    %449 = arith.addf %421, %448 : vector<8x256xf32>
    %450 = arith.truncf %448 : vector<8x256xf32> to vector<8x256xbf16>
    %c31 = arith.constant 31 : index
    %c0_225 = arith.constant 0 : index
    %c0_226 = arith.constant 0 : index
    %451 = vector.load %arg5[%c31, %c0_225, %c0_226] : memref<36x16x8xbf16, #tpu.memory_space<vmem>>, vector<1x16x8xbf16>
    %452 = vector.shape_cast %451 : vector<1x16x8xbf16> to vector<16x8xbf16>
    %cst_227 = arith.constant dense<0.000000e+00> : vector<16x256xf32>
    %453 = tpu.matmul %452, %450, %cst_227 {dimension_numbers = #tpu.dot_dimension_numbers<[1], [0], [0], [1], [0, 0, 1, 1], [], []>} : vector<16x8xbf16>, vector<8x256xbf16>, vector<16x256xf32> -> vector<16x256xf32>
    %c10_228 = arith.constant 10 : index
    %c0_229 = arith.constant 0 : index
    %c0_230 = arith.constant 0 : index
    %454 = vector.load %arg6[%c10_228, %c0_229, %c0_230] : memref<12x16x1xf32, #tpu.memory_space<vmem>>, vector<1x16x1xf32>
    %455 = vector.shape_cast %454 : vector<1x16x1xf32> to vector<16x1xf32>
    %456 = vector.broadcast %455 : vector<16x1xf32> to vector<16x256xf32>
    %457 = arith.addf %453, %456 : vector<16x256xf32>
    %458 = vector.extract_strided_slice %457 {offsets = [0, 0], sizes = [8, 256], strides = [1, 1]} : vector<16x256xf32> to vector<8x256xf32>
    %459 = math.tanh %458 : vector<8x256xf32>
    %460 = vector.extract_strided_slice %457 {offsets = [8, 0], sizes = [8, 256], strides = [1, 1]} : vector<16x256xf32> to vector<8x256xf32>
    %cst_231 = arith.constant 5.000000e-01 : f32
    %461 = vector.broadcast %cst_231 : f32 to vector<8x256xf32>
    %462 = arith.mulf %461, %460 : vector<8x256xf32>
    %463 = math.tanh %462 : vector<8x256xf32>
    %cst_232 = arith.constant 5.000000e-01 : f32
    %464 = vector.broadcast %cst_232 : f32 to vector<8x256xf32>
    %465 = arith.mulf %464, %463 : vector<8x256xf32>
    %cst_233 = arith.constant 5.000000e-01 : f32
    %466 = vector.broadcast %cst_233 : f32 to vector<8x256xf32>
    %467 = arith.addf %465, %466 : vector<8x256xf32>
    %c10_234 = arith.constant 10 : index
    %c0_235 = arith.constant 0 : index
    %c0_236 = arith.constant 0 : index
    %468 = vector.load %arg7[%c10_234, %c0_235, %c0_236] : memref<12x8x8xbf16, #tpu.memory_space<vmem>>, vector<1x8x8xbf16>
    %469 = vector.shape_cast %468 : vector<1x8x8xbf16> to vector<8x8xbf16>
    %470 = arith.mulf %459, %467 : vector<8x256xf32>
    %471 = arith.truncf %470 : vector<8x256xf32> to vector<8x256xbf16>
    %cst_237 = arith.constant dense<0.000000e+00> : vector<8x256xf32>
    %472 = tpu.matmul %469, %471, %cst_237 {dimension_numbers = #tpu.dot_dimension_numbers<[1], [0], [0], [1], [0, 0, 1, 1], [], []>} : vector<8x8xbf16>, vector<8x256xbf16>, vector<8x256xf32> -> vector<8x256xf32>
    %c10_238 = arith.constant 10 : index
    %c0_239 = arith.constant 0 : index
    %c0_240 = arith.constant 0 : index
    %473 = vector.load %arg8[%c10_238, %c0_239, %c0_240] : memref<12x8x1xf32, #tpu.memory_space<vmem>>, vector<1x8x1xf32>
    %474 = vector.shape_cast %473 : vector<1x8x1xf32> to vector<8x1xf32>
    %475 = vector.broadcast %474 : vector<8x1xf32> to vector<8x256xf32>
    %476 = arith.addf %472, %475 : vector<8x256xf32>
    %477 = arith.addf %449, %476 : vector<8x256xf32>
    %478 = arith.truncf %476 : vector<8x256xf32> to vector<8x256xbf16>
    %c34 = arith.constant 34 : index
    %c0_241 = arith.constant 0 : index
    %c0_242 = arith.constant 0 : index
    %479 = vector.load %arg5[%c34, %c0_241, %c0_242] : memref<36x16x8xbf16, #tpu.memory_space<vmem>>, vector<1x16x8xbf16>
    %480 = vector.shape_cast %479 : vector<1x16x8xbf16> to vector<16x8xbf16>
    %cst_243 = arith.constant dense<0.000000e+00> : vector<16x256xf32>
    %481 = tpu.matmul %480, %478, %cst_243 {dimension_numbers = #tpu.dot_dimension_numbers<[1], [0], [0], [1], [0, 0, 1, 1], [], []>} : vector<16x8xbf16>, vector<8x256xbf16>, vector<16x256xf32> -> vector<16x256xf32>
    %c11_244 = arith.constant 11 : index
    %c0_245 = arith.constant 0 : index
    %c0_246 = arith.constant 0 : index
    %482 = vector.load %arg6[%c11_244, %c0_245, %c0_246] : memref<12x16x1xf32, #tpu.memory_space<vmem>>, vector<1x16x1xf32>
    %483 = vector.shape_cast %482 : vector<1x16x1xf32> to vector<16x1xf32>
    %484 = vector.broadcast %483 : vector<16x1xf32> to vector<16x256xf32>
    %485 = arith.addf %481, %484 : vector<16x256xf32>
    %486 = vector.extract_strided_slice %485 {offsets = [0, 0], sizes = [8, 256], strides = [1, 1]} : vector<16x256xf32> to vector<8x256xf32>
    %487 = math.tanh %486 : vector<8x256xf32>
    %488 = vector.extract_strided_slice %485 {offsets = [8, 0], sizes = [8, 256], strides = [1, 1]} : vector<16x256xf32> to vector<8x256xf32>
    %cst_247 = arith.constant 5.000000e-01 : f32
    %489 = vector.broadcast %cst_247 : f32 to vector<8x256xf32>
    %490 = arith.mulf %489, %488 : vector<8x256xf32>
    %491 = math.tanh %490 : vector<8x256xf32>
    %cst_248 = arith.constant 5.000000e-01 : f32
    %492 = vector.broadcast %cst_248 : f32 to vector<8x256xf32>
    %493 = arith.mulf %492, %491 : vector<8x256xf32>
    %cst_249 = arith.constant 5.000000e-01 : f32
    %494 = vector.broadcast %cst_249 : f32 to vector<8x256xf32>
    %495 = arith.addf %493, %494 : vector<8x256xf32>
    %c11_250 = arith.constant 11 : index
    %c0_251 = arith.constant 0 : index
    %c0_252 = arith.constant 0 : index
    %496 = vector.load %arg7[%c11_250, %c0_251, %c0_252] : memref<12x8x8xbf16, #tpu.memory_space<vmem>>, vector<1x8x8xbf16>
    %497 = vector.shape_cast %496 : vector<1x8x8xbf16> to vector<8x8xbf16>
    %498 = arith.mulf %487, %495 : vector<8x256xf32>
    %499 = arith.truncf %498 : vector<8x256xf32> to vector<8x256xbf16>
    %cst_253 = arith.constant dense<0.000000e+00> : vector<8x256xf32>
    %500 = tpu.matmul %497, %499, %cst_253 {dimension_numbers = #tpu.dot_dimension_numbers<[1], [0], [0], [1], [0, 0, 1, 1], [], []>} : vector<8x8xbf16>, vector<8x256xbf16>, vector<8x256xf32> -> vector<8x256xf32>
    %c11_254 = arith.constant 11 : index
    %c0_255 = arith.constant 0 : index
    %c0_256 = arith.constant 0 : index
    %501 = vector.load %arg8[%c11_254, %c0_255, %c0_256] : memref<12x8x1xf32, #tpu.memory_space<vmem>>, vector<1x8x1xf32>
    %502 = vector.shape_cast %501 : vector<1x8x1xf32> to vector<8x1xf32>
    %503 = vector.broadcast %502 : vector<8x1xf32> to vector<8x256xf32>
    %504 = arith.addf %500, %503 : vector<8x256xf32>
    %505 = arith.addf %477, %504 : vector<8x256xf32>
    %c0_257 = arith.constant 0 : index
    %c0_258 = arith.constant 0 : index
    %506 = vector.load %arg9[%c0_257, %c0_258] : memref<16x8xbf16, #tpu.memory_space<vmem>>, vector<16x8xbf16>
    %507 = arith.truncf %505 : vector<8x256xf32> to vector<8x256xbf16>
    %cst_259 = arith.constant dense<0.000000e+00> : vector<16x256xf32>
    %508 = tpu.matmul %506, %507, %cst_259 {dimension_numbers = #tpu.dot_dimension_numbers<[1], [0], [0], [1], [0, 0, 1, 1], [], []>} : vector<16x8xbf16>, vector<8x256xbf16>, vector<16x256xf32> -> vector<16x256xf32>
    %c0_260 = arith.constant 0 : index
    %c0_261 = arith.constant 0 : index
    %509 = vector.load %arg10[%c0_260, %c0_261] : memref<16x1xf32, #tpu.memory_space<vmem>>, vector<16x1xf32>
    %510 = vector.broadcast %509 : vector<16x1xf32> to vector<16x256xf32>
    %511 = arith.addf %508, %510 : vector<16x256xf32>
    %512 = arith.truncf %511 : vector<16x256xf32> to vector<16x256xbf16>
    %c1_262 = arith.constant 1 : index
    %c0_263 = arith.constant 0 : index
    %c0_264 = arith.constant 0 : index
    %513 = vector.load %arg11[%c1_262, %c0_263, %c0_264] : memref<24x32x16xbf16, #tpu.memory_space<vmem>>, vector<1x32x16xbf16>
    %514 = vector.shape_cast %513 : vector<1x32x16xbf16> to vector<32x16xbf16>
    %cst_265 = arith.constant dense<0.000000e+00> : vector<32x256xf32>
    %515 = tpu.matmul %514, %512, %cst_265 {dimension_numbers = #tpu.dot_dimension_numbers<[1], [0], [0], [1], [0, 0, 1, 1], [], []>} : vector<32x16xbf16>, vector<16x256xbf16>, vector<32x256xf32> -> vector<32x256xf32>
    %c1_i32_266 = arith.constant 1 : i32
    %516 = vector.broadcast %c1_i32_266 : i32 to vector<1x256xi32>
    %517 = arith.cmpi sge, %16, %516 : vector<1x256xi32>
    %c1_i32_267 = arith.constant 1 : i32
    %518 = tpu.dynamic_rotate %511 by %c1_i32_267 dim 1 : vector<16x256xf32>, i32 -> vector<16x256xf32>
    %cst_268 = arith.constant 0.000000e+00 : f32
    %519 = vector.shape_cast %517 : vector<1x256xi1> to vector<1x256xi1>
    %520 = vector.broadcast %519 : vector<1x256xi1> to vector<16x256xi1>
    %521 = vector.broadcast %cst_268 : f32 to vector<16x256xf32>
    %522 = arith.select %520, %518, %521 : vector<16x256xi1>, vector<16x256xf32>
    %c63_i32_269 = arith.constant 63 : i32
    %523 = vector.broadcast %c63_i32_269 : i32 to vector<1x256xi32>
    %524 = arith.cmpi slt, %16, %523 : vector<1x256xi32>
    %c255_i32_270 = arith.constant 255 : i32
    %525 = tpu.dynamic_rotate %511 by %c255_i32_270 dim 1 : vector<16x256xf32>, i32 -> vector<16x256xf32>
    %cst_271 = arith.constant 0.000000e+00 : f32
    %526 = vector.shape_cast %524 : vector<1x256xi1> to vector<1x256xi1>
    %527 = vector.broadcast %526 : vector<1x256xi1> to vector<16x256xi1>
    %528 = vector.broadcast %cst_271 : f32 to vector<16x256xf32>
    %529 = arith.select %527, %525, %528 : vector<16x256xi1>, vector<16x256xf32>
    %c0_272 = arith.constant 0 : index
    %c0_273 = arith.constant 0 : index
    %c0_274 = arith.constant 0 : index
    %530 = vector.load %arg11[%c0_272, %c0_273, %c0_274] : memref<24x32x16xbf16, #tpu.memory_space<vmem>>, vector<1x32x16xbf16>
    %531 = vector.shape_cast %530 : vector<1x32x16xbf16> to vector<32x16xbf16>
    %532 = arith.truncf %522 : vector<16x256xf32> to vector<16x256xbf16>
    %cst_275 = arith.constant dense<0.000000e+00> : vector<32x256xf32>
    %533 = tpu.matmul %531, %532, %cst_275 {dimension_numbers = #tpu.dot_dimension_numbers<[1], [0], [0], [1], [0, 0, 1, 1], [], []>} : vector<32x16xbf16>, vector<16x256xbf16>, vector<32x256xf32> -> vector<32x256xf32>
    %534 = arith.addf %515, %533 : vector<32x256xf32>
    %c2_276 = arith.constant 2 : index
    %c0_277 = arith.constant 0 : index
    %c0_278 = arith.constant 0 : index
    %535 = vector.load %arg11[%c2_276, %c0_277, %c0_278] : memref<24x32x16xbf16, #tpu.memory_space<vmem>>, vector<1x32x16xbf16>
    %536 = vector.shape_cast %535 : vector<1x32x16xbf16> to vector<32x16xbf16>
    %537 = arith.truncf %529 : vector<16x256xf32> to vector<16x256xbf16>
    %cst_279 = arith.constant dense<0.000000e+00> : vector<32x256xf32>
    %538 = tpu.matmul %536, %537, %cst_279 {dimension_numbers = #tpu.dot_dimension_numbers<[1], [0], [0], [1], [0, 0, 1, 1], [], []>} : vector<32x16xbf16>, vector<16x256xbf16>, vector<32x256xf32> -> vector<32x256xf32>
    %539 = arith.addf %534, %538 : vector<32x256xf32>
    %c0_280 = arith.constant 0 : index
    %c0_281 = arith.constant 0 : index
    %c0_282 = arith.constant 0 : index
    %540 = vector.load %arg12[%c0_280, %c0_281, %c0_282] : memref<8x32x1xf32, #tpu.memory_space<vmem>>, vector<1x32x1xf32>
    %541 = vector.shape_cast %540 : vector<1x32x1xf32> to vector<32x1xf32>
    %542 = vector.broadcast %541 : vector<32x1xf32> to vector<32x256xf32>
    %543 = arith.addf %539, %542 : vector<32x256xf32>
    %544 = vector.extract_strided_slice %543 {offsets = [0, 0], sizes = [16, 256], strides = [1, 1]} : vector<32x256xf32> to vector<16x256xf32>
    %545 = math.tanh %544 : vector<16x256xf32>
    %546 = vector.extract_strided_slice %543 {offsets = [16, 0], sizes = [16, 256], strides = [1, 1]} : vector<32x256xf32> to vector<16x256xf32>
    %cst_283 = arith.constant 5.000000e-01 : f32
    %547 = vector.broadcast %cst_283 : f32 to vector<16x256xf32>
    %548 = arith.mulf %547, %546 : vector<16x256xf32>
    %549 = math.tanh %548 : vector<16x256xf32>
    %cst_284 = arith.constant 5.000000e-01 : f32
    %550 = vector.broadcast %cst_284 : f32 to vector<16x256xf32>
    %551 = arith.mulf %550, %549 : vector<16x256xf32>
    %cst_285 = arith.constant 5.000000e-01 : f32
    %552 = vector.broadcast %cst_285 : f32 to vector<16x256xf32>
    %553 = arith.addf %551, %552 : vector<16x256xf32>
    %c0_286 = arith.constant 0 : index
    %c0_287 = arith.constant 0 : index
    %c0_288 = arith.constant 0 : index
    %554 = vector.load %arg13[%c0_286, %c0_287, %c0_288] : memref<8x16x16xbf16, #tpu.memory_space<vmem>>, vector<1x16x16xbf16>
    %555 = vector.shape_cast %554 : vector<1x16x16xbf16> to vector<16x16xbf16>
    %556 = arith.mulf %545, %553 : vector<16x256xf32>
    %557 = arith.truncf %556 : vector<16x256xf32> to vector<16x256xbf16>
    %cst_289 = arith.constant dense<0.000000e+00> : vector<16x256xf32>
    %558 = tpu.matmul %555, %557, %cst_289 {dimension_numbers = #tpu.dot_dimension_numbers<[1], [0], [0], [1], [0, 0, 1, 1], [], []>} : vector<16x16xbf16>, vector<16x256xbf16>, vector<16x256xf32> -> vector<16x256xf32>
    %c0_290 = arith.constant 0 : index
    %c0_291 = arith.constant 0 : index
    %c0_292 = arith.constant 0 : index
    %559 = vector.load %arg14[%c0_290, %c0_291, %c0_292] : memref<8x16x1xf32, #tpu.memory_space<vmem>>, vector<1x16x1xf32>
    %560 = vector.shape_cast %559 : vector<1x16x1xf32> to vector<16x1xf32>
    %561 = vector.broadcast %560 : vector<16x1xf32> to vector<16x256xf32>
    %562 = arith.addf %558, %561 : vector<16x256xf32>
    %563 = arith.addf %511, %562 : vector<16x256xf32>
    %564 = arith.truncf %562 : vector<16x256xf32> to vector<16x256xbf16>
    %c4_293 = arith.constant 4 : index
    %c0_294 = arith.constant 0 : index
    %c0_295 = arith.constant 0 : index
    %565 = vector.load %arg11[%c4_293, %c0_294, %c0_295] : memref<24x32x16xbf16, #tpu.memory_space<vmem>>, vector<1x32x16xbf16>
    %566 = vector.shape_cast %565 : vector<1x32x16xbf16> to vector<32x16xbf16>
    %cst_296 = arith.constant dense<0.000000e+00> : vector<32x256xf32>
    %567 = tpu.matmul %566, %564, %cst_296 {dimension_numbers = #tpu.dot_dimension_numbers<[1], [0], [0], [1], [0, 0, 1, 1], [], []>} : vector<32x16xbf16>, vector<16x256xbf16>, vector<32x256xf32> -> vector<32x256xf32>
    %c2_i32_297 = arith.constant 2 : i32
    %568 = vector.broadcast %c2_i32_297 : i32 to vector<1x256xi32>
    %569 = arith.cmpi sge, %16, %568 : vector<1x256xi32>
    %c2_i32_298 = arith.constant 2 : i32
    %570 = tpu.dynamic_rotate %562 by %c2_i32_298 dim 1 : vector<16x256xf32>, i32 -> vector<16x256xf32>
    %cst_299 = arith.constant 0.000000e+00 : f32
    %571 = vector.shape_cast %569 : vector<1x256xi1> to vector<1x256xi1>
    %572 = vector.broadcast %571 : vector<1x256xi1> to vector<16x256xi1>
    %573 = vector.broadcast %cst_299 : f32 to vector<16x256xf32>
    %574 = arith.select %572, %570, %573 : vector<16x256xi1>, vector<16x256xf32>
    %c62_i32_300 = arith.constant 62 : i32
    %575 = vector.broadcast %c62_i32_300 : i32 to vector<1x256xi32>
    %576 = arith.cmpi slt, %16, %575 : vector<1x256xi32>
    %c254_i32_301 = arith.constant 254 : i32
    %577 = tpu.dynamic_rotate %562 by %c254_i32_301 dim 1 : vector<16x256xf32>, i32 -> vector<16x256xf32>
    %cst_302 = arith.constant 0.000000e+00 : f32
    %578 = vector.shape_cast %576 : vector<1x256xi1> to vector<1x256xi1>
    %579 = vector.broadcast %578 : vector<1x256xi1> to vector<16x256xi1>
    %580 = vector.broadcast %cst_302 : f32 to vector<16x256xf32>
    %581 = arith.select %579, %577, %580 : vector<16x256xi1>, vector<16x256xf32>
    %c3_303 = arith.constant 3 : index
    %c0_304 = arith.constant 0 : index
    %c0_305 = arith.constant 0 : index
    %582 = vector.load %arg11[%c3_303, %c0_304, %c0_305] : memref<24x32x16xbf16, #tpu.memory_space<vmem>>, vector<1x32x16xbf16>
    %583 = vector.shape_cast %582 : vector<1x32x16xbf16> to vector<32x16xbf16>
    %584 = arith.truncf %574 : vector<16x256xf32> to vector<16x256xbf16>
    %cst_306 = arith.constant dense<0.000000e+00> : vector<32x256xf32>
    %585 = tpu.matmul %583, %584, %cst_306 {dimension_numbers = #tpu.dot_dimension_numbers<[1], [0], [0], [1], [0, 0, 1, 1], [], []>} : vector<32x16xbf16>, vector<16x256xbf16>, vector<32x256xf32> -> vector<32x256xf32>
    %586 = arith.addf %567, %585 : vector<32x256xf32>
    %c5_307 = arith.constant 5 : index
    %c0_308 = arith.constant 0 : index
    %c0_309 = arith.constant 0 : index
    %587 = vector.load %arg11[%c5_307, %c0_308, %c0_309] : memref<24x32x16xbf16, #tpu.memory_space<vmem>>, vector<1x32x16xbf16>
    %588 = vector.shape_cast %587 : vector<1x32x16xbf16> to vector<32x16xbf16>
    %589 = arith.truncf %581 : vector<16x256xf32> to vector<16x256xbf16>
    %cst_310 = arith.constant dense<0.000000e+00> : vector<32x256xf32>
    %590 = tpu.matmul %588, %589, %cst_310 {dimension_numbers = #tpu.dot_dimension_numbers<[1], [0], [0], [1], [0, 0, 1, 1], [], []>} : vector<32x16xbf16>, vector<16x256xbf16>, vector<32x256xf32> -> vector<32x256xf32>
    %591 = arith.addf %586, %590 : vector<32x256xf32>
    %c1_311 = arith.constant 1 : index
    %c0_312 = arith.constant 0 : index
    %c0_313 = arith.constant 0 : index
    %592 = vector.load %arg12[%c1_311, %c0_312, %c0_313] : memref<8x32x1xf32, #tpu.memory_space<vmem>>, vector<1x32x1xf32>
    %593 = vector.shape_cast %592 : vector<1x32x1xf32> to vector<32x1xf32>
    %594 = vector.broadcast %593 : vector<32x1xf32> to vector<32x256xf32>
    %595 = arith.addf %591, %594 : vector<32x256xf32>
    %596 = vector.extract_strided_slice %595 {offsets = [0, 0], sizes = [16, 256], strides = [1, 1]} : vector<32x256xf32> to vector<16x256xf32>
    %597 = math.tanh %596 : vector<16x256xf32>
    %598 = vector.extract_strided_slice %595 {offsets = [16, 0], sizes = [16, 256], strides = [1, 1]} : vector<32x256xf32> to vector<16x256xf32>
    %cst_314 = arith.constant 5.000000e-01 : f32
    %599 = vector.broadcast %cst_314 : f32 to vector<16x256xf32>
    %600 = arith.mulf %599, %598 : vector<16x256xf32>
    %601 = math.tanh %600 : vector<16x256xf32>
    %cst_315 = arith.constant 5.000000e-01 : f32
    %602 = vector.broadcast %cst_315 : f32 to vector<16x256xf32>
    %603 = arith.mulf %602, %601 : vector<16x256xf32>
    %cst_316 = arith.constant 5.000000e-01 : f32
    %604 = vector.broadcast %cst_316 : f32 to vector<16x256xf32>
    %605 = arith.addf %603, %604 : vector<16x256xf32>
    %c1_317 = arith.constant 1 : index
    %c0_318 = arith.constant 0 : index
    %c0_319 = arith.constant 0 : index
    %606 = vector.load %arg13[%c1_317, %c0_318, %c0_319] : memref<8x16x16xbf16, #tpu.memory_space<vmem>>, vector<1x16x16xbf16>
    %607 = vector.shape_cast %606 : vector<1x16x16xbf16> to vector<16x16xbf16>
    %608 = arith.mulf %597, %605 : vector<16x256xf32>
    %609 = arith.truncf %608 : vector<16x256xf32> to vector<16x256xbf16>
    %cst_320 = arith.constant dense<0.000000e+00> : vector<16x256xf32>
    %610 = tpu.matmul %607, %609, %cst_320 {dimension_numbers = #tpu.dot_dimension_numbers<[1], [0], [0], [1], [0, 0, 1, 1], [], []>} : vector<16x16xbf16>, vector<16x256xbf16>, vector<16x256xf32> -> vector<16x256xf32>
    %c1_321 = arith.constant 1 : index
    %c0_322 = arith.constant 0 : index
    %c0_323 = arith.constant 0 : index
    %611 = vector.load %arg14[%c1_321, %c0_322, %c0_323] : memref<8x16x1xf32, #tpu.memory_space<vmem>>, vector<1x16x1xf32>
    %612 = vector.shape_cast %611 : vector<1x16x1xf32> to vector<16x1xf32>
    %613 = vector.broadcast %612 : vector<16x1xf32> to vector<16x256xf32>
    %614 = arith.addf %610, %613 : vector<16x256xf32>
    %615 = arith.addf %563, %614 : vector<16x256xf32>
    %616 = arith.truncf %614 : vector<16x256xf32> to vector<16x256xbf16>
    %c7_324 = arith.constant 7 : index
    %c0_325 = arith.constant 0 : index
    %c0_326 = arith.constant 0 : index
    %617 = vector.load %arg11[%c7_324, %c0_325, %c0_326] : memref<24x32x16xbf16, #tpu.memory_space<vmem>>, vector<1x32x16xbf16>
    %618 = vector.shape_cast %617 : vector<1x32x16xbf16> to vector<32x16xbf16>
    %cst_327 = arith.constant dense<0.000000e+00> : vector<32x256xf32>
    %619 = tpu.matmul %618, %616, %cst_327 {dimension_numbers = #tpu.dot_dimension_numbers<[1], [0], [0], [1], [0, 0, 1, 1], [], []>} : vector<32x16xbf16>, vector<16x256xbf16>, vector<32x256xf32> -> vector<32x256xf32>
    %c4_i32_328 = arith.constant 4 : i32
    %620 = vector.broadcast %c4_i32_328 : i32 to vector<1x256xi32>
    %621 = arith.cmpi sge, %16, %620 : vector<1x256xi32>
    %c4_i32_329 = arith.constant 4 : i32
    %622 = tpu.dynamic_rotate %614 by %c4_i32_329 dim 1 : vector<16x256xf32>, i32 -> vector<16x256xf32>
    %cst_330 = arith.constant 0.000000e+00 : f32
    %623 = vector.shape_cast %621 : vector<1x256xi1> to vector<1x256xi1>
    %624 = vector.broadcast %623 : vector<1x256xi1> to vector<16x256xi1>
    %625 = vector.broadcast %cst_330 : f32 to vector<16x256xf32>
    %626 = arith.select %624, %622, %625 : vector<16x256xi1>, vector<16x256xf32>
    %c60_i32_331 = arith.constant 60 : i32
    %627 = vector.broadcast %c60_i32_331 : i32 to vector<1x256xi32>
    %628 = arith.cmpi slt, %16, %627 : vector<1x256xi32>
    %c252_i32_332 = arith.constant 252 : i32
    %629 = tpu.dynamic_rotate %614 by %c252_i32_332 dim 1 : vector<16x256xf32>, i32 -> vector<16x256xf32>
    %cst_333 = arith.constant 0.000000e+00 : f32
    %630 = vector.shape_cast %628 : vector<1x256xi1> to vector<1x256xi1>
    %631 = vector.broadcast %630 : vector<1x256xi1> to vector<16x256xi1>
    %632 = vector.broadcast %cst_333 : f32 to vector<16x256xf32>
    %633 = arith.select %631, %629, %632 : vector<16x256xi1>, vector<16x256xf32>
    %c6_334 = arith.constant 6 : index
    %c0_335 = arith.constant 0 : index
    %c0_336 = arith.constant 0 : index
    %634 = vector.load %arg11[%c6_334, %c0_335, %c0_336] : memref<24x32x16xbf16, #tpu.memory_space<vmem>>, vector<1x32x16xbf16>
    %635 = vector.shape_cast %634 : vector<1x32x16xbf16> to vector<32x16xbf16>
    %636 = arith.truncf %626 : vector<16x256xf32> to vector<16x256xbf16>
    %cst_337 = arith.constant dense<0.000000e+00> : vector<32x256xf32>
    %637 = tpu.matmul %635, %636, %cst_337 {dimension_numbers = #tpu.dot_dimension_numbers<[1], [0], [0], [1], [0, 0, 1, 1], [], []>} : vector<32x16xbf16>, vector<16x256xbf16>, vector<32x256xf32> -> vector<32x256xf32>
    %638 = arith.addf %619, %637 : vector<32x256xf32>
    %c8_338 = arith.constant 8 : index
    %c0_339 = arith.constant 0 : index
    %c0_340 = arith.constant 0 : index
    %639 = vector.load %arg11[%c8_338, %c0_339, %c0_340] : memref<24x32x16xbf16, #tpu.memory_space<vmem>>, vector<1x32x16xbf16>
    %640 = vector.shape_cast %639 : vector<1x32x16xbf16> to vector<32x16xbf16>
    %641 = arith.truncf %633 : vector<16x256xf32> to vector<16x256xbf16>
    %cst_341 = arith.constant dense<0.000000e+00> : vector<32x256xf32>
    %642 = tpu.matmul %640, %641, %cst_341 {dimension_numbers = #tpu.dot_dimension_numbers<[1], [0], [0], [1], [0, 0, 1, 1], [], []>} : vector<32x16xbf16>, vector<16x256xbf16>, vector<32x256xf32> -> vector<32x256xf32>
    %643 = arith.addf %638, %642 : vector<32x256xf32>
    %c2_342 = arith.constant 2 : index
    %c0_343 = arith.constant 0 : index
    %c0_344 = arith.constant 0 : index
    %644 = vector.load %arg12[%c2_342, %c0_343, %c0_344] : memref<8x32x1xf32, #tpu.memory_space<vmem>>, vector<1x32x1xf32>
    %645 = vector.shape_cast %644 : vector<1x32x1xf32> to vector<32x1xf32>
    %646 = vector.broadcast %645 : vector<32x1xf32> to vector<32x256xf32>
    %647 = arith.addf %643, %646 : vector<32x256xf32>
    %648 = vector.extract_strided_slice %647 {offsets = [0, 0], sizes = [16, 256], strides = [1, 1]} : vector<32x256xf32> to vector<16x256xf32>
    %649 = math.tanh %648 : vector<16x256xf32>
    %650 = vector.extract_strided_slice %647 {offsets = [16, 0], sizes = [16, 256], strides = [1, 1]} : vector<32x256xf32> to vector<16x256xf32>
    %cst_345 = arith.constant 5.000000e-01 : f32
    %651 = vector.broadcast %cst_345 : f32 to vector<16x256xf32>
    %652 = arith.mulf %651, %650 : vector<16x256xf32>
    %653 = math.tanh %652 : vector<16x256xf32>
    %cst_346 = arith.constant 5.000000e-01 : f32
    %654 = vector.broadcast %cst_346 : f32 to vector<16x256xf32>
    %655 = arith.mulf %654, %653 : vector<16x256xf32>
    %cst_347 = arith.constant 5.000000e-01 : f32
    %656 = vector.broadcast %cst_347 : f32 to vector<16x256xf32>
    %657 = arith.addf %655, %656 : vector<16x256xf32>
    %c2_348 = arith.constant 2 : index
    %c0_349 = arith.constant 0 : index
    %c0_350 = arith.constant 0 : index
    %658 = vector.load %arg13[%c2_348, %c0_349, %c0_350] : memref<8x16x16xbf16, #tpu.memory_space<vmem>>, vector<1x16x16xbf16>
    %659 = vector.shape_cast %658 : vector<1x16x16xbf16> to vector<16x16xbf16>
    %660 = arith.mulf %649, %657 : vector<16x256xf32>
    %661 = arith.truncf %660 : vector<16x256xf32> to vector<16x256xbf16>
    %cst_351 = arith.constant dense<0.000000e+00> : vector<16x256xf32>
    %662 = tpu.matmul %659, %661, %cst_351 {dimension_numbers = #tpu.dot_dimension_numbers<[1], [0], [0], [1], [0, 0, 1, 1], [], []>} : vector<16x16xbf16>, vector<16x256xbf16>, vector<16x256xf32> -> vector<16x256xf32>
    %c2_352 = arith.constant 2 : index
    %c0_353 = arith.constant 0 : index
    %c0_354 = arith.constant 0 : index
    %663 = vector.load %arg14[%c2_352, %c0_353, %c0_354] : memref<8x16x1xf32, #tpu.memory_space<vmem>>, vector<1x16x1xf32>
    %664 = vector.shape_cast %663 : vector<1x16x1xf32> to vector<16x1xf32>
    %665 = vector.broadcast %664 : vector<16x1xf32> to vector<16x256xf32>
    %666 = arith.addf %662, %665 : vector<16x256xf32>
    %667 = arith.addf %615, %666 : vector<16x256xf32>
    %668 = arith.truncf %666 : vector<16x256xf32> to vector<16x256xbf16>
    %c10_355 = arith.constant 10 : index
    %c0_356 = arith.constant 0 : index
    %c0_357 = arith.constant 0 : index
    %669 = vector.load %arg11[%c10_355, %c0_356, %c0_357] : memref<24x32x16xbf16, #tpu.memory_space<vmem>>, vector<1x32x16xbf16>
    %670 = vector.shape_cast %669 : vector<1x32x16xbf16> to vector<32x16xbf16>
    %cst_358 = arith.constant dense<0.000000e+00> : vector<32x256xf32>
    %671 = tpu.matmul %670, %668, %cst_358 {dimension_numbers = #tpu.dot_dimension_numbers<[1], [0], [0], [1], [0, 0, 1, 1], [], []>} : vector<32x16xbf16>, vector<16x256xbf16>, vector<32x256xf32> -> vector<32x256xf32>
    %c8_i32_359 = arith.constant 8 : i32
    %672 = vector.broadcast %c8_i32_359 : i32 to vector<1x256xi32>
    %673 = arith.cmpi sge, %16, %672 : vector<1x256xi32>
    %c8_i32_360 = arith.constant 8 : i32
    %674 = tpu.dynamic_rotate %666 by %c8_i32_360 dim 1 : vector<16x256xf32>, i32 -> vector<16x256xf32>
    %cst_361 = arith.constant 0.000000e+00 : f32
    %675 = vector.shape_cast %673 : vector<1x256xi1> to vector<1x256xi1>
    %676 = vector.broadcast %675 : vector<1x256xi1> to vector<16x256xi1>
    %677 = vector.broadcast %cst_361 : f32 to vector<16x256xf32>
    %678 = arith.select %676, %674, %677 : vector<16x256xi1>, vector<16x256xf32>
    %c56_i32_362 = arith.constant 56 : i32
    %679 = vector.broadcast %c56_i32_362 : i32 to vector<1x256xi32>
    %680 = arith.cmpi slt, %16, %679 : vector<1x256xi32>
    %c248_i32_363 = arith.constant 248 : i32
    %681 = tpu.dynamic_rotate %666 by %c248_i32_363 dim 1 : vector<16x256xf32>, i32 -> vector<16x256xf32>
    %cst_364 = arith.constant 0.000000e+00 : f32
    %682 = vector.shape_cast %680 : vector<1x256xi1> to vector<1x256xi1>
    %683 = vector.broadcast %682 : vector<1x256xi1> to vector<16x256xi1>
    %684 = vector.broadcast %cst_364 : f32 to vector<16x256xf32>
    %685 = arith.select %683, %681, %684 : vector<16x256xi1>, vector<16x256xf32>
    %c9_365 = arith.constant 9 : index
    %c0_366 = arith.constant 0 : index
    %c0_367 = arith.constant 0 : index
    %686 = vector.load %arg11[%c9_365, %c0_366, %c0_367] : memref<24x32x16xbf16, #tpu.memory_space<vmem>>, vector<1x32x16xbf16>
    %687 = vector.shape_cast %686 : vector<1x32x16xbf16> to vector<32x16xbf16>
    %688 = arith.truncf %678 : vector<16x256xf32> to vector<16x256xbf16>
    %cst_368 = arith.constant dense<0.000000e+00> : vector<32x256xf32>
    %689 = tpu.matmul %687, %688, %cst_368 {dimension_numbers = #tpu.dot_dimension_numbers<[1], [0], [0], [1], [0, 0, 1, 1], [], []>} : vector<32x16xbf16>, vector<16x256xbf16>, vector<32x256xf32> -> vector<32x256xf32>
    %690 = arith.addf %671, %689 : vector<32x256xf32>
    %c11_369 = arith.constant 11 : index
    %c0_370 = arith.constant 0 : index
    %c0_371 = arith.constant 0 : index
    %691 = vector.load %arg11[%c11_369, %c0_370, %c0_371] : memref<24x32x16xbf16, #tpu.memory_space<vmem>>, vector<1x32x16xbf16>
    %692 = vector.shape_cast %691 : vector<1x32x16xbf16> to vector<32x16xbf16>
    %693 = arith.truncf %685 : vector<16x256xf32> to vector<16x256xbf16>
    %cst_372 = arith.constant dense<0.000000e+00> : vector<32x256xf32>
    %694 = tpu.matmul %692, %693, %cst_372 {dimension_numbers = #tpu.dot_dimension_numbers<[1], [0], [0], [1], [0, 0, 1, 1], [], []>} : vector<32x16xbf16>, vector<16x256xbf16>, vector<32x256xf32> -> vector<32x256xf32>
    %695 = arith.addf %690, %694 : vector<32x256xf32>
    %c3_373 = arith.constant 3 : index
    %c0_374 = arith.constant 0 : index
    %c0_375 = arith.constant 0 : index
    %696 = vector.load %arg12[%c3_373, %c0_374, %c0_375] : memref<8x32x1xf32, #tpu.memory_space<vmem>>, vector<1x32x1xf32>
    %697 = vector.shape_cast %696 : vector<1x32x1xf32> to vector<32x1xf32>
    %698 = vector.broadcast %697 : vector<32x1xf32> to vector<32x256xf32>
    %699 = arith.addf %695, %698 : vector<32x256xf32>
    %700 = vector.extract_strided_slice %699 {offsets = [0, 0], sizes = [16, 256], strides = [1, 1]} : vector<32x256xf32> to vector<16x256xf32>
    %701 = math.tanh %700 : vector<16x256xf32>
    %702 = vector.extract_strided_slice %699 {offsets = [16, 0], sizes = [16, 256], strides = [1, 1]} : vector<32x256xf32> to vector<16x256xf32>
    %cst_376 = arith.constant 5.000000e-01 : f32
    %703 = vector.broadcast %cst_376 : f32 to vector<16x256xf32>
    %704 = arith.mulf %703, %702 : vector<16x256xf32>
    %705 = math.tanh %704 : vector<16x256xf32>
    %cst_377 = arith.constant 5.000000e-01 : f32
    %706 = vector.broadcast %cst_377 : f32 to vector<16x256xf32>
    %707 = arith.mulf %706, %705 : vector<16x256xf32>
    %cst_378 = arith.constant 5.000000e-01 : f32
    %708 = vector.broadcast %cst_378 : f32 to vector<16x256xf32>
    %709 = arith.addf %707, %708 : vector<16x256xf32>
    %c3_379 = arith.constant 3 : index
    %c0_380 = arith.constant 0 : index
    %c0_381 = arith.constant 0 : index
    %710 = vector.load %arg13[%c3_379, %c0_380, %c0_381] : memref<8x16x16xbf16, #tpu.memory_space<vmem>>, vector<1x16x16xbf16>
    %711 = vector.shape_cast %710 : vector<1x16x16xbf16> to vector<16x16xbf16>
    %712 = arith.mulf %701, %709 : vector<16x256xf32>
    %713 = arith.truncf %712 : vector<16x256xf32> to vector<16x256xbf16>
    %cst_382 = arith.constant dense<0.000000e+00> : vector<16x256xf32>
    %714 = tpu.matmul %711, %713, %cst_382 {dimension_numbers = #tpu.dot_dimension_numbers<[1], [0], [0], [1], [0, 0, 1, 1], [], []>} : vector<16x16xbf16>, vector<16x256xbf16>, vector<16x256xf32> -> vector<16x256xf32>
    %c3_383 = arith.constant 3 : index
    %c0_384 = arith.constant 0 : index
    %c0_385 = arith.constant 0 : index
    %715 = vector.load %arg14[%c3_383, %c0_384, %c0_385] : memref<8x16x1xf32, #tpu.memory_space<vmem>>, vector<1x16x1xf32>
    %716 = vector.shape_cast %715 : vector<1x16x1xf32> to vector<16x1xf32>
    %717 = vector.broadcast %716 : vector<16x1xf32> to vector<16x256xf32>
    %718 = arith.addf %714, %717 : vector<16x256xf32>
    %719 = arith.addf %667, %718 : vector<16x256xf32>
    %720 = arith.truncf %718 : vector<16x256xf32> to vector<16x256xbf16>
    %c13_386 = arith.constant 13 : index
    %c0_387 = arith.constant 0 : index
    %c0_388 = arith.constant 0 : index
    %721 = vector.load %arg11[%c13_386, %c0_387, %c0_388] : memref<24x32x16xbf16, #tpu.memory_space<vmem>>, vector<1x32x16xbf16>
    %722 = vector.shape_cast %721 : vector<1x32x16xbf16> to vector<32x16xbf16>
    %cst_389 = arith.constant dense<0.000000e+00> : vector<32x256xf32>
    %723 = tpu.matmul %722, %720, %cst_389 {dimension_numbers = #tpu.dot_dimension_numbers<[1], [0], [0], [1], [0, 0, 1, 1], [], []>} : vector<32x16xbf16>, vector<16x256xbf16>, vector<32x256xf32> -> vector<32x256xf32>
    %c16_i32_390 = arith.constant 16 : i32
    %724 = vector.broadcast %c16_i32_390 : i32 to vector<1x256xi32>
    %725 = arith.cmpi sge, %16, %724 : vector<1x256xi32>
    %c16_i32_391 = arith.constant 16 : i32
    %726 = tpu.dynamic_rotate %718 by %c16_i32_391 dim 1 : vector<16x256xf32>, i32 -> vector<16x256xf32>
    %cst_392 = arith.constant 0.000000e+00 : f32
    %727 = vector.shape_cast %725 : vector<1x256xi1> to vector<1x256xi1>
    %728 = vector.broadcast %727 : vector<1x256xi1> to vector<16x256xi1>
    %729 = vector.broadcast %cst_392 : f32 to vector<16x256xf32>
    %730 = arith.select %728, %726, %729 : vector<16x256xi1>, vector<16x256xf32>
    %c48_i32_393 = arith.constant 48 : i32
    %731 = vector.broadcast %c48_i32_393 : i32 to vector<1x256xi32>
    %732 = arith.cmpi slt, %16, %731 : vector<1x256xi32>
    %c240_i32_394 = arith.constant 240 : i32
    %733 = tpu.dynamic_rotate %718 by %c240_i32_394 dim 1 : vector<16x256xf32>, i32 -> vector<16x256xf32>
    %cst_395 = arith.constant 0.000000e+00 : f32
    %734 = vector.shape_cast %732 : vector<1x256xi1> to vector<1x256xi1>
    %735 = vector.broadcast %734 : vector<1x256xi1> to vector<16x256xi1>
    %736 = vector.broadcast %cst_395 : f32 to vector<16x256xf32>
    %737 = arith.select %735, %733, %736 : vector<16x256xi1>, vector<16x256xf32>
    %c12_396 = arith.constant 12 : index
    %c0_397 = arith.constant 0 : index
    %c0_398 = arith.constant 0 : index
    %738 = vector.load %arg11[%c12_396, %c0_397, %c0_398] : memref<24x32x16xbf16, #tpu.memory_space<vmem>>, vector<1x32x16xbf16>
    %739 = vector.shape_cast %738 : vector<1x32x16xbf16> to vector<32x16xbf16>
    %740 = arith.truncf %730 : vector<16x256xf32> to vector<16x256xbf16>
    %cst_399 = arith.constant dense<0.000000e+00> : vector<32x256xf32>
    %741 = tpu.matmul %739, %740, %cst_399 {dimension_numbers = #tpu.dot_dimension_numbers<[1], [0], [0], [1], [0, 0, 1, 1], [], []>} : vector<32x16xbf16>, vector<16x256xbf16>, vector<32x256xf32> -> vector<32x256xf32>
    %742 = arith.addf %723, %741 : vector<32x256xf32>
    %c14_400 = arith.constant 14 : index
    %c0_401 = arith.constant 0 : index
    %c0_402 = arith.constant 0 : index
    %743 = vector.load %arg11[%c14_400, %c0_401, %c0_402] : memref<24x32x16xbf16, #tpu.memory_space<vmem>>, vector<1x32x16xbf16>
    %744 = vector.shape_cast %743 : vector<1x32x16xbf16> to vector<32x16xbf16>
    %745 = arith.truncf %737 : vector<16x256xf32> to vector<16x256xbf16>
    %cst_403 = arith.constant dense<0.000000e+00> : vector<32x256xf32>
    %746 = tpu.matmul %744, %745, %cst_403 {dimension_numbers = #tpu.dot_dimension_numbers<[1], [0], [0], [1], [0, 0, 1, 1], [], []>} : vector<32x16xbf16>, vector<16x256xbf16>, vector<32x256xf32> -> vector<32x256xf32>
    %747 = arith.addf %742, %746 : vector<32x256xf32>
    %c4_404 = arith.constant 4 : index
    %c0_405 = arith.constant 0 : index
    %c0_406 = arith.constant 0 : index
    %748 = vector.load %arg12[%c4_404, %c0_405, %c0_406] : memref<8x32x1xf32, #tpu.memory_space<vmem>>, vector<1x32x1xf32>
    %749 = vector.shape_cast %748 : vector<1x32x1xf32> to vector<32x1xf32>
    %750 = vector.broadcast %749 : vector<32x1xf32> to vector<32x256xf32>
    %751 = arith.addf %747, %750 : vector<32x256xf32>
    %752 = vector.extract_strided_slice %751 {offsets = [0, 0], sizes = [16, 256], strides = [1, 1]} : vector<32x256xf32> to vector<16x256xf32>
    %753 = math.tanh %752 : vector<16x256xf32>
    %754 = vector.extract_strided_slice %751 {offsets = [16, 0], sizes = [16, 256], strides = [1, 1]} : vector<32x256xf32> to vector<16x256xf32>
    %cst_407 = arith.constant 5.000000e-01 : f32
    %755 = vector.broadcast %cst_407 : f32 to vector<16x256xf32>
    %756 = arith.mulf %755, %754 : vector<16x256xf32>
    %757 = math.tanh %756 : vector<16x256xf32>
    %cst_408 = arith.constant 5.000000e-01 : f32
    %758 = vector.broadcast %cst_408 : f32 to vector<16x256xf32>
    %759 = arith.mulf %758, %757 : vector<16x256xf32>
    %cst_409 = arith.constant 5.000000e-01 : f32
    %760 = vector.broadcast %cst_409 : f32 to vector<16x256xf32>
    %761 = arith.addf %759, %760 : vector<16x256xf32>
    %c4_410 = arith.constant 4 : index
    %c0_411 = arith.constant 0 : index
    %c0_412 = arith.constant 0 : index
    %762 = vector.load %arg13[%c4_410, %c0_411, %c0_412] : memref<8x16x16xbf16, #tpu.memory_space<vmem>>, vector<1x16x16xbf16>
    %763 = vector.shape_cast %762 : vector<1x16x16xbf16> to vector<16x16xbf16>
    %764 = arith.mulf %753, %761 : vector<16x256xf32>
    %765 = arith.truncf %764 : vector<16x256xf32> to vector<16x256xbf16>
    %cst_413 = arith.constant dense<0.000000e+00> : vector<16x256xf32>
    %766 = tpu.matmul %763, %765, %cst_413 {dimension_numbers = #tpu.dot_dimension_numbers<[1], [0], [0], [1], [0, 0, 1, 1], [], []>} : vector<16x16xbf16>, vector<16x256xbf16>, vector<16x256xf32> -> vector<16x256xf32>
    %c4_414 = arith.constant 4 : index
    %c0_415 = arith.constant 0 : index
    %c0_416 = arith.constant 0 : index
    %767 = vector.load %arg14[%c4_414, %c0_415, %c0_416] : memref<8x16x1xf32, #tpu.memory_space<vmem>>, vector<1x16x1xf32>
    %768 = vector.shape_cast %767 : vector<1x16x1xf32> to vector<16x1xf32>
    %769 = vector.broadcast %768 : vector<16x1xf32> to vector<16x256xf32>
    %770 = arith.addf %766, %769 : vector<16x256xf32>
    %771 = arith.addf %719, %770 : vector<16x256xf32>
    %772 = arith.truncf %770 : vector<16x256xf32> to vector<16x256xbf16>
    %c16_417 = arith.constant 16 : index
    %c0_418 = arith.constant 0 : index
    %c0_419 = arith.constant 0 : index
    %773 = vector.load %arg11[%c16_417, %c0_418, %c0_419] : memref<24x32x16xbf16, #tpu.memory_space<vmem>>, vector<1x32x16xbf16>
    %774 = vector.shape_cast %773 : vector<1x32x16xbf16> to vector<32x16xbf16>
    %cst_420 = arith.constant dense<0.000000e+00> : vector<32x256xf32>
    %775 = tpu.matmul %774, %772, %cst_420 {dimension_numbers = #tpu.dot_dimension_numbers<[1], [0], [0], [1], [0, 0, 1, 1], [], []>} : vector<32x16xbf16>, vector<16x256xbf16>, vector<32x256xf32> -> vector<32x256xf32>
    %c32_i32_421 = arith.constant 32 : i32
    %776 = vector.broadcast %c32_i32_421 : i32 to vector<1x256xi32>
    %777 = arith.cmpi sge, %16, %776 : vector<1x256xi32>
    %c32_i32_422 = arith.constant 32 : i32
    %778 = tpu.dynamic_rotate %770 by %c32_i32_422 dim 1 : vector<16x256xf32>, i32 -> vector<16x256xf32>
    %cst_423 = arith.constant 0.000000e+00 : f32
    %779 = vector.shape_cast %777 : vector<1x256xi1> to vector<1x256xi1>
    %780 = vector.broadcast %779 : vector<1x256xi1> to vector<16x256xi1>
    %781 = vector.broadcast %cst_423 : f32 to vector<16x256xf32>
    %782 = arith.select %780, %778, %781 : vector<16x256xi1>, vector<16x256xf32>
    %c32_i32_424 = arith.constant 32 : i32
    %783 = vector.broadcast %c32_i32_424 : i32 to vector<1x256xi32>
    %784 = arith.cmpi slt, %16, %783 : vector<1x256xi32>
    %c224_i32_425 = arith.constant 224 : i32
    %785 = tpu.dynamic_rotate %770 by %c224_i32_425 dim 1 : vector<16x256xf32>, i32 -> vector<16x256xf32>
    %cst_426 = arith.constant 0.000000e+00 : f32
    %786 = vector.shape_cast %784 : vector<1x256xi1> to vector<1x256xi1>
    %787 = vector.broadcast %786 : vector<1x256xi1> to vector<16x256xi1>
    %788 = vector.broadcast %cst_426 : f32 to vector<16x256xf32>
    %789 = arith.select %787, %785, %788 : vector<16x256xi1>, vector<16x256xf32>
    %c15_427 = arith.constant 15 : index
    %c0_428 = arith.constant 0 : index
    %c0_429 = arith.constant 0 : index
    %790 = vector.load %arg11[%c15_427, %c0_428, %c0_429] : memref<24x32x16xbf16, #tpu.memory_space<vmem>>, vector<1x32x16xbf16>
    %791 = vector.shape_cast %790 : vector<1x32x16xbf16> to vector<32x16xbf16>
    %792 = arith.truncf %782 : vector<16x256xf32> to vector<16x256xbf16>
    %cst_430 = arith.constant dense<0.000000e+00> : vector<32x256xf32>
    %793 = tpu.matmul %791, %792, %cst_430 {dimension_numbers = #tpu.dot_dimension_numbers<[1], [0], [0], [1], [0, 0, 1, 1], [], []>} : vector<32x16xbf16>, vector<16x256xbf16>, vector<32x256xf32> -> vector<32x256xf32>
    %794 = arith.addf %775, %793 : vector<32x256xf32>
    %c17_431 = arith.constant 17 : index
    %c0_432 = arith.constant 0 : index
    %c0_433 = arith.constant 0 : index
    %795 = vector.load %arg11[%c17_431, %c0_432, %c0_433] : memref<24x32x16xbf16, #tpu.memory_space<vmem>>, vector<1x32x16xbf16>
    %796 = vector.shape_cast %795 : vector<1x32x16xbf16> to vector<32x16xbf16>
    %797 = arith.truncf %789 : vector<16x256xf32> to vector<16x256xbf16>
    %cst_434 = arith.constant dense<0.000000e+00> : vector<32x256xf32>
    %798 = tpu.matmul %796, %797, %cst_434 {dimension_numbers = #tpu.dot_dimension_numbers<[1], [0], [0], [1], [0, 0, 1, 1], [], []>} : vector<32x16xbf16>, vector<16x256xbf16>, vector<32x256xf32> -> vector<32x256xf32>
    %799 = arith.addf %794, %798 : vector<32x256xf32>
    %c5_435 = arith.constant 5 : index
    %c0_436 = arith.constant 0 : index
    %c0_437 = arith.constant 0 : index
    %800 = vector.load %arg12[%c5_435, %c0_436, %c0_437] : memref<8x32x1xf32, #tpu.memory_space<vmem>>, vector<1x32x1xf32>
    %801 = vector.shape_cast %800 : vector<1x32x1xf32> to vector<32x1xf32>
    %802 = vector.broadcast %801 : vector<32x1xf32> to vector<32x256xf32>
    %803 = arith.addf %799, %802 : vector<32x256xf32>
    %804 = vector.extract_strided_slice %803 {offsets = [0, 0], sizes = [16, 256], strides = [1, 1]} : vector<32x256xf32> to vector<16x256xf32>
    %805 = math.tanh %804 : vector<16x256xf32>
    %806 = vector.extract_strided_slice %803 {offsets = [16, 0], sizes = [16, 256], strides = [1, 1]} : vector<32x256xf32> to vector<16x256xf32>
    %cst_438 = arith.constant 5.000000e-01 : f32
    %807 = vector.broadcast %cst_438 : f32 to vector<16x256xf32>
    %808 = arith.mulf %807, %806 : vector<16x256xf32>
    %809 = math.tanh %808 : vector<16x256xf32>
    %cst_439 = arith.constant 5.000000e-01 : f32
    %810 = vector.broadcast %cst_439 : f32 to vector<16x256xf32>
    %811 = arith.mulf %810, %809 : vector<16x256xf32>
    %cst_440 = arith.constant 5.000000e-01 : f32
    %812 = vector.broadcast %cst_440 : f32 to vector<16x256xf32>
    %813 = arith.addf %811, %812 : vector<16x256xf32>
    %c5_441 = arith.constant 5 : index
    %c0_442 = arith.constant 0 : index
    %c0_443 = arith.constant 0 : index
    %814 = vector.load %arg13[%c5_441, %c0_442, %c0_443] : memref<8x16x16xbf16, #tpu.memory_space<vmem>>, vector<1x16x16xbf16>
    %815 = vector.shape_cast %814 : vector<1x16x16xbf16> to vector<16x16xbf16>
    %816 = arith.mulf %805, %813 : vector<16x256xf32>
    %817 = arith.truncf %816 : vector<16x256xf32> to vector<16x256xbf16>
    %cst_444 = arith.constant dense<0.000000e+00> : vector<16x256xf32>
    %818 = tpu.matmul %815, %817, %cst_444 {dimension_numbers = #tpu.dot_dimension_numbers<[1], [0], [0], [1], [0, 0, 1, 1], [], []>} : vector<16x16xbf16>, vector<16x256xbf16>, vector<16x256xf32> -> vector<16x256xf32>
    %c5_445 = arith.constant 5 : index
    %c0_446 = arith.constant 0 : index
    %c0_447 = arith.constant 0 : index
    %819 = vector.load %arg14[%c5_445, %c0_446, %c0_447] : memref<8x16x1xf32, #tpu.memory_space<vmem>>, vector<1x16x1xf32>
    %820 = vector.shape_cast %819 : vector<1x16x1xf32> to vector<16x1xf32>
    %821 = vector.broadcast %820 : vector<16x1xf32> to vector<16x256xf32>
    %822 = arith.addf %818, %821 : vector<16x256xf32>
    %823 = arith.addf %771, %822 : vector<16x256xf32>
    %824 = arith.truncf %822 : vector<16x256xf32> to vector<16x256xbf16>
    %c19_448 = arith.constant 19 : index
    %c0_449 = arith.constant 0 : index
    %c0_450 = arith.constant 0 : index
    %825 = vector.load %arg11[%c19_448, %c0_449, %c0_450] : memref<24x32x16xbf16, #tpu.memory_space<vmem>>, vector<1x32x16xbf16>
    %826 = vector.shape_cast %825 : vector<1x32x16xbf16> to vector<32x16xbf16>
    %cst_451 = arith.constant dense<0.000000e+00> : vector<32x256xf32>
    %827 = tpu.matmul %826, %824, %cst_451 {dimension_numbers = #tpu.dot_dimension_numbers<[1], [0], [0], [1], [0, 0, 1, 1], [], []>} : vector<32x16xbf16>, vector<16x256xbf16>, vector<32x256xf32> -> vector<32x256xf32>
    %c6_452 = arith.constant 6 : index
    %c0_453 = arith.constant 0 : index
    %c0_454 = arith.constant 0 : index
    %828 = vector.load %arg12[%c6_452, %c0_453, %c0_454] : memref<8x32x1xf32, #tpu.memory_space<vmem>>, vector<1x32x1xf32>
    %829 = vector.shape_cast %828 : vector<1x32x1xf32> to vector<32x1xf32>
    %830 = vector.broadcast %829 : vector<32x1xf32> to vector<32x256xf32>
    %831 = arith.addf %827, %830 : vector<32x256xf32>
    %832 = vector.extract_strided_slice %831 {offsets = [0, 0], sizes = [16, 256], strides = [1, 1]} : vector<32x256xf32> to vector<16x256xf32>
    %833 = math.tanh %832 : vector<16x256xf32>
    %834 = vector.extract_strided_slice %831 {offsets = [16, 0], sizes = [16, 256], strides = [1, 1]} : vector<32x256xf32> to vector<16x256xf32>
    %cst_455 = arith.constant 5.000000e-01 : f32
    %835 = vector.broadcast %cst_455 : f32 to vector<16x256xf32>
    %836 = arith.mulf %835, %834 : vector<16x256xf32>
    %837 = math.tanh %836 : vector<16x256xf32>
    %cst_456 = arith.constant 5.000000e-01 : f32
    %838 = vector.broadcast %cst_456 : f32 to vector<16x256xf32>
    %839 = arith.mulf %838, %837 : vector<16x256xf32>
    %cst_457 = arith.constant 5.000000e-01 : f32
    %840 = vector.broadcast %cst_457 : f32 to vector<16x256xf32>
    %841 = arith.addf %839, %840 : vector<16x256xf32>
    %c6_458 = arith.constant 6 : index
    %c0_459 = arith.constant 0 : index
    %c0_460 = arith.constant 0 : index
    %842 = vector.load %arg13[%c6_458, %c0_459, %c0_460] : memref<8x16x16xbf16, #tpu.memory_space<vmem>>, vector<1x16x16xbf16>
    %843 = vector.shape_cast %842 : vector<1x16x16xbf16> to vector<16x16xbf16>
    %844 = arith.mulf %833, %841 : vector<16x256xf32>
    %845 = arith.truncf %844 : vector<16x256xf32> to vector<16x256xbf16>
    %cst_461 = arith.constant dense<0.000000e+00> : vector<16x256xf32>
    %846 = tpu.matmul %843, %845, %cst_461 {dimension_numbers = #tpu.dot_dimension_numbers<[1], [0], [0], [1], [0, 0, 1, 1], [], []>} : vector<16x16xbf16>, vector<16x256xbf16>, vector<16x256xf32> -> vector<16x256xf32>
    %c6_462 = arith.constant 6 : index
    %c0_463 = arith.constant 0 : index
    %c0_464 = arith.constant 0 : index
    %847 = vector.load %arg14[%c6_462, %c0_463, %c0_464] : memref<8x16x1xf32, #tpu.memory_space<vmem>>, vector<1x16x1xf32>
    %848 = vector.shape_cast %847 : vector<1x16x1xf32> to vector<16x1xf32>
    %849 = vector.broadcast %848 : vector<16x1xf32> to vector<16x256xf32>
    %850 = arith.addf %846, %849 : vector<16x256xf32>
    %851 = arith.addf %823, %850 : vector<16x256xf32>
    %852 = arith.truncf %850 : vector<16x256xf32> to vector<16x256xbf16>
    %c22_465 = arith.constant 22 : index
    %c0_466 = arith.constant 0 : index
    %c0_467 = arith.constant 0 : index
    %853 = vector.load %arg11[%c22_465, %c0_466, %c0_467] : memref<24x32x16xbf16, #tpu.memory_space<vmem>>, vector<1x32x16xbf16>
    %854 = vector.shape_cast %853 : vector<1x32x16xbf16> to vector<32x16xbf16>
    %cst_468 = arith.constant dense<0.000000e+00> : vector<32x256xf32>
    %855 = tpu.matmul %854, %852, %cst_468 {dimension_numbers = #tpu.dot_dimension_numbers<[1], [0], [0], [1], [0, 0, 1, 1], [], []>} : vector<32x16xbf16>, vector<16x256xbf16>, vector<32x256xf32> -> vector<32x256xf32>
    %c7_469 = arith.constant 7 : index
    %c0_470 = arith.constant 0 : index
    %c0_471 = arith.constant 0 : index
    %856 = vector.load %arg12[%c7_469, %c0_470, %c0_471] : memref<8x32x1xf32, #tpu.memory_space<vmem>>, vector<1x32x1xf32>
    %857 = vector.shape_cast %856 : vector<1x32x1xf32> to vector<32x1xf32>
    %858 = vector.broadcast %857 : vector<32x1xf32> to vector<32x256xf32>
    %859 = arith.addf %855, %858 : vector<32x256xf32>
    %860 = vector.extract_strided_slice %859 {offsets = [0, 0], sizes = [16, 256], strides = [1, 1]} : vector<32x256xf32> to vector<16x256xf32>
    %861 = math.tanh %860 : vector<16x256xf32>
    %862 = vector.extract_strided_slice %859 {offsets = [16, 0], sizes = [16, 256], strides = [1, 1]} : vector<32x256xf32> to vector<16x256xf32>
    %cst_472 = arith.constant 5.000000e-01 : f32
    %863 = vector.broadcast %cst_472 : f32 to vector<16x256xf32>
    %864 = arith.mulf %863, %862 : vector<16x256xf32>
    %865 = math.tanh %864 : vector<16x256xf32>
    %cst_473 = arith.constant 5.000000e-01 : f32
    %866 = vector.broadcast %cst_473 : f32 to vector<16x256xf32>
    %867 = arith.mulf %866, %865 : vector<16x256xf32>
    %cst_474 = arith.constant 5.000000e-01 : f32
    %868 = vector.broadcast %cst_474 : f32 to vector<16x256xf32>
    %869 = arith.addf %867, %868 : vector<16x256xf32>
    %c7_475 = arith.constant 7 : index
    %c0_476 = arith.constant 0 : index
    %c0_477 = arith.constant 0 : index
    %870 = vector.load %arg13[%c7_475, %c0_476, %c0_477] : memref<8x16x16xbf16, #tpu.memory_space<vmem>>, vector<1x16x16xbf16>
    %871 = vector.shape_cast %870 : vector<1x16x16xbf16> to vector<16x16xbf16>
    %872 = arith.mulf %861, %869 : vector<16x256xf32>
    %873 = arith.truncf %872 : vector<16x256xf32> to vector<16x256xbf16>
    %cst_478 = arith.constant dense<0.000000e+00> : vector<16x256xf32>
    %874 = tpu.matmul %871, %873, %cst_478 {dimension_numbers = #tpu.dot_dimension_numbers<[1], [0], [0], [1], [0, 0, 1, 1], [], []>} : vector<16x16xbf16>, vector<16x256xbf16>, vector<16x256xf32> -> vector<16x256xf32>
    %c7_479 = arith.constant 7 : index
    %c0_480 = arith.constant 0 : index
    %c0_481 = arith.constant 0 : index
    %875 = vector.load %arg14[%c7_479, %c0_480, %c0_481] : memref<8x16x1xf32, #tpu.memory_space<vmem>>, vector<1x16x1xf32>
    %876 = vector.shape_cast %875 : vector<1x16x1xf32> to vector<16x1xf32>
    %877 = vector.broadcast %876 : vector<16x1xf32> to vector<16x256xf32>
    %878 = arith.addf %874, %877 : vector<16x256xf32>
    %879 = arith.addf %851, %878 : vector<16x256xf32>
    %c0_482 = arith.constant 0 : index
    %c0_483 = arith.constant 0 : index
    %880 = vector.load %arg15[%c0_482, %c0_483] : memref<32x16xbf16, #tpu.memory_space<vmem>>, vector<32x16xbf16>
    %881 = arith.truncf %879 : vector<16x256xf32> to vector<16x256xbf16>
    %cst_484 = arith.constant dense<0.000000e+00> : vector<32x256xf32>
    %882 = tpu.matmul %880, %881, %cst_484 {dimension_numbers = #tpu.dot_dimension_numbers<[1], [0], [0], [1], [0, 0, 1, 1], [], []>} : vector<32x16xbf16>, vector<16x256xbf16>, vector<32x256xf32> -> vector<32x256xf32>
    %c0_485 = arith.constant 0 : index
    %c0_486 = arith.constant 0 : index
    %883 = vector.load %arg16[%c0_485, %c0_486] : memref<32x1xf32, #tpu.memory_space<vmem>>, vector<32x1xf32>
    %884 = vector.broadcast %883 : vector<32x1xf32> to vector<32x256xf32>
    %885 = arith.addf %882, %884 : vector<32x256xf32>
    %886 = arith.truncf %885 : vector<32x256xf32> to vector<32x256xbf16>
    %c1_487 = arith.constant 1 : index
    %c0_488 = arith.constant 0 : index
    %c0_489 = arith.constant 0 : index
    %887 = vector.load %arg17[%c1_487, %c0_488, %c0_489] : memref<12x64x32xbf16, #tpu.memory_space<vmem>>, vector<1x64x32xbf16>
    %888 = vector.shape_cast %887 : vector<1x64x32xbf16> to vector<64x32xbf16>
    %cst_490 = arith.constant dense<0.000000e+00> : vector<64x256xf32>
    %889 = tpu.matmul %888, %886, %cst_490 {dimension_numbers = #tpu.dot_dimension_numbers<[1], [0], [0], [1], [0, 0, 1, 1], [], []>} : vector<64x32xbf16>, vector<32x256xbf16>, vector<64x256xf32> -> vector<64x256xf32>
    %c1_i32_491 = arith.constant 1 : i32
    %890 = vector.broadcast %c1_i32_491 : i32 to vector<1x256xi32>
    %891 = arith.cmpi sge, %16, %890 : vector<1x256xi32>
    %c1_i32_492 = arith.constant 1 : i32
    %892 = tpu.dynamic_rotate %885 by %c1_i32_492 dim 1 : vector<32x256xf32>, i32 -> vector<32x256xf32>
    %cst_493 = arith.constant 0.000000e+00 : f32
    %893 = vector.shape_cast %891 : vector<1x256xi1> to vector<1x256xi1>
    %894 = vector.broadcast %893 : vector<1x256xi1> to vector<32x256xi1>
    %895 = vector.broadcast %cst_493 : f32 to vector<32x256xf32>
    %896 = arith.select %894, %892, %895 : vector<32x256xi1>, vector<32x256xf32>
    %c63_i32_494 = arith.constant 63 : i32
    %897 = vector.broadcast %c63_i32_494 : i32 to vector<1x256xi32>
    %898 = arith.cmpi slt, %16, %897 : vector<1x256xi32>
    %c255_i32_495 = arith.constant 255 : i32
    %899 = tpu.dynamic_rotate %885 by %c255_i32_495 dim 1 : vector<32x256xf32>, i32 -> vector<32x256xf32>
    %cst_496 = arith.constant 0.000000e+00 : f32
    %900 = vector.shape_cast %898 : vector<1x256xi1> to vector<1x256xi1>
    %901 = vector.broadcast %900 : vector<1x256xi1> to vector<32x256xi1>
    %902 = vector.broadcast %cst_496 : f32 to vector<32x256xf32>
    %903 = arith.select %901, %899, %902 : vector<32x256xi1>, vector<32x256xf32>
    %c0_497 = arith.constant 0 : index
    %c0_498 = arith.constant 0 : index
    %c0_499 = arith.constant 0 : index
    %904 = vector.load %arg17[%c0_497, %c0_498, %c0_499] : memref<12x64x32xbf16, #tpu.memory_space<vmem>>, vector<1x64x32xbf16>
    %905 = vector.shape_cast %904 : vector<1x64x32xbf16> to vector<64x32xbf16>
    %906 = arith.truncf %896 : vector<32x256xf32> to vector<32x256xbf16>
    %cst_500 = arith.constant dense<0.000000e+00> : vector<64x256xf32>
    %907 = tpu.matmul %905, %906, %cst_500 {dimension_numbers = #tpu.dot_dimension_numbers<[1], [0], [0], [1], [0, 0, 1, 1], [], []>} : vector<64x32xbf16>, vector<32x256xbf16>, vector<64x256xf32> -> vector<64x256xf32>
    %908 = arith.addf %889, %907 : vector<64x256xf32>
    %c2_501 = arith.constant 2 : index
    %c0_502 = arith.constant 0 : index
    %c0_503 = arith.constant 0 : index
    %909 = vector.load %arg17[%c2_501, %c0_502, %c0_503] : memref<12x64x32xbf16, #tpu.memory_space<vmem>>, vector<1x64x32xbf16>
    %910 = vector.shape_cast %909 : vector<1x64x32xbf16> to vector<64x32xbf16>
    %911 = arith.truncf %903 : vector<32x256xf32> to vector<32x256xbf16>
    %cst_504 = arith.constant dense<0.000000e+00> : vector<64x256xf32>
    %912 = tpu.matmul %910, %911, %cst_504 {dimension_numbers = #tpu.dot_dimension_numbers<[1], [0], [0], [1], [0, 0, 1, 1], [], []>} : vector<64x32xbf16>, vector<32x256xbf16>, vector<64x256xf32> -> vector<64x256xf32>
    %913 = arith.addf %908, %912 : vector<64x256xf32>
    %c0_505 = arith.constant 0 : index
    %c0_506 = arith.constant 0 : index
    %c0_507 = arith.constant 0 : index
    %914 = vector.load %arg18[%c0_505, %c0_506, %c0_507] : memref<4x64x1xf32, #tpu.memory_space<vmem>>, vector<1x64x1xf32>
    %915 = vector.shape_cast %914 : vector<1x64x1xf32> to vector<64x1xf32>
    %916 = vector.broadcast %915 : vector<64x1xf32> to vector<64x256xf32>
    %917 = arith.addf %913, %916 : vector<64x256xf32>
    %918 = vector.extract_strided_slice %917 {offsets = [0, 0], sizes = [32, 256], strides = [1, 1]} : vector<64x256xf32> to vector<32x256xf32>
    %919 = math.tanh %918 : vector<32x256xf32>
    %920 = vector.extract_strided_slice %917 {offsets = [32, 0], sizes = [32, 256], strides = [1, 1]} : vector<64x256xf32> to vector<32x256xf32>
    %cst_508 = arith.constant 5.000000e-01 : f32
    %921 = vector.broadcast %cst_508 : f32 to vector<32x256xf32>
    %922 = arith.mulf %921, %920 : vector<32x256xf32>
    %923 = math.tanh %922 : vector<32x256xf32>
    %cst_509 = arith.constant 5.000000e-01 : f32
    %924 = vector.broadcast %cst_509 : f32 to vector<32x256xf32>
    %925 = arith.mulf %924, %923 : vector<32x256xf32>
    %cst_510 = arith.constant 5.000000e-01 : f32
    %926 = vector.broadcast %cst_510 : f32 to vector<32x256xf32>
    %927 = arith.addf %925, %926 : vector<32x256xf32>
    %c0_511 = arith.constant 0 : index
    %c0_512 = arith.constant 0 : index
    %c0_513 = arith.constant 0 : index
    %928 = vector.load %arg19[%c0_511, %c0_512, %c0_513] : memref<4x32x32xbf16, #tpu.memory_space<vmem>>, vector<1x32x32xbf16>
    %929 = vector.shape_cast %928 : vector<1x32x32xbf16> to vector<32x32xbf16>
    %930 = arith.mulf %919, %927 : vector<32x256xf32>
    %931 = arith.truncf %930 : vector<32x256xf32> to vector<32x256xbf16>
    %cst_514 = arith.constant dense<0.000000e+00> : vector<32x256xf32>
    %932 = tpu.matmul %929, %931, %cst_514 {dimension_numbers = #tpu.dot_dimension_numbers<[1], [0], [0], [1], [0, 0, 1, 1], [], []>} : vector<32x32xbf16>, vector<32x256xbf16>, vector<32x256xf32> -> vector<32x256xf32>
    %c0_515 = arith.constant 0 : index
    %c0_516 = arith.constant 0 : index
    %c0_517 = arith.constant 0 : index
    %933 = vector.load %arg20[%c0_515, %c0_516, %c0_517] : memref<4x32x1xf32, #tpu.memory_space<vmem>>, vector<1x32x1xf32>
    %934 = vector.shape_cast %933 : vector<1x32x1xf32> to vector<32x1xf32>
    %935 = vector.broadcast %934 : vector<32x1xf32> to vector<32x256xf32>
    %936 = arith.addf %932, %935 : vector<32x256xf32>
    %937 = arith.addf %885, %936 : vector<32x256xf32>
    %938 = arith.truncf %936 : vector<32x256xf32> to vector<32x256xbf16>
    %c4_518 = arith.constant 4 : index
    %c0_519 = arith.constant 0 : index
    %c0_520 = arith.constant 0 : index
    %939 = vector.load %arg17[%c4_518, %c0_519, %c0_520] : memref<12x64x32xbf16, #tpu.memory_space<vmem>>, vector<1x64x32xbf16>
    %940 = vector.shape_cast %939 : vector<1x64x32xbf16> to vector<64x32xbf16>
    %cst_521 = arith.constant dense<0.000000e+00> : vector<64x256xf32>
    %941 = tpu.matmul %940, %938, %cst_521 {dimension_numbers = #tpu.dot_dimension_numbers<[1], [0], [0], [1], [0, 0, 1, 1], [], []>} : vector<64x32xbf16>, vector<32x256xbf16>, vector<64x256xf32> -> vector<64x256xf32>
    %c2_i32_522 = arith.constant 2 : i32
    %942 = vector.broadcast %c2_i32_522 : i32 to vector<1x256xi32>
    %943 = arith.cmpi sge, %16, %942 : vector<1x256xi32>
    %c2_i32_523 = arith.constant 2 : i32
    %944 = tpu.dynamic_rotate %936 by %c2_i32_523 dim 1 : vector<32x256xf32>, i32 -> vector<32x256xf32>
    %cst_524 = arith.constant 0.000000e+00 : f32
    %945 = vector.shape_cast %943 : vector<1x256xi1> to vector<1x256xi1>
    %946 = vector.broadcast %945 : vector<1x256xi1> to vector<32x256xi1>
    %947 = vector.broadcast %cst_524 : f32 to vector<32x256xf32>
    %948 = arith.select %946, %944, %947 : vector<32x256xi1>, vector<32x256xf32>
    %c62_i32_525 = arith.constant 62 : i32
    %949 = vector.broadcast %c62_i32_525 : i32 to vector<1x256xi32>
    %950 = arith.cmpi slt, %16, %949 : vector<1x256xi32>
    %c254_i32_526 = arith.constant 254 : i32
    %951 = tpu.dynamic_rotate %936 by %c254_i32_526 dim 1 : vector<32x256xf32>, i32 -> vector<32x256xf32>
    %cst_527 = arith.constant 0.000000e+00 : f32
    %952 = vector.shape_cast %950 : vector<1x256xi1> to vector<1x256xi1>
    %953 = vector.broadcast %952 : vector<1x256xi1> to vector<32x256xi1>
    %954 = vector.broadcast %cst_527 : f32 to vector<32x256xf32>
    %955 = arith.select %953, %951, %954 : vector<32x256xi1>, vector<32x256xf32>
    %c3_528 = arith.constant 3 : index
    %c0_529 = arith.constant 0 : index
    %c0_530 = arith.constant 0 : index
    %956 = vector.load %arg17[%c3_528, %c0_529, %c0_530] : memref<12x64x32xbf16, #tpu.memory_space<vmem>>, vector<1x64x32xbf16>
    %957 = vector.shape_cast %956 : vector<1x64x32xbf16> to vector<64x32xbf16>
    %958 = arith.truncf %948 : vector<32x256xf32> to vector<32x256xbf16>
    %cst_531 = arith.constant dense<0.000000e+00> : vector<64x256xf32>
    %959 = tpu.matmul %957, %958, %cst_531 {dimension_numbers = #tpu.dot_dimension_numbers<[1], [0], [0], [1], [0, 0, 1, 1], [], []>} : vector<64x32xbf16>, vector<32x256xbf16>, vector<64x256xf32> -> vector<64x256xf32>
    %960 = arith.addf %941, %959 : vector<64x256xf32>
    %c5_532 = arith.constant 5 : index
    %c0_533 = arith.constant 0 : index
    %c0_534 = arith.constant 0 : index
    %961 = vector.load %arg17[%c5_532, %c0_533, %c0_534] : memref<12x64x32xbf16, #tpu.memory_space<vmem>>, vector<1x64x32xbf16>
    %962 = vector.shape_cast %961 : vector<1x64x32xbf16> to vector<64x32xbf16>
    %963 = arith.truncf %955 : vector<32x256xf32> to vector<32x256xbf16>
    %cst_535 = arith.constant dense<0.000000e+00> : vector<64x256xf32>
    %964 = tpu.matmul %962, %963, %cst_535 {dimension_numbers = #tpu.dot_dimension_numbers<[1], [0], [0], [1], [0, 0, 1, 1], [], []>} : vector<64x32xbf16>, vector<32x256xbf16>, vector<64x256xf32> -> vector<64x256xf32>
    %965 = arith.addf %960, %964 : vector<64x256xf32>
    %c1_536 = arith.constant 1 : index
    %c0_537 = arith.constant 0 : index
    %c0_538 = arith.constant 0 : index
    %966 = vector.load %arg18[%c1_536, %c0_537, %c0_538] : memref<4x64x1xf32, #tpu.memory_space<vmem>>, vector<1x64x1xf32>
    %967 = vector.shape_cast %966 : vector<1x64x1xf32> to vector<64x1xf32>
    %968 = vector.broadcast %967 : vector<64x1xf32> to vector<64x256xf32>
    %969 = arith.addf %965, %968 : vector<64x256xf32>
    %970 = vector.extract_strided_slice %969 {offsets = [0, 0], sizes = [32, 256], strides = [1, 1]} : vector<64x256xf32> to vector<32x256xf32>
    %971 = math.tanh %970 : vector<32x256xf32>
    %972 = vector.extract_strided_slice %969 {offsets = [32, 0], sizes = [32, 256], strides = [1, 1]} : vector<64x256xf32> to vector<32x256xf32>
    %cst_539 = arith.constant 5.000000e-01 : f32
    %973 = vector.broadcast %cst_539 : f32 to vector<32x256xf32>
    %974 = arith.mulf %973, %972 : vector<32x256xf32>
    %975 = math.tanh %974 : vector<32x256xf32>
    %cst_540 = arith.constant 5.000000e-01 : f32
    %976 = vector.broadcast %cst_540 : f32 to vector<32x256xf32>
    %977 = arith.mulf %976, %975 : vector<32x256xf32>
    %cst_541 = arith.constant 5.000000e-01 : f32
    %978 = vector.broadcast %cst_541 : f32 to vector<32x256xf32>
    %979 = arith.addf %977, %978 : vector<32x256xf32>
    %c1_542 = arith.constant 1 : index
    %c0_543 = arith.constant 0 : index
    %c0_544 = arith.constant 0 : index
    %980 = vector.load %arg19[%c1_542, %c0_543, %c0_544] : memref<4x32x32xbf16, #tpu.memory_space<vmem>>, vector<1x32x32xbf16>
    %981 = vector.shape_cast %980 : vector<1x32x32xbf16> to vector<32x32xbf16>
    %982 = arith.mulf %971, %979 : vector<32x256xf32>
    %983 = arith.truncf %982 : vector<32x256xf32> to vector<32x256xbf16>
    %cst_545 = arith.constant dense<0.000000e+00> : vector<32x256xf32>
    %984 = tpu.matmul %981, %983, %cst_545 {dimension_numbers = #tpu.dot_dimension_numbers<[1], [0], [0], [1], [0, 0, 1, 1], [], []>} : vector<32x32xbf16>, vector<32x256xbf16>, vector<32x256xf32> -> vector<32x256xf32>
    %c1_546 = arith.constant 1 : index
    %c0_547 = arith.constant 0 : index
    %c0_548 = arith.constant 0 : index
    %985 = vector.load %arg20[%c1_546, %c0_547, %c0_548] : memref<4x32x1xf32, #tpu.memory_space<vmem>>, vector<1x32x1xf32>
    %986 = vector.shape_cast %985 : vector<1x32x1xf32> to vector<32x1xf32>
    %987 = vector.broadcast %986 : vector<32x1xf32> to vector<32x256xf32>
    %988 = arith.addf %984, %987 : vector<32x256xf32>
    %989 = arith.addf %937, %988 : vector<32x256xf32>
    %990 = arith.truncf %988 : vector<32x256xf32> to vector<32x256xbf16>
    %c7_549 = arith.constant 7 : index
    %c0_550 = arith.constant 0 : index
    %c0_551 = arith.constant 0 : index
    %991 = vector.load %arg17[%c7_549, %c0_550, %c0_551] : memref<12x64x32xbf16, #tpu.memory_space<vmem>>, vector<1x64x32xbf16>
    %992 = vector.shape_cast %991 : vector<1x64x32xbf16> to vector<64x32xbf16>
    %cst_552 = arith.constant dense<0.000000e+00> : vector<64x256xf32>
    %993 = tpu.matmul %992, %990, %cst_552 {dimension_numbers = #tpu.dot_dimension_numbers<[1], [0], [0], [1], [0, 0, 1, 1], [], []>} : vector<64x32xbf16>, vector<32x256xbf16>, vector<64x256xf32> -> vector<64x256xf32>
    %c4_i32_553 = arith.constant 4 : i32
    %994 = vector.broadcast %c4_i32_553 : i32 to vector<1x256xi32>
    %995 = arith.cmpi sge, %16, %994 : vector<1x256xi32>
    %c4_i32_554 = arith.constant 4 : i32
    %996 = tpu.dynamic_rotate %988 by %c4_i32_554 dim 1 : vector<32x256xf32>, i32 -> vector<32x256xf32>
    %cst_555 = arith.constant 0.000000e+00 : f32
    %997 = vector.shape_cast %995 : vector<1x256xi1> to vector<1x256xi1>
    %998 = vector.broadcast %997 : vector<1x256xi1> to vector<32x256xi1>
    %999 = vector.broadcast %cst_555 : f32 to vector<32x256xf32>
    %1000 = arith.select %998, %996, %999 : vector<32x256xi1>, vector<32x256xf32>
    %c60_i32_556 = arith.constant 60 : i32
    %1001 = vector.broadcast %c60_i32_556 : i32 to vector<1x256xi32>
    %1002 = arith.cmpi slt, %16, %1001 : vector<1x256xi32>
    %c252_i32_557 = arith.constant 252 : i32
    %1003 = tpu.dynamic_rotate %988 by %c252_i32_557 dim 1 : vector<32x256xf32>, i32 -> vector<32x256xf32>
    %cst_558 = arith.constant 0.000000e+00 : f32
    %1004 = vector.shape_cast %1002 : vector<1x256xi1> to vector<1x256xi1>
    %1005 = vector.broadcast %1004 : vector<1x256xi1> to vector<32x256xi1>
    %1006 = vector.broadcast %cst_558 : f32 to vector<32x256xf32>
    %1007 = arith.select %1005, %1003, %1006 : vector<32x256xi1>, vector<32x256xf32>
    %c6_559 = arith.constant 6 : index
    %c0_560 = arith.constant 0 : index
    %c0_561 = arith.constant 0 : index
    %1008 = vector.load %arg17[%c6_559, %c0_560, %c0_561] : memref<12x64x32xbf16, #tpu.memory_space<vmem>>, vector<1x64x32xbf16>
    %1009 = vector.shape_cast %1008 : vector<1x64x32xbf16> to vector<64x32xbf16>
    %1010 = arith.truncf %1000 : vector<32x256xf32> to vector<32x256xbf16>
    %cst_562 = arith.constant dense<0.000000e+00> : vector<64x256xf32>
    %1011 = tpu.matmul %1009, %1010, %cst_562 {dimension_numbers = #tpu.dot_dimension_numbers<[1], [0], [0], [1], [0, 0, 1, 1], [], []>} : vector<64x32xbf16>, vector<32x256xbf16>, vector<64x256xf32> -> vector<64x256xf32>
    %1012 = arith.addf %993, %1011 : vector<64x256xf32>
    %c8_563 = arith.constant 8 : index
    %c0_564 = arith.constant 0 : index
    %c0_565 = arith.constant 0 : index
    %1013 = vector.load %arg17[%c8_563, %c0_564, %c0_565] : memref<12x64x32xbf16, #tpu.memory_space<vmem>>, vector<1x64x32xbf16>
    %1014 = vector.shape_cast %1013 : vector<1x64x32xbf16> to vector<64x32xbf16>
    %1015 = arith.truncf %1007 : vector<32x256xf32> to vector<32x256xbf16>
    %cst_566 = arith.constant dense<0.000000e+00> : vector<64x256xf32>
    %1016 = tpu.matmul %1014, %1015, %cst_566 {dimension_numbers = #tpu.dot_dimension_numbers<[1], [0], [0], [1], [0, 0, 1, 1], [], []>} : vector<64x32xbf16>, vector<32x256xbf16>, vector<64x256xf32> -> vector<64x256xf32>
    %1017 = arith.addf %1012, %1016 : vector<64x256xf32>
    %c2_567 = arith.constant 2 : index
    %c0_568 = arith.constant 0 : index
    %c0_569 = arith.constant 0 : index
    %1018 = vector.load %arg18[%c2_567, %c0_568, %c0_569] : memref<4x64x1xf32, #tpu.memory_space<vmem>>, vector<1x64x1xf32>
    %1019 = vector.shape_cast %1018 : vector<1x64x1xf32> to vector<64x1xf32>
    %1020 = vector.broadcast %1019 : vector<64x1xf32> to vector<64x256xf32>
    %1021 = arith.addf %1017, %1020 : vector<64x256xf32>
    %1022 = vector.extract_strided_slice %1021 {offsets = [0, 0], sizes = [32, 256], strides = [1, 1]} : vector<64x256xf32> to vector<32x256xf32>
    %1023 = math.tanh %1022 : vector<32x256xf32>
    %1024 = vector.extract_strided_slice %1021 {offsets = [32, 0], sizes = [32, 256], strides = [1, 1]} : vector<64x256xf32> to vector<32x256xf32>
    %cst_570 = arith.constant 5.000000e-01 : f32
    %1025 = vector.broadcast %cst_570 : f32 to vector<32x256xf32>
    %1026 = arith.mulf %1025, %1024 : vector<32x256xf32>
    %1027 = math.tanh %1026 : vector<32x256xf32>
    %cst_571 = arith.constant 5.000000e-01 : f32
    %1028 = vector.broadcast %cst_571 : f32 to vector<32x256xf32>
    %1029 = arith.mulf %1028, %1027 : vector<32x256xf32>
    %cst_572 = arith.constant 5.000000e-01 : f32
    %1030 = vector.broadcast %cst_572 : f32 to vector<32x256xf32>
    %1031 = arith.addf %1029, %1030 : vector<32x256xf32>
    %c2_573 = arith.constant 2 : index
    %c0_574 = arith.constant 0 : index
    %c0_575 = arith.constant 0 : index
    %1032 = vector.load %arg19[%c2_573, %c0_574, %c0_575] : memref<4x32x32xbf16, #tpu.memory_space<vmem>>, vector<1x32x32xbf16>
    %1033 = vector.shape_cast %1032 : vector<1x32x32xbf16> to vector<32x32xbf16>
    %1034 = arith.mulf %1023, %1031 : vector<32x256xf32>
    %1035 = arith.truncf %1034 : vector<32x256xf32> to vector<32x256xbf16>
    %cst_576 = arith.constant dense<0.000000e+00> : vector<32x256xf32>
    %1036 = tpu.matmul %1033, %1035, %cst_576 {dimension_numbers = #tpu.dot_dimension_numbers<[1], [0], [0], [1], [0, 0, 1, 1], [], []>} : vector<32x32xbf16>, vector<32x256xbf16>, vector<32x256xf32> -> vector<32x256xf32>
    %c2_577 = arith.constant 2 : index
    %c0_578 = arith.constant 0 : index
    %c0_579 = arith.constant 0 : index
    %1037 = vector.load %arg20[%c2_577, %c0_578, %c0_579] : memref<4x32x1xf32, #tpu.memory_space<vmem>>, vector<1x32x1xf32>
    %1038 = vector.shape_cast %1037 : vector<1x32x1xf32> to vector<32x1xf32>
    %1039 = vector.broadcast %1038 : vector<32x1xf32> to vector<32x256xf32>
    %1040 = arith.addf %1036, %1039 : vector<32x256xf32>
    %1041 = arith.addf %989, %1040 : vector<32x256xf32>
    %1042 = arith.truncf %1040 : vector<32x256xf32> to vector<32x256xbf16>
    %c10_580 = arith.constant 10 : index
    %c0_581 = arith.constant 0 : index
    %c0_582 = arith.constant 0 : index
    %1043 = vector.load %arg17[%c10_580, %c0_581, %c0_582] : memref<12x64x32xbf16, #tpu.memory_space<vmem>>, vector<1x64x32xbf16>
    %1044 = vector.shape_cast %1043 : vector<1x64x32xbf16> to vector<64x32xbf16>
    %cst_583 = arith.constant dense<0.000000e+00> : vector<64x256xf32>
    %1045 = tpu.matmul %1044, %1042, %cst_583 {dimension_numbers = #tpu.dot_dimension_numbers<[1], [0], [0], [1], [0, 0, 1, 1], [], []>} : vector<64x32xbf16>, vector<32x256xbf16>, vector<64x256xf32> -> vector<64x256xf32>
    %c8_i32_584 = arith.constant 8 : i32
    %1046 = vector.broadcast %c8_i32_584 : i32 to vector<1x256xi32>
    %1047 = arith.cmpi sge, %16, %1046 : vector<1x256xi32>
    %c8_i32_585 = arith.constant 8 : i32
    %1048 = tpu.dynamic_rotate %1040 by %c8_i32_585 dim 1 : vector<32x256xf32>, i32 -> vector<32x256xf32>
    %cst_586 = arith.constant 0.000000e+00 : f32
    %1049 = vector.shape_cast %1047 : vector<1x256xi1> to vector<1x256xi1>
    %1050 = vector.broadcast %1049 : vector<1x256xi1> to vector<32x256xi1>
    %1051 = vector.broadcast %cst_586 : f32 to vector<32x256xf32>
    %1052 = arith.select %1050, %1048, %1051 : vector<32x256xi1>, vector<32x256xf32>
    %c56_i32_587 = arith.constant 56 : i32
    %1053 = vector.broadcast %c56_i32_587 : i32 to vector<1x256xi32>
    %1054 = arith.cmpi slt, %16, %1053 : vector<1x256xi32>
    %c248_i32_588 = arith.constant 248 : i32
    %1055 = tpu.dynamic_rotate %1040 by %c248_i32_588 dim 1 : vector<32x256xf32>, i32 -> vector<32x256xf32>
    %cst_589 = arith.constant 0.000000e+00 : f32
    %1056 = vector.shape_cast %1054 : vector<1x256xi1> to vector<1x256xi1>
    %1057 = vector.broadcast %1056 : vector<1x256xi1> to vector<32x256xi1>
    %1058 = vector.broadcast %cst_589 : f32 to vector<32x256xf32>
    %1059 = arith.select %1057, %1055, %1058 : vector<32x256xi1>, vector<32x256xf32>
    %c9_590 = arith.constant 9 : index
    %c0_591 = arith.constant 0 : index
    %c0_592 = arith.constant 0 : index
    %1060 = vector.load %arg17[%c9_590, %c0_591, %c0_592] : memref<12x64x32xbf16, #tpu.memory_space<vmem>>, vector<1x64x32xbf16>
    %1061 = vector.shape_cast %1060 : vector<1x64x32xbf16> to vector<64x32xbf16>
    %1062 = arith.truncf %1052 : vector<32x256xf32> to vector<32x256xbf16>
    %cst_593 = arith.constant dense<0.000000e+00> : vector<64x256xf32>
    %1063 = tpu.matmul %1061, %1062, %cst_593 {dimension_numbers = #tpu.dot_dimension_numbers<[1], [0], [0], [1], [0, 0, 1, 1], [], []>} : vector<64x32xbf16>, vector<32x256xbf16>, vector<64x256xf32> -> vector<64x256xf32>
    %1064 = arith.addf %1045, %1063 : vector<64x256xf32>
    %c11_594 = arith.constant 11 : index
    %c0_595 = arith.constant 0 : index
    %c0_596 = arith.constant 0 : index
    %1065 = vector.load %arg17[%c11_594, %c0_595, %c0_596] : memref<12x64x32xbf16, #tpu.memory_space<vmem>>, vector<1x64x32xbf16>
    %1066 = vector.shape_cast %1065 : vector<1x64x32xbf16> to vector<64x32xbf16>
    %1067 = arith.truncf %1059 : vector<32x256xf32> to vector<32x256xbf16>
    %cst_597 = arith.constant dense<0.000000e+00> : vector<64x256xf32>
    %1068 = tpu.matmul %1066, %1067, %cst_597 {dimension_numbers = #tpu.dot_dimension_numbers<[1], [0], [0], [1], [0, 0, 1, 1], [], []>} : vector<64x32xbf16>, vector<32x256xbf16>, vector<64x256xf32> -> vector<64x256xf32>
    %1069 = arith.addf %1064, %1068 : vector<64x256xf32>
    %c3_598 = arith.constant 3 : index
    %c0_599 = arith.constant 0 : index
    %c0_600 = arith.constant 0 : index
    %1070 = vector.load %arg18[%c3_598, %c0_599, %c0_600] : memref<4x64x1xf32, #tpu.memory_space<vmem>>, vector<1x64x1xf32>
    %1071 = vector.shape_cast %1070 : vector<1x64x1xf32> to vector<64x1xf32>
    %1072 = vector.broadcast %1071 : vector<64x1xf32> to vector<64x256xf32>
    %1073 = arith.addf %1069, %1072 : vector<64x256xf32>
    %1074 = vector.extract_strided_slice %1073 {offsets = [0, 0], sizes = [32, 256], strides = [1, 1]} : vector<64x256xf32> to vector<32x256xf32>
    %1075 = math.tanh %1074 : vector<32x256xf32>
    %1076 = vector.extract_strided_slice %1073 {offsets = [32, 0], sizes = [32, 256], strides = [1, 1]} : vector<64x256xf32> to vector<32x256xf32>
    %cst_601 = arith.constant 5.000000e-01 : f32
    %1077 = vector.broadcast %cst_601 : f32 to vector<32x256xf32>
    %1078 = arith.mulf %1077, %1076 : vector<32x256xf32>
    %1079 = math.tanh %1078 : vector<32x256xf32>
    %cst_602 = arith.constant 5.000000e-01 : f32
    %1080 = vector.broadcast %cst_602 : f32 to vector<32x256xf32>
    %1081 = arith.mulf %1080, %1079 : vector<32x256xf32>
    %cst_603 = arith.constant 5.000000e-01 : f32
    %1082 = vector.broadcast %cst_603 : f32 to vector<32x256xf32>
    %1083 = arith.addf %1081, %1082 : vector<32x256xf32>
    %c3_604 = arith.constant 3 : index
    %c0_605 = arith.constant 0 : index
    %c0_606 = arith.constant 0 : index
    %1084 = vector.load %arg19[%c3_604, %c0_605, %c0_606] : memref<4x32x32xbf16, #tpu.memory_space<vmem>>, vector<1x32x32xbf16>
    %1085 = vector.shape_cast %1084 : vector<1x32x32xbf16> to vector<32x32xbf16>
    %1086 = arith.mulf %1075, %1083 : vector<32x256xf32>
    %1087 = arith.truncf %1086 : vector<32x256xf32> to vector<32x256xbf16>
    %cst_607 = arith.constant dense<0.000000e+00> : vector<32x256xf32>
    %1088 = tpu.matmul %1085, %1087, %cst_607 {dimension_numbers = #tpu.dot_dimension_numbers<[1], [0], [0], [1], [0, 0, 1, 1], [], []>} : vector<32x32xbf16>, vector<32x256xbf16>, vector<32x256xf32> -> vector<32x256xf32>
    %c3_608 = arith.constant 3 : index
    %c0_609 = arith.constant 0 : index
    %c0_610 = arith.constant 0 : index
    %1089 = vector.load %arg20[%c3_608, %c0_609, %c0_610] : memref<4x32x1xf32, #tpu.memory_space<vmem>>, vector<1x32x1xf32>
    %1090 = vector.shape_cast %1089 : vector<1x32x1xf32> to vector<32x1xf32>
    %1091 = vector.broadcast %1090 : vector<32x1xf32> to vector<32x256xf32>
    %1092 = arith.addf %1088, %1091 : vector<32x256xf32>
    %1093 = arith.addf %1041, %1092 : vector<32x256xf32>
    %c0_611 = arith.constant 0 : index
    %c0_612 = arith.constant 0 : index
    %1094 = vector.load %arg21[%c0_611, %c0_612] : memref<64x32xbf16, #tpu.memory_space<vmem>>, vector<64x32xbf16>
    %1095 = arith.truncf %1093 : vector<32x256xf32> to vector<32x256xbf16>
    %cst_613 = arith.constant dense<0.000000e+00> : vector<64x256xf32>
    %1096 = tpu.matmul %1094, %1095, %cst_613 {dimension_numbers = #tpu.dot_dimension_numbers<[1], [0], [0], [1], [0, 0, 1, 1], [], []>} : vector<64x32xbf16>, vector<32x256xbf16>, vector<64x256xf32> -> vector<64x256xf32>
    %c0_614 = arith.constant 0 : index
    %c0_615 = arith.constant 0 : index
    %1097 = vector.load %arg22[%c0_614, %c0_615] : memref<64x1xf32, #tpu.memory_space<vmem>>, vector<64x1xf32>
    %1098 = vector.broadcast %1097 : vector<64x1xf32> to vector<64x256xf32>
    %1099 = arith.addf %1096, %1098 : vector<64x256xf32>
    %1100 = arith.truncf %1099 : vector<64x256xf32> to vector<64x256xbf16>
    %c1_616 = arith.constant 1 : index
    %c0_617 = arith.constant 0 : index
    %c0_618 = arith.constant 0 : index
    %1101 = vector.load %arg23[%c1_616, %c0_617, %c0_618] : memref<3x128x64xbf16, #tpu.memory_space<vmem>>, vector<1x128x64xbf16>
    %1102 = vector.shape_cast %1101 : vector<1x128x64xbf16> to vector<128x64xbf16>
    %cst_619 = arith.constant dense<0.000000e+00> : vector<128x256xf32>
    %1103 = tpu.matmul %1102, %1100, %cst_619 {dimension_numbers = #tpu.dot_dimension_numbers<[1], [0], [0], [1], [0, 0, 1, 1], [], []>} : vector<128x64xbf16>, vector<64x256xbf16>, vector<128x256xf32> -> vector<128x256xf32>
    %c1_i32_620 = arith.constant 1 : i32
    %1104 = vector.broadcast %c1_i32_620 : i32 to vector<1x256xi32>
    %1105 = arith.cmpi sge, %16, %1104 : vector<1x256xi32>
    %c1_i32_621 = arith.constant 1 : i32
    %1106 = tpu.dynamic_rotate %1099 by %c1_i32_621 dim 1 : vector<64x256xf32>, i32 -> vector<64x256xf32>
    %cst_622 = arith.constant 0.000000e+00 : f32
    %1107 = vector.shape_cast %1105 : vector<1x256xi1> to vector<1x256xi1>
    %1108 = vector.broadcast %1107 : vector<1x256xi1> to vector<64x256xi1>
    %1109 = vector.broadcast %cst_622 : f32 to vector<64x256xf32>
    %1110 = arith.select %1108, %1106, %1109 : vector<64x256xi1>, vector<64x256xf32>
    %c63_i32_623 = arith.constant 63 : i32
    %1111 = vector.broadcast %c63_i32_623 : i32 to vector<1x256xi32>
    %1112 = arith.cmpi slt, %16, %1111 : vector<1x256xi32>
    %c255_i32_624 = arith.constant 255 : i32
    %1113 = tpu.dynamic_rotate %1099 by %c255_i32_624 dim 1 : vector<64x256xf32>, i32 -> vector<64x256xf32>
    %cst_625 = arith.constant 0.000000e+00 : f32
    %1114 = vector.shape_cast %1112 : vector<1x256xi1> to vector<1x256xi1>
    %1115 = vector.broadcast %1114 : vector<1x256xi1> to vector<64x256xi1>
    %1116 = vector.broadcast %cst_625 : f32 to vector<64x256xf32>
    %1117 = arith.select %1115, %1113, %1116 : vector<64x256xi1>, vector<64x256xf32>
    %c0_626 = arith.constant 0 : index
    %c0_627 = arith.constant 0 : index
    %c0_628 = arith.constant 0 : index
    %1118 = vector.load %arg23[%c0_626, %c0_627, %c0_628] : memref<3x128x64xbf16, #tpu.memory_space<vmem>>, vector<1x128x64xbf16>
    %1119 = vector.shape_cast %1118 : vector<1x128x64xbf16> to vector<128x64xbf16>
    %1120 = arith.truncf %1110 : vector<64x256xf32> to vector<64x256xbf16>
    %cst_629 = arith.constant dense<0.000000e+00> : vector<128x256xf32>
    %1121 = tpu.matmul %1119, %1120, %cst_629 {dimension_numbers = #tpu.dot_dimension_numbers<[1], [0], [0], [1], [0, 0, 1, 1], [], []>} : vector<128x64xbf16>, vector<64x256xbf16>, vector<128x256xf32> -> vector<128x256xf32>
    %1122 = arith.addf %1103, %1121 : vector<128x256xf32>
    %c2_630 = arith.constant 2 : index
    %c0_631 = arith.constant 0 : index
    %c0_632 = arith.constant 0 : index
    %1123 = vector.load %arg23[%c2_630, %c0_631, %c0_632] : memref<3x128x64xbf16, #tpu.memory_space<vmem>>, vector<1x128x64xbf16>
    %1124 = vector.shape_cast %1123 : vector<1x128x64xbf16> to vector<128x64xbf16>
    %1125 = arith.truncf %1117 : vector<64x256xf32> to vector<64x256xbf16>
    %cst_633 = arith.constant dense<0.000000e+00> : vector<128x256xf32>
    %1126 = tpu.matmul %1124, %1125, %cst_633 {dimension_numbers = #tpu.dot_dimension_numbers<[1], [0], [0], [1], [0, 0, 1, 1], [], []>} : vector<128x64xbf16>, vector<64x256xbf16>, vector<128x256xf32> -> vector<128x256xf32>
    %1127 = arith.addf %1122, %1126 : vector<128x256xf32>
    %c0_634 = arith.constant 0 : index
    %c0_635 = arith.constant 0 : index
    %c0_636 = arith.constant 0 : index
    %1128 = vector.load %arg24[%c0_634, %c0_635, %c0_636] : memref<1x128x1xf32, #tpu.memory_space<vmem>>, vector<1x128x1xf32>
    %1129 = vector.shape_cast %1128 : vector<1x128x1xf32> to vector<128x1xf32>
    %1130 = vector.broadcast %1129 : vector<128x1xf32> to vector<128x256xf32>
    %1131 = arith.addf %1127, %1130 : vector<128x256xf32>
    %1132 = vector.extract_strided_slice %1131 {offsets = [0, 0], sizes = [64, 256], strides = [1, 1]} : vector<128x256xf32> to vector<64x256xf32>
    %1133 = math.tanh %1132 : vector<64x256xf32>
    %1134 = vector.extract_strided_slice %1131 {offsets = [64, 0], sizes = [64, 256], strides = [1, 1]} : vector<128x256xf32> to vector<64x256xf32>
    %cst_637 = arith.constant 5.000000e-01 : f32
    %1135 = vector.broadcast %cst_637 : f32 to vector<64x256xf32>
    %1136 = arith.mulf %1135, %1134 : vector<64x256xf32>
    %1137 = math.tanh %1136 : vector<64x256xf32>
    %cst_638 = arith.constant 5.000000e-01 : f32
    %1138 = vector.broadcast %cst_638 : f32 to vector<64x256xf32>
    %1139 = arith.mulf %1138, %1137 : vector<64x256xf32>
    %cst_639 = arith.constant 5.000000e-01 : f32
    %1140 = vector.broadcast %cst_639 : f32 to vector<64x256xf32>
    %1141 = arith.addf %1139, %1140 : vector<64x256xf32>
    %c0_640 = arith.constant 0 : index
    %c0_641 = arith.constant 0 : index
    %c0_642 = arith.constant 0 : index
    %1142 = vector.load %arg25[%c0_640, %c0_641, %c0_642] : memref<1x64x64xbf16, #tpu.memory_space<vmem>>, vector<1x64x64xbf16>
    %1143 = vector.shape_cast %1142 : vector<1x64x64xbf16> to vector<64x64xbf16>
    %1144 = arith.mulf %1133, %1141 : vector<64x256xf32>
    %1145 = arith.truncf %1144 : vector<64x256xf32> to vector<64x256xbf16>
    %cst_643 = arith.constant dense<0.000000e+00> : vector<64x256xf32>
    %1146 = tpu.matmul %1143, %1145, %cst_643 {dimension_numbers = #tpu.dot_dimension_numbers<[1], [0], [0], [1], [0, 0, 1, 1], [], []>} : vector<64x64xbf16>, vector<64x256xbf16>, vector<64x256xf32> -> vector<64x256xf32>
    %c0_644 = arith.constant 0 : index
    %c0_645 = arith.constant 0 : index
    %c0_646 = arith.constant 0 : index
    %1147 = vector.load %arg26[%c0_644, %c0_645, %c0_646] : memref<1x64x1xf32, #tpu.memory_space<vmem>>, vector<1x64x1xf32>
    %1148 = vector.shape_cast %1147 : vector<1x64x1xf32> to vector<64x1xf32>
    %1149 = vector.broadcast %1148 : vector<64x1xf32> to vector<64x256xf32>
    %1150 = arith.addf %1146, %1149 : vector<64x256xf32>
    %1151 = arith.addf %1099, %1150 : vector<64x256xf32>
    %c0_647 = arith.constant 0 : index
    %c0_648 = arith.constant 0 : index
    %1152 = vector.load %arg2[%c0_647, %c0_648] : memref<64x16xf32, #tpu.memory_space<vmem>>, vector<64x16xf32>
    %1153 = vector.extract_strided_slice %1151 {offsets = [0, 0], sizes = [64, 64], strides = [1, 1]} : vector<64x256xf32> to vector<64x64xf32>
    %cst_649 = arith.constant dense<0.000000e+00> : vector<64x16xf32>
    %1154 = tpu.matmul %1153, %1152, %cst_649 {dimension_numbers = #tpu.dot_dimension_numbers<[1], [0], [0], [1], [0, 0, 1, 1], [], []>} : vector<64x64xf32>, vector<64x16xf32>, vector<64x16xf32> -> vector<64x16xf32>
    %c0_650 = arith.constant 0 : index
    %c0_651 = arith.constant 0 : index
    %c0_652 = arith.constant 0 : index
    %1155 = vector.load %arg27[%c0_650, %c0_651, %c0_652] : memref<4x64x16xf32, #tpu.memory_space<vmem>>, vector<1x64x16xf32>
    %1156 = vector.shape_cast %1155 : vector<1x64x16xf32> to vector<64x16xf32>
    %1157 = vector.shape_cast %1154 : vector<64x16xf32> to vector<1x64x16xf32>
    tpu.vector_store %arg27[%c0_650, %c0_651, %c0_652], %1157 {strides = array<i32>} : memref<4x64x16xf32, #tpu.memory_space<vmem>>, vector<1x64x16xf32>,
    %1158 = vector.extract_strided_slice %1151 {offsets = [0, 64], sizes = [64, 64], strides = [1, 1]} : vector<64x256xf32> to vector<64x64xf32>
    %cst_653 = arith.constant dense<0.000000e+00> : vector<64x16xf32>
    %1159 = tpu.matmul %1158, %1152, %cst_653 {dimension_numbers = #tpu.dot_dimension_numbers<[1], [0], [0], [1], [0, 0, 1, 1], [], []>} : vector<64x64xf32>, vector<64x16xf32>, vector<64x16xf32> -> vector<64x16xf32>
    %c1_654 = arith.constant 1 : index
    %c0_655 = arith.constant 0 : index
    %c0_656 = arith.constant 0 : index
    %1160 = vector.load %arg27[%c1_654, %c0_655, %c0_656] : memref<4x64x16xf32, #tpu.memory_space<vmem>>, vector<1x64x16xf32>
    %1161 = vector.shape_cast %1160 : vector<1x64x16xf32> to vector<64x16xf32>
    %1162 = vector.shape_cast %1159 : vector<64x16xf32> to vector<1x64x16xf32>
    tpu.vector_store %arg27[%c1_654, %c0_655, %c0_656], %1162 {strides = array<i32>} : memref<4x64x16xf32, #tpu.memory_space<vmem>>, vector<1x64x16xf32>,
    %1163 = vector.extract_strided_slice %1151 {offsets = [0, 128], sizes = [64, 64], strides = [1, 1]} : vector<64x256xf32> to vector<64x64xf32>
    %cst_657 = arith.constant dense<0.000000e+00> : vector<64x16xf32>
    %1164 = tpu.matmul %1163, %1152, %cst_657 {dimension_numbers = #tpu.dot_dimension_numbers<[1], [0], [0], [1], [0, 0, 1, 1], [], []>} : vector<64x64xf32>, vector<64x16xf32>, vector<64x16xf32> -> vector<64x16xf32>
    %c2_658 = arith.constant 2 : index
    %c0_659 = arith.constant 0 : index
    %c0_660 = arith.constant 0 : index
    %1165 = vector.load %arg27[%c2_658, %c0_659, %c0_660] : memref<4x64x16xf32, #tpu.memory_space<vmem>>, vector<1x64x16xf32>
    %1166 = vector.shape_cast %1165 : vector<1x64x16xf32> to vector<64x16xf32>
    %1167 = vector.shape_cast %1164 : vector<64x16xf32> to vector<1x64x16xf32>
    tpu.vector_store %arg27[%c2_658, %c0_659, %c0_660], %1167 {strides = array<i32>} : memref<4x64x16xf32, #tpu.memory_space<vmem>>, vector<1x64x16xf32>,
    %1168 = vector.extract_strided_slice %1151 {offsets = [0, 192], sizes = [64, 64], strides = [1, 1]} : vector<64x256xf32> to vector<64x64xf32>
    %cst_661 = arith.constant dense<0.000000e+00> : vector<64x16xf32>
    %1169 = tpu.matmul %1168, %1152, %cst_661 {dimension_numbers = #tpu.dot_dimension_numbers<[1], [0], [0], [1], [0, 0, 1, 1], [], []>} : vector<64x64xf32>, vector<64x16xf32>, vector<64x16xf32> -> vector<64x16xf32>
    %c3_662 = arith.constant 3 : index
    %c0_663 = arith.constant 0 : index
    %c0_664 = arith.constant 0 : index
    %1170 = vector.load %arg27[%c3_662, %c0_663, %c0_664] : memref<4x64x16xf32, #tpu.memory_space<vmem>>, vector<1x64x16xf32>
    %1171 = vector.shape_cast %1170 : vector<1x64x16xf32> to vector<64x16xf32>
    %1172 = vector.shape_cast %1169 : vector<64x16xf32> to vector<1x64x16xf32>
    tpu.vector_store %arg27[%c3_662, %c0_663, %c0_664], %1172 {strides = array<i32>} : memref<4x64x16xf32, #tpu.memory_space<vmem>>, vector<1x64x16xf32>,
    return
  }
  func.func @transform_0(%arg0: i32) -> (i32, i32, i32) {
    %c0_i32 = arith.constant 0 : i32
    %c0_i32_0 = arith.constant 0 : i32
    %c0_i32_1 = arith.constant 0 : i32
    return %arg0, %c0_i32, %c0_i32_0 : i32, i32, i32
  }
  func.func @transform_1(%arg0: i32) -> (i32, i32) {
    %c0_i32 = arith.constant 0 : i32
    %c0_i32_0 = arith.constant 0 : i32
    %c0_i32_1 = arith.constant 0 : i32
    return %c0_i32, %c0_i32_0 : i32, i32
  }
  func.func @transform_2(%arg0: i32) -> (i32, i32) {
    %c0_i32 = arith.constant 0 : i32
    %c0_i32_0 = arith.constant 0 : i32
    %c0_i32_1 = arith.constant 0 : i32
    return %c0_i32, %c0_i32_0 : i32, i32
  }
  func.func @transform_3(%arg0: i32) -> (i32, i32) {
    %c0_i32 = arith.constant 0 : i32
    %c0_i32_0 = arith.constant 0 : i32
    %c0_i32_1 = arith.constant 0 : i32
    return %c0_i32, %c0_i32_0 : i32, i32
  }
  func.func @transform_4(%arg0: i32) -> (i32, i32, i32) {
    %c0_i32 = arith.constant 0 : i32
    %c0_i32_0 = arith.constant 0 : i32
    %c0_i32_1 = arith.constant 0 : i32
    %c0_i32_2 = arith.constant 0 : i32
    return %c0_i32, %c0_i32_0, %c0_i32_1 : i32, i32, i32
  }
  func.func @transform_5(%arg0: i32) -> (i32, i32, i32) {
    %c0_i32 = arith.constant 0 : i32
    %c0_i32_0 = arith.constant 0 : i32
    %c0_i32_1 = arith.constant 0 : i32
    %c0_i32_2 = arith.constant 0 : i32
    return %c0_i32, %c0_i32_0, %c0_i32_1 : i32, i32, i32
  }
  func.func @transform_6(%arg0: i32) -> (i32, i32, i32) {
    %c0_i32 = arith.constant 0 : i32
    %c0_i32_0 = arith.constant 0 : i32
    %c0_i32_1 = arith.constant 0 : i32
    %c0_i32_2 = arith.constant 0 : i32
    return %c0_i32, %c0_i32_0, %c0_i32_1 : i32, i32, i32
  }
  func.func @transform_7(%arg0: i32) -> (i32, i32, i32) {
    %c0_i32 = arith.constant 0 : i32
    %c0_i32_0 = arith.constant 0 : i32
    %c0_i32_1 = arith.constant 0 : i32
    %c0_i32_2 = arith.constant 0 : i32
    return %c0_i32, %c0_i32_0, %c0_i32_1 : i32, i32, i32
  }
  func.func @transform_8(%arg0: i32) -> (i32, i32) {
    %c0_i32 = arith.constant 0 : i32
    %c0_i32_0 = arith.constant 0 : i32
    %c0_i32_1 = arith.constant 0 : i32
    return %c0_i32, %c0_i32_0 : i32, i32
  }
  func.func @transform_9(%arg0: i32) -> (i32, i32) {
    %c0_i32 = arith.constant 0 : i32
    %c0_i32_0 = arith.constant 0 : i32
    %c0_i32_1 = arith.constant 0 : i32
    return %c0_i32, %c0_i32_0 : i32, i32
  }
  func.func @transform_10(%arg0: i32) -> (i32, i32, i32) {
    %c0_i32 = arith.constant 0 : i32
    %c0_i32_0 = arith.constant 0 : i32
    %c0_i32_1 = arith.constant 0 : i32
    %c0_i32_2 = arith.constant 0 : i32
    return %c0_i32, %c0_i32_0, %c0_i32_1 : i32, i32, i32
  }
  func.func @transform_11(%arg0: i32) -> (i32, i32, i32) {
    %c0_i32 = arith.constant 0 : i32
    %c0_i32_0 = arith.constant 0 : i32
    %c0_i32_1 = arith.constant 0 : i32
    %c0_i32_2 = arith.constant 0 : i32
    return %c0_i32, %c0_i32_0, %c0_i32_1 : i32, i32, i32
  }
  func.func @transform_12(%arg0: i32) -> (i32, i32, i32) {
    %c0_i32 = arith.constant 0 : i32
    %c0_i32_0 = arith.constant 0 : i32
    %c0_i32_1 = arith.constant 0 : i32
    %c0_i32_2 = arith.constant 0 : i32
    return %c0_i32, %c0_i32_0, %c0_i32_1 : i32, i32, i32
  }
  func.func @transform_13(%arg0: i32) -> (i32, i32, i32) {
    %c0_i32 = arith.constant 0 : i32
    %c0_i32_0 = arith.constant 0 : i32
    %c0_i32_1 = arith.constant 0 : i32
    %c0_i32_2 = arith.constant 0 : i32
    return %c0_i32, %c0_i32_0, %c0_i32_1 : i32, i32, i32
  }
  func.func @transform_14(%arg0: i32) -> (i32, i32) {
    %c0_i32 = arith.constant 0 : i32
    %c0_i32_0 = arith.constant 0 : i32
    %c0_i32_1 = arith.constant 0 : i32
    return %c0_i32, %c0_i32_0 : i32, i32
  }
  func.func @transform_15(%arg0: i32) -> (i32, i32) {
    %c0_i32 = arith.constant 0 : i32
    %c0_i32_0 = arith.constant 0 : i32
    %c0_i32_1 = arith.constant 0 : i32
    return %c0_i32, %c0_i32_0 : i32, i32
  }
  func.func @transform_16(%arg0: i32) -> (i32, i32, i32) {
    %c0_i32 = arith.constant 0 : i32
    %c0_i32_0 = arith.constant 0 : i32
    %c0_i32_1 = arith.constant 0 : i32
    %c0_i32_2 = arith.constant 0 : i32
    return %c0_i32, %c0_i32_0, %c0_i32_1 : i32, i32, i32
  }
  func.func @transform_17(%arg0: i32) -> (i32, i32, i32) {
    %c0_i32 = arith.constant 0 : i32
    %c0_i32_0 = arith.constant 0 : i32
    %c0_i32_1 = arith.constant 0 : i32
    %c0_i32_2 = arith.constant 0 : i32
    return %c0_i32, %c0_i32_0, %c0_i32_1 : i32, i32, i32
  }
  func.func @transform_18(%arg0: i32) -> (i32, i32, i32) {
    %c0_i32 = arith.constant 0 : i32
    %c0_i32_0 = arith.constant 0 : i32
    %c0_i32_1 = arith.constant 0 : i32
    %c0_i32_2 = arith.constant 0 : i32
    return %c0_i32, %c0_i32_0, %c0_i32_1 : i32, i32, i32
  }
  func.func @transform_19(%arg0: i32) -> (i32, i32, i32) {
    %c0_i32 = arith.constant 0 : i32
    %c0_i32_0 = arith.constant 0 : i32
    %c0_i32_1 = arith.constant 0 : i32
    %c0_i32_2 = arith.constant 0 : i32
    return %c0_i32, %c0_i32_0, %c0_i32_1 : i32, i32, i32
  }
  func.func @transform_20(%arg0: i32) -> (i32, i32) {
    %c0_i32 = arith.constant 0 : i32
    %c0_i32_0 = arith.constant 0 : i32
    %c0_i32_1 = arith.constant 0 : i32
    return %c0_i32, %c0_i32_0 : i32, i32
  }
  func.func @transform_21(%arg0: i32) -> (i32, i32) {
    %c0_i32 = arith.constant 0 : i32
    %c0_i32_0 = arith.constant 0 : i32
    %c0_i32_1 = arith.constant 0 : i32
    return %c0_i32, %c0_i32_0 : i32, i32
  }
  func.func @transform_22(%arg0: i32) -> (i32, i32, i32) {
    %c0_i32 = arith.constant 0 : i32
    %c0_i32_0 = arith.constant 0 : i32
    %c0_i32_1 = arith.constant 0 : i32
    %c0_i32_2 = arith.constant 0 : i32
    return %c0_i32, %c0_i32_0, %c0_i32_1 : i32, i32, i32
  }
  func.func @transform_23(%arg0: i32) -> (i32, i32, i32) {
    %c0_i32 = arith.constant 0 : i32
    %c0_i32_0 = arith.constant 0 : i32
    %c0_i32_1 = arith.constant 0 : i32
    %c0_i32_2 = arith.constant 0 : i32
    return %c0_i32, %c0_i32_0, %c0_i32_1 : i32, i32, i32
  }
  func.func @transform_24(%arg0: i32) -> (i32, i32, i32) {
    %c0_i32 = arith.constant 0 : i32
    %c0_i32_0 = arith.constant 0 : i32
    %c0_i32_1 = arith.constant 0 : i32
    %c0_i32_2 = arith.constant 0 : i32
    return %c0_i32, %c0_i32_0, %c0_i32_1 : i32, i32, i32
  }
  func.func @transform_25(%arg0: i32) -> (i32, i32, i32) {
    %c0_i32 = arith.constant 0 : i32
    %c0_i32_0 = arith.constant 0 : i32
    %c0_i32_1 = arith.constant 0 : i32
    %c0_i32_2 = arith.constant 0 : i32
    return %c0_i32, %c0_i32_0, %c0_i32_1 : i32, i32, i32
  }
  func.func @transform_26(%arg0: i32) -> (i32, i32, i32) {
    %c0_i32 = arith.constant 0 : i32
    %c0_i32_0 = arith.constant 0 : i32
    %c0_i32_1 = arith.constant 0 : i32
    return %arg0, %c0_i32, %c0_i32_0 : i32, i32, i32
  }
}

</mosaic_0001>

<bundles_post_ra>
// kernel: tpu_custom_call.1
= control target key start
LH: loop header
LB: loop body
LE: loop exit
PB: predicated region body
PF: predicated region fallthrough
CT: control target
= control target key end

     0   :  { %s12479_s27 = smov 0   ;;  %s15683_s0 = inlined_call_operand.vmem [shape: f32[2,1,256], index: 0, kind: input, shape index: {}]   ;;  %s15684_s1 = inlined_call_operand.vmem [shape: f32[64,16], index: 1, kind: input, shape index: {}]   ;;  %s15685_s2 = inlined_call_operand.vmem [shape: f32[8,1], index: 2, kind: input, shape index: {}]   ;;  %s15686_s3 = inlined_call_operand.vmem [shape: f32[8,1], index: 3, kind: input, shape index: {}]   ;;  %s15687_s4 = inlined_call_operand.vmem [shape: bf16[36,16,8], index: 4, kind: input, shape index: {}]   ;;  %s15688_s5 = inlined_call_operand.vmem [shape: f32[12,16,1], index: 5, kind: input, shape index: {}]   ;;  %s15689_s6 = inlined_call_operand.vmem [shape: bf16[12,8,8], index: 6, kind: input, shape index: {}]   ;;  %s15690_s7 = inlined_call_operand.vmem [shape: f32[12,8,1], index: 7, kind: input, shape index: {}]   ;;  %s15691_s8 = inlined_call_operand.vmem [shape: bf16[16,8], index: 8, kind: input, shape index: {}]   ;;  %s15692_s9 = inlined_call_operand.vmem [shape: f32[16,1], index: 9, kind: input, shape index: {}]   ;;  %s15693_s10 = inlined_call_operand.vmem [shape: bf16[24,32,16], index: 10, kind: input, shape index: {}]   ;;  %s15694_s11 = inlined_call_operand.vmem [shape: f32[8,32,1], index: 11, kind: input, shape index: {}]   ;;  %s15695_s12 = inlined_call_operand.vmem [shape: bf16[8,16,16], index: 12, kind: input, shape index: {}]   ;;  %s15696_s13 = inlined_call_operand.vmem [shape: f32[8,16,1], index: 13, kind: input, shape index: {}]   ;;  %s15697_s14 = inlined_call_operand.vmem [shape: bf16[32,16], index: 14, kind: input, shape index: {}]   ;;  %s15698_s15 = inlined_call_operand.vmem [shape: f32[32,1], index: 15, kind: input, shape index: {}]   ;;  %s15699_s16 = inlined_call_operand.vmem [shape: bf16[12,64,32], index: 16, kind: input, shape index: {}]   ;;  %s15700_s17 = inlined_call_operand.vmem [shape: f32[4,64,1], index: 17, kind: input, shape index: {}]   ;;  %s15701_s18 = inlined_call_operand.vmem [shape: bf16[4,32,32], index: 18, kind: input, shape index: {}]   ;;  %s15702_s19 = inlined_call_operand.vmem [shape: f32[4,32,1], index: 19, kind: input, shape index: {}]   ;;  %s15703_s20 = inlined_call_operand.vmem [shape: bf16[64,32], index: 20, kind: input, shape index: {}]   ;;  %s15704_s21 = inlined_call_operand.vmem [shape: f32[64,1], index: 21, kind: input, shape index: {}]   ;;  %s15705_s22 = inlined_call_operand.vmem [shape: bf16[3,128,64], index: 22, kind: input, shape index: {}]   ;;  %s15706_s23 = inlined_call_operand.vmem [shape: f32[1,128,1], index: 23, kind: input, shape index: {}]   ;;  %s15707_s24 = inlined_call_operand.vmem [shape: bf16[1,64,64], index: 24, kind: input, shape index: {}]   ;;  %s15708_s25 = inlined_call_operand.vmem [shape: f32[1,64,1], index: 25, kind: input, shape index: {}]   ;;  %s15709_s26 = inlined_call_operand.vmem [shape: f32[8,64,16], index: 26, kind: output, shape index: {}]  }
   0x1   :  { %15848 = sst [smem:[#allocation23_spill]] %s15683_s0 }
   0x2   :  { %15849 = sst [smem:[#allocation24_spill]] %s15684_s1 }
   0x3   :  { %15850 = sst [smem:[#allocation25_spill]] %s15685_s2 }
   0x4   :  { %15851 = sst [smem:[#allocation26_spill]] %s15686_s3 }
   0x5   :  { %15852 = sst [smem:[#allocation27_spill]] %s15687_s4 }
   0x6   :  { %15853 = sst [smem:[#allocation28_spill]] %s15688_s5 }
   0x7   :  { %15854 = sst [smem:[#allocation29_spill]] %s15689_s6 }
   0x8   :  { %15855 = sst [smem:[#allocation30_spill]] %s15690_s7 }
   0x9   :  { %15856 = sst [smem:[#allocation31_spill]] %s15691_s8 }
   0xa   :  { %15857 = sst [smem:[#allocation32_spill]] %s15692_s9 }
   0xb   :  { %15858 = sst [smem:[#allocation33_spill]] %s15693_s10 }
   0xc   :  { %15859 = sst [smem:[#allocation34_spill]] %s15705_s22 }
   0xd   :  { %15860 = sst [smem:[#allocation35_spill]] %s15706_s23 }
   0xe   :  { %15861 = sst [smem:[#allocation36_spill]] %s15707_s24 }
   0xf   :  { %15862 = sst [smem:[#allocation37_spill]] %s15708_s25 }
  0x10   :  { %15863 = sst [smem:[#allocation38_spill]] %s15709_s26 }
  0x11 LB: > { %15864 = sst [smem:[#allocation2_spill]] %s12328_s27  ;;  %s12485_s3 = sadd.s32 4294967295, %s12328_s27   ;;  %s12328_s27 = sphi %s12479_s27, %s36_s27  }
  0x12   : > { %15865 = sst [smem:[#allocation3_spill]] %s12485_s3  ;;  %p9610_p0 = scmp.ge.s32.totalorder %s12328_s27, 1 }
  0x13   : > { %p711_p1 = scmp.lt.s32.totalorder %s12328_s27, 3 }
  0x15   : > { %p712_p2 = pnand %p9610_p0, %p711_p1 }
  0x17   : > { %715 = sbr.rel (%p712_p2) target bundleno = 11781 (0x2e05), region = 124 }
  0x1c   : > { %s15866_s8 = sld [smem:[#allocation25_spill]]  ;;  %v12330_v1 = vmov 0   ;;  %p781_p3 = scmp.lt.s32.totalorder %s12485_s3, 1  ;;  %vm890_vm0 = vcmask 1043456   ;;  %vm886_vm1 = vcmask 64512   ;;  %v793_v20 = vlaneseq }
  0x1d   : > { %11483 = vset.pattern.permute.xlu0 %v12330_v1  ;;  %11494 = vset.pattern.permute.xlu2 %v12330_v1  ;;  %s15867_s0 = sld [smem:[#allocation26_spill]]  ;;  %s15742_s30 = smov 126  }
  0x1e   : > { %11505 = vset.pattern.permute.xlu1 %v12330_v1  ;;  %s15868_s2 = sld [smem:[#allocation30_spill]]  ;;  %v12525_v21 = vand.u32 127, %v793_v20  ;;  %s15722_s5 = smov 2  }
  0x1f   : > { %s15869_s6 = sld [smem:[#allocation28_spill]]  ;;  %s15718_s10 = smov 124  }
  0x20   : > { %s782_s1 = scalar_select %p781_p3, %s12485_s3, 1  ;;  %15872 = vst [vmem:[#allocation4_spill] sm:$0xff] %v12525_v21  ;;  %v795_v22 = vadd.s32 128, %v12525_v21  ;;  %v12532_v24 = vand.u32 63, %v12525_v21  ;;  %vm15771_vm2 = vcmp.lt.s32.totalorder %v12525_v21, 1  ;;  %vm15770_vm5 = vcmp.lt.s32.totalorder %v12525_v21, 127 }
  0x21   : > { %s15870_s27 = sld [smem:[#allocation23_spill]]  ;;  %vm15774_vm8 = vcmp.lt.s32.totalorder %v12525_v21, 126  ;;  %vm15726_vm12 = vcmp.lt.s32.totalorder %v12525_v21, 2  ;;  %vm15752_vm14 = vcmp.lt.s32.totalorder %v12525_v21, 4  ;;  %vm15733_vm15 = vcmp.lt.s32.totalorder %v12525_v21, 124  ;;  %s15730_s4 = smov 120  }
  0x22   : > { %v821_v0 = vld [vmem:[%s15866_s8] sm:$0xff]  ;;  %s9611_s7 = sshll.u32 %s782_s1, 1  ;;  %v12534_v25 = vand.u32 63, %v795_v22  ;;  %vm847_vm3 = vcmp.ge.s32.totalorder %v12532_v24, 1  ;;  %vm862_vm6 = vcmp.lt.s32.totalorder %v12532_v24, 63  ;;  %s15873_s9 = sld [smem:[#allocation29_spill]] }
  0x23   : > { %824 = vperm.xlu0 %11483, %v821_v0   ;;  %v834_v2 = vld [vmem:[%s15867_s0] sm:$0xff]  ;;  %s15871_s0 = sld [smem:[#allocation27_spill]]  ;;  %vm15725_vm9 = vcmp.lt.s32.totalorder %v12532_v24, 62  ;;  %vm1097_vm11 = vcmp.ge.s32.totalorder %v12532_v24, 2  ;;  %s15720_s1 = smov 4  }
  0x24   : > { %v1049_v3 = vld [vmem:[%s15868_s2] sm:$0xff]  ;;  %vm848_vm4 = vcmp.ge.s32.totalorder %v12534_v25, 1  ;;  %vm863_vm7 = vcmp.lt.s32.totalorder %v12534_v25, 63  ;;  %vm15724_vm10 = vcmp.lt.s32.totalorder %v12534_v25, 62  ;;  %vm15727_vm13 = vcmp.ge.s32.totalorder %v12534_v25, 2  ;;  %s15728_s29 = smov 8  }
  0x25   : > { %v9664_v4 = vld [vmem:[%s15869_s6 + $0x18] sm:$0xff]  ;;  %v1019_v23 = vld [vmem:[%s15869_s6 + $0x8] sm:$0xff]  ;;  %v1018_v29 = vld [vmem:[%s15869_s6] sm:$0xff]  ;;  %s15740_s28 = smov 112   ;;  %s15738_s8 = smov 16  }
  0x26   : > { %1027 = vperm.xlu2 %11494, %v1019_v23   ;;  %s15943_s24 = smov 120   ;;  %s15944_s3 = smov 8  }
  0x27   : > { %s784_s26 = scalar_lea.vmem %s15870_s27, %s9611_s7  ;;  %s15746_s27 = smov 127  }
  0x28   : > { %v820_v6 = vld [vmem:[%s784_s26] sm:$0x3]  ;;  %s15744_s26 = smov 1   ;;  %s15877_s7 = smov 1  }
  0x29   : > { %v828_v7 = vperm.slane %v820_v6, 0  ;;  %v829_v8 = vperm.slane %v820_v6, 1  ;;  %v11282_v19 = vld [vmem:[%s15871_s0 + $0x8] sm:$0xff]  ;;  %v11283_v38 = vld [vmem:[%s15871_s0] sm:$0xff]  ;;  %v11284_v50 = vld [vmem:[%s15871_s0 + $0x10] sm:$0xff]  ;;  %s15983_s22 = smov 112  }
  0x2a   : > { %s15984_s25 = smov 16   ;;  %s16012_s23 = smov 96  }
  0x2b   : > { %837 = vperm.xlu0 %11483, %v834_v2  }
  0x2e   : > { %1022 = vperm.xlu2 %11494, %v1018_v29  }
  0x33   : > { %1052 = vperm.xlu0 %11483, %v1049_v3  }
  0x3b   : > { %1277 = vperm.xlu0 %11483, %v9664_v4  }
  0x80   : > { %v1028_v59 = vpop.permute.xlu2 %1027 }
  0x95   : > { %v825_v5 = vpop.permute.xlu0 %824 }
  0x96   : > { %v832_v9 = vmul.f32 %v828_v7, %v825_v5  ;;  %v833_v10 = vmul.f32 %v829_v8, %v825_v5 }
  0x9d   : > { %v838_v11 = vpop.permute.xlu0 %837 }
  0x9e   : > { %v12506_v12 = vadd.f32 %v838_v11, %v832_v9  ;;  %v12508_v13 = vadd.f32 %v838_v11, %v833_v10  ;;  %v1023_v10 = vpop.permute.xlu2 %1022 }
  0xa0   : > { %v11484_v14 = vpack.i.bf16 %v12508_v13, %v12506_v12  ;;  %v842_v15 = vpack.c.bf16 %v12506_v12, %v12506_v12  ;;  %v843_v16 = vpack.c.bf16 %v12508_v13, %v12508_v13 }
  0xa2   : > { %11485 = vrot.lane.b32.xlu1 %v11484_v14, %s15744_s26  ;;  %v934_v17 = vsel %vm890_vm0, %v842_v15, 0  ;;  %v937_v18 = vsel %vm890_vm0, %v843_v16, 0  ;;  %s15754_s26 = smov 32  }
  0xa3   : > { %946 = vmatpush.bf16.msra.mxu2 %v934_v17  ;;  %960 = vmatpush.bf16.msra.mxu3 %v937_v18 }
  0xa6   : > { %9627 = vmatmul.msk.bf16.vlgmr.msra.gmra.mxu2 %vm886_vm1, %v11282_v19  ;;  %9628 = vmatmul.msk.bf16.vlgmr.msra.gmra.mxu3 %vm886_vm1, %v11282_v19 }
  0xaa   : > { %11490 = vrot.lane.b32.xlu1 %v11484_v14, %s15746_s27 }
 0x114   : > { %v11486_v26 = vpop.permute.xlu1 %11485 }
 0x115   : > { %v11488_v27 = vunpack.i.h.bf16 %v11486_v26  ;;  %v11487_v28 = vunpack.i.l.bf16 %v11486_v26 }
 0x117   : > { %v855_v30 = vsel %vm15771_vm2, %v11488_v27, %v11487_v28  ;;  %v854_v31 = vsel %vm15771_vm2, %v11487_v28, %v11488_v27 }
 0x118   : > { %v860_v32 = vsel %vm847_vm3, %v855_v30, 0.0  ;;  %v861_v33 = vsel %vm848_vm4, %v854_v31, 0.0 }
 0x119   : > { %v879_v34 = vpack.c.bf16 %v860_v32, %v860_v32  ;;  %v880_v35 = vpack.c.bf16 %v861_v33, %v861_v33 }
 0x11b   : > { %v892_v36 = vsel %vm890_vm0, %v879_v34, 0  ;;  %v895_v37 = vsel %vm890_vm0, %v880_v35, 0  ;;  %v1044_v34 = vld [vmem:[%s15873_s9] sm:$0xf]  ;;  %v1053_v35 = vpop.permute.xlu0 %1052 }
 0x11c   : > { %v11491_v39 = vpop.permute.xlu1 %11490  ;;  %904 = vmatpush.bf16.msra.mxu0 %v892_v36  ;;  %918 = vmatpush.bf16.msra.mxu1 %v895_v37 }
 0x11d   : > { %v11493_v40 = vunpack.i.h.bf16 %v11491_v39  ;;  %v11492_v41 = vunpack.i.l.bf16 %v11491_v39 }
 0x11f   : > { %9621 = vmatmul.msk.bf16.vlgmr.msra.gmra.mxu0 %vm886_vm1, %v11283_v38  ;;  %9622 = vmatmul.msk.bf16.vlgmr.msra.gmra.mxu1 %vm886_vm1, %v11283_v38  ;;  %v869_v42 = vsel %vm15770_vm5, %v11492_v41, %v11493_v40  ;;  %v870_v43 = vsel %vm15770_vm5, %v11493_v40, %v11492_v41 }
 0x120   : > { %v875_v44 = vsel %vm862_vm6, %v869_v42, 0.0  ;;  %v876_v45 = vsel %vm863_vm7, %v870_v43, 0.0 }
 0x121   : > { %v970_v46 = vpack.c.bf16 %v875_v44, %v875_v44  ;;  %v971_v47 = vpack.c.bf16 %v876_v45, %v876_v45 }
 0x123   : > { %v981_v48 = vsel %vm890_vm0, %v970_v46, 0  ;;  %v984_v49 = vsel %vm890_vm0, %v971_v47, 0  ;;  %v9666_v47 = vld [vmem:[%s15868_s2 + $0x8] sm:$0xff] }
 0x124   : > { %993 = vmatpush.bf16.msrb.mxu0 %v981_v48  ;;  %1007 = vmatpush.bf16.msrb.mxu1 %v984_v49  ;;  %v9694_v48 = vld [vmem:[%s15869_s6 + $0x28] sm:$0xff]  ;;  %v11285_v49 = vld [vmem:[%s15871_s0 + $0x20] sm:$0xff] }
 0x129   : > { %v948_v55 = vpop.f32.mrf.mxu2  ;;  %v962_v56 = vpop.f32.mrf.mxu3 }
 0x12f   : > { %9635 = vmatmul.msk.bf16.vlgmr.msrb.gmra.mxu0 %vm886_vm1, %v11284_v50  ;;  %9636 = vmatmul.msk.bf16.vlgmr.msrb.gmra.mxu1 %vm886_vm1, %v11284_v50 }
 0x131   : > { %v950_v60 = vpop.f32.mrf.mxu2  ;;  %v964_v61 = vpop.f32.mrf.mxu3 }
 0x19c   : > { %v906_v51 = vpop.f32.mrf.mxu0  ;;  %v920_v52 = vpop.f32.mrf.mxu1 }
 0x19d   : > { %v949_v2 = vadd.f32 %v948_v55, %v906_v51  ;;  %v963_v5 = vadd.f32 %v962_v56, %v920_v52 }
 0x1a4   : > { %v908_v53 = vpop.f32.mrf.mxu0  ;;  %v922_v54 = vpop.f32.mrf.mxu1 }
 0x1a5   : > { %v951_v62 = vadd.f32 %v950_v60, %v908_v53  ;;  %v965_v63 = vadd.f32 %v964_v61, %v922_v54  ;;  %v9663_v53 = vld [vmem:[%s15869_s6 + $0x10] sm:$0xff] }
 0x1ac   : > { %v995_v57 = vpop.f32.mrf.mxu0  ;;  %v1009_v58 = vpop.f32.mrf.mxu1 }
 0x1ad   : > { %v1014_v6 = vadd.f32 %v995_v57, %v949_v2  ;;  %v1015_v9 = vadd.f32 %v1009_v58, %v963_v5 }
 0x1af   : > { %v1030_v15 = vadd.f32 %v1023_v10, %v1014_v6  ;;  %v1031_v16 = vadd.f32 %v1023_v10, %v1015_v9  ;;  %v11287_v10 = vld [vmem:[%s15871_s0 + $0x28] sm:$0xff] }
 0x1b4   : > { %v997_v0 = vpop.f32.mrf.mxu0  ;;  %v1011_v1 = vpop.f32.mrf.mxu1 }
 0x1b5   : > { %v1016_v3 = vadd.f32 %v997_v0, %v951_v62  ;;  %v1017_v4 = vadd.f32 %v1011_v1, %v965_v63 }
 0x1b7   : > { %v1032_v7 = vadd.f32 %v1028_v59, %v1016_v3  ;;  %v1033_v8 = vadd.f32 %v1028_v59, %v1017_v4 }
 0x1b9   : > { %v1036_v11 = vmul.f32 0.5, %v1032_v7  ;;  %v1037_v14 = vmul.f32 0.5, %v1033_v8  ;;  %v11286_v7 = vld [vmem:[%s15871_s0 + $0x18] sm:$0xff] }
 0x1bb   : > { %11906 = vtanh.f32 %v1036_v11 }
 0x1bc   : > { %11908 = vtanh.f32 %v1037_v14 }
 0x1bd   : > { %11910 = vtanh.f32 %v1030_v15 }
 0x1be   : > { %11912 = vtanh.f32 %v1031_v16 }
 0x1c1   : > { %v11907_v17 = vpop.eup %11906 }
 0x1c2   : > { %v11909_v18 = vpop.eup %11908  ;;  %v1040_v19 = vmul.f32 0.5, %v11907_v17 }
 0x1c3   : > { %v1041_v20 = vmul.f32 0.5, %v11909_v18  ;;  %v11911_v23 = vpop.eup %11910 }
 0x1c4   : > { %v1042_v22 = vadd.f32 0.5, %v1040_v19  ;;  %v11913_v27 = vpop.eup %11912 }
 0x1c5   : > { %v1043_v26 = vadd.f32 0.5, %v1041_v20 }
 0x1c6   : > { %v1045_v28 = vmul.f32 %v11911_v23, %v1042_v22 }
 0x1c7   : > { %v1046_v29 = vmul.f32 %v11913_v27, %v1043_v26 }
 0x1c8   : > { %v1047_v30 = vpack.c.bf16 %v1045_v28, %v1045_v28 }
 0x1c9   : > { %v1048_v31 = vpack.c.bf16 %v1046_v29, %v1046_v29 }
 0x1ca   : > { %v1059_v32 = vsel %vm890_vm0, %v1047_v30, 0 }
 0x1cb   : > { %1071 = vmatpush.bf16.msrb.mxu2 %v1059_v32  ;;  %v1062_v33 = vsel %vm890_vm0, %v1048_v31, 0 }
 0x1cc   : > { %1084 = vmatpush.bf16.msrb.mxu3 %v1062_v33  ;;  %v1278_v33 = vpop.permute.xlu0 %1277 }
 0x1ce   : > { %9637 = vmatmul.msk.bf16.vlgmr.msrb.gmra.mxu2 %vm886_vm1, %v1044_v34 }
 0x1cf   : > { %9638 = vmatmul.msk.bf16.vlgmr.msrb.gmra.mxu3 %vm886_vm1, %v1044_v34 }
 0x251   : > { %v1073_v36 = vpop.f32.mrf.mxu2 }
 0x252   : > { %v12582_v37 = vadd.f32 %v1073_v36, %v1053_v35  ;;  %v1086_v38 = vpop.f32.mrf.mxu3 }
 0x253   : > { %v12584_v39 = vadd.f32 %v1086_v38, %v1053_v35 }
 0x254   : > { %v1092_v40 = vpack.c.bf16 %v12582_v37, %v12582_v37 }
 0x255   : > { %v11500_v41 = vpack.i.bf16 %v12584_v39, %v12582_v37  ;;  %v1093_v42 = vpack.c.bf16 %v12584_v39, %v12584_v39 }
 0x256   : > { %v1183_v43 = vsel %vm890_vm0, %v1092_v40, 0 }
 0x257   : > { %11501 = vrot.lane.b32.xlu2 %v11500_v41, %s15742_s30  ;;  %11496 = vrot.lane.b32.xlu1 %v11500_v41, %s15722_s5  ;;  %v1186_v44 = vsel %vm890_vm0, %v1093_v42, 0  ;;  %s15891_s5 = smov 126  }
 0x258   : > { %1195 = vmatpush.bf16.msra.mxu2 %v1183_v43  ;;  %1209 = vmatpush.bf16.msra.mxu3 %v1186_v44 }
 0x259   : > { %v1075_v45 = vpop.f32.mrf.mxu2 }
 0x25a   : > { %v1088_v46 = vpop.f32.mrf.mxu3 }
 0x25b   : > { %9653 = vmatmul.msk.bf16.vlgmr.msra.gmra.mxu2 %vm886_vm1, %v11285_v49  ;;  %9654 = vmatmul.msk.bf16.vlgmr.msra.gmra.mxu3 %vm886_vm1, %v11285_v49 }
 0x25f   : > { %1304 = vperm.xlu2 %11494, %v9666_v47   ;;  %1272 = vperm.xlu1 %11505, %v9663_v53  }
 0x267   : > { %1529 = vperm.xlu2 %11494, %v9694_v48  }
 0x2b1   : > { %v11502_v50 = vpop.permute.xlu2 %11501 }
 0x2b2   : > { %v11504_v51 = vunpack.i.h.bf16 %v11502_v50  ;;  %v11503_v52 = vunpack.i.l.bf16 %v11502_v50 }
 0x2b4   : > { %v1119_v54 = vsel %vm15774_vm8, %v11503_v52, %v11504_v51  ;;  %v1120_v55 = vsel %vm15774_vm8, %v11504_v51, %v11503_v52 }
 0x2b5   : > { %v1125_v59 = vsel %vm15725_vm9, %v1119_v54, 0.0  ;;  %v1126_v60 = vsel %vm15724_vm10, %v1120_v55, 0.0  ;;  %vm15753_vm10 = vcmp.ge.s32.totalorder %v12532_v24, 4  ;;  %vm15751_vm9 = vcmp.ge.s32.totalorder %v12534_v25, 4 }
 0x2b6   : > { %v1219_v1 = vpack.c.bf16 %v1125_v59, %v1125_v59  ;;  %v1220_v2 = vpack.c.bf16 %v1126_v60, %v1126_v60  ;;  %v9665_v60 = vld [vmem:[%s15873_s9 + $0x4] sm:$0xf] }
 0x2b8   : > { %v1230_v8 = vsel %vm890_vm0, %v1219_v1, 0  ;;  %v1233_v9 = vsel %vm890_vm0, %v1220_v2, 0  ;;  %v1091_v2 = vadd.f32 %v12584_v39, %v12508_v13  ;;  %v9696_v39 = vld [vmem:[%s15868_s2 + $0x10] sm:$0xff] }
 0x2c9   : > { %v11497_v56 = vpop.permute.xlu1 %11496 }
 0x2ca   : > { %v11499_v57 = vunpack.i.h.bf16 %v11497_v56  ;;  %v11498_v58 = vunpack.i.l.bf16 %v11497_v56 }
 0x2cc   : > { %v1105_v61 = vsel %vm15726_vm12, %v11499_v57, %v11498_v58  ;;  %v1104_v62 = vsel %vm15726_vm12, %v11498_v58, %v11499_v57  ;;  %vm15734_vm12 = vcmp.lt.s32.totalorder %v12532_v24, 60 }
 0x2cd   : > { %v1110_v63 = vsel %vm1097_vm11, %v1105_v61, 0.0  ;;  %v1111_v0 = vsel %vm15727_vm13, %v1104_v62, 0.0  ;;  %v1305_v61 = vpop.permute.xlu2 %1304  ;;  %vm15732_vm13 = vcmp.lt.s32.totalorder %v12534_v25, 60 }
 0x2ce   : > { %v1130_v3 = vpack.c.bf16 %v1110_v63, %v1110_v63  ;;  %v1131_v4 = vpack.c.bf16 %v1111_v0, %v1111_v0  ;;  %v1090_v63 = vadd.f32 %v12582_v37, %v12506_v12 }
 0x2d0   : > { %v1141_v5 = vsel %vm890_vm0, %v1130_v3, 0  ;;  %v1144_v6 = vsel %vm890_vm0, %v1131_v4, 0 }
 0x2d1   : > { %1153 = vmatpush.bf16.msra.mxu0 %v1141_v5  ;;  %1167 = vmatpush.bf16.msra.mxu1 %v1144_v6  ;;  %v1273_v41 = vpop.permute.xlu1 %1272 }
 0x2d4   : > { %9647 = vmatmul.msk.bf16.vlgmr.msra.gmra.mxu0 %vm886_vm1, %v11286_v7  ;;  %9648 = vmatmul.msk.bf16.vlgmr.msra.gmra.mxu1 %vm886_vm1, %v11286_v7 }
 0x2d5   : > { %1242 = vmatpush.bf16.msrb.mxu0 %v1230_v8  ;;  %1256 = vmatpush.bf16.msrb.mxu1 %v1233_v9 }
 0x2de   : > { %v1197_v17 = vpop.f32.mrf.mxu2  ;;  %v1211_v18 = vpop.f32.mrf.mxu3 }
 0x2e4   : > { %9661 = vmatmul.msk.bf16.vlgmr.msrb.gmra.mxu0 %vm886_vm1, %v11287_v10  ;;  %9662 = vmatmul.msk.bf16.vlgmr.msrb.gmra.mxu1 %vm886_vm1, %v11287_v10  ;;  %v9693_v10 = vld [vmem:[%s15869_s6 + $0x20] sm:$0xff] }
 0x2e6   : > { %v1199_v22 = vpop.f32.mrf.mxu2  ;;  %v1213_v23 = vpop.f32.mrf.mxu3 }
 0x351   : > { %v1155_v11 = vpop.f32.mrf.mxu0  ;;  %v1169_v14 = vpop.f32.mrf.mxu1 }
 0x352   : > { %v1198_v30 = vadd.f32 %v1197_v17, %v1155_v11  ;;  %v1212_v34 = vadd.f32 %v1211_v18, %v1169_v14  ;;  %v9724_v11 = vld [vmem:[%s15869_s6 + $0x38] sm:$0xff] }
 0x353   : > { %v11288_v14 = vld [vmem:[%s15871_s0 + $0x38] sm:$0xff] }
 0x359   : > { %v1157_v15 = vpop.f32.mrf.mxu0  ;;  %v1171_v16 = vpop.f32.mrf.mxu1 }
 0x35a   : > { %v1200_v26 = vadd.f32 %v1199_v22, %v1157_v15  ;;  %v1214_v27 = vadd.f32 %v1213_v23, %v1171_v16 }
 0x361   : > { %v1244_v19 = vpop.f32.mrf.mxu0  ;;  %v1258_v20 = vpop.f32.mrf.mxu1 }
 0x362   : > { %v1263_v35 = vadd.f32 %v1244_v19, %v1198_v30  ;;  %v1264_v40 = vadd.f32 %v1258_v20, %v1212_v34 }
 0x364   : > { %v1280_v44 = vadd.f32 %v1273_v41, %v1263_v35  ;;  %v1281_v45 = vadd.f32 %v1273_v41, %v1264_v40 }
 0x369   : > { %v1246_v28 = vpop.f32.mrf.mxu0  ;;  %v1260_v29 = vpop.f32.mrf.mxu1 }
 0x36a   : > { %v1265_v31 = vadd.f32 %v1246_v28, %v1200_v26  ;;  %v1266_v32 = vadd.f32 %v1260_v29, %v1214_v27 }
 0x36c   : > { %v1282_v36 = vadd.f32 %v1278_v33, %v1265_v31  ;;  %v1283_v38 = vadd.f32 %v1278_v33, %v1266_v32 }
 0x36e   : > { %v1286_v42 = vmul.f32 0.5, %v1282_v36  ;;  %v1287_v43 = vmul.f32 0.5, %v1283_v38 }
 0x370   : > { %11914 = vtanh.f32 %v1286_v42  ;;  %v11289_v42 = vld [vmem:[%s15871_s0 + $0x30] sm:$0xff] }
 0x371   : > { %11916 = vtanh.f32 %v1287_v43  ;;  %v11290_v43 = vld [vmem:[%s15871_s0 + $0x40] sm:$0xff] }
 0x372   : > { %11918 = vtanh.f32 %v1280_v44 }
 0x373   : > { %11920 = vtanh.f32 %v1281_v45 }
 0x376   : > { %v11915_v46 = vpop.eup %11914 }
 0x377   : > { %v11917_v47 = vpop.eup %11916  ;;  %v1290_v48 = vmul.f32 0.5, %v11915_v46 }
 0x378   : > { %v1291_v49 = vmul.f32 0.5, %v11917_v47  ;;  %v11919_v51 = vpop.eup %11918 }
 0x379   : > { %v1292_v50 = vadd.f32 0.5, %v1290_v48  ;;  %v11921_v53 = vpop.eup %11920 }
 0x37a   : > { %v1293_v52 = vadd.f32 0.5, %v1291_v49 }
 0x37b   : > { %v1296_v54 = vmul.f32 %v11919_v51, %v1292_v50 }
 0x37c   : > { %v1297_v55 = vmul.f32 %v11921_v53, %v1293_v52 }
 0x37d   : > { %v1298_v56 = vpack.c.bf16 %v1296_v54, %v1296_v54 }
 0x37e   : > { %v1299_v57 = vpack.c.bf16 %v1297_v55, %v1297_v55 }
 0x37f   : > { %v1311_v58 = vsel %vm890_vm0, %v1298_v56, 0 }
 0x380   : > { %1323 = vmatpush.bf16.msrb.mxu2 %v1311_v58  ;;  %v1314_v59 = vsel %vm890_vm0, %v1299_v57, 0 }
 0x381   : > { %1336 = vmatpush.bf16.msrb.mxu3 %v1314_v59 }
 0x383   : > { %9667 = vmatmul.msk.bf16.vlgmr.msrb.gmra.mxu2 %vm886_vm1, %v9665_v60 }
 0x384   : > { %9668 = vmatmul.msk.bf16.vlgmr.msrb.gmra.mxu3 %vm886_vm1, %v9665_v60 }
 0x406   : > { %v1325_v62 = vpop.f32.mrf.mxu2 }
 0x407   : > { %v1326_v0 = vadd.f32 %v1325_v62, %v1305_v61  ;;  %v1338_v1 = vpop.f32.mrf.mxu3 }
 0x408   : > { %v1339_v3 = vadd.f32 %v1338_v1, %v1305_v61  ;;  %v1530_v61 = vpop.permute.xlu2 %1529 }
 0x409   : > { %v12657_v4 = vadd.f32 %v1326_v0, %v1090_v63  ;;  %v1344_v5 = vpack.c.bf16 %v1326_v0, %v1326_v0 }
 0x40a   : > { %v12659_v6 = vadd.f32 %v1339_v3, %v1091_v2  ;;  %v11511_v7 = vpack.i.bf16 %v1339_v3, %v1326_v0  ;;  %v1345_v8 = vpack.c.bf16 %v1339_v3, %v1339_v3 }
 0x40b   : > { %v1435_v9 = vsel %vm890_vm0, %v1344_v5, 0 }
 0x40c   : > { %11512 = vrot.lane.b32.xlu1 %v11511_v7, %s15718_s10  ;;  %11507 = vrot.lane.b32.xlu0 %v11511_v7, %s15720_s1  ;;  %v1438_v12 = vsel %vm890_vm0, %v1345_v8, 0  ;;  %s15875_s10 = sld [smem:[#allocation31_spill]]  ;;  %s15876_s1 = smov 127  }
 0x40d   : > { %1447 = vmatpush.bf16.msra.mxu2 %v1435_v9  ;;  %1461 = vmatpush.bf16.msra.mxu3 %v1438_v12 }
 0x40e   : > { %v1327_v13 = vpop.f32.mrf.mxu2 }
 0x40f   : > { %v1340_v37 = vpop.f32.mrf.mxu3 }
 0x410   : > { %9683 = vmatmul.msk.bf16.vlgmr.msra.gmra.mxu2 %vm886_vm1, %v11288_v14  ;;  %9684 = vmatmul.msk.bf16.vlgmr.msra.gmra.mxu3 %vm886_vm1, %v11288_v14 }
 0x414   : > { %1556 = vperm.xlu1 %11505, %v9696_v39   ;;  %1524 = vperm.xlu0 %11483, %v9693_v10  }
 0x41c   : > { %1781 = vperm.xlu1 %11505, %v9724_v11  }
 0x47e   : > { %v11513_v15 = vpop.permute.xlu1 %11512  ;;  %v11508_v16 = vpop.permute.xlu0 %11507 }
 0x47f   : > { %v11515_v17 = vunpack.i.h.bf16 %v11513_v15  ;;  %v11514_v18 = vunpack.i.l.bf16 %v11513_v15  ;;  %v11510_v19 = vunpack.i.h.bf16 %v11508_v16  ;;  %v11509_v20 = vunpack.i.l.bf16 %v11508_v16 }
 0x481   : > { %v1357_v22 = vsel %vm15752_vm14, %v11510_v19, %v11509_v20  ;;  %v1356_v23 = vsel %vm15752_vm14, %v11509_v20, %v11510_v19  ;;  %v1371_v26 = vsel %vm15733_vm15, %v11514_v18, %v11515_v17  ;;  %v1372_v27 = vsel %vm15733_vm15, %v11515_v17, %v11514_v18 }
 0x482   : > { %v1362_v28 = vsel %vm15753_vm10, %v1357_v22, 0.0  ;;  %v1363_v29 = vsel %vm15751_vm9, %v1356_v23, 0.0  ;;  %v1377_v30 = vsel %vm15734_vm12, %v1371_v26, 0.0  ;;  %v1378_v31 = vsel %vm15732_vm13, %v1372_v27, 0.0  ;;  %v9695_v23 = vld [vmem:[%s15873_s9 + $0x8] sm:$0xf] }
 0x483   : > { %v1382_v32 = vpack.c.bf16 %v1362_v28, %v1362_v28  ;;  %v1383_v33 = vpack.c.bf16 %v1363_v29, %v1363_v29  ;;  %v1471_v34 = vpack.c.bf16 %v1377_v30, %v1377_v30  ;;  %v1472_v35 = vpack.c.bf16 %v1378_v31, %v1378_v31 }
 0x484   : > { %vm15735_vm13 = vcmp.lt.s32.totalorder %v12525_v21, 8  ;;  %vm15737_vm15 = vcmp.ge.s32.totalorder %v12532_v24, 8  ;;  %vm15736_vm12 = vcmp.ge.s32.totalorder %v12534_v25, 8  ;;  %vm15763_vm9 = vcmp.ge.s32.totalorder %v12532_v24, 16 }
 0x485   : > { %v1393_v36 = vsel %vm890_vm0, %v1382_v32, 0  ;;  %v1396_v38 = vsel %vm890_vm0, %v1383_v33, 0  ;;  %v1482_v40 = vsel %vm890_vm0, %v1471_v34, 0  ;;  %v1485_v41 = vsel %vm890_vm0, %v1472_v35, 0 }
 0x486   : > { %1405 = vmatpush.bf16.msra.mxu0 %v1393_v36  ;;  %1419 = vmatpush.bf16.msra.mxu1 %v1396_v38  ;;  %v1525_v7 = vpop.permute.xlu0 %1524  ;;  %v1557_v26 = vpop.permute.xlu1 %1556  ;;  %vm15760_vm14 = vcmp.lt.s32.totalorder %v12525_v21, 16  ;;  %vm15761_vm10 = vcmp.ge.s32.totalorder %v12534_v25, 16 }
 0x489   : > { %9677 = vmatmul.msk.bf16.vlgmr.msra.gmra.mxu0 %vm886_vm1, %v11289_v42  ;;  %9678 = vmatmul.msk.bf16.vlgmr.msra.gmra.mxu1 %vm886_vm1, %v11289_v42  ;;  %v9754_v42 = vld [vmem:[%s15869_s6 + $0x48] sm:$0xff] }
 0x48a   : > { %1494 = vmatpush.bf16.msrb.mxu0 %v1482_v40  ;;  %1508 = vmatpush.bf16.msrb.mxu1 %v1485_v41  ;;  %v9726_v41 = vld [vmem:[%s15868_s2 + $0x18] sm:$0xff] }
 0x493   : > { %v1449_v48 = vpop.f32.mrf.mxu2  ;;  %v1463_v49 = vpop.f32.mrf.mxu3 }
 0x499   : > { %9691 = vmatmul.msk.bf16.vlgmr.msrb.gmra.mxu0 %vm886_vm1, %v11290_v43  ;;  %9692 = vmatmul.msk.bf16.vlgmr.msrb.gmra.mxu1 %vm886_vm1, %v11290_v43  ;;  %v11291_v43 = vld [vmem:[%s15871_s0 + $0x50] sm:$0xff] }
 0x49b   : > { %v1451_v52 = vpop.f32.mrf.mxu2  ;;  %v1465_v53 = vpop.f32.mrf.mxu3 }
 0x506   : > { %v1407_v44 = vpop.f32.mrf.mxu0  ;;  %v1421_v45 = vpop.f32.mrf.mxu1 }
 0x507   : > { %v1450_v58 = vadd.f32 %v1449_v48, %v1407_v44  ;;  %v1464_v62 = vadd.f32 %v1463_v49, %v1421_v45 }
 0x50e   : > { %v1409_v46 = vpop.f32.mrf.mxu0  ;;  %v1423_v47 = vpop.f32.mrf.mxu1 }
 0x50f   : > { %v1452_v54 = vadd.f32 %v1451_v52, %v1409_v46  ;;  %v1466_v55 = vadd.f32 %v1465_v53, %v1423_v47 }
 0x516   : > { %v1496_v50 = vpop.f32.mrf.mxu0  ;;  %v1510_v51 = vpop.f32.mrf.mxu1 }
 0x517   : > { %v1515_v63 = vadd.f32 %v1496_v50, %v1450_v58  ;;  %v1516_v2 = vadd.f32 %v1510_v51, %v1464_v62 }
 0x519   : > { %v1532_v8 = vadd.f32 %v1525_v7, %v1515_v63  ;;  %v1533_v9 = vadd.f32 %v1525_v7, %v1516_v2 }
 0x51e   : > { %v1498_v56 = vpop.f32.mrf.mxu0  ;;  %v1512_v57 = vpop.f32.mrf.mxu1 }
 0x51f   : > { %v1517_v59 = vadd.f32 %v1498_v56, %v1452_v54  ;;  %v1518_v60 = vadd.f32 %v1512_v57, %v1466_v55  ;;  %v11292_v55 = vld [vmem:[%s15871_s0 + $0x48] sm:$0xff] }
 0x521   : > { %v1534_v0 = vadd.f32 %v1530_v61, %v1517_v59  ;;  %v1535_v1 = vadd.f32 %v1530_v61, %v1518_v60 }
 0x523   : > { %v1538_v3 = vmul.f32 0.5, %v1534_v0  ;;  %v1539_v5 = vmul.f32 0.5, %v1535_v1 }
 0x525   : > { %11922 = vtanh.f32 %v1538_v3  ;;  %v11293_v3 = vld [vmem:[%s15871_s0 + $0x58] sm:$0xff] }
 0x526   : > { %11924 = vtanh.f32 %v1539_v5 }
 0x527   : > { %11926 = vtanh.f32 %v1532_v8 }
 0x528   : > { %11928 = vtanh.f32 %v1533_v9 }
 0x52b   : > { %v11923_v12 = vpop.eup %11922 }
 0x52c   : > { %v11925_v13 = vpop.eup %11924  ;;  %v1542_v37 = vmul.f32 0.5, %v11923_v12 }
 0x52d   : > { %v1543_v39 = vmul.f32 0.5, %v11925_v13  ;;  %v11927_v11 = vpop.eup %11926 }
 0x52e   : > { %v1544_v10 = vadd.f32 0.5, %v1542_v37  ;;  %v11929_v15 = vpop.eup %11928 }
 0x52f   : > { %v1545_v14 = vadd.f32 0.5, %v1543_v39 }
 0x530   : > { %v1548_v16 = vmul.f32 %v11927_v11, %v1544_v10 }
 0x531   : > { %v1549_v17 = vmul.f32 %v11929_v15, %v1545_v14 }
 0x532   : > { %v1550_v18 = vpack.c.bf16 %v1548_v16, %v1548_v16 }
 0x533   : > { %v1551_v19 = vpack.c.bf16 %v1549_v17, %v1549_v17 }
 0x534   : > { %v1563_v20 = vsel %vm890_vm0, %v1550_v18, 0 }
 0x535   : > { %1575 = vmatpush.bf16.msrb.mxu2 %v1563_v20  ;;  %v1566_v22 = vsel %vm890_vm0, %v1551_v19, 0 }
 0x536   : > { %1588 = vmatpush.bf16.msrb.mxu3 %v1566_v22  ;;  %v1782_v22 = vpop.permute.xlu1 %1781 }
 0x538   : > { %9697 = vmatmul.msk.bf16.vlgmr.msrb.gmra.mxu2 %vm886_vm1, %v9695_v23 }
 0x539   : > { %9698 = vmatmul.msk.bf16.vlgmr.msrb.gmra.mxu3 %vm886_vm1, %v9695_v23 }
 0x5bb   : > { %v1577_v27 = vpop.f32.mrf.mxu2 }
 0x5bc   : > { %v1578_v28 = vadd.f32 %v1577_v27, %v1557_v26  ;;  %v1590_v29 = vpop.f32.mrf.mxu3 }
 0x5bd   : > { %v1591_v30 = vadd.f32 %v1590_v29, %v1557_v26 }
 0x5be   : > { %v1596_v31 = vpack.c.bf16 %v1578_v28, %v1578_v28  ;;  %v12723_v32 = vadd.f32 %v1578_v28, %v12657_v4 }
 0x5bf   : > { %v11521_v33 = vpack.i.bf16 %v1591_v30, %v1578_v28  ;;  %v1597_v34 = vpack.c.bf16 %v1591_v30, %v1591_v30  ;;  %v12726_v35 = vadd.f32 %v1591_v30, %v12659_v6  ;;  %v9723_v6 = vld [vmem:[%s15869_s6 + $0x30] sm:$0xff] }
 0x5c0   : > { %v1687_v36 = vsel %vm890_vm0, %v1596_v31, 0 }
 0x5c1   : > { %11522 = vrot.lane.b32.xlu0 %v11521_v33, %s15730_s4  ;;  %11517 = vrot.lane.b32.xlu2 %v11521_v33, %s15728_s29  ;;  %v1690_v38 = vsel %vm890_vm0, %v1597_v34, 0  ;;  %s15874_s4 = sld [smem:[#allocation32_spill]] }
 0x5c2   : > { %1699 = vmatpush.bf16.msra.mxu2 %v1687_v36  ;;  %1713 = vmatpush.bf16.msra.mxu3 %v1690_v38  ;;  %s15878_s29 = sld [smem:[#allocation33_spill]] }
 0x5c3   : > { %v1579_v40 = vpop.f32.mrf.mxu2 }
 0x5c4   : > { %v1592_v4 = vpop.f32.mrf.mxu3 }
 0x5c5   : > { %9713 = vmatmul.msk.bf16.vlgmr.msra.gmra.mxu2 %vm886_vm1, %v11291_v43  ;;  %9714 = vmatmul.msk.bf16.vlgmr.msra.gmra.mxu3 %vm886_vm1, %v11291_v43 }
 0x5c9   : > { %1808 = vperm.xlu0 %11483, %v9726_v41   ;;  %1776 = vperm.xlu2 %11494, %v9723_v6  }
 0x5d1   : > { %2033 = vperm.xlu0 %11483, %v9754_v42  }
 0x61b   : > { %v11518_v44 = vpop.permute.xlu2 %11517 }
 0x61c   : > { %v11520_v45 = vunpack.i.h.bf16 %v11518_v44  ;;  %v11519_v46 = vunpack.i.l.bf16 %v11518_v44 }
 0x61e   : > { %v1609_v47 = vsel %vm15735_vm13, %v11520_v45, %v11519_v46  ;;  %v1608_v48 = vsel %vm15735_vm13, %v11519_v46, %v11520_v45  ;;  %vm15749_vm13 = vcmp.lt.s32.totalorder %v12525_v21, 120 }
 0x61f   : > { %v1614_v49 = vsel %vm15737_vm15, %v1609_v47, 0.0  ;;  %v1615_v50 = vsel %vm15736_vm12, %v1608_v48, 0.0  ;;  %vm15750_vm12 = vcmp.lt.s32.totalorder %v12532_v24, 56  ;;  %vm15748_vm15 = vcmp.lt.s32.totalorder %v12534_v25, 56 }
 0x620   : > { %v1634_v51 = vpack.c.bf16 %v1614_v49, %v1614_v49  ;;  %v1635_v52 = vpack.c.bf16 %v1615_v50, %v1615_v50 }
 0x622   : > { %v1645_v53 = vsel %vm890_vm0, %v1634_v51, 0  ;;  %v1648_v54 = vsel %vm890_vm0, %v1635_v52, 0  ;;  %v9725_v51 = vld [vmem:[%s15873_s9 + $0xc] sm:$0xf] }
 0x623   : > { %1657 = vmatpush.bf16.msra.mxu0 %v1645_v53  ;;  %1671 = vmatpush.bf16.msra.mxu1 %v1648_v54  ;;  %v1777_v33 = vpop.permute.xlu2 %1776 }
 0x626   : > { %9707 = vmatmul.msk.bf16.vlgmr.msra.gmra.mxu0 %vm886_vm1, %v11292_v55  ;;  %9708 = vmatmul.msk.bf16.vlgmr.msra.gmra.mxu1 %vm886_vm1, %v11292_v55 }
 0x633   : > { %v11523_v56 = vpop.permute.xlu0 %11522 }
 0x634   : > { %v11525_v57 = vunpack.i.h.bf16 %v11523_v56  ;;  %v11524_v58 = vunpack.i.l.bf16 %v11523_v56 }
 0x636   : > { %v1623_v59 = vsel %vm15749_vm13, %v11524_v58, %v11525_v57  ;;  %v1624_v60 = vsel %vm15749_vm13, %v11525_v57, %v11524_v58  ;;  %vm15759_vm13 = vcmp.lt.s32.totalorder %v12532_v24, 48 }
 0x637   : > { %v1629_v61 = vsel %vm15750_vm12, %v1623_v59, 0.0  ;;  %v1630_v62 = vsel %vm15748_vm15, %v1624_v60, 0.0  ;;  %vm15762_vm15 = vcmp.lt.s32.totalorder %v12525_v21, 112  ;;  %vm15758_vm12 = vcmp.lt.s32.totalorder %v12534_v25, 48 }
 0x638   : > { %v1723_v63 = vpack.c.bf16 %v1629_v61, %v1629_v61  ;;  %v1724_v0 = vpack.c.bf16 %v1630_v62, %v1630_v62 }
 0x63a   : > { %v1734_v1 = vsel %vm890_vm0, %v1723_v63, 0  ;;  %v1737_v2 = vsel %vm890_vm0, %v1724_v0, 0 }
 0x63b   : > { %1746 = vmatpush.bf16.msrb.mxu0 %v1734_v1  ;;  %1760 = vmatpush.bf16.msrb.mxu1 %v1737_v2  ;;  %v1809_v52 = vpop.permute.xlu0 %1808  ;;  %v9756_v1 = vld [vmem:[%s15868_s2 + $0x20] sm:$0xff]  ;;  %v9784_v2 = vld [vmem:[%s15869_s6 + $0x58] sm:$0xff] }
 0x63e   : > { %9721 = vmatmul.msk.bf16.vlgmr.msrb.gmra.mxu0 %vm886_vm1, %v11293_v3  ;;  %9722 = vmatmul.msk.bf16.vlgmr.msrb.gmra.mxu1 %vm886_vm1, %v11293_v3  ;;  %v9792_v3 = vld [vmem:[%s15869_s6 + $0x68] sm:$0xff] }
 0x648   : > { %v1701_v12 = vpop.f32.mrf.mxu2  ;;  %v1715_v13 = vpop.f32.mrf.mxu3 }
 0x650   : > { %v1703_v10 = vpop.f32.mrf.mxu2  ;;  %v1717_v11 = vpop.f32.mrf.mxu3 }
 0x6a3   : > { %v1659_v5 = vpop.f32.mrf.mxu0  ;;  %v1673_v7 = vpop.f32.mrf.mxu1 }
 0x6a4   : > { %v1702_v18 = vadd.f32 %v1701_v12, %v1659_v5  ;;  %v1716_v23 = vadd.f32 %v1715_v13, %v1673_v7  ;;  %v9806_v5 = vld [vmem:[%s15869_s6 + $0x78] sm:$0xff]  ;;  %v9820_v7 = vld [vmem:[%s15869_s6 + $0x88] sm:$0xff]  ;;  %v3076_v13 = vld [vmem:[%s15874_s4] sm:$0xff] }
 0x6a5   : > { %v9862_v12 = vld [vmem:[%s15869_s6 + $0xb8] sm:$0xff] }
 0x6ab   : > { %v1661_v8 = vpop.f32.mrf.mxu0  ;;  %v1675_v9 = vpop.f32.mrf.mxu1 }
 0x6ac   : > { %v1704_v14 = vadd.f32 %v1703_v10, %v1661_v8  ;;  %v1718_v15 = vadd.f32 %v1717_v11, %v1675_v9  ;;  %v9834_v8 = vld [vmem:[%s15869_s6 + $0x98] sm:$0xff]  ;;  %v9848_v9 = vld [vmem:[%s15869_s6 + $0xa8] sm:$0xff] }
 0x6bb   : > { %v1748_v37 = vpop.f32.mrf.mxu0  ;;  %v1762_v39 = vpop.f32.mrf.mxu1 }
 0x6bc   : > { %v1767_v26 = vadd.f32 %v1748_v37, %v1702_v18  ;;  %v1768_v29 = vadd.f32 %v1762_v39, %v1716_v23  ;;  %v11294_v37 = vld [vmem:[%s15871_s0 + $0x68] sm:$0xff] }
 0x6be   : > { %v1784_v34 = vadd.f32 %v1777_v33, %v1767_v26  ;;  %v1785_v36 = vadd.f32 %v1777_v33, %v1768_v29 }
 0x6c3   : > { %v1750_v16 = vpop.f32.mrf.mxu0  ;;  %v1764_v17 = vpop.f32.mrf.mxu1 }
 0x6c4   : > { %v1769_v19 = vadd.f32 %v1750_v16, %v1704_v14  ;;  %v1770_v20 = vadd.f32 %v1764_v17, %v1718_v15 }
 0x6c6   : > { %v1786_v27 = vadd.f32 %v1782_v22, %v1769_v19  ;;  %v1787_v28 = vadd.f32 %v1782_v22, %v1770_v20 }
 0x6c8   : > { %v1790_v30 = vmul.f32 0.5, %v1786_v27  ;;  %v1791_v31 = vmul.f32 0.5, %v1787_v28 }
 0x6ca   : > { %11930 = vtanh.f32 %v1790_v30 }
 0x6cb   : > { %11932 = vtanh.f32 %v1791_v31 }
 0x6cc   : > { %11934 = vtanh.f32 %v1784_v34 }
 0x6cd   : > { %11936 = vtanh.f32 %v1785_v36  ;;  %v11295_v36 = vld [vmem:[%s15871_s0 + $0x60] sm:$0xff] }
 0x6d0   : > { %v11931_v38 = vpop.eup %11930 }
 0x6d1   : > { %v11933_v40 = vpop.eup %11932  ;;  %v1794_v4 = vmul.f32 0.5, %v11931_v38 }
 0x6d2   : > { %v1795_v41 = vmul.f32 0.5, %v11933_v40  ;;  %v11935_v42 = vpop.eup %11934 }
 0x6d3   : > { %v1796_v6 = vadd.f32 0.5, %v1794_v4  ;;  %v11937_v44 = vpop.eup %11936  ;;  %v11296_v4 = vld [vmem:[%s15871_s0 + $0x70] sm:$0xff] }
 0x6d4   : > { %v1797_v43 = vadd.f32 0.5, %v1795_v41 }
 0x6d5   : > { %v1800_v45 = vmul.f32 %v11935_v42, %v1796_v6 }
 0x6d6   : > { %v1801_v46 = vmul.f32 %v11937_v44, %v1797_v43 }
 0x6d7   : > { %v1802_v47 = vpack.c.bf16 %v1800_v45, %v1800_v45 }
 0x6d8   : > { %v1803_v48 = vpack.c.bf16 %v1801_v46, %v1801_v46 }
 0x6d9   : > { %v1815_v49 = vsel %vm890_vm0, %v1802_v47, 0 }
 0x6da   : > { %1827 = vmatpush.bf16.msrb.mxu2 %v1815_v49  ;;  %v1818_v50 = vsel %vm890_vm0, %v1803_v48, 0 }
 0x6db   : > { %1840 = vmatpush.bf16.msrb.mxu3 %v1818_v50 }
 0x6dd   : > { %9727 = vmatmul.msk.bf16.vlgmr.msrb.gmra.mxu2 %vm886_vm1, %v9725_v51 }
 0x6de   : > { %9728 = vmatmul.msk.bf16.vlgmr.msrb.gmra.mxu3 %vm886_vm1, %v9725_v51 }
 0x760   : > { %v1829_v53 = vpop.f32.mrf.mxu2 }
 0x761   : > { %v1830_v54 = vadd.f32 %v1829_v53, %v1809_v52  ;;  %v1842_v55 = vpop.f32.mrf.mxu3 }
 0x762   : > { %v1843_v56 = vadd.f32 %v1842_v55, %v1809_v52 }
 0x763   : > { %v1848_v57 = vpack.c.bf16 %v1830_v54, %v1830_v54  ;;  %v12790_v58 = vadd.f32 %v1830_v54, %v12723_v32 }
 0x764   : > { %v11531_v59 = vpack.i.bf16 %v1843_v56, %v1830_v54  ;;  %v1849_v60 = vpack.c.bf16 %v1843_v56, %v1843_v56  ;;  %v12793_v61 = vadd.f32 %v1843_v56, %v12726_v35  ;;  %v9753_v35 = vld [vmem:[%s15869_s6 + $0x40] sm:$0xff] }
 0x765   : > { %v1939_v62 = vsel %vm890_vm0, %v1848_v57, 0  ;;  %v2034_v57 = vpop.permute.xlu0 %2033 }
 0x766   : > { %11532 = vrot.lane.b32.xlu2 %v11531_v59, %s15740_s28  ;;  %11527 = vrot.lane.b32.xlu1 %v11531_v59, %s15738_s8  ;;  %v1942_v63 = vsel %vm890_vm0, %v1849_v60, 0  ;;  %s15756_s8 = smov 96   ;;  %s16159_s28 = sld [smem:[#allocation37_spill]] }
 0x767   : > { %1951 = vmatpush.bf16.msra.mxu2 %v1939_v62  ;;  %1965 = vmatpush.bf16.msra.mxu3 %v1942_v63 }
 0x768   : > { %v1831_v0 = vpop.f32.mrf.mxu2 }
 0x769   : > { %v1844_v32 = vpop.f32.mrf.mxu3 }
 0x76a   : > { %9743 = vmatmul.msk.bf16.vlgmr.msra.gmra.mxu2 %vm886_vm1, %v11294_v37  ;;  %9744 = vmatmul.msk.bf16.vlgmr.msra.gmra.mxu3 %vm886_vm1, %v11294_v37 }
 0x76e   : > { %2060 = vperm.xlu2 %11494, %v9756_v1   ;;  %2028 = vperm.xlu1 %11505, %v9753_v35  }
 0x776   : > { %2285 = vperm.xlu2 %11494, %v9784_v2  }
 0x77e   : > { %2367 = vperm.xlu2 %11494, %v9792_v3  }
 0x786   : > { %2487 = vperm.xlu2 %11494, %v9806_v5  }
 0x78e   : > { %2607 = vperm.xlu2 %11494, %v9820_v7  }
 0x796   : > { %2727 = vperm.xlu2 %11494, %v9834_v8  }
 0x79e   : > { %2847 = vperm.xlu2 %11494, %v9848_v9  }
 0x7a6   : > { %2967 = vperm.xlu2 %11494, %v9862_v12  }
 0x7ae   : > { %3080 = vperm.xlu2 %11494, %v3076_v13  }
 0x7c0   : > { %v11533_v39 = vpop.permute.xlu2 %11532 }
 0x7c1   : > { %v11535_v10 = vunpack.i.h.bf16 %v11533_v39  ;;  %v11534_v11 = vunpack.i.l.bf16 %v11533_v39 }
 0x7c3   : > { %v1875_v14 = vsel %vm15762_vm15, %v11534_v11, %v11535_v10  ;;  %v1876_v15 = vsel %vm15762_vm15, %v11535_v10, %v11534_v11  ;;  %vm15773_vm15 = vcmp.lt.s32.totalorder %v12532_v24, 32 }
 0x7c4   : > { %v1881_v19 = vsel %vm15759_vm13, %v1875_v14, 0.0  ;;  %v1882_v20 = vsel %vm15758_vm12, %v1876_v15, 0.0  ;;  %vm15778_vm12 = vcmp.lt.s32.totalorder %v12525_v21, 32  ;;  %vm15772_vm13 = vcmp.lt.s32.totalorder %v12525_v21, 96 }
 0x7c5   : > { %v1975_v28 = vpack.c.bf16 %v1881_v19, %v1881_v19  ;;  %v1976_v29 = vpack.c.bf16 %v1882_v20, %v1882_v20 }
 0x7c7   : > { %v1986_v38 = vsel %vm890_vm0, %v1975_v28, 0  ;;  %v1989_v40 = vsel %vm890_vm0, %v1976_v29, 0 }
 0x7c8   : > { %v2061_v19 = vpop.permute.xlu2 %2060 }
 0x7d8   : > { %v11528_v16 = vpop.permute.xlu1 %11527 }
 0x7d9   : > { %v11530_v17 = vunpack.i.h.bf16 %v11528_v16  ;;  %v11529_v18 = vunpack.i.l.bf16 %v11528_v16 }
 0x7db   : > { %v1861_v22 = vsel %vm15760_vm14, %v11530_v17, %v11529_v18  ;;  %v1860_v23 = vsel %vm15760_vm14, %v11529_v18, %v11530_v17  ;;  %v9755_v18 = vld [vmem:[%s15873_s9 + $0x10] sm:$0xf]  ;;  %vm15779_vm14 = vcmp.ge.s32.totalorder %v12532_v24, 32 }
 0x7dc   : > { %v1866_v26 = vsel %vm15763_vm9, %v1861_v22, 0.0  ;;  %v1867_v27 = vsel %vm15761_vm10, %v1860_v23, 0.0  ;;  %vm15775_vm10 = vcmp.ge.s32.totalorder %v12534_v25, 32  ;;  %vm15766_vm9 = vcmp.lt.s32.totalorder %v12534_v25, 32 }
 0x7dd   : > { %v1886_v30 = vpack.c.bf16 %v1866_v26, %v1866_v26  ;;  %v1887_v31 = vpack.c.bf16 %v1867_v27, %v1867_v27 }
 0x7df   : > { %v1897_v33 = vsel %vm890_vm0, %v1886_v30, 0  ;;  %v1900_v34 = vsel %vm890_vm0, %v1887_v31, 0 }
 0x7e0   : > { %1909 = vmatpush.bf16.msra.mxu0 %v1897_v33  ;;  %1923 = vmatpush.bf16.msra.mxu1 %v1900_v34  ;;  %v2029_v35 = vpop.permute.xlu1 %2028 }
 0x7e3   : > { %9737 = vmatmul.msk.bf16.vlgmr.msra.gmra.mxu0 %vm886_vm1, %v11295_v36  ;;  %9738 = vmatmul.msk.bf16.vlgmr.msra.gmra.mxu1 %vm886_vm1, %v11295_v36 }
 0x7e4   : > { %1998 = vmatpush.bf16.msrb.mxu0 %v1986_v38  ;;  %2012 = vmatpush.bf16.msrb.mxu1 %v1989_v40  ;;  %v9786_v38 = vld [vmem:[%s15868_s2 + $0x28] sm:$0xff]  ;;  %v9800_v40 = vld [vmem:[%s15868_s2 + $0x30] sm:$0xff] }
 0x7ed   : > { %v1953_v44 = vpop.f32.mrf.mxu2  ;;  %v1967_v45 = vpop.f32.mrf.mxu3 }
 0x7f3   : > { %9751 = vmatmul.msk.bf16.vlgmr.msrb.gmra.mxu0 %vm886_vm1, %v11296_v4  ;;  %9752 = vmatmul.msk.bf16.vlgmr.msrb.gmra.mxu1 %vm886_vm1, %v11296_v4  ;;  %v9791_v4 = vld [vmem:[%s15869_s6 + $0x60] sm:$0xff] }
 0x7f5   : > { %v1955_v48 = vpop.f32.mrf.mxu2  ;;  %v1969_v49 = vpop.f32.mrf.mxu3 }
 0x860   : > { %v1911_v41 = vpop.f32.mrf.mxu0  ;;  %v1925_v6 = vpop.f32.mrf.mxu1 }
 0x861   : > { %v1954_v54 = vadd.f32 %v1953_v44, %v1911_v41  ;;  %v1968_v59 = vadd.f32 %v1967_v45, %v1925_v6  ;;  %v9814_v41 = vld [vmem:[%s15868_s2 + $0x38] sm:$0xff]  ;;  %v9805_v6 = vld [vmem:[%s15869_s6 + $0x70] sm:$0xff]  ;;  %v9842_v44 = vld [vmem:[%s15868_s2 + $0x48] sm:$0xff] }
 0x862   : > { %v9833_v45 = vld [vmem:[%s15869_s6 + $0x90] sm:$0xff] }
 0x868   : > { %v1913_v42 = vpop.f32.mrf.mxu0  ;;  %v1927_v43 = vpop.f32.mrf.mxu1 }
 0x869   : > { %v1956_v50 = vadd.f32 %v1955_v48, %v1913_v42  ;;  %v1970_v51 = vadd.f32 %v1969_v49, %v1927_v43  ;;  %v9828_v42 = vld [vmem:[%s15868_s2 + $0x40] sm:$0xff]  ;;  %v9870_v48 = vld [vmem:[%s15868_s2 + $0x58] sm:$0xff]  ;;  %v9861_v49 = vld [vmem:[%s15869_s6 + $0xb0] sm:$0xff] }
 0x86a   : > { %v9819_v43 = vld [vmem:[%s15869_s6 + $0x80] sm:$0xff] }
 0x870   : > { %v2000_v46 = vpop.f32.mrf.mxu0  ;;  %v2014_v47 = vpop.f32.mrf.mxu1 }
 0x871   : > { %v2019_v60 = vadd.f32 %v2000_v46, %v1954_v54  ;;  %v2020_v0 = vadd.f32 %v2014_v47, %v1968_v59  ;;  %v9856_v46 = vld [vmem:[%s15868_s2 + $0x50] sm:$0xff]  ;;  %v9847_v47 = vld [vmem:[%s15869_s6 + $0xa0] sm:$0xff]  ;;  %s16013_s2 = smov 32  }
 0x873   : > { %v2036_v2 = vadd.f32 %v2029_v35, %v2019_v60  ;;  %v2037_v3 = vadd.f32 %v2029_v35, %v2020_v0 }
 0x878   : > { %v2002_v52 = vpop.f32.mrf.mxu0  ;;  %v2016_v53 = vpop.f32.mrf.mxu1 }
 0x879   : > { %v2021_v55 = vadd.f32 %v2002_v52, %v1956_v50  ;;  %v2022_v56 = vadd.f32 %v2016_v53, %v1970_v51  ;;  %v3077_v50 = vld [vmem:[%s15874_s4 + $0x8] sm:$0xff]  ;;  %v11297_v51 = vld [vmem:[%s15871_s0 + $0x80] sm:$0xff] }
 0x87b   : > { %v2038_v62 = vadd.f32 %v2034_v57, %v2021_v55  ;;  %v2039_v63 = vadd.f32 %v2034_v57, %v2022_v56 }
 0x87d   : > { %v2042_v32 = vmul.f32 0.5, %v2038_v62  ;;  %v2043_v1 = vmul.f32 0.5, %v2039_v63 }
 0x87f   : > { %11938 = vtanh.f32 %v2042_v32 }
 0x880   : > { %11940 = vtanh.f32 %v2043_v1 }
 0x881   : > { %11942 = vtanh.f32 %v2036_v2 }
 0x882   : > { %11944 = vtanh.f32 %v2037_v3 }
 0x885   : > { %v11939_v5 = vpop.eup %11938 }
 0x886   : > { %v11941_v7 = vpop.eup %11940  ;;  %v2046_v8 = vmul.f32 0.5, %v11939_v5 }
 0x887   : > { %v2047_v9 = vmul.f32 0.5, %v11941_v7  ;;  %v11943_v13 = vpop.eup %11942 }
 0x888   : > { %v2048_v12 = vadd.f32 0.5, %v2046_v8  ;;  %v11945_v39 = vpop.eup %11944 }
 0x889   : > { %v2049_v37 = vadd.f32 0.5, %v2047_v9 }
 0x88a   : > { %v2052_v10 = vmul.f32 %v11943_v13, %v2048_v12 }
 0x88b   : > { %v2053_v11 = vmul.f32 %v11945_v39, %v2049_v37  ;;  %v11298_v37 = vld [vmem:[%s15871_s0 + $0x78] sm:$0xff]  ;;  %v11299_v39 = vld [vmem:[%s15871_s0 + $0x88] sm:$0xff] }
 0x88c   : > { %v2054_v14 = vpack.c.bf16 %v2052_v10, %v2052_v10 }
 0x88d   : > { %v2055_v15 = vpack.c.bf16 %v2053_v11, %v2053_v11 }
 0x88e   : > { %v2067_v16 = vsel %vm890_vm0, %v2054_v14, 0 }
 0x88f   : > { %2079 = vmatpush.bf16.msrb.mxu2 %v2067_v16  ;;  %v2070_v17 = vsel %vm890_vm0, %v2055_v15, 0 }
 0x890   : > { %2092 = vmatpush.bf16.msrb.mxu3 %v2070_v17 }
 0x892   : > { %9757 = vmatmul.msk.bf16.vlgmr.msrb.gmra.mxu2 %vm886_vm1, %v9755_v18 }
 0x893   : > { %9758 = vmatmul.msk.bf16.vlgmr.msrb.gmra.mxu3 %vm886_vm1, %v9755_v18 }
 0x915   : > { %v2081_v20 = vpop.f32.mrf.mxu2 }
 0x916   : > { %v2082_v22 = vadd.f32 %v2081_v20, %v2061_v19  ;;  %v2094_v23 = vpop.f32.mrf.mxu3 }
 0x917   : > { %v2095_v26 = vadd.f32 %v2094_v23, %v2061_v19 }
 0x918   : > { %v2100_v27 = vpack.c.bf16 %v2082_v22, %v2082_v22  ;;  %v12878_v28 = vadd.f32 %v2082_v22, %v12790_v58 }
 0x919   : > { %v11541_v29 = vpack.i.bf16 %v2095_v26, %v2082_v22  ;;  %v2101_v30 = vpack.c.bf16 %v2095_v26, %v2095_v26  ;;  %v12881_v31 = vadd.f32 %v2095_v26, %v12793_v61  ;;  %v9783_v61 = vld [vmem:[%s15869_s6 + $0x50] sm:$0xff]  ;;  %s15908_s6 = smov 124  }
 0x91a   : > { %v2191_v33 = vsel %vm890_vm0, %v2100_v27, 0 }
 0x91b   : > { %11542 = vrot.lane.b32.xlu1 %v11541_v29, %s15756_s8  ;;  %11537 = vrot.lane.b32.xlu0 %v11541_v29, %s15754_s26  ;;  %v2194_v34 = vsel %vm890_vm0, %v2101_v30, 0 }
 0x91c   : > { %2203 = vmatpush.bf16.msra.mxu2 %v2191_v33  ;;  %2217 = vmatpush.bf16.msra.mxu3 %v2194_v34 }
 0x91d   : > { %v2083_v36 = vpop.f32.mrf.mxu2 }
 0x91e   : > { %v2096_v58 = vpop.f32.mrf.mxu3 }
 0x91f   : > { %9773 = vmatmul.msk.bf16.vlgmr.msra.gmra.mxu2 %vm886_vm1, %v11297_v51  ;;  %9774 = vmatmul.msk.bf16.vlgmr.msra.gmra.mxu3 %vm886_vm1, %v11297_v51  ;;  %v2286_v58 = vpop.permute.xlu2 %2285 }
 0x923   : > { %2312 = vperm.xlu1 %11505, %v9786_v38   ;;  %2280 = vperm.xlu0 %11483, %v9783_v61  }
 0x92b   : > { %2432 = vperm.xlu1 %11505, %v9800_v40   ;;  %2362 = vperm.xlu0 %11483, %v9791_v4  }
 0x933   : > { %2552 = vperm.xlu1 %11505, %v9814_v41   ;;  %2482 = vperm.xlu0 %11483, %v9805_v6  }
 0x93b   : > { %2672 = vperm.xlu1 %11505, %v9828_v42   ;;  %2602 = vperm.xlu0 %11483, %v9819_v43  }
 0x943   : > { %2792 = vperm.xlu1 %11505, %v9842_v44   ;;  %2722 = vperm.xlu0 %11483, %v9833_v45  }
 0x94b   : > { %2912 = vperm.xlu1 %11505, %v9856_v46   ;;  %2842 = vperm.xlu0 %11483, %v9847_v47  }
 0x953   : > { %3032 = vperm.xlu1 %11505, %v9870_v48   ;;  %2962 = vperm.xlu0 %11483, %v9861_v49  }
 0x95b   : > { %3085 = vperm.xlu0 %11483, %v3077_v50  }
 0x98d   : > { %v11543_v52 = vpop.permute.xlu1 %11542  ;;  %v11538_v53 = vpop.permute.xlu0 %11537 }
 0x98e   : > { %v11545_v54 = vunpack.i.h.bf16 %v11543_v52  ;;  %v11544_v55 = vunpack.i.l.bf16 %v11543_v52  ;;  %v11540_v56 = vunpack.i.h.bf16 %v11538_v53  ;;  %v11539_v57 = vunpack.i.l.bf16 %v11538_v53 }
 0x990   : > { %v2113_v59 = vsel %vm15778_vm12, %v11540_v56, %v11539_v57  ;;  %v2112_v60 = vsel %vm15778_vm12, %v11539_v57, %v11540_v56  ;;  %v2127_v62 = vsel %vm15772_vm13, %v11544_v55, %v11545_v54  ;;  %v2128_v63 = vsel %vm15772_vm13, %v11545_v54, %v11544_v55 }
 0x991   : > { %v2118_v0 = vsel %vm15779_vm14, %v2113_v59, 0.0  ;;  %v2119_v32 = vsel %vm15775_vm10, %v2112_v60, 0.0  ;;  %v2133_v1 = vsel %vm15773_vm15, %v2127_v62, 0.0  ;;  %v2134_v35 = vsel %vm15766_vm9, %v2128_v63, 0.0  ;;  %v9785_v60 = vld [vmem:[%s15873_s9 + $0x14] sm:$0xf]  ;;  %vm13131_vm9 = vmpackc.low %vm848_vm4, %vm848_vm4 }
 0x992   : > { %v2138_v2 = vpack.c.bf16 %v2118_v0, %v2118_v0  ;;  %v2139_v3 = vpack.c.bf16 %v2119_v32, %v2119_v32  ;;  %v2227_v5 = vpack.c.bf16 %v2133_v1, %v2133_v1  ;;  %v2228_v7 = vpack.c.bf16 %v2134_v35, %v2134_v35  ;;  %vm13162_vm4 = vmpackc.low %vm863_vm7, %vm863_vm7 }
 0x993   : > { %vm15895_vm7 = vcmp.ge.s32.totalorder %v12534_v25, 2  ;;  %vm15918_vm14 = vcmp.ge.s32.totalorder %v12534_v25, 4 }
 0x994   : > { %v2149_v8 = vsel %vm890_vm0, %v2138_v2, 0  ;;  %v2152_v9 = vsel %vm890_vm0, %v2139_v3, 0  ;;  %v2238_v12 = vsel %vm890_vm0, %v2227_v5, 0  ;;  %v2241_v13 = vsel %vm890_vm0, %v2228_v7, 0 }
 0x995   : > { %2161 = vmatpush.bf16.msra.mxu0 %v2149_v8  ;;  %2175 = vmatpush.bf16.msra.mxu1 %v2152_v9  ;;  %v2281_v42 = vpop.permute.xlu0 %2280  ;;  %v2313_v62 = vpop.permute.xlu1 %2312  ;;  %v11300_v8 = vld [vmem:[%s15871_s0 + $0x98] sm:$0xff] }
 0x998   : > { %9767 = vmatmul.msk.bf16.vlgmr.msra.gmra.mxu0 %vm886_vm1, %v11298_v37  ;;  %9768 = vmatmul.msk.bf16.vlgmr.msra.gmra.mxu1 %vm886_vm1, %v11298_v37 }
 0x999   : > { %2250 = vmatpush.bf16.msrb.mxu0 %v2238_v12  ;;  %2264 = vmatpush.bf16.msrb.mxu1 %v2241_v13 }
 0x9a2   : > { %v2219_v14 = vpop.f32.mrf.mxu3  ;;  %v2205_v17 = vpop.f32.mrf.mxu2 }
 0x9a8   : > { %9781 = vmatmul.msk.bf16.vlgmr.msrb.gmra.mxu0 %vm886_vm1, %v11299_v39  ;;  %9782 = vmatmul.msk.bf16.vlgmr.msrb.gmra.mxu1 %vm886_vm1, %v11299_v39 }
 0x9aa   : > { %v2221_v20 = vpop.f32.mrf.mxu3  ;;  %v2207_v22 = vpop.f32.mrf.mxu2 }
 0xa15   : > { %v2163_v10 = vpop.f32.mrf.mxu0  ;;  %v2177_v11 = vpop.f32.mrf.mxu1 }
 0xa16   : > { %v2220_v27 = vadd.f32 %v2219_v14, %v2177_v11  ;;  %v2206_v33 = vadd.f32 %v2205_v17, %v2163_v10 }
 0xa1d   : > { %v2165_v15 = vpop.f32.mrf.mxu0  ;;  %v2179_v16 = vpop.f32.mrf.mxu1 }
 0xa1e   : > { %v2222_v23 = vadd.f32 %v2221_v20, %v2179_v16  ;;  %v2208_v26 = vadd.f32 %v2207_v22, %v2165_v15  ;;  %v2363_v16 = vpop.permute.xlu0 %2362 }
 0xa25   : > { %v2252_v18 = vpop.f32.mrf.mxu0  ;;  %v2266_v19 = vpop.f32.mrf.mxu1 }
 0xa26   : > { %v2271_v38 = vadd.f32 %v2252_v18, %v2206_v33  ;;  %v2272_v4 = vadd.f32 %v2266_v19, %v2220_v27 }
 0xa28   : > { %v2288_v43 = vadd.f32 %v2281_v42, %v2271_v38  ;;  %v2289_v44 = vadd.f32 %v2281_v42, %v2272_v4  ;;  %v9799_v4 = vld [vmem:[%s15873_s9 + $0x18] sm:$0xf] }
 0xa2d   : > { %v2254_v29 = vpop.f32.mrf.mxu0  ;;  %v2268_v30 = vpop.f32.mrf.mxu1 }
 0xa2e   : > { %v2273_v34 = vadd.f32 %v2254_v29, %v2208_v26  ;;  %v2274_v36 = vadd.f32 %v2268_v30, %v2222_v23 }
 0xa30   : > { %v2290_v61 = vadd.f32 %v2286_v58, %v2273_v34  ;;  %v2291_v40 = vadd.f32 %v2286_v58, %v2274_v36 }
 0xa32   : > { %v2294_v41 = vmul.f32 0.5, %v2290_v61  ;;  %v2295_v6 = vmul.f32 0.5, %v2291_v40 }
 0xa34   : > { %11946 = vtanh.f32 %v2294_v41  ;;  %v2433_v41 = vpop.permute.xlu1 %2432 }
 0xa35   : > { %11948 = vtanh.f32 %v2295_v6 }
 0xa36   : > { %11950 = vtanh.f32 %v2288_v43 }
 0xa37   : > { %11952 = vtanh.f32 %v2289_v44 }
 0xa3a   : > { %v11947_v45 = vpop.eup %11946 }
 0xa3b   : > { %v11949_v46 = vpop.eup %11948  ;;  %v2298_v47 = vmul.f32 0.5, %v11947_v45 }
 0xa3c   : > { %v2299_v48 = vmul.f32 0.5, %v11949_v46  ;;  %v11951_v50 = vpop.eup %11950 }
 0xa3d   : > { %v2300_v49 = vadd.f32 0.5, %v2298_v47  ;;  %v11953_v52 = vpop.eup %11952 }
 0xa3e   : > { %v2301_v51 = vadd.f32 0.5, %v2299_v48 }
 0xa3f   : > { %v2304_v53 = vmul.f32 %v11951_v50, %v2300_v49  ;;  %v11301_v50 = vld [vmem:[%s15871_s0 + $0xb0] sm:$0xff] }
 0xa40   : > { %v2305_v54 = vmul.f32 %v11953_v52, %v2301_v51 }
 0xa41   : > { %v2306_v55 = vpack.c.bf16 %v2304_v53, %v2304_v53 }
 0xa42   : > { %v2307_v56 = vpack.c.bf16 %v2305_v54, %v2305_v54 }
 0xa43   : > { %v2319_v57 = vsel %vm890_vm0, %v2306_v55, 0 }
 0xa44   : > { %2331 = vmatpush.bf16.msrb.mxu2 %v2319_v57  ;;  %v2322_v59 = vsel %vm890_vm0, %v2307_v56, 0 }
 0xa45   : > { %2344 = vmatpush.bf16.msrb.mxu3 %v2322_v59 }
 0xa47   : > { %9787 = vmatmul.msk.bf16.vlgmr.msrb.gmra.mxu2 %vm886_vm1, %v9785_v60 }
 0xa48   : > { %9788 = vmatmul.msk.bf16.vlgmr.msrb.gmra.mxu3 %vm886_vm1, %v9785_v60 }
 0xaca   : > { %v2333_v63 = vpop.f32.mrf.mxu2 }
 0xacb   : > { %v2334_v0 = vadd.f32 %v2333_v63, %v2313_v62  ;;  %v2346_v32 = vpop.f32.mrf.mxu3 }
 0xacc   : > { %v2347_v1 = vadd.f32 %v2346_v32, %v2313_v62 }
 0xacd   : > { %v2350_v35 = vadd.f32 %v2334_v0, %v12878_v28  ;;  %v2352_v2 = vpack.c.bf16 %v2334_v0, %v2334_v0  ;;  %v2483_v0 = vpop.permute.xlu0 %2482 }
 0xace   : > { %v2351_v3 = vadd.f32 %v2347_v1, %v12881_v31  ;;  %v2353_v5 = vpack.c.bf16 %v2347_v1, %v2347_v1  ;;  %v2368_v31 = vpop.permute.xlu2 %2367 }
 0xacf   : > { %v2379_v7 = vsel %vm890_vm0, %v2352_v2, 0 }
 0xad0   : > { %2391 = vmatpush.bf16.msra.mxu0 %v2379_v7  ;;  %v2382_v9 = vsel %vm890_vm0, %v2353_v5, 0 }
 0xad1   : > { %2405 = vmatpush.bf16.msra.mxu1 %v2382_v9 }
 0xad2   : > { %v2335_v12 = vpop.f32.mrf.mxu2 }
 0xad3   : > { %9797 = vmatmul.msk.bf16.vlgmr.msra.gmra.mxu0 %vm886_vm1, %v11300_v8  ;;  %v2348_v13 = vpop.f32.mrf.mxu3 }
 0xad4   : > { %9798 = vmatmul.msk.bf16.vlgmr.msra.gmra.mxu1 %vm886_vm1, %v11300_v8 }
 0xad6   : > { %v2488_v56 = vpop.permute.xlu2 %2487 }
 0xb50   : > { %v2393_v28 = vpop.f32.mrf.mxu0 }
 0xb51   : > { %v2407_v37 = vpop.f32.mrf.mxu1  ;;  %v2394_v18 = vadd.f32 %v2393_v28, %v2363_v16 }
 0xb52   : > { %v2408_v19 = vadd.f32 %v2407_v37, %v2363_v16 }
 0xb58   : > { %v2395_v39 = vpop.f32.mrf.mxu0 }
 0xb59   : > { %v2396_v10 = vadd.f32 %v2395_v39, %v2368_v31  ;;  %v2409_v11 = vpop.f32.mrf.mxu1 }
 0xb5a   : > { %v2410_v14 = vadd.f32 %v2409_v11, %v2368_v31 }
 0xb5b   : > { %v2414_v15 = vmul.f32 0.5, %v2396_v10 }
 0xb5c   : > { %v2415_v17 = vmul.f32 0.5, %v2410_v14  ;;  %v9813_v14 = vld [vmem:[%s15873_s9 + $0x1c] sm:$0xf] }
 0xb5d   : > { %11954 = vtanh.f32 %v2414_v15  ;;  %v2553_v15 = vpop.permute.xlu1 %2552 }
 0xb5e   : > { %11956 = vtanh.f32 %v2415_v17 }
 0xb5f   : > { %11958 = vtanh.f32 %v2394_v18 }
 0xb60   : > { %11960 = vtanh.f32 %v2408_v19 }
 0xb63   : > { %v11955_v20 = vpop.eup %11954 }
 0xb64   : > { %v11957_v22 = vpop.eup %11956  ;;  %v2418_v23 = vmul.f32 0.5, %v11955_v20 }
 0xb65   : > { %v2419_v26 = vmul.f32 0.5, %v11957_v22  ;;  %v11959_v29 = vpop.eup %11958 }
 0xb66   : > { %v2420_v27 = vadd.f32 0.5, %v2418_v23  ;;  %v11961_v33 = vpop.eup %11960 }
 0xb67   : > { %v2421_v30 = vadd.f32 0.5, %v2419_v26 }
 0xb68   : > { %v2424_v34 = vmul.f32 %v11959_v29, %v2420_v27  ;;  %v11302_v29 = vld [vmem:[%s15871_s0 + $0xc8] sm:$0xff] }
 0xb69   : > { %v2425_v36 = vmul.f32 %v11961_v33, %v2421_v30 }
 0xb6a   : > { %v2426_v58 = vpack.c.bf16 %v2424_v34, %v2424_v34 }
 0xb6b   : > { %v2427_v38 = vpack.c.bf16 %v2425_v36, %v2425_v36 }
 0xb6c   : > { %v2439_v61 = vsel %vm890_vm0, %v2426_v58, 0 }
 0xb6d   : > { %2451 = vmatpush.bf16.msra.mxu2 %v2439_v61  ;;  %v2442_v40 = vsel %vm890_vm0, %v2427_v38, 0  ;;  %v2608_v38 = vpop.permute.xlu2 %2607 }
 0xb6e   : > { %2464 = vmatpush.bf16.msra.mxu3 %v2442_v40 }
 0xb70   : > { %9801 = vmatmul.msk.bf16.vlgmr.msra.gmra.mxu2 %vm886_vm1, %v9799_v4 }
 0xb71   : > { %9802 = vmatmul.msk.bf16.vlgmr.msra.gmra.mxu3 %vm886_vm1, %v9799_v4 }
 0xbf3   : > { %v2453_v6 = vpop.f32.mrf.mxu2 }
 0xbf4   : > { %v2454_v42 = vadd.f32 %v2453_v6, %v2433_v41  ;;  %v2466_v43 = vpop.f32.mrf.mxu3 }
 0xbf5   : > { %v2467_v44 = vadd.f32 %v2466_v43, %v2433_v41 }
 0xbf6   : > { %v2470_v45 = vadd.f32 %v2454_v42, %v2350_v35  ;;  %v2472_v46 = vpack.c.bf16 %v2454_v42, %v2454_v42  ;;  %v2603_v42 = vpop.permute.xlu0 %2602 }
 0xbf7   : > { %v2471_v47 = vadd.f32 %v2467_v44, %v2351_v3  ;;  %v2473_v48 = vpack.c.bf16 %v2467_v44, %v2467_v44 }
 0xbf8   : > { %v2499_v49 = vsel %vm890_vm0, %v2472_v46, 0 }
 0xbf9   : > { %2511 = vmatpush.bf16.msrb.mxu0 %v2499_v49  ;;  %v2502_v51 = vsel %vm890_vm0, %v2473_v48, 0 }
 0xbfa   : > { %2525 = vmatpush.bf16.msrb.mxu1 %v2502_v51 }
 0xbfb   : > { %v2455_v52 = vpop.f32.mrf.mxu2 }
 0xbfc   : > { %9811 = vmatmul.msk.bf16.vlgmr.msrb.gmra.mxu0 %vm886_vm1, %v11301_v50  ;;  %v2468_v53 = vpop.f32.mrf.mxu3 }
 0xbfd   : > { %9812 = vmatmul.msk.bf16.vlgmr.msrb.gmra.mxu1 %vm886_vm1, %v11301_v50 }
 0xc79   : > { %v2513_v54 = vpop.f32.mrf.mxu0 }
 0xc7a   : > { %v2527_v55 = vpop.f32.mrf.mxu1  ;;  %v2514_v1 = vadd.f32 %v2513_v54, %v2483_v0 }
 0xc7b   : > { %v2528_v35 = vadd.f32 %v2527_v55, %v2483_v0 }
 0xc81   : > { %v2515_v57 = vpop.f32.mrf.mxu0 }
 0xc82   : > { %v2516_v59 = vadd.f32 %v2515_v57, %v2488_v56  ;;  %v2529_v60 = vpop.f32.mrf.mxu1 }
 0xc83   : > { %v2530_v62 = vadd.f32 %v2529_v60, %v2488_v56 }
 0xc84   : > { %v2534_v63 = vmul.f32 0.5, %v2516_v59 }
 0xc85   : > { %v2535_v32 = vmul.f32 0.5, %v2530_v62  ;;  %v9827_v62 = vld [vmem:[%s15873_s9 + $0x20] sm:$0xf] }
 0xc86   : > { %11962 = vtanh.f32 %v2534_v63  ;;  %v2673_v63 = vpop.permute.xlu1 %2672 }
 0xc87   : > { %11964 = vtanh.f32 %v2535_v32 }
 0xc88   : > { %11966 = vtanh.f32 %v2514_v1 }
 0xc89   : > { %11968 = vtanh.f32 %v2528_v35 }
 0xc8c   : > { %v11963_v2 = vpop.eup %11962 }
 0xc8d   : > { %v11965_v3 = vpop.eup %11964  ;;  %v2538_v5 = vmul.f32 0.5, %v11963_v2 }
 0xc8e   : > { %v2539_v7 = vmul.f32 0.5, %v11965_v3  ;;  %v11967_v9 = vpop.eup %11966 }
 0xc8f   : > { %v2540_v8 = vadd.f32 0.5, %v2538_v5  ;;  %v11969_v13 = vpop.eup %11968 }
 0xc90   : > { %v2541_v12 = vadd.f32 0.5, %v2539_v7 }
 0xc91   : > { %v2544_v28 = vmul.f32 %v11967_v9, %v2540_v8  ;;  %v11303_v9 = vld [vmem:[%s15871_s0 + $0xe0] sm:$0xff] }
 0xc92   : > { %v2545_v37 = vmul.f32 %v11969_v13, %v2541_v12 }
 0xc93   : > { %v2546_v31 = vpack.c.bf16 %v2544_v28, %v2544_v28 }
 0xc94   : > { %v2547_v39 = vpack.c.bf16 %v2545_v37, %v2545_v37 }
 0xc95   : > { %v2559_v10 = vsel %vm890_vm0, %v2546_v31, 0 }
 0xc96   : > { %2571 = vmatpush.bf16.msrb.mxu2 %v2559_v10  ;;  %v2562_v11 = vsel %vm890_vm0, %v2547_v39, 0  ;;  %v2728_v39 = vpop.permute.xlu2 %2727 }
 0xc97   : > { %2584 = vmatpush.bf16.msrb.mxu3 %v2562_v11 }
 0xc99   : > { %9815 = vmatmul.msk.bf16.vlgmr.msrb.gmra.mxu2 %vm886_vm1, %v9813_v14 }
 0xc9a   : > { %9816 = vmatmul.msk.bf16.vlgmr.msrb.gmra.mxu3 %vm886_vm1, %v9813_v14 }
 0xd1c   : > { %v2573_v16 = vpop.f32.mrf.mxu2 }
 0xd1d   : > { %v2574_v17 = vadd.f32 %v2573_v16, %v2553_v15  ;;  %v2586_v18 = vpop.f32.mrf.mxu3 }
 0xd1e   : > { %v2587_v19 = vadd.f32 %v2586_v18, %v2553_v15 }
 0xd1f   : > { %v2590_v20 = vadd.f32 %v2574_v17, %v2470_v45  ;;  %v2592_v22 = vpack.c.bf16 %v2574_v17, %v2574_v17  ;;  %v2723_v17 = vpop.permute.xlu0 %2722 }
 0xd20   : > { %v2591_v23 = vadd.f32 %v2587_v19, %v2471_v47  ;;  %v2593_v26 = vpack.c.bf16 %v2587_v19, %v2587_v19 }
 0xd21   : > { %v2619_v27 = vsel %vm890_vm0, %v2592_v22, 0 }
 0xd22   : > { %2631 = vmatpush.bf16.msra.mxu0 %v2619_v27  ;;  %v2622_v30 = vsel %vm890_vm0, %v2593_v26, 0 }
 0xd23   : > { %2645 = vmatpush.bf16.msra.mxu1 %v2622_v30 }
 0xd24   : > { %v2575_v33 = vpop.f32.mrf.mxu2 }
 0xd25   : > { %9825 = vmatmul.msk.bf16.vlgmr.msra.gmra.mxu0 %vm886_vm1, %v11302_v29  ;;  %v2588_v34 = vpop.f32.mrf.mxu3 }
 0xd26   : > { %9826 = vmatmul.msk.bf16.vlgmr.msra.gmra.mxu1 %vm886_vm1, %v11302_v29 }
 0xda2   : > { %v2633_v36 = vpop.f32.mrf.mxu0 }
 0xda3   : > { %v2647_v58 = vpop.f32.mrf.mxu1  ;;  %v2634_v44 = vadd.f32 %v2633_v36, %v2603_v42 }
 0xda4   : > { %v2648_v45 = vadd.f32 %v2647_v58, %v2603_v42 }
 0xdaa   : > { %v2635_v61 = vpop.f32.mrf.mxu0 }
 0xdab   : > { %v2636_v40 = vadd.f32 %v2635_v61, %v2608_v38  ;;  %v2649_v4 = vpop.f32.mrf.mxu1 }
 0xdac   : > { %v2650_v41 = vadd.f32 %v2649_v4, %v2608_v38 }
 0xdad   : > { %v2654_v6 = vmul.f32 0.5, %v2636_v40 }
 0xdae   : > { %v2655_v43 = vmul.f32 0.5, %v2650_v41  ;;  %v9841_v41 = vld [vmem:[%s15873_s9 + $0x24] sm:$0xf] }
 0xdaf   : > { %11970 = vtanh.f32 %v2654_v6  ;;  %v2793_v6 = vpop.permute.xlu1 %2792 }
 0xdb0   : > { %11972 = vtanh.f32 %v2655_v43 }
 0xdb1   : > { %11974 = vtanh.f32 %v2634_v44 }
 0xdb2   : > { %11976 = vtanh.f32 %v2648_v45 }
 0xdb5   : > { %v11971_v46 = vpop.eup %11970 }
 0xdb6   : > { %v11973_v47 = vpop.eup %11972  ;;  %v2658_v48 = vmul.f32 0.5, %v11971_v46 }
 0xdb7   : > { %v2659_v49 = vmul.f32 0.5, %v11973_v47  ;;  %v11975_v51 = vpop.eup %11974 }
 0xdb8   : > { %v2660_v50 = vadd.f32 0.5, %v2658_v48  ;;  %v11977_v53 = vpop.eup %11976 }
 0xdb9   : > { %v2661_v52 = vadd.f32 0.5, %v2659_v49 }
 0xdba   : > { %v2664_v54 = vmul.f32 %v11975_v51, %v2660_v50  ;;  %v11304_v51 = vld [vmem:[%s15871_s0 + $0xf8] sm:$0xff] }
 0xdbb   : > { %v2665_v55 = vmul.f32 %v11977_v53, %v2661_v52 }
 0xdbc   : > { %v2666_v56 = vpack.c.bf16 %v2664_v54, %v2664_v54 }
 0xdbd   : > { %v2667_v57 = vpack.c.bf16 %v2665_v55, %v2665_v55 }
 0xdbe   : > { %v2679_v59 = vsel %vm890_vm0, %v2666_v56, 0 }
 0xdbf   : > { %2691 = vmatpush.bf16.msra.mxu2 %v2679_v59  ;;  %v2682_v60 = vsel %vm890_vm0, %v2667_v57, 0  ;;  %v2848_v57 = vpop.permute.xlu2 %2847 }
 0xdc0   : > { %2704 = vmatpush.bf16.msra.mxu3 %v2682_v60 }
 0xdc2   : > { %9829 = vmatmul.msk.bf16.vlgmr.msra.gmra.mxu2 %vm886_vm1, %v9827_v62 }
 0xdc3   : > { %9830 = vmatmul.msk.bf16.vlgmr.msra.gmra.mxu3 %vm886_vm1, %v9827_v62 }
 0xe45   : > { %v2693_v0 = vpop.f32.mrf.mxu2 }
 0xe46   : > { %v2694_v32 = vadd.f32 %v2693_v0, %v2673_v63  ;;  %v2706_v1 = vpop.f32.mrf.mxu3 }
 0xe47   : > { %v2707_v35 = vadd.f32 %v2706_v1, %v2673_v63 }
 0xe48   : > { %v2710_v2 = vadd.f32 %v2694_v32, %v2590_v20  ;;  %v2712_v3 = vpack.c.bf16 %v2694_v32, %v2694_v32  ;;  %v2843_v32 = vpop.permute.xlu0 %2842 }
 0xe49   : > { %v2711_v5 = vadd.f32 %v2707_v35, %v2591_v23  ;;  %v2713_v7 = vpack.c.bf16 %v2707_v35, %v2707_v35 }
 0xe4a   : > { %v2739_v8 = vsel %vm890_vm0, %v2712_v3, 0 }
 0xe4b   : > { %2751 = vmatpush.bf16.msrb.mxu0 %v2739_v8  ;;  %v2742_v12 = vsel %vm890_vm0, %v2713_v7, 0 }
 0xe4c   : > { %2765 = vmatpush.bf16.msrb.mxu1 %v2742_v12 }
 0xe4d   : > { %v2695_v13 = vpop.f32.mrf.mxu2 }
 0xe4e   : > { %9839 = vmatmul.msk.bf16.vlgmr.msrb.gmra.mxu0 %vm886_vm1, %v11303_v9  ;;  %v2708_v28 = vpop.f32.mrf.mxu3 }
 0xe4f   : > { %9840 = vmatmul.msk.bf16.vlgmr.msrb.gmra.mxu1 %vm886_vm1, %v11303_v9 }
 0xecb   : > { %v2753_v37 = vpop.f32.mrf.mxu0 }
 0xecc   : > { %v2767_v31 = vpop.f32.mrf.mxu1  ;;  %v2754_v19 = vadd.f32 %v2753_v37, %v2723_v17 }
 0xecd   : > { %v2768_v20 = vadd.f32 %v2767_v31, %v2723_v17 }
 0xed3   : > { %v2755_v10 = vpop.f32.mrf.mxu0 }
 0xed4   : > { %v2756_v11 = vadd.f32 %v2755_v10, %v2728_v39  ;;  %v2769_v14 = vpop.f32.mrf.mxu1 }
 0xed5   : > { %v2770_v15 = vadd.f32 %v2769_v14, %v2728_v39 }
 0xed6   : > { %v2774_v16 = vmul.f32 0.5, %v2756_v11 }
 0xed7   : > { %v2775_v18 = vmul.f32 0.5, %v2770_v15  ;;  %v9855_v15 = vld [vmem:[%s15873_s9 + $0x28] sm:$0xf] }
 0xed8   : > { %11978 = vtanh.f32 %v2774_v16  ;;  %v2913_v16 = vpop.permute.xlu1 %2912 }
 0xed9   : > { %11980 = vtanh.f32 %v2775_v18 }
 0xeda   : > { %11982 = vtanh.f32 %v2754_v19 }
 0xedb   : > { %11984 = vtanh.f32 %v2768_v20 }
 0xede   : > { %v11979_v22 = vpop.eup %11978 }
 0xedf   : > { %v11981_v23 = vpop.eup %11980  ;;  %v2778_v26 = vmul.f32 0.5, %v11979_v22 }
 0xee0   : > { %v2779_v27 = vmul.f32 0.5, %v11981_v23  ;;  %v11983_v30 = vpop.eup %11982 }
 0xee1   : > { %v2780_v29 = vadd.f32 0.5, %v2778_v26  ;;  %v11985_v34 = vpop.eup %11984 }
 0xee2   : > { %v2781_v33 = vadd.f32 0.5, %v2779_v27 }
 0xee3   : > { %v2784_v36 = vmul.f32 %v11983_v30, %v2780_v29  ;;  %v11305_v30 = vld [vmem:[%s15871_s0 + $0x110] sm:$0xff] }
 0xee4   : > { %v2785_v58 = vmul.f32 %v11985_v34, %v2781_v33 }
 0xee5   : > { %v2786_v38 = vpack.c.bf16 %v2784_v36, %v2784_v36 }
 0xee6   : > { %v2787_v61 = vpack.c.bf16 %v2785_v58, %v2785_v58 }
 0xee7   : > { %v2799_v40 = vsel %vm890_vm0, %v2786_v38, 0 }
 0xee8   : > { %2811 = vmatpush.bf16.msrb.mxu2 %v2799_v40  ;;  %v2802_v4 = vsel %vm890_vm0, %v2787_v61, 0  ;;  %v2968_v61 = vpop.permute.xlu2 %2967 }
 0xee9   : > { %2824 = vmatpush.bf16.msrb.mxu3 %v2802_v4 }
 0xeeb   : > { %9843 = vmatmul.msk.bf16.vlgmr.msrb.gmra.mxu2 %vm886_vm1, %v9841_v41 }
 0xeec   : > { %9844 = vmatmul.msk.bf16.vlgmr.msrb.gmra.mxu3 %vm886_vm1, %v9841_v41 }
 0xf6e   : > { %v2813_v42 = vpop.f32.mrf.mxu2 }
 0xf6f   : > { %v2814_v43 = vadd.f32 %v2813_v42, %v2793_v6  ;;  %v2826_v44 = vpop.f32.mrf.mxu3 }
 0xf70   : > { %v2827_v45 = vadd.f32 %v2826_v44, %v2793_v6 }
 0xf71   : > { %v2830_v46 = vadd.f32 %v2814_v43, %v2710_v2  ;;  %v2832_v47 = vpack.c.bf16 %v2814_v43, %v2814_v43  ;;  %v2963_v43 = vpop.permute.xlu0 %2962 }
 0xf72   : > { %v2831_v48 = vadd.f32 %v2827_v45, %v2711_v5  ;;  %v2833_v49 = vpack.c.bf16 %v2827_v45, %v2827_v45 }
 0xf73   : > { %v2859_v50 = vsel %vm890_vm0, %v2832_v47, 0 }
 0xf74   : > { %2871 = vmatpush.bf16.msra.mxu0 %v2859_v50  ;;  %v2862_v52 = vsel %vm890_vm0, %v2833_v49, 0 }
 0xf75   : > { %2885 = vmatpush.bf16.msra.mxu1 %v2862_v52 }
 0xf76   : > { %v2815_v53 = vpop.f32.mrf.mxu2 }
 0xf77   : > { %9853 = vmatmul.msk.bf16.vlgmr.msra.gmra.mxu0 %vm886_vm1, %v11304_v51  ;;  %v2828_v54 = vpop.f32.mrf.mxu3 }
 0xf78   : > { %9854 = vmatmul.msk.bf16.vlgmr.msra.gmra.mxu1 %vm886_vm1, %v11304_v51 }
 0xff4   : > { %v2873_v55 = vpop.f32.mrf.mxu0 }
 0xff5   : > { %v2887_v56 = vpop.f32.mrf.mxu1  ;;  %v2874_v35 = vadd.f32 %v2873_v55, %v2843_v32 }
 0xff6   : > { %v2888_v2 = vadd.f32 %v2887_v56, %v2843_v32 }
 0xffc   : > { %v2875_v59 = vpop.f32.mrf.mxu0 }
 0xffd   : > { %v2876_v60 = vadd.f32 %v2875_v59, %v2848_v57  ;;  %v2889_v62 = vpop.f32.mrf.mxu1 }
 0xffe   : > { %v2890_v63 = vadd.f32 %v2889_v62, %v2848_v57 }
 0xfff   : > { %v2894_v0 = vmul.f32 0.5, %v2876_v60 }
0x1000   : > { %v2895_v1 = vmul.f32 0.5, %v2890_v63  ;;  %v9869_v63 = vld [vmem:[%s15873_s9 + $0x2c] sm:$0xf]  ;;  %s15909_s9 = smov 4  }
0x1001   : > { %11986 = vtanh.f32 %v2894_v0  ;;  %v3033_v0 = vpop.permute.xlu1 %3032 }
0x1002   : > { %11988 = vtanh.f32 %v2895_v1 }
0x1003   : > { %11990 = vtanh.f32 %v2874_v35 }
0x1004   : > { %11992 = vtanh.f32 %v2888_v2 }
0x1007   : > { %v11987_v3 = vpop.eup %11986 }
0x1008   : > { %v11989_v5 = vpop.eup %11988  ;;  %v2898_v7 = vmul.f32 0.5, %v11987_v3 }
0x1009   : > { %v2899_v8 = vmul.f32 0.5, %v11989_v5  ;;  %v11991_v12 = vpop.eup %11990 }
0x100a   : > { %v2900_v9 = vadd.f32 0.5, %v2898_v7  ;;  %v11993_v28 = vpop.eup %11992 }
0x100b   : > { %v2901_v13 = vadd.f32 0.5, %v2899_v8 }
0x100c   : > { %v2904_v37 = vmul.f32 %v11991_v12, %v2900_v9  ;;  %v11306_v12 = vld [vmem:[%s15875_s10] sm:$0xff]  ;;  %s15892_s10 = smov 2  }
0x100d   : > { %v2905_v31 = vmul.f32 %v11993_v28, %v2901_v13 }
0x100e   : > { %v2906_v39 = vpack.c.bf16 %v2904_v37, %v2904_v37 }
0x100f   : > { %v2907_v10 = vpack.c.bf16 %v2905_v31, %v2905_v31 }
0x1010   : > { %v2919_v11 = vsel %vm890_vm0, %v2906_v39, 0 }
0x1011   : > { %2931 = vmatpush.bf16.msra.mxu2 %v2919_v11  ;;  %v2922_v14 = vsel %vm890_vm0, %v2907_v10, 0  ;;  %v3081_v10 = vpop.permute.xlu2 %3080  ;;  %v3086_v11 = vpop.permute.xlu0 %3085 }
0x1012   : > { %2944 = vmatpush.bf16.msra.mxu3 %v2922_v14 }
0x1014   : > { %9857 = vmatmul.msk.bf16.vlgmr.msra.gmra.mxu2 %vm886_vm1, %v9855_v15 }
0x1015   : > { %9858 = vmatmul.msk.bf16.vlgmr.msra.gmra.mxu3 %vm886_vm1, %v9855_v15 }
0x1097   : > { %v2933_v17 = vpop.f32.mrf.mxu2 }
0x1098   : > { %v2934_v18 = vadd.f32 %v2933_v17, %v2913_v16  ;;  %v2946_v19 = vpop.f32.mrf.mxu3 }
0x1099   : > { %v2947_v20 = vadd.f32 %v2946_v19, %v2913_v16 }
0x109a   : > { %v2950_v22 = vadd.f32 %v2934_v18, %v2830_v46  ;;  %v2952_v23 = vpack.c.bf16 %v2934_v18, %v2934_v18 }
0x109b   : > { %v2951_v26 = vadd.f32 %v2947_v20, %v2831_v48  ;;  %v2953_v27 = vpack.c.bf16 %v2947_v20, %v2947_v20 }
0x109c   : > { %v2979_v29 = vsel %vm890_vm0, %v2952_v23, 0 }
0x109d   : > { %2991 = vmatpush.bf16.msrb.mxu0 %v2979_v29  ;;  %v2982_v33 = vsel %vm890_vm0, %v2953_v27, 0  ;;  %v3356_v27 = vld [vmem:[%s15694_s11 + $0x18] sm:$0xff]  ;;  %v3355_v29 = vld [vmem:[%s15694_s11 + $0x10] sm:$0xff] }
0x109e   : > { %3005 = vmatpush.bf16.msrb.mxu1 %v2982_v33  ;;  %v3353_v33 = vld [vmem:[%s15694_s11] sm:$0xff] }
0x109f   : > { %v2935_v34 = vpop.f32.mrf.mxu2 }
0x10a0   : > { %9867 = vmatmul.msk.bf16.vlgmr.msrb.gmra.mxu0 %vm886_vm1, %v11305_v30  ;;  %v2948_v36 = vpop.f32.mrf.mxu3  ;;  %v3354_v34 = vld [vmem:[%s15694_s11 + $0x8] sm:$0xff] }
0x10a1   : > { %9868 = vmatmul.msk.bf16.vlgmr.msrb.gmra.mxu1 %vm886_vm1, %v11305_v30  ;;  %v3413_v30 = vld [vmem:[%s15696_s13] sm:$0xff]  ;;  %v3414_v36 = vld [vmem:[%s15696_s13 + $0x8] sm:$0xff] }
0x111d   : > { %v2993_v58 = vpop.f32.mrf.mxu0 }
0x111e   : > { %v3007_v38 = vpop.f32.mrf.mxu1  ;;  %v2994_v45 = vadd.f32 %v2993_v58, %v2963_v43  ;;  %v11307_v58 = vld [vmem:[%s15878_s29 + $0x10] sm:$0xff] }
0x111f   : > { %v3008_v46 = vadd.f32 %v3007_v38, %v2963_v43  ;;  %v11308_v38 = vld [vmem:[%s15878_s29 + $0x18] sm:$0xff]  ;;  %v15879_v43 = vmov 0 }
0x1125   : > { %v2995_v40 = vpop.f32.mrf.mxu0 }
0x1126   : > { %v2996_v4 = vadd.f32 %v2995_v40, %v2968_v61  ;;  %v3009_v41 = vpop.f32.mrf.mxu1 }
0x1127   : > { %v3010_v6 = vadd.f32 %v3009_v41, %v2968_v61 }
0x1128   : > { %v3014_v42 = vmul.f32 0.5, %v2996_v4 }
0x1129   : > { %v3015_v44 = vmul.f32 0.5, %v3010_v6 }
0x112a   : > { %11994 = vtanh.f32 %v3014_v42 }
0x112b   : > { %11996 = vtanh.f32 %v3015_v44  ;;  %v15882_v44 = vmov 0 }
0x112c   : > { %11998 = vtanh.f32 %v2994_v45  ;;  %v15883_v44 = vsel %vm13131_vm9, 4294967295, %v15882_v44 }
0x112d   : > { %12000 = vtanh.f32 %v3008_v46  ;;  %15884 = vst [vmem:[#allocation6_spill] sm:$0xff] %v15883_v44 }
0x1130   : > { %v11995_v47 = vpop.eup %11994 }
0x1131   : > { %v11997_v48 = vpop.eup %11996  ;;  %v3018_v49 = vmul.f32 0.5, %v11995_v47 }
0x1132   : > { %v3019_v50 = vmul.f32 0.5, %v11997_v48  ;;  %v11999_v52 = vpop.eup %11998 }
0x1133   : > { %v3020_v51 = vadd.f32 0.5, %v3018_v49  ;;  %v12001_v54 = vpop.eup %12000 }
0x1134   : > { %v3021_v53 = vadd.f32 0.5, %v3019_v50 }
0x1135   : > { %v3024_v55 = vmul.f32 %v11999_v52, %v3020_v51  ;;  %v11309_v51 = vld [vmem:[%s15878_s29] sm:$0xff] }
0x1136   : > { %v3025_v56 = vmul.f32 %v12001_v54, %v3021_v53 }
0x1137   : > { %v3026_v57 = vpack.c.bf16 %v3024_v55, %v3024_v55 }
0x1138   : > { %v3027_v59 = vpack.c.bf16 %v3025_v56, %v3025_v56 }
0x1139   : > { %v3039_v60 = vsel %vm890_vm0, %v3026_v57, 0 }
0x113a   : > { %3051 = vmatpush.bf16.msrb.mxu2 %v3039_v60  ;;  %v3042_v62 = vsel %vm890_vm0, %v3027_v59, 0  ;;  %v15885_v59 = vmov 0  ;;  %v15888_v60 = vmov 0 }
0x113b   : > { %3064 = vmatpush.bf16.msrb.mxu3 %v3042_v62  ;;  %v15889_v60 = vsel %vm13162_vm4, 4294967295, %v15888_v60 }
0x113c   : > { %15890 = vst [vmem:[#allocation8_spill] sm:$0xff] %v15889_v60 }
0x113d   : > { %9871 = vmatmul.msk.bf16.vlgmr.msrb.gmra.mxu2 %vm886_vm1, %v9869_v63 }
0x113e   : > { %9872 = vmatmul.msk.bf16.vlgmr.msrb.gmra.mxu3 %vm886_vm1, %v9869_v63 }
0x11c0   : > { %v3053_v32 = vpop.f32.mrf.mxu2 }
0x11c1   : > { %v3054_v1 = vadd.f32 %v3053_v32, %v3033_v0  ;;  %v3066_v35 = vpop.f32.mrf.mxu3 }
0x11c2   : > { %v3067_v2 = vadd.f32 %v3066_v35, %v3033_v0 }
0x11c3   : > { %v3070_v3 = vadd.f32 %v3054_v1, %v2950_v22 }
0x11c4   : > { %v3071_v5 = vadd.f32 %v3067_v2, %v2951_v26  ;;  %v11310_v2 = vld [vmem:[%s15878_s29 + $0x8] sm:$0xff] }
0x11c5   : > { %v3074_v7 = vpack.c.bf16 %v3070_v3, %v3070_v3  ;;  %v11311_v3 = vld [vmem:[%s15878_s29 + $0x20] sm:$0xff] }
0x11c6   : > { %v3075_v8 = vpack.c.bf16 %v3071_v5, %v3071_v5  ;;  %v11312_v5 = vld [vmem:[%s15878_s29 + $0x28] sm:$0xff] }
0x11c7   : > { %v3097_v9 = vsel %vm890_vm0, %v3074_v7, 0 }
0x11c8   : > { %v3055_v13 = vpop.f32.mrf.mxu2  ;;  %3109 = vmatpush.bf16.msra.mxu0 %v3097_v9  ;;  %v3100_v28 = vsel %vm890_vm0, %v3075_v8, 0  ;;  %vm15780_vm0 = vcmask 130048  }
0x11c9   : > { %3123 = vmatpush.bf16.msra.mxu1 %v3100_v28  ;;  %v3068_v37 = vpop.f32.mrf.mxu3 }
0x11cb   : > { %9877 = vmatmul.msk.bf16.vlgmr.msra.gmra.mxu0 %vm886_vm1, %v11306_v12 }
0x11cc   : > { %9878 = vmatmul.msk.bf16.vlgmr.msra.gmra.mxu1 %vm886_vm1, %v11306_v12  ;;  %vm13124_vm1 = vmpackc.low %vm847_vm3, %vm847_vm3 }
0x11cd   : > { %v15880_v43 = vsel %vm13124_vm1, 4294967295, %v15879_v43  ;;  %vm13155_vm3 = vmpackc.low %vm862_vm6, %vm862_vm6 }
0x11ce   : > { %15881 = vst [vmem:[#allocation5_spill] sm:$0xff] %v15880_v43  ;;  %v15886_v59 = vsel %vm13155_vm3, 4294967295, %v15885_v59  ;;  %vm13249_vm6 = vmpackc.low %vm1097_vm11, %vm1097_vm11  ;;  %vm15898_vm11 = vcmp.lt.s32.totalorder %v12525_v21, 2 }
0x11cf   : > { %15887 = vst [vmem:[#allocation7_spill] sm:$0xff] %v15886_v59 }
0x1248   : > { %v3111_v31 = vpop.f32.mrf.mxu0 }
0x1249   : > { %v3125_v39 = vpop.f32.mrf.mxu1  ;;  %v13073_v15 = vadd.f32 %v3111_v31, %v3081_v10 }
0x124a   : > { %v13077_v18 = vadd.f32 %v3125_v39, %v3081_v10 }
0x1250   : > { %v3113_v14 = vpop.f32.mrf.mxu0 }
0x1251   : > { %v13075_v16 = vadd.f32 %v3113_v14, %v3086_v11  ;;  %v3127_v17 = vpop.f32.mrf.mxu1 }
0x1252   : > { %v13079_v19 = vadd.f32 %v3127_v17, %v3086_v11 }
0x1253   : > { %v11556_v20 = vpack.i.bf16 %v13075_v16, %v13073_v15  ;;  %v3130_v22 = vpack.c.bf16 %v13075_v16, %v13073_v15 }
0x1254   : > { %v11551_v23 = vpack.i.bf16 %v13079_v19, %v13077_v18  ;;  %v3131_v26 = vpack.c.bf16 %v13079_v19, %v13077_v18 }
0x1255   : > { %11557 = vrot.lane.b32.xlu0 %v11556_v20, %s15876_s1  ;;  %11547 = vrot.lane.b32.xlu1 %v11556_v20, %s15877_s7 }
0x1256   : > { %11552 = vrot.lane.b32.xlu2 %v11551_v23, %s15877_s7  ;;  %3272 = vmatpush.bf16.msrb.mxu1 %v3131_v26 }
0x1257   : > { %3253 = vmatpush.bf16.msrb.mxu0 %v3130_v22 }
0x1259   : > { %9911 = vmatmul.msk.bf16.vlgmr.msrb.gmra.mxu1 %vm15780_vm0, %v11307_v58 }
0x125a   : > { %9909 = vmatmul.msk.bf16.vlgmr.msrb.gmra.mxu0 %vm15780_vm0, %v11307_v58 }
0x125d   : > { %3374 = vperm.xlu0 %11483, %v3356_v27   ;;  %11562 = vrot.lane.b32.xlu1 %v11551_v23, %s15876_s1 }
0x125e   : > { %3369 = vperm.xlu2 %11494, %v3355_v29  }
0x1265   : > { %3417 = vperm.xlu0 %11483, %v3413_v30   ;;  %3359 = vperm.xlu1 %11505, %v3353_v33  }
0x1266   : > { %3364 = vperm.xlu2 %11494, %v3354_v34  }
0x1269   : > { %9912 = vmatmul.msk.bf16.gmra.mxu1 %vm15780_vm0, %v11308_v38 }
0x126a   : > { %9910 = vmatmul.msk.bf16.gmra.mxu0 %vm15780_vm0, %v11308_v38 }
0x126d   : > { %3422 = vperm.xlu1 %11505, %v3414_v36  }
0x12b0   : > { %v11553_v61 = vpop.permute.xlu2 %11552 }
0x12b1   : > { %v11555_v4 = vunpack.i.h.bf16 %v11553_v61  ;;  %v11554_v41 = vunpack.i.l.bf16 %v11553_v61 }
0x12b8   : > { %v3370_v38 = vpop.permute.xlu2 %3369 }
0x12c7   : > { %v11548_v40 = vpop.permute.xlu1 %11547  ;;  %v11558_v52 = vpop.permute.xlu0 %11557 }
0x12c8   : > { %v11550_v6 = vunpack.i.h.bf16 %v11548_v40  ;;  %v11549_v42 = vunpack.i.l.bf16 %v11548_v40  ;;  %v11560_v54 = vunpack.i.h.bf16 %v11558_v52  ;;  %v11559_v55 = vunpack.i.l.bf16 %v11558_v52 }
0x12ca   : > { %v3146_v45 = vsel %vm15771_vm2, %v11550_v6, %v11555_v4  ;;  %v3148_v46 = vsel %vm15771_vm2, %v11555_v4, %v11550_v6  ;;  %v3145_v47 = vsel %vm15771_vm2, %v11549_v42, %v11554_v41  ;;  %v3147_v48 = vsel %vm15771_vm2, %v11554_v41, %v11549_v42  ;;  %vm15899_vm2 = vmmov %vm15898_vm11 }
0x12cb   : > { %v9892_v49 = vpack.c.bf16 %v3148_v46, %v3147_v48  ;;  %v9897_v50 = vpack.c.bf16 %v3146_v45, %v3145_v47  ;;  %vm15900_vm13 = vmmov %vm15899_vm2 }
0x12cc   : > { %vm15901_vm15 = vmmov %vm15899_vm2 }
0x12cd   : > { %9893 = vmatpush.bf16.msk.msra.mxu2 %vm13124_vm1, %v9892_v49  ;;  %9898 = vmatpush.bf16.msk.msra.mxu3 %vm13131_vm9, %v9897_v50 }
0x12cf   : > { %v11563_v53 = vpop.permute.xlu1 %11562 }
0x12d0   : > { %v11565_v56 = vunpack.i.h.bf16 %v11563_v53  ;;  %v11564_v57 = vunpack.i.l.bf16 %v11563_v53  ;;  %9894 = vmatmul.msk.bf16.vlgmr.msra.gmra.mxu2 %vm15780_vm0, %v11309_v51  ;;  %9899 = vmatmul.msk.bf16.vlgmr.msra.gmra.mxu3 %vm15780_vm0, %v11309_v51 }
0x12d2   : > { %v3162_v62 = vsel %vm15770_vm5, %v11560_v54, %v11565_v56  ;;  %v3164_v63 = vsel %vm15770_vm5, %v11565_v56, %v11560_v54  ;;  %v3161_v0 = vsel %vm15770_vm5, %v11559_v55, %v11564_v57  ;;  %v3163_v32 = vsel %vm15770_vm5, %v11564_v57, %v11559_v55  ;;  %v3375_v55 = vpop.permute.xlu0 %3374  ;;  %vm13264_vm5 = vmpackc.low %vm15895_vm7, %vm15895_vm7 }
0x12d3   : > { %v9926_v1 = vpack.c.bf16 %v3162_v62, %v3161_v0  ;;  %v9931_v35 = vpack.c.bf16 %v3164_v63, %v3163_v32  ;;  %vm15905_vm7 = vcmp.lt.s32.totalorder %v12534_v25, 62 }
0x12d5   : > { %9927 = vmatpush.bf16.msk.msrb.mxu2 %vm13155_vm3, %v9926_v1  ;;  %9932 = vmatpush.bf16.msk.msrb.mxu3 %vm13162_vm4, %v9931_v35 }
0x12d6   : > { %v3274_v37 = vpop.f32.mrf.mxu1 }
0x12d7   : > { %v3255_v31 = vpop.f32.mrf.mxu0  ;;  %v3360_v32 = vpop.permute.xlu1 %3359 }
0x12de   : > { %v3276_v11 = vpop.f32.mrf.mxu1 }
0x12df   : > { %v3257_v14 = vpop.f32.mrf.mxu0 }
0x12e0   : > { %9895 = vmatmul.msk.bf16.gmra.mxu2 %vm15780_vm0, %v11310_v2  ;;  %9900 = vmatmul.msk.bf16.gmra.mxu3 %vm15780_vm0, %v11310_v2 }
0x12e6   : > { %v3279_v26 = vpop.f32.mrf.mxu1 }
0x12e7   : > { %v3260_v27 = vpop.f32.mrf.mxu0 }
0x12ee   : > { %v3281_v4 = vpop.f32.mrf.mxu1 }
0x12ef   : > { %v3262_v41 = vpop.f32.mrf.mxu0 }
0x12f0   : > { %9928 = vmatmul.msk.bf16.vlgmr.msrb.gmra.mxu2 %vm15780_vm0, %v11311_v3  ;;  %9933 = vmatmul.msk.bf16.vlgmr.msrb.gmra.mxu3 %vm15780_vm0, %v11311_v3 }
0x1300   : > { %9929 = vmatmul.msk.bf16.gmra.mxu2 %vm15780_vm0, %v11312_v5  ;;  %9934 = vmatmul.msk.bf16.gmra.mxu3 %vm15780_vm0, %v11312_v5  ;;  %v3365_v5 = vpop.permute.xlu2 %3364 }
0x1353   : > { %v3201_v7 = vpop.f32.mrf.mxu2  ;;  %v3220_v8 = vpop.f32.mrf.mxu3 }
0x1354   : > { %v3256_v45 = vadd.f32 %v3255_v31, %v3201_v7  ;;  %v3275_v48 = vadd.f32 %v3274_v37, %v3220_v8 }
0x135b   : > { %v3203_v9 = vpop.f32.mrf.mxu2  ;;  %v3222_v12 = vpop.f32.mrf.mxu3 }
0x135c   : > { %v3258_v49 = vadd.f32 %v3257_v14, %v3203_v9  ;;  %v3277_v56 = vadd.f32 %v3276_v11, %v3222_v12 }
0x1363   : > { %v3206_v13 = vpop.f32.mrf.mxu2  ;;  %v3225_v28 = vpop.f32.mrf.mxu3 }
0x1364   : > { %v3280_v29 = vadd.f32 %v3279_v26, %v3225_v28  ;;  %v3261_v30 = vadd.f32 %v3260_v27, %v3206_v13 }
0x136b   : > { %v3208_v39 = vpop.f32.mrf.mxu2  ;;  %v3227_v10 = vpop.f32.mrf.mxu3 }
0x136c   : > { %v3282_v46 = vadd.f32 %v3281_v4, %v3227_v10  ;;  %v3263_v47 = vadd.f32 %v3262_v41, %v3208_v39  ;;  %v3418_v41 = vpop.permute.xlu0 %3417 }
0x1373   : > { %v3316_v17 = vpop.f32.mrf.mxu2  ;;  %v3335_v20 = vpop.f32.mrf.mxu3 }
0x1374   : > { %v3345_v52 = vadd.f32 %v3316_v17, %v3256_v45  ;;  %v3346_v57 = vadd.f32 %v3335_v20, %v3275_v48 }
0x1376   : > { %v3377_v35 = vadd.f32 %v3360_v32, %v3345_v52  ;;  %v3378_v7 = vadd.f32 %v3360_v32, %v3346_v57  ;;  %v10001_v57 = vld [vmem:[%s15694_s11 + $0x20] sm:$0xff]  ;;  %v11315_v32 = vld [vmem:[%s15878_s29 + $0x48] sm:$0xff] }
0x137b   : > { %v3318_v22 = vpop.f32.mrf.mxu2  ;;  %v3337_v23 = vpop.f32.mrf.mxu3 }
0x137c   : > { %v3347_v62 = vadd.f32 %v3318_v22, %v3258_v49  ;;  %v3348_v1 = vadd.f32 %v3337_v23, %v3277_v56  ;;  %v10007_v56 = vld [vmem:[%s15696_s13 + $0x10] sm:$0xff] }
0x137e   : > { %v3379_v9 = vadd.f32 %v3365_v5, %v3347_v62  ;;  %v3380_v28 = vadd.f32 %v3365_v5, %v3348_v1  ;;  %v10002_v62 = vld [vmem:[%s15694_s11 + $0x28] sm:$0xff] }
0x1383   : > { %v3321_v33 = vpop.f32.mrf.mxu2  ;;  %v3340_v34 = vpop.f32.mrf.mxu3 }
0x1384   : > { %v3349_v36 = vadd.f32 %v3321_v33, %v3261_v30  ;;  %v3350_v58 = vadd.f32 %v3340_v34, %v3280_v29 }
0x1386   : > { %v3381_v61 = vadd.f32 %v3370_v38, %v3349_v36  ;;  %v3382_v40 = vadd.f32 %v3370_v38, %v3350_v58 }
0x1388   : > { %v3389_v6 = vmul.f32 0.5, %v3381_v61  ;;  %v3390_v42 = vmul.f32 0.5, %v3382_v40  ;;  %v11313_v61 = vld [vmem:[%s15695_s12] sm:$0xff] }
0x138a   : > { %12002 = vtanh.f32 %v3389_v6  ;;  %v3423_v6 = vpop.permute.xlu1 %3422 }
0x138b   : > { %v3323_v50 = vpop.f32.mrf.mxu2  ;;  %v3342_v51 = vpop.f32.mrf.mxu3  ;;  %12004 = vtanh.f32 %v3390_v42 }
0x138c   : > { %v3351_v53 = vadd.f32 %v3323_v50, %v3263_v47  ;;  %v3352_v54 = vadd.f32 %v3342_v51, %v3282_v46 }
0x138e   : > { %v3383_v63 = vadd.f32 %v3375_v55, %v3351_v53  ;;  %v3384_v0 = vadd.f32 %v3375_v55, %v3352_v54  ;;  %v10004_v54 = vld [vmem:[%s15694_s11 + $0x38] sm:$0xff]  ;;  %v10003_v55 = vld [vmem:[%s15694_s11 + $0x30] sm:$0xff] }
0x1390   : > { %v3391_v2 = vmul.f32 0.5, %v3383_v63  ;;  %v3392_v3 = vmul.f32 0.5, %v3384_v0  ;;  %v12003_v8 = vpop.eup %12002  ;;  %v10008_v63 = vld [vmem:[%s15696_s13 + $0x18] sm:$0xff]  ;;  %v11314_v0 = vld [vmem:[%s15878_s29 + $0x40] sm:$0xff] }
0x1391   : > { %v12005_v13 = vpop.eup %12004  ;;  %v3397_v12 = vmul.f32 0.5, %v12003_v8 }
0x1392   : > { %12006 = vtanh.f32 %v3391_v2  ;;  %v3398_v37 = vmul.f32 0.5, %v12005_v13 }
0x1393   : > { %12008 = vtanh.f32 %v3392_v3  ;;  %v3401_v10 = vadd.f32 0.5, %v3397_v12 }
0x1394   : > { %12010 = vtanh.f32 %v3377_v35  ;;  %v3402_v17 = vadd.f32 0.5, %v3398_v37 }
0x1395   : > { %12012 = vtanh.f32 %v3378_v7 }
0x1396   : > { %12014 = vtanh.f32 %v3379_v9 }
0x1397   : > { %12016 = vtanh.f32 %v3380_v28 }
0x1398   : > { %v12007_v31 = vpop.eup %12006 }
0x1399   : > { %v12009_v39 = vpop.eup %12008  ;;  %v3399_v11 = vmul.f32 0.5, %v12007_v31 }
0x139a   : > { %v12011_v14 = vpop.eup %12010  ;;  %v3400_v20 = vmul.f32 0.5, %v12009_v39 }
0x139b   : > { %v12013_v22 = vpop.eup %12012  ;;  %v3403_v23 = vadd.f32 0.5, %v3399_v11  ;;  %v3407_v30 = vmul.f32 %v12011_v14, %v3401_v10 }
0x139c   : > { %v12015_v26 = vpop.eup %12014  ;;  %v3404_v27 = vadd.f32 0.5, %v3400_v20  ;;  %v3408_v34 = vmul.f32 %v12013_v22, %v3402_v17 }
0x139d   : > { %v12017_v29 = vpop.eup %12016  ;;  %v3409_v33 = vmul.f32 %v12015_v26, %v3403_v23 }
0x139e   : > { %v3410_v36 = vmul.f32 %v12017_v29, %v3404_v27  ;;  %v11374_v27 = vld [vmem:[%s15699_s16 + $0x98] sm:$0xff] }
0x139f   : > { %v3411_v58 = vpack.c.bf16 %v3409_v33, %v3407_v30 }
0x13a0   : > { %v3412_v38 = vpack.c.bf16 %v3410_v36, %v3408_v34  ;;  %v15906_v36 = vmov 0 }
0x13a1   : > { %3440 = vmatpush.bf16.msra.mxu0 %v3411_v58  ;;  %v11316_v58 = vld [vmem:[%s15878_s29 + $0x30] sm:$0xff] }
0x13a2   : > { %3454 = vmatpush.bf16.msra.mxu1 %v3412_v38  ;;  %v11317_v38 = vld [vmem:[%s15878_s29 + $0x38] sm:$0xff] }
0x13a4   : > { %9939 = vmatmul.msk.bf16.vlgmr.msra.gmra.mxu0 %vm15780_vm0, %v11313_v61 }
0x13a5   : > { %9940 = vmatmul.msk.bf16.vlgmr.msra.gmra.mxu1 %vm15780_vm0, %v11313_v61  ;;  %v11318_v61 = vld [vmem:[%s15878_s29 + $0x50] sm:$0xff] }
0x1421   : > { %v3442_v40 = vpop.f32.mrf.mxu0 }
0x1422   : > { %v3456_v4 = vpop.f32.mrf.mxu1  ;;  %v13198_v45 = vadd.f32 %v3442_v40, %v3418_v41  ;;  %v11319_v40 = vld [vmem:[%s15878_s29 + $0x58] sm:$0xff] }
0x1423   : > { %v13202_v48 = vadd.f32 %v3456_v4, %v3418_v41 }
0x1429   : > { %v3444_v42 = vpop.f32.mrf.mxu0 }
0x142a   : > { %v13200_v46 = vadd.f32 %v3444_v42, %v3423_v6  ;;  %v3458_v47 = vpop.f32.mrf.mxu1 }
0x142b   : > { %v13204_v49 = vadd.f32 %v3458_v47, %v3423_v6 }
0x142c   : > { %v11576_v50 = vpack.i.bf16 %v13200_v46, %v13198_v45  ;;  %v3465_v51 = vpack.c.bf16 %v13200_v46, %v13198_v45 }
0x142d   : > { %v11571_v52 = vpack.i.bf16 %v13204_v49, %v13202_v48  ;;  %v3466_v53 = vpack.c.bf16 %v13204_v49, %v13202_v48 }
0x142e   : > { %11577 = vrot.lane.b32.xlu1 %v11576_v50, %s15891_s5  ;;  %11567 = vrot.lane.b32.xlu2 %v11576_v50, %s15892_s10 }
0x142f   : > { %11572 = vrot.lane.b32.xlu0 %v11571_v52, %s15892_s10  ;;  %3607 = vmatpush.bf16.msra.mxu3 %v3466_v53 }
0x1430   : > { %3588 = vmatpush.bf16.msra.mxu2 %v3465_v51 }
0x1432   : > { %9977 = vmatmul.msk.bf16.vlgmr.msra.gmra.mxu3 %vm15780_vm0, %v11314_v0 }
0x1433   : > { %9975 = vmatmul.msk.bf16.vlgmr.msra.gmra.mxu2 %vm15780_vm0, %v11314_v0 }
0x1436   : > { %3710 = vperm.xlu1 %11505, %v10004_v54   ;;  %11582 = vrot.lane.b32.xlu2 %v11571_v52, %s15891_s5 }
0x1437   : > { %3705 = vperm.xlu0 %11483, %v10003_v55  }
0x143e   : > { %3755 = vperm.xlu1 %11505, %v10007_v56   ;;  %3695 = vperm.xlu2 %11494, %v10001_v57  }
0x143f   : > { %3700 = vperm.xlu0 %11483, %v10002_v62  }
0x1442   : > { %9978 = vmatmul.msk.bf16.gmra.mxu3 %vm15780_vm0, %v11315_v32 }
0x1443   : > { %9976 = vmatmul.msk.bf16.gmra.mxu2 %vm15780_vm0, %v11315_v32 }
0x1446   : > { %3760 = vperm.xlu2 %11494, %v10008_v63  }
0x1488   : > { %v11568_v1 = vpop.permute.xlu2 %11567 }
0x1489   : > { %v11570_v13 = vunpack.i.h.bf16 %v11568_v1  ;;  %v11569_v28 = vunpack.i.l.bf16 %v11568_v1 }
0x1490   : > { %v11583_v35 = vpop.permute.xlu2 %11582 }
0x1491   : > { %v11585_v3 = vunpack.i.h.bf16 %v11583_v35  ;;  %v11584_v5 = vunpack.i.l.bf16 %v11583_v35 }
0x14a0   : > { %v11578_v2 = vpop.permute.xlu1 %11577 }
0x14a1   : > { %v11573_v7 = vpop.permute.xlu0 %11572  ;;  %v11580_v8 = vunpack.i.h.bf16 %v11578_v2  ;;  %v11579_v9 = vunpack.i.l.bf16 %v11578_v2 }
0x14a2   : > { %v11575_v12 = vunpack.i.h.bf16 %v11573_v7  ;;  %v11574_v37 = vunpack.i.l.bf16 %v11573_v7 }
0x14a3   : > { %v3496_v39 = vsel %vm15774_vm8, %v11579_v9, %v11584_v5  ;;  %v3497_v10 = vsel %vm15774_vm8, %v11580_v8, %v11585_v3  ;;  %v3498_v11 = vsel %vm15774_vm8, %v11584_v5, %v11579_v9  ;;  %v3499_v14 = vsel %vm15774_vm8, %v11585_v3, %v11580_v8 }
0x14a4   : > { %v3480_v20 = vsel %vm15898_vm11, %v11569_v28, %v11574_v37  ;;  %v3481_v22 = vsel %vm15899_vm2, %v11570_v13, %v11575_v12  ;;  %v3482_v23 = vsel %vm15900_vm13, %v11574_v37, %v11569_v28  ;;  %v3483_v26 = vsel %vm15901_vm15, %v11575_v12, %v11570_v13  ;;  %vm13286_vm2 = vmpackc.low %vm15905_vm7, %vm15905_vm7 }
0x14a5   : > { %vm15902_vm8 = vcmp.lt.s32.totalorder %v12532_v24, 62  ;;  %v9958_v29 = vpack.c.bf16 %v3483_v26, %v3482_v23  ;;  %v9963_v30 = vpack.c.bf16 %v3481_v22, %v3480_v20  ;;  %v9992_v33 = vpack.c.bf16 %v3497_v10, %v3496_v39 }
0x14a6   : > { %vm13279_vm10 = vmpackc.low %vm15902_vm8, %vm15902_vm8  ;;  %v9997_v34 = vpack.c.bf16 %v3499_v14, %v3498_v11  ;;  %v15907_v36 = vsel %vm13286_vm2, 4294967295, %v15906_v36  ;;  %vm15910_vm8 = vcmp.ge.s32.totalorder %v12532_v24, 4  ;;  %vm15914_vm15 = vcmp.lt.s32.totalorder %v12525_v21, 4 }
0x14a7   : > { %9959 = vmatpush.bf16.msk.msrb.mxu0 %vm13249_vm6, %v9958_v29  ;;  %9964 = vmatpush.bf16.msk.msrb.mxu1 %vm13264_vm5, %v9963_v30  ;;  %vm13374_vm13 = vmpackc.low %vm15910_vm8, %vm15910_vm8  ;;  %vm15924_vm8 = vcmp.lt.s32.totalorder %v12532_v24, 60 }
0x14a8   : > { %vm15915_vm11 = vmmov %vm15914_vm15 }
0x14a9   : > { %v3706_v9 = vpop.permute.xlu0 %3705  ;;  %vm15916_vm7 = vmmov %vm15915_vm11 }
0x14aa   : > { %9960 = vmatmul.msk.bf16.vlgmr.msrb.gmra.mxu0 %vm15780_vm0, %v11316_v58  ;;  %9965 = vmatmul.msk.bf16.vlgmr.msrb.gmra.mxu1 %vm15780_vm0, %v11316_v58  ;;  %v3711_v58 = vpop.permute.xlu1 %3710  ;;  %vm15917_vm12 = vmmov %vm15916_vm7 }
0x14ab   : > { %9993 = vmatpush.bf16.msk.msra.mxu0 %vm13279_vm10, %v9992_v33  ;;  %9998 = vmatpush.bf16.msk.msra.mxu1 %vm13286_vm2, %v9997_v34 }
0x14b5   : > { %v3609_v52 = vpop.f32.mrf.mxu3 }
0x14b6   : > { %v3590_v51 = vpop.f32.mrf.mxu2 }
0x14ba   : > { %9961 = vmatmul.msk.bf16.gmra.mxu0 %vm15780_vm0, %v11317_v38  ;;  %9966 = vmatmul.msk.bf16.gmra.mxu1 %vm15780_vm0, %v11317_v38 }
0x14bd   : > { %v3611_v56 = vpop.f32.mrf.mxu3 }
0x14be   : > { %v3592_v55 = vpop.f32.mrf.mxu2 }
0x14c5   : > { %v3614_v1 = vpop.f32.mrf.mxu3 }
0x14c6   : > { %v3595_v32 = vpop.f32.mrf.mxu2 }
0x14ca   : > { %9994 = vmatmul.msk.bf16.vlgmr.msra.gmra.mxu0 %vm15780_vm0, %v11318_v61  ;;  %9999 = vmatmul.msk.bf16.vlgmr.msra.gmra.mxu1 %vm15780_vm0, %v11318_v61 }
0x14cd   : > { %v3616_v37 = vpop.f32.mrf.mxu3 }
0x14ce   : > { %v3597_v12 = vpop.f32.mrf.mxu2 }
0x14da   : > { %9995 = vmatmul.msk.bf16.gmra.mxu0 %vm15780_vm0, %v11319_v40  ;;  %10000 = vmatmul.msk.bf16.gmra.mxu1 %vm15780_vm0, %v11319_v40 }
0x1527   : > { %v3536_v4 = vpop.f32.mrf.mxu0  ;;  %v3555_v41 = vpop.f32.mrf.mxu1 }
0x1528   : > { %v3591_v11 = vadd.f32 %v3590_v51, %v3536_v4  ;;  %v3610_v22 = vadd.f32 %v3609_v52, %v3555_v41  ;;  %v3701_v41 = vpop.permute.xlu0 %3700 }
0x152f   : > { %v3538_v6 = vpop.f32.mrf.mxu0  ;;  %v3557_v42 = vpop.f32.mrf.mxu1 }
0x1530   : > { %v3593_v23 = vadd.f32 %v3592_v55, %v3538_v6  ;;  %v3612_v38 = vadd.f32 %v3611_v56, %v3557_v42 }
0x1537   : > { %v3541_v47 = vpop.f32.mrf.mxu0  ;;  %v3560_v50 = vpop.f32.mrf.mxu1 }
0x1538   : > { %v3596_v35 = vadd.f32 %v3595_v32, %v3541_v47  ;;  %v3615_v2 = vadd.f32 %v3614_v1, %v3560_v50  ;;  %v3696_v32 = vpop.permute.xlu2 %3695 }
0x153f   : > { %v3543_v53 = vpop.f32.mrf.mxu0  ;;  %v3562_v54 = vpop.f32.mrf.mxu1 }
0x1540   : > { %v3598_v14 = vadd.f32 %v3597_v12, %v3543_v53  ;;  %v3617_v20 = vadd.f32 %v3616_v37, %v3562_v54 }
0x1547   : > { %v3651_v57 = vpop.f32.mrf.mxu0  ;;  %v3670_v62 = vpop.f32.mrf.mxu1 }
0x1548   : > { %v3680_v30 = vadd.f32 %v3651_v57, %v3591_v11  ;;  %v3681_v61 = vadd.f32 %v3670_v62, %v3610_v22  ;;  %v3756_v22 = vpop.permute.xlu1 %3755 }
0x154a   : > { %v3713_v4 = vadd.f32 %v3696_v32, %v3680_v30  ;;  %v3714_v6 = vadd.f32 %v3696_v32, %v3681_v61  ;;  %v3761_v61 = vpop.permute.xlu2 %3760 }
0x154f   : > { %v3653_v63 = vpop.f32.mrf.mxu0  ;;  %v3672_v0 = vpop.f32.mrf.mxu1 }
0x1550   : > { %v3682_v40 = vadd.f32 %v3653_v63, %v3593_v23  ;;  %v3683_v1 = vadd.f32 %v3672_v0, %v3612_v38 }
0x1552   : > { %v3715_v54 = vadd.f32 %v3701_v41, %v3682_v40  ;;  %v3716_v57 = vadd.f32 %v3701_v41, %v3683_v1  ;;  %v10076_v41 = vld [vmem:[%s15694_s11 + $0x48] sm:$0xff] }
0x1557   : > { %v3656_v3 = vpop.f32.mrf.mxu0  ;;  %v3675_v5 = vpop.f32.mrf.mxu1 }
0x1558   : > { %v3684_v7 = vadd.f32 %v3656_v3, %v3596_v35  ;;  %v3685_v8 = vadd.f32 %v3675_v5, %v3615_v2 }
0x155a   : > { %v3717_v13 = vadd.f32 %v3706_v9, %v3684_v7  ;;  %v3718_v28 = vadd.f32 %v3706_v9, %v3685_v8 }
0x155c   : > { %v3725_v39 = vmul.f32 0.5, %v3717_v13  ;;  %v3726_v10 = vmul.f32 0.5, %v3718_v28 }
0x155e   : > { %12018 = vtanh.f32 %v3725_v39 }
0x155f   : > { %v3658_v26 = vpop.f32.mrf.mxu0  ;;  %v3677_v29 = vpop.f32.mrf.mxu1  ;;  %12020 = vtanh.f32 %v3726_v10 }
0x1560   : > { %v3686_v33 = vadd.f32 %v3658_v26, %v3598_v14  ;;  %v3687_v34 = vadd.f32 %v3677_v29, %v3617_v20  ;;  %v11320_v20 = vld [vmem:[%s15695_s12 + $0x8] sm:$0xff]  ;;  %v3461_v26 = vadd.f32 %v13198_v45, %v13073_v15  ;;  %v3464_v15 = vadd.f32 %v13204_v49, %v13079_v19  ;;  %v10077_v19 = vld [vmem:[%s15694_s11 + $0x50] sm:$0xff]  ;;  %v10075_v49 = vld [vmem:[%s15694_s11 + $0x40] sm:$0xff] }
0x1562   : > { %v3719_v47 = vadd.f32 %v3711_v58, %v3686_v33  ;;  %v3720_v50 = vadd.f32 %v3711_v58, %v3687_v34  ;;  %v3462_v33 = vadd.f32 %v13202_v48, %v13077_v18 }
0x1564   : > { %v3727_v51 = vmul.f32 0.5, %v3719_v47  ;;  %v3728_v53 = vmul.f32 0.5, %v3720_v50  ;;  %v12019_v52 = vpop.eup %12018  ;;  %v3463_v47 = vadd.f32 %v13200_v46, %v13075_v16  ;;  %v10078_v16 = vld [vmem:[%s15694_s11 + $0x58] sm:$0xff]  ;;  %v10081_v46 = vld [vmem:[%s15696_s13 + $0x20] sm:$0xff] }
0x1565   : > { %v12021_v55 = vpop.eup %12020  ;;  %v3733_v42 = vmul.f32 0.5, %v12019_v52  ;;  %v11321_v52 = vld [vmem:[%s15878_s29 + $0x70] sm:$0xff] }
0x1566   : > { %12022 = vtanh.f32 %v3727_v51  ;;  %v3734_v56 = vmul.f32 0.5, %v12021_v55 }
0x1567   : > { %12024 = vtanh.f32 %v3728_v53  ;;  %v3737_v0 = vadd.f32 0.5, %v3733_v42 }
0x1568   : > { %12026 = vtanh.f32 %v3713_v4  ;;  %v3738_v3 = vadd.f32 0.5, %v3734_v56 }
0x1569   : > { %12028 = vtanh.f32 %v3714_v6  ;;  %v10082_v6 = vld [vmem:[%s15696_s13 + $0x28] sm:$0xff] }
0x156a   : > { %12030 = vtanh.f32 %v3715_v54  ;;  %v11322_v54 = vld [vmem:[%s15878_s29 + $0x78] sm:$0xff] }
0x156b   : > { %12032 = vtanh.f32 %v3716_v57 }
0x156c   : > { %v12023_v62 = vpop.eup %12022 }
0x156d   : > { %v12025_v63 = vpop.eup %12024  ;;  %v3735_v35 = vmul.f32 0.5, %v12023_v62 }
0x156e   : > { %v12027_v2 = vpop.eup %12026  ;;  %v3736_v5 = vmul.f32 0.5, %v12025_v63 }
0x156f   : > { %v12029_v7 = vpop.eup %12028  ;;  %v3739_v8 = vadd.f32 0.5, %v3735_v35  ;;  %v3744_v12 = vmul.f32 %v12027_v2, %v3737_v0  ;;  %v15911_v0 = vmov 0 }
0x1570   : > { %v12031_v9 = vpop.eup %12030  ;;  %v3740_v13 = vadd.f32 0.5, %v3736_v5  ;;  %v3745_v39 = vmul.f32 %v12029_v7, %v3738_v3  ;;  %v15912_v0 = vsel %vm13374_vm13, 4294967295, %v15911_v0  ;;  %v15919_v7 = vmov 0 }
0x1571   : > { %v12033_v28 = vpop.eup %12032  ;;  %v3746_v37 = vmul.f32 %v12031_v9, %v3739_v8  ;;  %15913 = vst [vmem:[#allocation9_spill] sm:$0xff] %v15912_v0 }
0x1572   : > { %v3747_v10 = vmul.f32 %v12033_v28, %v3740_v13  ;;  %v11323_v28 = vld [vmem:[%s15878_s29 + $0x60] sm:$0xff] }
0x1573   : > { %v3748_v11 = vpack.c.bf16 %v3746_v37, %v3744_v12 }
0x1574   : > { %v3749_v14 = vpack.c.bf16 %v3747_v10, %v3745_v39 }
0x1575   : > { %3778 = vmatpush.bf16.msrb.mxu2 %v3748_v11 }
0x1576   : > { %3792 = vmatpush.bf16.msrb.mxu3 %v3749_v14  ;;  %v15925_v14 = vmov 0 }
0x1578   : > { %10013 = vmatmul.msk.bf16.vlgmr.msrb.gmra.mxu2 %vm15780_vm0, %v11320_v20 }
0x1579   : > { %10014 = vmatmul.msk.bf16.vlgmr.msrb.gmra.mxu3 %vm15780_vm0, %v11320_v20 }
0x15fb   : > { %v3780_v23 = vpop.f32.mrf.mxu2 }
0x15fc   : > { %v3781_v29 = vadd.f32 %v3780_v23, %v3756_v22  ;;  %v3794_v30 = vpop.f32.mrf.mxu3 }
0x15fd   : > { %v3795_v34 = vadd.f32 %v3794_v30, %v3756_v22 }
0x15fe   : > { %v13327_v58 = vadd.f32 %v3781_v29, %v3461_v26 }
0x15ff   : > { %v13329_v38 = vadd.f32 %v3795_v34, %v3462_v33 }
0x1603   : > { %v3782_v40 = vpop.f32.mrf.mxu2 }
0x1604   : > { %v3783_v50 = vadd.f32 %v3782_v40, %v3761_v61  ;;  %v3796_v32 = vpop.f32.mrf.mxu3  ;;  %v11326_v40 = vld [vmem:[%s15878_s29 + $0x88] sm:$0xff] }
0x1605   : > { %v3797_v45 = vadd.f32 %v3796_v32, %v3761_v61  ;;  %v11325_v61 = vld [vmem:[%s15878_s29 + $0x80] sm:$0xff] }
0x1606   : > { %v13335_v1 = vadd.f32 %v3783_v50, %v3463_v47  ;;  %v11596_v4 = vpack.i.bf16 %v3783_v50, %v3781_v29  ;;  %v3803_v18 = vpack.c.bf16 %v3783_v50, %v3781_v29  ;;  %v15933_v29 = vmov 0 }
0x1607   : > { %v13337_v48 = vadd.f32 %v3797_v45, %v3464_v15  ;;  %v11591_v51 = vpack.i.bf16 %v3797_v45, %v3795_v34  ;;  %v3804_v53 = vpack.c.bf16 %v3797_v45, %v3795_v34  ;;  %v11324_v34 = vld [vmem:[%s15878_s29 + $0x68] sm:$0xff] }
0x1608   : > { %11597 = vrot.lane.b32.xlu2 %v11596_v4, %s15908_s6  ;;  %11587 = vrot.lane.b32.xlu0 %v11596_v4, %s15909_s9 }
0x1609   : > { %11592 = vrot.lane.b32.xlu1 %v11591_v51, %s15909_s9  ;;  %3945 = vmatpush.bf16.msrb.mxu1 %v3804_v53 }
0x160a   : > { %3926 = vmatpush.bf16.msrb.mxu0 %v3803_v18 }
0x160c   : > { %10051 = vmatmul.msk.bf16.vlgmr.msrb.gmra.mxu1 %vm15780_vm0, %v11321_v52 }
0x160d   : > { %10049 = vmatmul.msk.bf16.vlgmr.msrb.gmra.mxu0 %vm15780_vm0, %v11321_v52 }
0x1610   : > { %4048 = vperm.xlu2 %11494, %v10078_v16   ;;  %11602 = vrot.lane.b32.xlu0 %v11591_v51, %s15908_s6 }
0x1611   : > { %4043 = vperm.xlu1 %11505, %v10077_v19  }
0x1618   : > { %4093 = vperm.xlu2 %11494, %v10081_v46   ;;  %4033 = vperm.xlu0 %11483, %v10075_v49  }
0x1619   : > { %4038 = vperm.xlu1 %11505, %v10076_v41  }
0x161c   : > { %10052 = vmatmul.msk.bf16.gmra.mxu1 %vm15780_vm0, %v11322_v54 }
0x161d   : > { %10050 = vmatmul.msk.bf16.gmra.mxu0 %vm15780_vm0, %v11322_v54  ;;  %vm13389_vm0 = vmpackc.low %vm15918_vm14, %vm15918_vm14 }
0x161e   : > { %v15920_v7 = vsel %vm13389_vm0, 4294967295, %v15919_v7 }
0x161f   : > { %15921 = vst [vmem:[#allocation10_spill] sm:$0xff] %v15920_v7 }
0x1620   : > { %4098 = vperm.xlu0 %11483, %v10082_v6  }
0x1662   : > { %v11598_v13 = vpop.permute.xlu2 %11597 }
0x1663   : > { %v11600_v37 = vunpack.i.h.bf16 %v11598_v13  ;;  %v11599_v39 = vunpack.i.l.bf16 %v11598_v13 }
0x167a   : > { %v11588_v55 = vpop.permute.xlu0 %11587 }
0x167b   : > { %v11593_v57 = vpop.permute.xlu1 %11592  ;;  %v11590_v42 = vunpack.i.h.bf16 %v11588_v55  ;;  %v11589_v56 = vunpack.i.l.bf16 %v11588_v55 }
0x167c   : > { %v11595_v62 = vunpack.i.h.bf16 %v11593_v57  ;;  %v11594_v63 = vunpack.i.l.bf16 %v11593_v57 }
0x167e   : > { %v3819_v35 = vsel %vm15914_vm15, %v11590_v42, %v11595_v62  ;;  %v3821_v2 = vsel %vm15915_vm11, %v11595_v62, %v11590_v42  ;;  %v3818_v3 = vsel %vm15916_vm7, %v11589_v56, %v11594_v63  ;;  %v3820_v5 = vsel %vm15917_vm12, %v11594_v63, %v11589_v56  ;;  %vm13405_vm15 = vmpackc.low %vm15924_vm8, %vm15924_vm8 }
0x167f   : > { %v10032_v8 = vpack.c.bf16 %v3821_v2, %v3820_v5  ;;  %v10037_v9 = vpack.c.bf16 %v3819_v35, %v3818_v3  ;;  %vm15922_vm12 = vcmask 130048   ;;  %v15926_v14 = vsel %vm13405_vm15, 4294967295, %v15925_v14 }
0x1680   : > { %vm15923_vm14 = vmmov %vm15922_vm12  ;;  %15927 = vst [vmem:[#allocation11_spill] sm:$0xff] %v15926_v14  ;;  %vm15928_vm11 = vcmp.lt.s32.totalorder %v12525_v21, 124 }
0x1681   : > { %10033 = vmatpush.bf16.msk.msra.mxu2 %vm13374_vm13, %v10032_v8  ;;  %10038 = vmatpush.bf16.msk.msra.mxu3 %vm13389_vm0, %v10037_v9  ;;  %vm15929_vm7 = vmmov %vm15928_vm11 }
0x1682   : > { %v11603_v12 = vpop.permute.xlu0 %11602  ;;  %vm15930_vm0 = vmmov %vm15929_vm7 }
0x1683   : > { %v11605_v10 = vunpack.i.h.bf16 %v11603_v12  ;;  %v11604_v11 = vunpack.i.l.bf16 %v11603_v12  ;;  %v4044_v2 = vpop.permute.xlu1 %4043 }
0x1684   : > { %10034 = vmatmul.msk.bf16.vlgmr.msra.gmra.mxu2 %vm15922_vm12, %v11323_v28  ;;  %10039 = vmatmul.msk.bf16.vlgmr.msra.gmra.mxu3 %vm15923_vm14, %v11323_v28  ;;  %vm15931_vm12 = vmmov %vm15930_vm0  ;;  %vm15932_vm14 = vcmp.lt.s32.totalorder %v12534_v25, 60 }
0x1685   : > { %v3835_v20 = vsel %vm15928_vm11, %v11600_v37, %v11605_v10  ;;  %v3837_v22 = vsel %vm15929_vm7, %v11605_v10, %v11600_v37  ;;  %v3834_v23 = vsel %vm15930_vm0, %v11599_v39, %v11604_v11  ;;  %v3836_v26 = vsel %vm15931_vm12, %v11604_v11, %v11599_v39  ;;  %vm13420_vm13 = vmpackc.low %vm15932_vm14, %vm15932_vm14 }
0x1686   : > { %v15934_v29 = vsel %vm13420_vm13, 4294967295, %v15933_v29  ;;  %v10066_v30 = vpack.c.bf16 %v3835_v20, %v3834_v23  ;;  %v10071_v33 = vpack.c.bf16 %v3837_v22, %v3836_v26  ;;  %vm15936_vm0 = vcmask 130048  }
0x1687   : > { %15935 = vst [vmem:[#allocation12_spill] sm:$0xff] %v15934_v29  ;;  %vm15937_vm8 = vmmov %vm15936_vm0 }
0x1688   : > { %10067 = vmatpush.bf16.msk.msrb.mxu2 %vm13405_vm15, %v10066_v30  ;;  %10072 = vmatpush.bf16.msk.msrb.mxu3 %vm13420_vm13, %v10071_v33  ;;  %vm15938_vm11 = vmmov %vm15936_vm0  ;;  %v4049_v33 = vpop.permute.xlu2 %4048  ;;  %vm15957_vm13 = vcmp.ge.s32.totalorder %v12534_v25, 8 }
0x1689   : > { %vm15939_vm7 = vmmov %vm15936_vm0  ;;  %v3947_v51 = vpop.f32.mrf.mxu1 }
0x168a   : > { %vm15940_vm12 = vmmov %vm15936_vm0  ;;  %v3928_v18 = vpop.f32.mrf.mxu0 }
0x168b   : > { %vm15941_vm14 = vmmov %vm15936_vm0 }
0x168c   : > { %vm13510_vm15 = vmpackc.low %vm15957_vm13, %vm15957_vm13  ;;  %vm15961_vm13 = vcmask 130048  }
0x1691   : > { %v3949_v46 = vpop.f32.mrf.mxu1 }
0x1692   : > { %v3930_v19 = vpop.f32.mrf.mxu0 }
0x1694   : > { %10035 = vmatmul.msk.bf16.gmra.mxu2 %vm15936_vm0, %v11324_v34  ;;  %10040 = vmatmul.msk.bf16.gmra.mxu3 %vm15937_vm8, %v11324_v34  ;;  %vm15942_vm8 = vmmov %vm15936_vm0 }
0x1699   : > { %v3952_v55 = vpop.f32.mrf.mxu1 }
0x169a   : > { %v3933_v54 = vpop.f32.mrf.mxu0 }
0x16a1   : > { %v3954_v9 = vpop.f32.mrf.mxu1 }
0x16a2   : > { %v3935_v8 = vpop.f32.mrf.mxu0 }
0x16a4   : > { %10068 = vmatmul.msk.bf16.vlgmr.msrb.gmra.mxu2 %vm15938_vm11, %v11325_v61  ;;  %10073 = vmatmul.msk.bf16.vlgmr.msrb.gmra.mxu3 %vm15939_vm7, %v11325_v61  ;;  %vm15945_vm11 = vmmov %vm15936_vm0 }
0x16a5   : > { %vm15946_vm7 = vmmov %vm15936_vm0 }
0x16b4   : > { %10069 = vmatmul.msk.bf16.gmra.mxu2 %vm15940_vm12, %v11326_v40  ;;  %10074 = vmatmul.msk.bf16.gmra.mxu3 %vm15941_vm14, %v11326_v40  ;;  %vm15947_vm12 = vmmov %vm15936_vm0 }
0x16b5   : > { %vm15948_vm14 = vmmov %vm15936_vm0 }
0x1707   : > { %v3874_v47 = vpop.f32.mrf.mxu2  ;;  %v3893_v50 = vpop.f32.mrf.mxu3 }
0x1708   : > { %v3929_v12 = vadd.f32 %v3928_v18, %v3874_v47  ;;  %v3948_v11 = vadd.f32 %v3947_v51, %v3893_v50 }
0x170f   : > { %v3876_v32 = vpop.f32.mrf.mxu2  ;;  %v3895_v15 = vpop.f32.mrf.mxu3 }
0x1710   : > { %v3931_v10 = vadd.f32 %v3930_v19, %v3876_v32  ;;  %v3950_v34 = vadd.f32 %v3949_v46, %v3895_v15  ;;  %v4039_v32 = vpop.permute.xlu1 %4038 }
0x1717   : > { %v3879_v45 = vpop.f32.mrf.mxu2  ;;  %v3898_v4 = vpop.f32.mrf.mxu3 }
0x1718   : > { %v3934_v57 = vadd.f32 %v3933_v54, %v3879_v45  ;;  %v3953_v42 = vadd.f32 %v3952_v55, %v3898_v4  ;;  %v4034_v54 = vpop.permute.xlu0 %4033 }
0x171f   : > { %v3881_v53 = vpop.f32.mrf.mxu2  ;;  %v3900_v16 = vpop.f32.mrf.mxu3 }
0x1720   : > { %v3936_v37 = vadd.f32 %v3935_v8, %v3881_v53  ;;  %v3955_v39 = vadd.f32 %v3954_v9, %v3900_v16 }
0x1727   : > { %v3989_v49 = vpop.f32.mrf.mxu2  ;;  %v4008_v41 = vpop.f32.mrf.mxu3 }
0x1728   : > { %v4018_v23 = vadd.f32 %v3989_v49, %v3929_v12  ;;  %v4019_v61 = vadd.f32 %v4008_v41, %v3948_v11 }
0x172a   : > { %v4051_v47 = vadd.f32 %v4034_v54, %v4018_v23  ;;  %v4052_v50 = vadd.f32 %v4034_v54, %v4019_v61 }
0x172f   : > { %v3991_v6 = vpop.f32.mrf.mxu2  ;;  %v4010_v52 = vpop.f32.mrf.mxu3 }
0x1730   : > { %v4020_v40 = vadd.f32 %v3991_v6, %v3931_v10  ;;  %v4021_v55 = vadd.f32 %v4010_v52, %v3950_v34  ;;  %v4094_v10 = vpop.permute.xlu2 %4093 }
0x1732   : > { %v4053_v16 = vadd.f32 %v4039_v32, %v4020_v40  ;;  %v4054_v49 = vadd.f32 %v4039_v32, %v4021_v55  ;;  %v10150_v32 = vld [vmem:[%s15694_s11 + $0x68] sm:$0xff] }
0x1737   : > { %v3994_v56 = vpop.f32.mrf.mxu2  ;;  %v4013_v62 = vpop.f32.mrf.mxu3 }
0x1738   : > { %v4022_v63 = vadd.f32 %v3994_v56, %v3934_v57  ;;  %v4023_v35 = vadd.f32 %v4013_v62, %v3953_v42 }
0x173a   : > { %v4055_v3 = vadd.f32 %v4044_v2, %v4022_v63  ;;  %v4056_v5 = vadd.f32 %v4044_v2, %v4023_v35 }
0x173c   : > { %v4063_v13 = vmul.f32 0.5, %v4055_v3  ;;  %v4064_v28 = vmul.f32 0.5, %v4056_v5 }
0x173e   : > { %12034 = vtanh.f32 %v4063_v13 }
0x173f   : > { %v3996_v20 = vpop.f32.mrf.mxu2  ;;  %v4015_v22 = vpop.f32.mrf.mxu3  ;;  %12036 = vtanh.f32 %v4064_v28 }
0x1740   : > { %v4024_v26 = vadd.f32 %v3996_v20, %v3936_v37  ;;  %v4025_v30 = vadd.f32 %v4015_v22, %v3955_v39  ;;  %v11327_v39 = vld [vmem:[%s15695_s12 + $0x10] sm:$0xff] }
0x1742   : > { %v4057_v45 = vadd.f32 %v4049_v33, %v4024_v26  ;;  %v4058_v4 = vadd.f32 %v4049_v33, %v4025_v30  ;;  %v4099_v33 = vpop.permute.xlu0 %4098 }
0x1744   : > { %v4065_v18 = vmul.f32 0.5, %v4057_v45  ;;  %v4066_v53 = vmul.f32 0.5, %v4058_v4  ;;  %v12035_v51 = vpop.eup %12034 }
0x1745   : > { %v12037_v19 = vpop.eup %12036  ;;  %v4071_v15 = vmul.f32 0.5, %v12035_v51  ;;  %v11328_v51 = vld [vmem:[%s15878_s29 + $0xa0] sm:$0xff] }
0x1746   : > { %12038 = vtanh.f32 %v4065_v18  ;;  %v4072_v46 = vmul.f32 0.5, %v12037_v19 }
0x1747   : > { %12040 = vtanh.f32 %v4066_v53  ;;  %v4075_v52 = vadd.f32 0.5, %v4071_v15 }
0x1748   : > { %12042 = vtanh.f32 %v4051_v47  ;;  %v4076_v56 = vadd.f32 0.5, %v4072_v46 }
0x1749   : > { %12044 = vtanh.f32 %v4052_v50  ;;  %v10156_v50 = vld [vmem:[%s15696_s13 + $0x38] sm:$0xff] }
0x174a   : > { %12046 = vtanh.f32 %v4053_v16  ;;  %v11329_v16 = vld [vmem:[%s15878_s29 + $0xa8] sm:$0xff] }
0x174b   : > { %12048 = vtanh.f32 %v4054_v49 }
0x174c   : > { %v12039_v41 = vpop.eup %12038 }
0x174d   : > { %v12041_v6 = vpop.eup %12040  ;;  %v4073_v57 = vmul.f32 0.5, %v12039_v41 }
0x174e   : > { %v12043_v42 = vpop.eup %12042  ;;  %v4074_v62 = vmul.f32 0.5, %v12041_v6 }
0x174f   : > { %v12045_v63 = vpop.eup %12044  ;;  %v4077_v35 = vadd.f32 0.5, %v4073_v57  ;;  %v4082_v8 = vmul.f32 %v12043_v42, %v4075_v52  ;;  %v15950_v52 = vmov 0 }
0x1750   : > { %v12047_v2 = vpop.eup %12046  ;;  %v4078_v3 = vadd.f32 0.5, %v4074_v62  ;;  %v4083_v13 = vmul.f32 %v12045_v63, %v4076_v56  ;;  %v15958_v63 = vmov 0 }
0x1751   : > { %v12049_v5 = vpop.eup %12048  ;;  %v4084_v9 = vmul.f32 %v12047_v2, %v4077_v35  ;;  %v15959_v63 = vsel %vm13510_vm15, 4294967295, %v15958_v63 }
0x1752   : > { %v4085_v28 = vmul.f32 %v12049_v5, %v4078_v3  ;;  %15960 = vst [vmem:[#allocation14_spill] sm:$0xff] %v15959_v63  ;;  %v11330_v3 = vld [vmem:[%s15878_s29 + $0x90] sm:$0xff] }
0x1753   : > { %v4086_v12 = vpack.c.bf16 %v4084_v9, %v4082_v8 }
0x1754   : > { %v4087_v37 = vpack.c.bf16 %v4085_v28, %v4083_v13 }
0x1755   : > { %4116 = vmatpush.bf16.msra.mxu0 %v4086_v12 }
0x1756   : > { %4130 = vmatpush.bf16.msra.mxu1 %v4087_v37  ;;  %v15964_v37 = vmov 0 }
0x1758   : > { %10087 = vmatmul.msk.bf16.vlgmr.msra.gmra.mxu0 %vm15936_vm0, %v11327_v39  ;;  %vm15949_vm0 = vcmp.ge.s32.totalorder %v12532_v24, 8 }
0x1759   : > { %10088 = vmatmul.msk.bf16.vlgmr.msra.gmra.mxu1 %vm15942_vm8, %v11327_v39  ;;  %vm13495_vm8 = vmpackc.low %vm15949_vm0, %vm15949_vm0 }
0x175a   : > { %v15951_v52 = vsel %vm13495_vm8, 4294967295, %v15950_v52  ;;  %vm15962_vm0 = vmmov %vm15961_vm13 }
0x175b   : > { %15952 = vst [vmem:[#allocation13_spill] sm:$0xff] %v15951_v52 }
0x17d5   : > { %v4118_v11 = vpop.f32.mrf.mxu0 }
0x17d6   : > { %v4119_v20 = vadd.f32 %v4118_v11, %v4094_v10  ;;  %v4132_v22 = vpop.f32.mrf.mxu1 }
0x17d7   : > { %v4133_v23 = vadd.f32 %v4132_v22, %v4094_v10  ;;  %v15972_v22 = vmov 0 }
0x17d8   : > { %v13449_v26 = vadd.f32 %v4119_v20, %v13327_v58  ;;  %v10152_v58 = vld [vmem:[%s15694_s11 + $0x78] sm:$0xff] }
0x17d9   : > { %v13452_v30 = vadd.f32 %v4133_v23, %v13329_v38  ;;  %v10151_v38 = vld [vmem:[%s15694_s11 + $0x70] sm:$0xff] }
0x17dd   : > { %v4120_v34 = vpop.f32.mrf.mxu0 }
0x17de   : > { %v4121_v61 = vadd.f32 %v4120_v34, %v4099_v33  ;;  %v4134_v40 = vpop.f32.mrf.mxu1  ;;  %v11331_v34 = vld [vmem:[%s15878_s29 + $0x98] sm:$0xff] }
0x17df   : > { %v4135_v45 = vadd.f32 %v4134_v40, %v4099_v33  ;;  %v11333_v40 = vld [vmem:[%s15878_s29 + $0xb8] sm:$0xff] }
0x17e0   : > { %v11616_v4 = vpack.i.bf16 %v4121_v61, %v4119_v20  ;;  %v4141_v54 = vpack.c.bf16 %v4121_v61, %v4119_v20  ;;  %v13455_v55 = vadd.f32 %v4121_v61, %v13335_v1  ;;  %v10155_v1 = vld [vmem:[%s15696_s13 + $0x30] sm:$0xff] }
0x17e1   : > { %v11611_v47 = vpack.i.bf16 %v4135_v45, %v4133_v23  ;;  %v4142_v18 = vpack.c.bf16 %v4135_v45, %v4133_v23  ;;  %v13458_v53 = vadd.f32 %v4135_v45, %v13337_v48  ;;  %v10149_v48 = vld [vmem:[%s15694_s11 + $0x60] sm:$0xff]  ;;  %v11332_v61 = vld [vmem:[%s15878_s29 + $0xb0] sm:$0xff] }
0x17e2   : > { %11617 = vrot.lane.b32.xlu0 %v11616_v4, %s15943_s24  ;;  %11607 = vrot.lane.b32.xlu1 %v11616_v4, %s15944_s3 }
0x17e3   : > { %11612 = vrot.lane.b32.xlu2 %v11611_v47, %s15944_s3  ;;  %4283 = vmatpush.bf16.msra.mxu3 %v4142_v18 }
0x17e4   : > { %4264 = vmatpush.bf16.msra.mxu2 %v4141_v54 }
0x17e6   : > { %10125 = vmatmul.msk.bf16.vlgmr.msra.gmra.mxu3 %vm15945_vm11, %v11328_v51  ;;  %vm15953_vm11 = vcmp.lt.s32.totalorder %v12525_v21, 8 }
0x17e7   : > { %10123 = vmatmul.msk.bf16.vlgmr.msra.gmra.mxu2 %vm15946_vm7, %v11328_v51  ;;  %vm15954_vm7 = vmmov %vm15953_vm11 }
0x17ea   : > { %4386 = vperm.xlu0 %11483, %v10152_v58   ;;  %11622 = vrot.lane.b32.xlu1 %v11611_v47, %s15943_s24 }
0x17eb   : > { %4381 = vperm.xlu2 %11494, %v10151_v38  }
0x17f2   : > { %4431 = vperm.xlu0 %11483, %v10155_v1   ;;  %4371 = vperm.xlu1 %11505, %v10149_v48  }
0x17f3   : > { %4376 = vperm.xlu2 %11494, %v10150_v32  }
0x17f6   : > { %10126 = vmatmul.msk.bf16.gmra.mxu3 %vm15947_vm12, %v11329_v16  ;;  %vm15955_vm12 = vmmov %vm15954_vm7 }
0x17f7   : > { %10124 = vmatmul.msk.bf16.gmra.mxu2 %vm15948_vm14, %v11329_v16  ;;  %vm15956_vm14 = vmmov %vm15954_vm7 }
0x17fa   : > { %4436 = vperm.xlu1 %11505, %v10156_v50  }
0x183d   : > { %v11613_v19 = vpop.permute.xlu2 %11612 }
0x183e   : > { %v11615_v15 = vunpack.i.h.bf16 %v11613_v19  ;;  %v11614_v46 = vunpack.i.l.bf16 %v11613_v19 }
0x1854   : > { %v11608_v49 = vpop.permute.xlu1 %11607  ;;  %v11618_v5 = vpop.permute.xlu0 %11617 }
0x1855   : > { %v11610_v41 = vunpack.i.h.bf16 %v11608_v49  ;;  %v11609_v6 = vunpack.i.l.bf16 %v11608_v49  ;;  %v11620_v9 = vunpack.i.h.bf16 %v11618_v5  ;;  %v11619_v13 = vunpack.i.l.bf16 %v11618_v5 }
0x1857   : > { %v4157_v57 = vsel %vm15953_vm11, %v11610_v41, %v11615_v15  ;;  %v4159_v42 = vsel %vm15954_vm7, %v11615_v15, %v11610_v41  ;;  %v4156_v56 = vsel %vm15955_vm12, %v11609_v6, %v11614_v46  ;;  %v4158_v62 = vsel %vm15956_vm14, %v11614_v46, %v11609_v6 }
0x1858   : > { %v10106_v35 = vpack.c.bf16 %v4159_v42, %v4158_v62  ;;  %v10111_v2 = vpack.c.bf16 %v4157_v57, %v4156_v56  ;;  %vm15963_vm11 = vcmp.lt.s32.totalorder %v12532_v24, 56  ;;  %vm15967_vm12 = vcmp.lt.s32.totalorder %v12525_v21, 120 }
0x1859   : > { %vm13526_vm7 = vmpackc.low %vm15963_vm11, %vm15963_vm11 }
0x185a   : > { %10107 = vmatpush.bf16.msk.msrb.mxu0 %vm13495_vm8, %v10106_v35  ;;  %10112 = vmatpush.bf16.msk.msrb.mxu1 %vm13510_vm15, %v10111_v2  ;;  %v15965_v37 = vsel %vm13526_vm7, 4294967295, %v15964_v37  ;;  %vm15968_vm14 = vmmov %vm15967_vm12  ;;  %v4382_v2 = vpop.permute.xlu2 %4381 }
0x185b   : > { %15966 = vst [vmem:[#allocation15_spill] sm:$0xff] %v15965_v37  ;;  %vm15969_vm15 = vmmov %vm15967_vm12 }
0x185c   : > { %v11623_v8 = vpop.permute.xlu1 %11622 }
0x185d   : > { %v11625_v28 = vunpack.i.h.bf16 %v11623_v8  ;;  %v11624_v12 = vunpack.i.l.bf16 %v11623_v8  ;;  %10108 = vmatmul.msk.bf16.vlgmr.msrb.gmra.mxu0 %vm15961_vm13, %v11330_v3  ;;  %10113 = vmatmul.msk.bf16.vlgmr.msrb.gmra.mxu1 %vm15962_vm0, %v11330_v3  ;;  %vm15970_vm13 = vmmov %vm15967_vm12  ;;  %vm15971_vm0 = vcmp.lt.s32.totalorder %v12534_v25, 56 }
0x185e   : > { %vm13541_vm8 = vmpackc.low %vm15971_vm0, %vm15971_vm0 }
0x185f   : > { %v4173_v39 = vsel %vm15967_vm12, %v11620_v9, %v11625_v28  ;;  %v4175_v10 = vsel %vm15968_vm14, %v11625_v28, %v11620_v9  ;;  %v4172_v11 = vsel %vm15969_vm15, %v11619_v13, %v11624_v12  ;;  %v4174_v20 = vsel %vm15970_vm13, %v11624_v12, %v11619_v13 }
0x1860   : > { %v15973_v22 = vsel %vm13541_vm8, 4294967295, %v15972_v22  ;;  %v10140_v23 = vpack.c.bf16 %v4173_v39, %v4172_v11  ;;  %v10145_v33 = vpack.c.bf16 %v4175_v10, %v4174_v20  ;;  %vm15975_vm15 = vcmask 130048  }
0x1861   : > { %15974 = vst [vmem:[#allocation16_spill] sm:$0xff] %v15973_v22  ;;  %vm15976_vm11 = vmmov %vm15975_vm15 }
0x1862   : > { %10141 = vmatpush.bf16.msk.msra.mxu0 %vm13526_vm7, %v10140_v23  ;;  %10146 = vmatpush.bf16.msk.msra.mxu1 %vm13541_vm8, %v10145_v33  ;;  %vm15977_vm12 = vmmov %vm15976_vm11  ;;  %vm15995_vm8 = vcmp.ge.s32.totalorder %v12534_v25, 16 }
0x1863   : > { %vm15978_vm14 = vmmov %vm15976_vm11 }
0x1864   : > { %vm15979_vm13 = vmmov %vm15976_vm11 }
0x1865   : > { %vm15980_vm0 = vmmov %vm15976_vm11 }
0x1866   : > { %vm10184_vm7 = vmpackc.low %vm15995_vm8, %vm15995_vm8  ;;  %vm16001_vm8 = vcmp.lt.s32.totalorder %v12534_v25, 48 }
0x1869   : > { %v4285_v38 = vpop.f32.mrf.mxu3 }
0x186a   : > { %v4266_v1 = vpop.f32.mrf.mxu2 }
0x186d   : > { %10109 = vmatmul.msk.bf16.gmra.mxu0 %vm15975_vm15, %v11331_v34  ;;  %10114 = vmatmul.msk.bf16.gmra.mxu1 %vm15976_vm11, %v11331_v34  ;;  %vm15981_vm15 = vmmov %vm15980_vm0 }
0x186e   : > { %vm15982_vm11 = vmmov %vm15980_vm0 }
0x1871   : > { %v4287_v50 = vpop.f32.mrf.mxu3 }
0x1872   : > { %v4268_v51 = vpop.f32.mrf.mxu2 }
0x1879   : > { %v4290_v46 = vpop.f32.mrf.mxu3 }
0x187a   : > { %v4271_v41 = vpop.f32.mrf.mxu2 }
0x187d   : > { %10142 = vmatmul.msk.bf16.vlgmr.msra.gmra.mxu0 %vm15977_vm12, %v11332_v61  ;;  %10147 = vmatmul.msk.bf16.vlgmr.msra.gmra.mxu1 %vm15978_vm14, %v11332_v61  ;;  %vm15985_vm12 = vmmov %vm15980_vm0 }
0x187e   : > { %vm15986_vm14 = vmmov %vm15980_vm0 }
0x1881   : > { %v4292_v8 = vpop.f32.mrf.mxu3 }
0x1882   : > { %v4273_v9 = vpop.f32.mrf.mxu2 }
0x188d   : > { %10143 = vmatmul.msk.bf16.gmra.mxu0 %vm15979_vm13, %v11333_v40  ;;  %10148 = vmatmul.msk.bf16.gmra.mxu1 %vm15980_vm0, %v11333_v40  ;;  %vm15987_vm13 = vmmov %vm15980_vm0 }
0x18da   : > { %v4212_v45 = vpop.f32.mrf.mxu0  ;;  %v4231_v4 = vpop.f32.mrf.mxu1 }
0x18db   : > { %v4267_v12 = vadd.f32 %v4266_v1, %v4212_v45  ;;  %v4286_v11 = vadd.f32 %v4285_v38, %v4231_v4  ;;  %v4377_v4 = vpop.permute.xlu2 %4376 }
0x18e2   : > { %v4214_v54 = vpop.f32.mrf.mxu0  ;;  %v4233_v47 = vpop.f32.mrf.mxu1 }
0x18e3   : > { %v4269_v20 = vadd.f32 %v4268_v51, %v4214_v54 }
0x18ea   : > { %v4217_v18 = vpop.f32.mrf.mxu0  ;;  %v4236_v58 = vpop.f32.mrf.mxu1 }
0x18eb   : > { %v4291_v6 = vadd.f32 %v4290_v46, %v4236_v58  ;;  %v4272_v57 = vadd.f32 %v4271_v41, %v4217_v18  ;;  %v4387_v18 = vpop.permute.xlu0 %4386  ;;  %v4288_v58 = vadd.f32 %v4287_v50, %v4233_v47 }
0x18f2   : > { %v4219_v48 = vpop.f32.mrf.mxu0  ;;  %v4238_v32 = vpop.f32.mrf.mxu1 }
0x18f3   : > { %v4293_v39 = vadd.f32 %v4292_v8, %v4238_v32  ;;  %v4274_v10 = vadd.f32 %v4273_v9, %v4219_v48 }
0x18fa   : > { %v4327_v16 = vpop.f32.mrf.mxu0  ;;  %v4346_v19 = vpop.f32.mrf.mxu1 }
0x18fb   : > { %v4356_v34 = vadd.f32 %v4327_v16, %v4267_v12  ;;  %v4357_v46 = vadd.f32 %v4346_v19, %v4286_v11 }
0x1902   : > { %v4329_v49 = vpop.f32.mrf.mxu0  ;;  %v4348_v15 = vpop.f32.mrf.mxu1 }
0x1903   : > { %v4358_v41 = vadd.f32 %v4329_v49, %v4269_v20 }
0x1905   : > { %v4391_v32 = vadd.f32 %v4377_v4, %v4358_v41 }
0x190a   : > { %v4332_v42 = vpop.f32.mrf.mxu0  ;;  %v4351_v56 = vpop.f32.mrf.mxu1 }
0x190b   : > { %v4360_v62 = vadd.f32 %v4332_v42, %v4272_v57  ;;  %v4361_v35 = vadd.f32 %v4351_v56, %v4291_v6  ;;  %v4372_v42 = vpop.permute.xlu1 %4371  ;;  %v4359_v56 = vadd.f32 %v4348_v15, %v4288_v58 }
0x190c   : > { %v4389_v45 = vadd.f32 %v4372_v42, %v4356_v34  ;;  %v4390_v54 = vadd.f32 %v4372_v42, %v4357_v46  ;;  %v4432_v34 = vpop.permute.xlu0 %4431 }
0x190d   : > { %v4393_v3 = vadd.f32 %v4382_v2, %v4360_v62  ;;  %v4394_v5 = vadd.f32 %v4382_v2, %v4361_v35  ;;  %v4392_v16 = vadd.f32 %v4377_v4, %v4359_v56 }
0x190f   : > { %v4401_v13 = vmul.f32 0.5, %v4393_v3  ;;  %v4402_v28 = vmul.f32 0.5, %v4394_v5 }
0x1911   : > { %12050 = vtanh.f32 %v4401_v13 }
0x1912   : > { %v4334_v23 = vpop.f32.mrf.mxu0  ;;  %v4353_v33 = vpop.f32.mrf.mxu1  ;;  %12052 = vtanh.f32 %v4402_v28 }
0x1913   : > { %v4362_v61 = vadd.f32 %v4334_v23, %v4274_v10  ;;  %v4363_v40 = vadd.f32 %v4353_v33, %v4293_v39  ;;  %v11334_v33 = vld [vmem:[%s15695_s12 + $0x18] sm:$0xff] }
0x1915   : > { %v4395_v6 = vadd.f32 %v4387_v18, %v4362_v61  ;;  %v4396_v57 = vadd.f32 %v4387_v18, %v4363_v40 }
0x1917   : > { %v4403_v1 = vmul.f32 0.5, %v4395_v6  ;;  %v4404_v48 = vmul.f32 0.5, %v4396_v57  ;;  %v12051_v38 = vpop.eup %12050  ;;  %v4437_v6 = vpop.permute.xlu1 %4436 }
0x1918   : > { %v12053_v51 = vpop.eup %12052  ;;  %v4409_v47 = vmul.f32 0.5, %v12051_v38 }
0x1919   : > { %12054 = vtanh.f32 %v4403_v1  ;;  %v4410_v50 = vmul.f32 0.5, %v12053_v51  ;;  %v10224_v51 = vld [vmem:[%s15694_s11 + $0x88] sm:$0xff] }
0x191a   : > { %12056 = vtanh.f32 %v4404_v48  ;;  %v4413_v15 = vadd.f32 0.5, %v4409_v47  ;;  %v11335_v47 = vld [vmem:[%s15878_s29 + $0xd0] sm:$0xff] }
0x191b   : > { %12058 = vtanh.f32 %v4389_v45  ;;  %v4414_v2 = vadd.f32 0.5, %v4410_v50 }
0x191c   : > { %12060 = vtanh.f32 %v4390_v54 }
0x191d   : > { %12062 = vtanh.f32 %v4391_v32 }
0x191e   : > { %12064 = vtanh.f32 %v4392_v16  ;;  %v10230_v16 = vld [vmem:[%s15696_s13 + $0x48] sm:$0xff] }
0x191f   : > { %v12055_v19 = vpop.eup %12054 }
0x1920   : > { %v12057_v49 = vpop.eup %12056  ;;  %v4411_v62 = vmul.f32 0.5, %v12055_v19  ;;  %v11336_v19 = vld [vmem:[%s15878_s29 + $0xd8] sm:$0xff] }
0x1921   : > { %v12059_v35 = vpop.eup %12058  ;;  %v4412_v3 = vmul.f32 0.5, %v12057_v49 }
0x1922   : > { %v12061_v5 = vpop.eup %12060  ;;  %v4415_v8 = vadd.f32 0.5, %v4411_v62  ;;  %v4420_v12 = vmul.f32 %v12059_v35, %v4413_v15 }
0x1923   : > { %v12063_v9 = vpop.eup %12062  ;;  %v4416_v13 = vadd.f32 0.5, %v4412_v3  ;;  %v4421_v10 = vmul.f32 %v12061_v5, %v4414_v2 }
0x1924   : > { %v12065_v28 = vpop.eup %12064  ;;  %v4422_v39 = vmul.f32 %v12063_v9, %v4415_v8 }
0x1925   : > { %v4423_v11 = vmul.f32 %v12065_v28, %v4416_v13 }
0x1926   : > { %v4424_v20 = vpack.c.bf16 %v4422_v39, %v4420_v12 }
0x1927   : > { %v4425_v23 = vpack.c.bf16 %v4423_v11, %v4421_v10 }
0x1928   : > { %4454 = vmatpush.bf16.msrb.mxu2 %v4424_v20 }
0x1929   : > { %4468 = vmatpush.bf16.msrb.mxu3 %v4425_v23 }
0x192b   : > { %10161 = vmatmul.msk.bf16.vlgmr.msrb.gmra.mxu2 %vm15981_vm15, %v11334_v33  ;;  %vm15988_vm15 = vcmp.ge.s32.totalorder %v12532_v24, 16 }
0x192c   : > { %10162 = vmatmul.msk.bf16.vlgmr.msrb.gmra.mxu3 %vm15982_vm11, %v11334_v33  ;;  %vm13616_vm11 = vmpackc.low %vm15988_vm15, %vm15988_vm15  ;;  %vm15996_vm15 = vcmp.lt.s32.totalorder %v12525_v21, 16 }
0x192d   : > { %vm15997_vm2 = vmmov %vm15996_vm15 }
0x19ae   : > { %v4456_v61 = vpop.f32.mrf.mxu2 }
0x19af   : > { %v4457_v40 = vadd.f32 %v4456_v61, %v4432_v34  ;;  %v4470_v18 = vpop.f32.mrf.mxu3 }
0x19b0   : > { %v4471_v58 = vadd.f32 %v4470_v18, %v4432_v34 }
0x19b1   : > { %v13570_v46 = vadd.f32 %v4457_v40, %v13449_v26  ;;  %v10226_v26 = vld [vmem:[%s15694_s11 + $0x98] sm:$0xff] }
0x19b2   : > { %v13573_v41 = vadd.f32 %v4471_v58, %v13452_v30  ;;  %v10225_v30 = vld [vmem:[%s15694_s11 + $0x90] sm:$0xff] }
0x19b6   : > { %v4458_v57 = vpop.f32.mrf.mxu2 }
0x19b7   : > { %v4459_v42 = vadd.f32 %v4458_v57, %v4437_v6  ;;  %v4472_v56 = vpop.f32.mrf.mxu3  ;;  %v11337_v57 = vld [vmem:[%s15878_s29 + $0xc0] sm:$0xff] }
0x19b8   : > { %v4473_v45 = vadd.f32 %v4472_v56, %v4437_v6  ;;  %v11339_v56 = vld [vmem:[%s15878_s29 + $0xe0] sm:$0xff] }
0x19b9   : > { %v11636_v1 = vpack.i.bf16 %v4459_v42, %v4457_v40  ;;  %v4479_v48 = vpack.c.bf16 %v4459_v42, %v4457_v40  ;;  %v13576_v4 = vadd.f32 %v4459_v42, %v13455_v55  ;;  %v10229_v55 = vld [vmem:[%s15696_s13 + $0x40] sm:$0xff]  ;;  %v11338_v42 = vld [vmem:[%s15878_s29 + $0xc8] sm:$0xff] }
0x19ba   : > { %v11631_v54 = vpack.i.bf16 %v4473_v45, %v4471_v58  ;;  %v4480_v38 = vpack.c.bf16 %v4473_v45, %v4471_v58  ;;  %v13579_v32 = vadd.f32 %v4473_v45, %v13458_v53  ;;  %v10223_v53 = vld [vmem:[%s15694_s11 + $0x80] sm:$0xff]  ;;  %v11340_v45 = vld [vmem:[%s15878_s29 + $0xe8] sm:$0xff] }
0x19bb   : > { %11637 = vrot.lane.b32.xlu1 %v11636_v1, %s15983_s22  ;;  %11627 = vrot.lane.b32.xlu2 %v11636_v1, %s15984_s25 }
0x19bc   : > { %11632 = vrot.lane.b32.xlu0 %v11631_v54, %s15984_s25  ;;  %4621 = vmatpush.bf16.msrb.mxu1 %v4480_v38 }
0x19bd   : > { %4602 = vmatpush.bf16.msrb.mxu0 %v4479_v48 }
0x19bf   : > { %10199 = vmatmul.msk.bf16.vlgmr.msrb.gmra.mxu1 %vm15986_vm14, %v11335_v47 }
0x19c0   : > { %10197 = vmatmul.msk.bf16.vlgmr.msrb.gmra.mxu0 %vm15985_vm12, %v11335_v47  ;;  %vm15991_vm12 = vcmp.lt.s32.totalorder %v12525_v21, 112 }
0x19c1   : > { %vm15992_vm14 = vmmov %vm15991_vm12 }
0x19c3   : > { %4724 = vperm.xlu1 %11505, %v10226_v26   ;;  %11642 = vrot.lane.b32.xlu2 %v11631_v54, %s15983_s22  ;;  %s16158_s22 = sld [smem:[#allocation35_spill]] }
0x19c4   : > { %4719 = vperm.xlu0 %11483, %v10225_v30  }
0x19cb   : > { %4769 = vperm.xlu1 %11505, %v10229_v55   ;;  %4709 = vperm.xlu2 %11494, %v10223_v53  }
0x19cc   : > { %4714 = vperm.xlu0 %11483, %v10224_v51  }
0x19cf   : > { %10200 = vmatmul.msk.bf16.gmra.mxu1 %vm15980_vm0, %v11336_v19  ;;  %vm15994_vm0 = vmmov %vm15991_vm12 }
0x19d0   : > { %10198 = vmatmul.msk.bf16.gmra.mxu0 %vm15987_vm13, %v11336_v19  ;;  %vm15993_vm13 = vmmov %vm15991_vm12 }
0x19d3   : > { %4774 = vperm.xlu2 %11494, %v10230_v16  }
0x1a15   : > { %v11628_v50 = vpop.permute.xlu2 %11627 }
0x1a16   : > { %v11630_v8 = vunpack.i.h.bf16 %v11628_v50  ;;  %v11629_v9 = vunpack.i.l.bf16 %v11628_v50 }
0x1a1d   : > { %v11643_v49 = vpop.permute.xlu2 %11642 }
0x1a1e   : > { %v11645_v62 = vunpack.i.h.bf16 %v11643_v49  ;;  %v11644_v35 = vunpack.i.l.bf16 %v11643_v49 }
0x1a2d   : > { %v11638_v15 = vpop.permute.xlu1 %11637 }
0x1a2e   : > { %v11633_v2 = vpop.permute.xlu0 %11632  ;;  %v11640_v3 = vunpack.i.h.bf16 %v11638_v15  ;;  %v11639_v5 = vunpack.i.l.bf16 %v11638_v15 }
0x1a2f   : > { %v11635_v13 = vunpack.i.h.bf16 %v11633_v2  ;;  %v11634_v28 = vunpack.i.l.bf16 %v11633_v2 }
0x1a30   : > { %v4510_v39 = vsel %vm15991_vm12, %v11639_v5, %v11644_v35  ;;  %v4511_v10 = vsel %vm15992_vm14, %v11640_v3, %v11645_v62  ;;  %v4512_v11 = vsel %vm15993_vm13, %v11644_v35, %v11639_v5  ;;  %v4513_v20 = vsel %vm15994_vm0, %v11645_v62, %v11640_v3  ;;  %vm15998_vm12 = vmmov %vm15997_vm2 }
0x1a31   : > { %v4494_v23 = vsel %vm15996_vm15, %v11629_v9, %v11634_v28  ;;  %v4495_v33 = vsel %vm15997_vm2, %v11630_v8, %v11635_v13  ;;  %v4496_v34 = vsel %vm15998_vm12, %v11634_v28, %v11629_v9  ;;  %vm15999_vm14 = vmmov %vm15997_vm2  ;;  %vm16000_vm13 = vcmp.lt.s32.totalorder %v12532_v24, 48 }
0x1a32   : > { %v4497_v61 = vsel %vm15999_vm14, %v11635_v13, %v11630_v8  ;;  %vm10213_vm0 = vmpackc.low %vm16000_vm13, %vm16000_vm13  ;;  %v10185_v18 = vpack.c.bf16 %v4495_v33, %v4494_v23  ;;  %v10214_v58 = vpack.c.bf16 %v4511_v10, %v4510_v39  ;;  %v10219_v6 = vpack.c.bf16 %v4513_v20, %v4512_v11 }
0x1a33   : > { %v10180_v40 = vpack.c.bf16 %v4497_v61, %v4496_v34  ;;  %vm10218_vm15 = vmpackc.low %vm16001_vm8, %vm16001_vm8  ;;  %vm16002_vm2 = vcmask 130048  }
0x1a34   : > { %10186 = vmatpush.bf16.msk.msra.mxu3 %vm10184_vm7, %v10185_v18  ;;  %vm16003_vm12 = vmmov %vm16002_vm2 }
0x1a35   : > { %10181 = vmatpush.bf16.msk.msra.mxu2 %vm13616_vm11, %v10180_v40  ;;  %vm16004_vm14 = vmmov %vm16002_vm2 }
0x1a36   : > { %vm16005_vm13 = vmmov %vm16002_vm2  ;;  %v4720_v12 = vpop.permute.xlu0 %4719 }
0x1a37   : > { %10187 = vmatmul.msk.bf16.vlgmr.msra.gmra.mxu3 %vm16003_vm12, %v11337_v57  ;;  %vm16006_vm11 = vmmov %vm16002_vm2 }
0x1a38   : > { %10220 = vmatpush.bf16.msk.msrb.mxu3 %vm10218_vm15, %v10219_v6  ;;  %10182 = vmatmul.msk.bf16.vlgmr.msra.gmra.mxu2 %vm16002_vm2, %v11337_v57  ;;  %vm16007_vm7 = vmmov %vm16002_vm2 }
0x1a39   : > { %10215 = vmatpush.bf16.msk.msrb.mxu2 %vm10213_vm0, %v10214_v58  ;;  %vm16008_vm0 = vmmov %vm16002_vm2 }
0x1a3a   : > { %vm16009_vm8 = vmmov %vm16008_vm0 }
0x1a3b   : > { %vm16010_vm15 = vmmov %vm16008_vm0 }
0x1a3c   : > { %v4623_v53 = vpop.f32.mrf.mxu1  ;;  %vm16011_vm2 = vmmov %vm16008_vm0 }
0x1a3d   : > { %v4604_v55 = vpop.f32.mrf.mxu0  ;;  %vm16014_vm12 = vmmov %vm16008_vm0 }
0x1a44   : > { %v4625_v50 = vpop.f32.mrf.mxu1 }
0x1a45   : > { %v4606_v47 = vpop.f32.mrf.mxu0 }
0x1a47   : > { %10188 = vmatmul.msk.bf16.gmra.mxu3 %vm16005_vm13, %v11338_v42  ;;  %vm16016_vm13 = vmmov %vm16008_vm0 }
0x1a48   : > { %10183 = vmatmul.msk.bf16.gmra.mxu2 %vm16004_vm14, %v11338_v42  ;;  %vm16015_vm14 = vmmov %vm16008_vm0 }
0x1a4c   : > { %v4628_v2 = vpop.f32.mrf.mxu1 }
0x1a4d   : > { %v4609_v35 = vpop.f32.mrf.mxu0 }
0x1a54   : > { %v4630_v20 = vpop.f32.mrf.mxu1 }
0x1a55   : > { %v4611_v11 = vpop.f32.mrf.mxu0 }
0x1a57   : > { %10221 = vmatmul.msk.bf16.vlgmr.msrb.gmra.mxu3 %vm16007_vm7, %v11339_v56  ;;  %vm16018_vm7 = vcmp.ge.s32.totalorder %v12532_v24, 32 }
0x1a58   : > { %10216 = vmatmul.msk.bf16.vlgmr.msrb.gmra.mxu2 %vm16006_vm11, %v11339_v56  ;;  %vm16017_vm11 = vmmov %vm16008_vm0 }
0x1a67   : > { %10222 = vmatmul.msk.bf16.gmra.mxu3 %vm16009_vm8, %v11340_v45  ;;  %vm16019_vm8 = vcmp.lt.s32.totalorder %v12525_v21, 32 }
0x1a68   : > { %10217 = vmatmul.msk.bf16.gmra.mxu2 %vm16008_vm0, %v11340_v45  ;;  %vm10253_vm0 = vmpackc.low %vm16018_vm7, %vm16018_vm7 }
0x1a69   : > { %vm16024_vm7 = vmmov %vm16017_vm11 }
0x1aba   : > { %v4569_v48 = vpop.f32.mrf.mxu3 }
0x1abb   : > { %v4550_v1 = vpop.f32.mrf.mxu2  ;;  %v4624_v18 = vadd.f32 %v4623_v53, %v4569_v48  ;;  %v4715_v48 = vpop.permute.xlu0 %4714 }
0x1abc   : > { %v4605_v34 = vadd.f32 %v4604_v55, %v4550_v1 }
0x1ac2   : > { %v4571_v38 = vpop.f32.mrf.mxu3 }
0x1ac3   : > { %v4552_v54 = vpop.f32.mrf.mxu2 }
0x1ac4   : > { %v4607_v58 = vadd.f32 %v4606_v47, %v4552_v54 }
0x1aca   : > { %v4574_v30 = vpop.f32.mrf.mxu3 }
0x1acb   : > { %v4555_v26 = vpop.f32.mrf.mxu2  ;;  %v4629_v5 = vadd.f32 %v4628_v2, %v4574_v30  ;;  %v4626_v30 = vadd.f32 %v4625_v50, %v4571_v38 }
0x1acc   : > { %v4610_v3 = vadd.f32 %v4609_v35, %v4555_v26  ;;  %v4725_v26 = vpop.permute.xlu1 %4724 }
0x1ad2   : > { %v4576_v16 = vpop.f32.mrf.mxu3 }
0x1ad3   : > { %v4557_v51 = vpop.f32.mrf.mxu2  ;;  %v4631_v40 = vadd.f32 %v4630_v20, %v4576_v16 }
0x1ad4   : > { %v4612_v61 = vadd.f32 %v4611_v11, %v4557_v51 }
0x1ada   : > { %v4684_v49 = vpop.f32.mrf.mxu3 }
0x1adb   : > { %v4665_v19 = vpop.f32.mrf.mxu2  ;;  %v4695_v35 = vadd.f32 %v4684_v49, %v4624_v18 }
0x1adc   : > { %v4694_v42 = vadd.f32 %v4665_v19, %v4605_v34 }
0x1ae2   : > { %v4686_v62 = vpop.f32.mrf.mxu3 }
0x1ae3   : > { %v4667_v15 = vpop.f32.mrf.mxu2 }
0x1ae4   : > { %v4696_v2 = vadd.f32 %v4667_v15, %v4607_v58 }
0x1ae6   : > { %v4729_v16 = vadd.f32 %v4715_v48, %v4696_v2 }
0x1aea   : > { %v4689_v9 = vpop.f32.mrf.mxu3 }
0x1aeb   : > { %v4670_v8 = vpop.f32.mrf.mxu2  ;;  %v4699_v28 = vadd.f32 %v4689_v9, %v4629_v5  ;;  %v4697_v9 = vadd.f32 %v4686_v62, %v4626_v30 }
0x1aec   : > { %v4698_v13 = vadd.f32 %v4670_v8, %v4610_v3  ;;  %v4710_v8 = vpop.permute.xlu2 %4709 }
0x1aed   : > { %v4732_v10 = vadd.f32 %v4720_v12, %v4699_v28  ;;  %v4727_v1 = vadd.f32 %v4710_v8, %v4694_v42  ;;  %v4728_v54 = vadd.f32 %v4710_v8, %v4695_v35  ;;  %v4730_v19 = vadd.f32 %v4715_v48, %v4697_v9  ;;  %v4770_v42 = vpop.permute.xlu1 %4769 }
0x1aee   : > { %v4731_v39 = vadd.f32 %v4720_v12, %v4698_v13 }
0x1aef   : > { %v4740_v33 = vmul.f32 0.5, %v4732_v10 }
0x1af0   : > { %v4739_v23 = vmul.f32 0.5, %v4731_v39 }
0x1af2   : > { %v4691_v57 = vpop.f32.mrf.mxu3  ;;  %12066 = vtanh.f32 %v4739_v23 }
0x1af3   : > { %v4672_v6 = vpop.f32.mrf.mxu2  ;;  %v4701_v45 = vadd.f32 %v4691_v57, %v4631_v40  ;;  %12068 = vtanh.f32 %v4740_v33  ;;  %v11341_v57 = vld [vmem:[%s15695_s12 + $0x20] sm:$0xff] }
0x1af4   : > { %v4700_v56 = vadd.f32 %v4672_v6, %v4612_v61 }
0x1af5   : > { %v4734_v5 = vadd.f32 %v4725_v26, %v4701_v45 }
0x1af6   : > { %v4733_v3 = vadd.f32 %v4725_v26, %v4700_v56 }
0x1af7   : > { %v4742_v51 = vmul.f32 0.5, %v4734_v5 }
0x1af8   : > { %v4741_v55 = vmul.f32 0.5, %v4733_v3  ;;  %v12067_v53 = vpop.eup %12066  ;;  %v4775_v3 = vpop.permute.xlu2 %4774 }
0x1af9   : > { %v12069_v47 = vpop.eup %12068  ;;  %v4747_v38 = vmul.f32 0.5, %v12067_v53 }
0x1afa   : > { %12070 = vtanh.f32 %v4741_v55  ;;  %v4748_v50 = vmul.f32 0.5, %v12069_v47  ;;  %v10298_v47 = vld [vmem:[%s15694_s11 + $0xa8] sm:$0xff] }
0x1afb   : > { %12072 = vtanh.f32 %v4742_v51  ;;  %v4751_v62 = vadd.f32 0.5, %v4747_v38  ;;  %v10304_v38 = vld [vmem:[%s15696_s13 + $0x58] sm:$0xff] }
0x1afc   : > { %12074 = vtanh.f32 %v4727_v1  ;;  %v4752_v12 = vadd.f32 0.5, %v4748_v50  ;;  %v10317_v50 = vld [vmem:[%s15694_s11 + $0xd0] sm:$0xff] }
0x1afd   : > { %12076 = vtanh.f32 %v4728_v54 }
0x1afe   : > { %12078 = vtanh.f32 %v4729_v16 }
0x1aff   : > { %12080 = vtanh.f32 %v4730_v19  ;;  %v10318_v19 = vld [vmem:[%s15694_s11 + $0xd8] sm:$0xff] }
0x1b00   : > { %v12071_v49 = vpop.eup %12070 }
0x1b01   : > { %v12073_v15 = vpop.eup %12072  ;;  %v4749_v13 = vmul.f32 0.5, %v12071_v49  ;;  %v10333_v49 = vld [vmem:[%s15696_s13 + $0x60] sm:$0xff] }
0x1b02   : > { %v12075_v28 = vpop.eup %12074  ;;  %v4750_v39 = vmul.f32 0.5, %v12073_v15  ;;  %v10315_v15 = vld [vmem:[%s15694_s11 + $0xc0] sm:$0xff] }
0x1b03   : > { %v12077_v10 = vpop.eup %12076  ;;  %v4753_v11 = vadd.f32 0.5, %v4749_v13  ;;  %v4758_v34 = vmul.f32 %v12075_v28, %v4751_v62  ;;  %v10316_v62 = vld [vmem:[%s15694_s11 + $0xc8] sm:$0xff]  ;;  %v10348_v13 = vld [vmem:[%s15694_s11 + $0xf8] sm:$0xff] }
0x1b04   : > { %v12079_v20 = vpop.eup %12078  ;;  %v4754_v23 = vadd.f32 0.5, %v4750_v39  ;;  %v4759_v40 = vmul.f32 %v12077_v10, %v4752_v12  ;;  %v10334_v28 = vld [vmem:[%s15696_s13 + $0x68] sm:$0xff]  ;;  %v10347_v12 = vld [vmem:[%s15694_s11 + $0xf0] sm:$0xff]  ;;  %v10345_v10 = vld [vmem:[%s15694_s11 + $0xe0] sm:$0xff] }
0x1b05   : > { %v12081_v33 = vpop.eup %12080  ;;  %v4760_v61 = vmul.f32 %v12079_v20, %v4753_v11  ;;  %v10363_v39 = vld [vmem:[%s15696_s13 + $0x70] sm:$0xff]  ;;  %v10346_v11 = vld [vmem:[%s15694_s11 + $0xe8] sm:$0xff]  ;;  %v5500_v20 = vld [vmem:[%s15698_s15 + $0x18] sm:$0xff] }
0x1b06   : > { %v4761_v18 = vmul.f32 %v12081_v33, %v4754_v23  ;;  %v10364_v23 = vld [vmem:[%s15696_s13 + $0x78] sm:$0xff]  ;;  %v5499_v33 = vld [vmem:[%s15698_s15 + $0x10] sm:$0xff] }
0x1b07   : > { %v4762_v58 = vpack.c.bf16 %v4760_v61, %v4758_v34  ;;  %v5497_v34 = vld [vmem:[%s15698_s15] sm:$0xff]  ;;  %v5498_v61 = vld [vmem:[%s15698_s15 + $0x8] sm:$0xff] }
0x1b08   : > { %v4763_v6 = vpack.c.bf16 %v4761_v18, %v4759_v40  ;;  %v11342_v40 = vld [vmem:[%s15878_s29 + $0x100] sm:$0xff]  ;;  %v11343_v18 = vld [vmem:[%s15878_s29 + $0x108] sm:$0xff] }
0x1b09   : > { %4792 = vmatpush.bf16.msra.mxu0 %v4762_v58 }
0x1b0a   : > { %4806 = vmatpush.bf16.msra.mxu1 %v4763_v6 }
0x1b0c   : > { %10235 = vmatmul.msk.bf16.vlgmr.msra.gmra.mxu0 %vm16010_vm15, %v11341_v57  ;;  %vm16020_vm15 = vmmov %vm16019_vm8 }
0x1b0d   : > { %10236 = vmatmul.msk.bf16.vlgmr.msra.gmra.mxu1 %vm16011_vm2, %v11341_v57  ;;  %vm16021_vm2 = vmmov %vm16019_vm8 }
0x1b89   : > { %v4794_v56 = vpop.f32.mrf.mxu0 }
0x1b8a   : > { %v4795_v45 = vadd.f32 %v4794_v56, %v4770_v42  ;;  %v4808_v26 = vpop.f32.mrf.mxu1 }
0x1b8b   : > { %v4809_v30 = vadd.f32 %v4808_v26, %v4770_v42 }
0x1b8c   : > { %v13673_v35 = vadd.f32 %v4795_v45, %v13570_v46  ;;  %v10300_v46 = vld [vmem:[%s15694_s11 + $0xb8] sm:$0xff] }
0x1b8d   : > { %v13676_v2 = vadd.f32 %v4809_v30, %v13573_v41  ;;  %v10299_v41 = vld [vmem:[%s15694_s11 + $0xb0] sm:$0xff] }
0x1b91   : > { %v4796_v5 = vpop.f32.mrf.mxu0 }
0x1b92   : > { %v4797_v8 = vadd.f32 %v4796_v5, %v4775_v3  ;;  %v4810_v9 = vpop.f32.mrf.mxu1 }
0x1b93   : > { %v4811_v1 = vadd.f32 %v4810_v9, %v4775_v3 }
0x1b94   : > { %v11656_v55 = vpack.i.bf16 %v4797_v8, %v4795_v45  ;;  %v4817_v51 = vpack.c.bf16 %v4797_v8, %v4795_v45  ;;  %v13679_v48 = vadd.f32 %v4797_v8, %v13576_v4  ;;  %v10303_v4 = vld [vmem:[%s15696_s13 + $0x50] sm:$0xff] }
0x1b95   : > { %v11651_v54 = vpack.i.bf16 %v4811_v1, %v4809_v30  ;;  %v4818_v53 = vpack.c.bf16 %v4811_v1, %v4809_v30  ;;  %v13682_v16 = vadd.f32 %v4811_v1, %v13579_v32  ;;  %v10297_v32 = vld [vmem:[%s15694_s11 + $0xa0] sm:$0xff] }
0x1b96   : > { %11657 = vrot.lane.b32.xlu2 %v11656_v55, %s16012_s23  ;;  %11647 = vrot.lane.b32.xlu0 %v11656_v55, %s16013_s2  ;;  %v11344_v55 = vld [vmem:[%s15878_s29 + $0xf0] sm:$0xff] }
0x1b97   : > { %11652 = vrot.lane.b32.xlu1 %v11651_v54, %s16013_s2  ;;  %4959 = vmatpush.bf16.msra.mxu3 %v4818_v53 }
0x1b98   : > { %4940 = vmatpush.bf16.msra.mxu2 %v4817_v51 }
0x1b9a   : > { %10273 = vmatmul.msk.bf16.vlgmr.msra.gmra.mxu3 %vm16014_vm12, %v11342_v40  ;;  %vm16022_vm12 = vmmov %vm16021_vm2 }
0x1b9b   : > { %10271 = vmatmul.msk.bf16.vlgmr.msra.gmra.mxu2 %vm16015_vm14, %v11342_v40  ;;  %vm16023_vm14 = vcmp.ge.s32.totalorder %v12534_v25, 32 }
0x1b9e   : > { %5062 = vperm.xlu2 %11494, %v10300_v46   ;;  %11662 = vrot.lane.b32.xlu0 %v11651_v54, %s16012_s23 }
0x1b9f   : > { %5057 = vperm.xlu1 %11505, %v10299_v41  }
0x1ba6   : > { %5107 = vperm.xlu2 %11494, %v10303_v4   ;;  %5047 = vperm.xlu0 %11483, %v10297_v32  }
0x1ba7   : > { %5052 = vperm.xlu1 %11505, %v10298_v47  }
0x1baa   : > { %10274 = vmatmul.msk.bf16.gmra.mxu3 %vm16016_vm13, %v11343_v18  ;;  %vm10258_vm13 = vmpackc.low %vm16023_vm14, %vm16023_vm14 }
0x1bab   : > { %10272 = vmatmul.msk.bf16.gmra.mxu2 %vm16017_vm11, %v11343_v18 }
0x1bae   : > { %5184 = vperm.xlu2 %11494, %v10318_v19   ;;  %5112 = vperm.xlu0 %11483, %v10304_v38  }
0x1baf   : > { %5179 = vperm.xlu1 %11505, %v10317_v50   ;;  %v11345_v50 = vld [vmem:[%s15878_s29 + $0xf8] sm:$0xff] }
0x1bb6   : > { %5275 = vperm.xlu2 %11494, %v10333_v49   ;;  %5169 = vperm.xlu0 %11483, %v10315_v15   ;;  %v11346_v49 = vld [vmem:[%s15878_s29 + $0x110] sm:$0xff] }
0x1bb7   : > { %5174 = vperm.xlu1 %11505, %v10316_v62  }
0x1bbe   : > { %5352 = vperm.xlu2 %11494, %v10348_v13   ;;  %5280 = vperm.xlu0 %11483, %v10334_v28  }
0x1bbf   : > { %5347 = vperm.xlu1 %11505, %v10347_v12  }
0x1bc6   : > { %5443 = vperm.xlu2 %11494, %v10363_v39   ;;  %5337 = vperm.xlu0 %11483, %v10345_v10  }
0x1bc7   : > { %5342 = vperm.xlu1 %11505, %v10346_v11  }
0x1bce   : > { %5518 = vperm.xlu2 %11494, %v5500_v20   ;;  %5448 = vperm.xlu0 %11483, %v10364_v23  }
0x1bcf   : > { %5513 = vperm.xlu1 %11505, %v5499_v33  }
0x1bd6   : > { %5503 = vperm.xlu0 %11483, %v5497_v34  }
0x1bd7   : > { %5508 = vperm.xlu1 %11505, %v5498_v61  }
0x1bf0   : > { %v11658_v1 = vpop.permute.xlu2 %11657 }
0x1bf1   : > { %v11660_v54 = vunpack.i.h.bf16 %v11658_v1  ;;  %v11659_v53 = vunpack.i.l.bf16 %v11658_v1 }
0x1c08   : > { %v11648_v58 = vpop.permute.xlu0 %11647 }
0x1c09   : > { %v11653_v6 = vpop.permute.xlu1 %11652  ;;  %v11650_v57 = vunpack.i.h.bf16 %v11648_v58  ;;  %v11649_v42 = vunpack.i.l.bf16 %v11648_v58 }
0x1c0a   : > { %v11655_v56 = vunpack.i.h.bf16 %v11653_v6  ;;  %v11654_v45 = vunpack.i.l.bf16 %v11653_v6 }
0x1c0c   : > { %v4833_v26 = vsel %vm16019_vm8, %v11650_v57, %v11655_v56  ;;  %v4835_v30 = vsel %vm16020_vm15, %v11655_v56, %v11650_v57  ;;  %v4832_v3 = vsel %vm16021_vm2, %v11649_v42, %v11654_v45  ;;  %v4834_v5 = vsel %vm16022_vm12, %v11654_v45, %v11649_v42 }
0x1c0d   : > { %v10254_v8 = vpack.c.bf16 %v4835_v30, %v4834_v5  ;;  %v10259_v9 = vpack.c.bf16 %v4833_v26, %v4832_v3  ;;  %vm16025_vm8 = vcmp.lt.s32.totalorder %v12532_v24, 32  ;;  %vm16026_vm2 = vcmp.lt.s32.totalorder %v12525_v21, 96 }
0x1c0e   : > { %vm10287_vm15 = vmpackc.low %vm16025_vm8, %vm16025_vm8 }
0x1c0f   : > { %10255 = vmatpush.bf16.msk.msrb.mxu0 %vm10253_vm0, %v10254_v8  ;;  %10260 = vmatpush.bf16.msk.msrb.mxu1 %vm10258_vm13, %v10259_v9  ;;  %vm16027_vm12 = vmmov %vm16026_vm2  ;;  %vm16030_vm13 = vcmp.lt.s32.totalorder %v12534_v25, 32  ;;  %v11347_v25 = vld [vmem:[%s15878_s29 + $0x118] sm:$0xff] }
0x1c10   : > { %v11663_v51 = vpop.permute.xlu0 %11662  ;;  %vm16028_vm0 = vmmov %vm16026_vm2 }
0x1c11   : > { %v11665_v46 = vunpack.i.h.bf16 %v11663_v51  ;;  %v11664_v41 = vunpack.i.l.bf16 %v11663_v51  ;;  %vm16029_vm14 = vmmov %vm16028_vm0  ;;  %v5058_v5 = vpop.permute.xlu1 %5057 }
0x1c12   : > { %10256 = vmatmul.msk.bf16.vlgmr.msrb.gmra.mxu0 %vm16017_vm11, %v11344_v55  ;;  %10261 = vmatmul.msk.bf16.vlgmr.msrb.gmra.mxu1 %vm16024_vm7, %v11344_v55  ;;  %vm10292_vm11 = vmpackc.low %vm16030_vm13, %vm16030_vm13 }
0x1c13   : > { %v4849_v4 = vsel %vm16026_vm2, %v11660_v54, %v11665_v46  ;;  %v4851_v32 = vsel %vm16027_vm12, %v11665_v46, %v11660_v54  ;;  %v4848_v47 = vsel %vm16028_vm0, %v11659_v53, %v11664_v41  ;;  %v4850_v19 = vsel %vm16029_vm14, %v11664_v41, %v11659_v53  ;;  %vm16031_vm8 = vmmov %vm16024_vm7 }
0x1c14   : > { %v10288_v38 = vpack.c.bf16 %v4849_v4, %v4848_v47  ;;  %v10293_v24 = vpack.c.bf16 %v4851_v32, %v4850_v19  ;;  %vm16032_vm2 = vmmov %vm16024_vm7 }
0x1c15   : > { %vm16033_vm12 = vmmov %vm16032_vm2 }
0x1c16   : > { %10289 = vmatpush.bf16.msk.msra.mxu0 %vm10287_vm15, %v10288_v38  ;;  %10294 = vmatpush.bf16.msk.msra.mxu1 %vm10292_vm11, %v10293_v24  ;;  %vm16034_vm15 = vmmov %vm16032_vm2 }
0x1c17   : > { %vm16035_vm0 = vmmov %vm16032_vm2 }
0x1c18   : > { %vm16036_vm14 = vmmov %vm16035_vm0 }
0x1c19   : > { %vm16037_vm13 = vmmov %vm16035_vm0 }
0x1c1a   : > { %vm16038_vm11 = vmmov %vm16035_vm0 }
0x1c1d   : > { %v4961_v10 = vpop.f32.mrf.mxu3 }
0x1c1e   : > { %v4942_v11 = vpop.f32.mrf.mxu2 }
0x1c22   : > { %10257 = vmatmul.msk.bf16.gmra.mxu0 %vm16024_vm7, %v11345_v50  ;;  %10262 = vmatmul.msk.bf16.gmra.mxu1 %vm16031_vm8, %v11345_v50  ;;  %vm16039_vm7 = vmmov %vm16035_vm0 }
0x1c23   : > { %vm16040_vm8 = vmmov %vm16035_vm0 }
0x1c25   : > { %v4963_v33 = vpop.f32.mrf.mxu3 }
0x1c26   : > { %v4944_v34 = vpop.f32.mrf.mxu2 }
0x1c2d   : > { %v4966_v6 = vpop.f32.mrf.mxu3 }
0x1c2e   : > { %v4947_v57 = vpop.f32.mrf.mxu2 }
0x1c32   : > { %10290 = vmatmul.msk.bf16.vlgmr.msra.gmra.mxu0 %vm16032_vm2, %v11346_v49  ;;  %10295 = vmatmul.msk.bf16.vlgmr.msra.gmra.mxu1 %vm16033_vm12, %v11346_v49  ;;  %v5063_v49 = vpop.permute.xlu2 %5062  ;;  %vm16041_vm2 = vmmov %vm16035_vm0 }
0x1c33   : > { %vm16042_vm12 = vmmov %vm16035_vm0 }
0x1c35   : > { %v4968_v1 = vpop.f32.mrf.mxu3 }
0x1c36   : > { %v4949_v55 = vpop.f32.mrf.mxu2 }
0x1c42   : > { %10291 = vmatmul.msk.bf16.gmra.mxu0 %vm16034_vm15, %v11347_v25  ;;  %10296 = vmatmul.msk.bf16.gmra.mxu1 %vm16035_vm0, %v11347_v25  ;;  %vm16043_vm15 = vmmov %vm16035_vm0 }
0x1c8f   : > { %v4888_v15 = vpop.f32.mrf.mxu0  ;;  %v4907_v62 = vpop.f32.mrf.mxu1 }
0x1c90   : > { %v4943_v53 = vadd.f32 %v4942_v11, %v4888_v15  ;;  %v4962_v4 = vadd.f32 %v4961_v10, %v4907_v62  ;;  %v5053_v62 = vpop.permute.xlu1 %5052 }
0x1c97   : > { %v4890_v13 = vpop.f32.mrf.mxu0  ;;  %v4909_v28 = vpop.f32.mrf.mxu1 }
0x1c98   : > { %v4945_v32 = vadd.f32 %v4944_v34, %v4890_v13  ;;  %v4964_v25 = vadd.f32 %v4963_v33, %v4909_v28 }
0x1c9f   : > { %v4893_v12 = vpop.f32.mrf.mxu0  ;;  %v4912_v39 = vpop.f32.mrf.mxu1 }
0x1ca0   : > { %v4967_v42 = vadd.f32 %v4966_v6, %v4912_v39  ;;  %v4948_v56 = vadd.f32 %v4947_v57, %v4893_v12 }
0x1ca7   : > { %v4895_v20 = vpop.f32.mrf.mxu0  ;;  %v4914_v23 = vpop.f32.mrf.mxu1 }
0x1ca8   : > { %v4969_v46 = vadd.f32 %v4968_v1, %v4914_v23  ;;  %v4950_v41 = vadd.f32 %v4949_v55, %v4895_v20 }
0x1caf   : > { %v5003_v61 = vpop.f32.mrf.mxu0  ;;  %v5022_v40 = vpop.f32.mrf.mxu1 }
0x1cb0   : > { %v5032_v38 = vadd.f32 %v5003_v61, %v4943_v53  ;;  %v5033_v12 = vadd.f32 %v5022_v40, %v4962_v4 }
0x1cb7   : > { %v5005_v18 = vpop.f32.mrf.mxu0  ;;  %v5024_v58 = vpop.f32.mrf.mxu1 }
0x1cb8   : > { %v5034_v39 = vadd.f32 %v5005_v18, %v4945_v32  ;;  %v11348_v32 = vld [vmem:[%s15695_s12 + $0x28] sm:$0xff] }
0x1cba   : > { %v5067_v23 = vadd.f32 %v5053_v62, %v5034_v39 }
0x1cbf   : > { %v5008_v45 = vpop.f32.mrf.mxu0  ;;  %v5027_v26 = vpop.f32.mrf.mxu1 }
0x1cc0   : > { %v5036_v30 = vadd.f32 %v5008_v45, %v4948_v56  ;;  %v5037_v3 = vadd.f32 %v5027_v26, %v4967_v42  ;;  %v5048_v42 = vpop.permute.xlu0 %5047  ;;  %v5035_v56 = vadd.f32 %v5024_v58, %v4964_v25 }
0x1cc1   : > { %v5065_v15 = vadd.f32 %v5048_v42, %v5032_v38  ;;  %v5066_v13 = vadd.f32 %v5048_v42, %v5033_v12 }
0x1cc2   : > { %v5069_v8 = vadd.f32 %v5058_v5, %v5036_v30  ;;  %v5070_v9 = vadd.f32 %v5058_v5, %v5037_v3  ;;  %v5068_v61 = vadd.f32 %v5053_v62, %v5035_v56 }
0x1cc4   : > { %v5077_v51 = vmul.f32 0.5, %v5069_v8  ;;  %v5078_v54 = vmul.f32 0.5, %v5070_v9 }
0x1cc6   : > { %12082 = vtanh.f32 %v5077_v51 }
0x1cc7   : > { %v5010_v47 = vpop.f32.mrf.mxu0  ;;  %v5029_v19 = vpop.f32.mrf.mxu1  ;;  %12084 = vtanh.f32 %v5078_v54 }
0x1cc8   : > { %v5038_v24 = vadd.f32 %v5010_v47, %v4950_v41  ;;  %v5039_v50 = vadd.f32 %v5029_v19, %v4969_v46  ;;  %v5108_v47 = vpop.permute.xlu2 %5107  ;;  %v5113_v12 = vpop.permute.xlu0 %5112 }
0x1cca   : > { %v5071_v6 = vadd.f32 %v5063_v49, %v5038_v24  ;;  %v5072_v57 = vadd.f32 %v5063_v49, %v5039_v50 }
0x1ccc   : > { %v5079_v11 = vmul.f32 0.5, %v5071_v6  ;;  %v5080_v20 = vmul.f32 0.5, %v5072_v57  ;;  %v12083_v10 = vpop.eup %12082 }
0x1ccd   : > { %v12085_v34 = vpop.eup %12084  ;;  %v5085_v28 = vmul.f32 0.5, %v12083_v10  ;;  %v5180_v10 = vpop.permute.xlu1 %5179 }
0x1cce   : > { %12086 = vtanh.f32 %v5079_v11  ;;  %v5086_v33 = vmul.f32 0.5, %v12085_v34 }
0x1ccf   : > { %12088 = vtanh.f32 %v5080_v20  ;;  %v5089_v58 = vadd.f32 0.5, %v5085_v28 }
0x1cd0   : > { %12090 = vtanh.f32 %v5065_v15  ;;  %v5090_v30 = vadd.f32 0.5, %v5086_v33 }
0x1cd1   : > { %12092 = vtanh.f32 %v5066_v13 }
0x1cd2   : > { %12094 = vtanh.f32 %v5067_v23 }
0x1cd3   : > { %12096 = vtanh.f32 %v5068_v61 }
0x1cd4   : > { %v12087_v40 = vpop.eup %12086 }
0x1cd5   : > { %v12089_v18 = vpop.eup %12088  ;;  %v5087_v45 = vmul.f32 0.5, %v12087_v40 }
0x1cd6   : > { %v12091_v26 = vpop.eup %12090  ;;  %v5088_v3 = vmul.f32 0.5, %v12089_v18  ;;  %v5185_v18 = vpop.permute.xlu2 %5184 }
0x1cd7   : > { %v12093_v5 = vpop.eup %12092  ;;  %v5091_v8 = vadd.f32 0.5, %v5087_v45  ;;  %v5096_v51 = vmul.f32 %v12091_v26, %v5089_v58 }
0x1cd8   : > { %v12095_v9 = vpop.eup %12094  ;;  %v5092_v1 = vadd.f32 0.5, %v5088_v3  ;;  %v5097_v53 = vmul.f32 %v12093_v5, %v5090_v30  ;;  %v5170_v30 = vpop.permute.xlu0 %5169 }
0x1cd9   : > { %v12097_v55 = vpop.eup %12096  ;;  %v5098_v54 = vmul.f32 %v12095_v9, %v5091_v8  ;;  %v5175_v9 = vpop.permute.xlu1 %5174 }
0x1cda   : > { %v5099_v46 = vmul.f32 %v12097_v55, %v5092_v1 }
0x1cdb   : > { %v5100_v41 = vpack.c.bf16 %v5098_v54, %v5096_v51 }
0x1cdc   : > { %v5101_v4 = vpack.c.bf16 %v5099_v46, %v5097_v53 }
0x1cdd   : > { %5130 = vmatpush.bf16.msrb.mxu2 %v5100_v41 }
0x1cde   : > { %5144 = vmatpush.bf16.msrb.mxu3 %v5101_v4 }
0x1ce0   : > { %10309 = vmatmul.msk.bf16.vlgmr.msrb.gmra.mxu2 %vm16036_vm14, %v11348_v32  ;;  %vm16044_vm14 = vmmov %vm16035_vm0 }
0x1ce1   : > { %10310 = vmatmul.msk.bf16.vlgmr.msrb.gmra.mxu3 %vm16037_vm13, %v11348_v32  ;;  %vm16045_vm13 = vmmov %vm16035_vm0 }
0x1d63   : > { %v5132_v19 = vpop.f32.mrf.mxu2 }
0x1d64   : > { %v5133_v38 = vadd.f32 %v5132_v19, %v5108_v47  ;;  %v5146_v24 = vpop.f32.mrf.mxu3 }
0x1d65   : > { %v5147_v50 = vadd.f32 %v5146_v24, %v5108_v47 }
0x1d66   : > { %v13818_v49 = vadd.f32 %v5133_v38, %v13673_v35  ;;  %v11349_v35 = vld [vmem:[%s15878_s29 + $0x130] sm:$0xff] }
0x1d67   : > { %v13821_v25 = vadd.f32 %v5147_v50, %v13676_v2  ;;  %v11350_v2 = vld [vmem:[%s15878_s29 + $0x138] sm:$0xff] }
0x1d6b   : > { %v5134_v39 = vpop.f32.mrf.mxu2 }
0x1d6c   : > { %v5135_v6 = vadd.f32 %v5134_v39, %v5113_v12  ;;  %v5148_v57 = vpop.f32.mrf.mxu3 }
0x1d6d   : > { %v5149_v42 = vadd.f32 %v5148_v57, %v5113_v12 }
0x1d6e   : > { %v13824_v56 = vadd.f32 %v5135_v6, %v13679_v48  ;;  %v5155_v15 = vpack.c.bf16 %v5135_v6, %v5133_v38 }
0x1d6f   : > { %v13827_v11 = vadd.f32 %v5149_v42, %v13682_v16  ;;  %v5156_v20 = vpack.c.bf16 %v5149_v42, %v5147_v50 }
0x1d70   : > { %5210 = vmatpush.bf16.msra.mxu2 %v5155_v15 }
0x1d71   : > { %5229 = vmatpush.bf16.msra.mxu3 %v5156_v20 }
0x1d73   : > { %10327 = vmatmul.msk.bf16.vlgmr.msra.gmra.mxu2 %vm16038_vm11, %v11349_v35  ;;  %vm16046_vm11 = vmmov %vm16035_vm0 }
0x1d74   : > { %10329 = vmatmul.msk.bf16.vlgmr.msra.gmra.mxu3 %vm16039_vm7, %v11349_v35  ;;  %vm16047_vm7 = vmmov %vm16035_vm0 }
0x1d83   : > { %10328 = vmatmul.msk.bf16.gmra.mxu2 %vm16040_vm8, %v11350_v2  ;;  %vm16048_vm8 = vmmov %vm16035_vm0 }
0x1d84   : > { %10330 = vmatmul.msk.bf16.gmra.mxu3 %vm16041_vm2, %v11350_v2  ;;  %vm16049_vm2 = vmmov %vm16035_vm0 }
0x1df6   : > { %v5212_v48 = vpop.f32.mrf.mxu2 }
0x1df7   : > { %v5231_v16 = vpop.f32.mrf.mxu3  ;;  %v5213_v5 = vadd.f32 %v5212_v48, %v5170_v30 }
0x1df8   : > { %v5232_v1 = vadd.f32 %v5231_v16, %v5170_v30 }
0x1dfe   : > { %v5214_v62 = vpop.f32.mrf.mxu2 }
0x1dff   : > { %v5233_v13 = vpop.f32.mrf.mxu3  ;;  %v5215_v54 = vadd.f32 %v5214_v62, %v5175_v9 }
0x1e00   : > { %v5234_v46 = vadd.f32 %v5233_v13, %v5175_v9  ;;  %v11351_v13 = vld [vmem:[%s15695_s12 + $0x30] sm:$0xff] }
0x1e06   : > { %v5217_v23 = vpop.f32.mrf.mxu2 }
0x1e07   : > { %v5218_v34 = vadd.f32 %v5217_v23, %v5180_v10  ;;  %v5236_v61 = vpop.f32.mrf.mxu3 }
0x1e08   : > { %v5237_v28 = vadd.f32 %v5236_v61, %v5180_v10  ;;  %v5276_v10 = vpop.permute.xlu2 %5275 }
0x1e09   : > { %v5245_v33 = vmul.f32 0.5, %v5218_v34 }
0x1e0a   : > { %v5246_v40 = vmul.f32 0.5, %v5237_v28 }
0x1e0b   : > { %12098 = vtanh.f32 %v5245_v33 }
0x1e0c   : > { %12100 = vtanh.f32 %v5246_v40 }
0x1e0e   : > { %v5219_v58 = vpop.f32.mrf.mxu2 }
0x1e0f   : > { %v5220_v45 = vadd.f32 %v5219_v58, %v5185_v18  ;;  %v5238_v26 = vpop.f32.mrf.mxu3 }
0x1e10   : > { %v5239_v3 = vadd.f32 %v5238_v26, %v5185_v18  ;;  %v5281_v18 = vpop.permute.xlu0 %5280 }
0x1e11   : > { %v5247_v8 = vmul.f32 0.5, %v5220_v45  ;;  %v12099_v51 = vpop.eup %12098 }
0x1e12   : > { %v5248_v55 = vmul.f32 0.5, %v5239_v3  ;;  %v12101_v53 = vpop.eup %12100  ;;  %v5253_v41 = vmul.f32 0.5, %v12099_v51  ;;  %v5348_v51 = vpop.permute.xlu1 %5347 }
0x1e13   : > { %12102 = vtanh.f32 %v5247_v8  ;;  %v5254_v4 = vmul.f32 0.5, %v12101_v53 }
0x1e14   : > { %12104 = vtanh.f32 %v5248_v55  ;;  %v5257_v19 = vadd.f32 0.5, %v5253_v41 }
0x1e15   : > { %12106 = vtanh.f32 %v5213_v5  ;;  %v5258_v50 = vadd.f32 0.5, %v5254_v4 }
0x1e16   : > { %12108 = vtanh.f32 %v5232_v1 }
0x1e17   : > { %12110 = vtanh.f32 %v5215_v54 }
0x1e18   : > { %12112 = vtanh.f32 %v5234_v46 }
0x1e19   : > { %v12103_v32 = vpop.eup %12102 }
0x1e1a   : > { %v12105_v47 = vpop.eup %12104  ;;  %v5255_v38 = vmul.f32 0.5, %v12103_v32 }
0x1e1b   : > { %v12107_v24 = vpop.eup %12106  ;;  %v5256_v12 = vmul.f32 0.5, %v12105_v47  ;;  %v5353_v47 = vpop.permute.xlu2 %5352 }
0x1e1c   : > { %v12109_v39 = vpop.eup %12108  ;;  %v5259_v6 = vadd.f32 0.5, %v5255_v38  ;;  %v5264_v20 = vmul.f32 %v12107_v24, %v5257_v19 }
0x1e1d   : > { %v12111_v57 = vpop.eup %12110  ;;  %v5260_v42 = vadd.f32 0.5, %v5256_v12  ;;  %v5265_v2 = vmul.f32 %v12109_v39, %v5258_v50  ;;  %v5338_v50 = vpop.permute.xlu0 %5337 }
0x1e1e   : > { %v12113_v15 = vpop.eup %12112  ;;  %v5266_v35 = vmul.f32 %v12111_v57, %v5259_v6  ;;  %v5343_v57 = vpop.permute.xlu1 %5342 }
0x1e1f   : > { %v5267_v48 = vmul.f32 %v12113_v15, %v5260_v42 }
0x1e20   : > { %v5268_v16 = vpack.c.bf16 %v5266_v35, %v5264_v20 }
0x1e21   : > { %v5269_v62 = vpack.c.bf16 %v5267_v48, %v5265_v2 }
0x1e22   : > { %5298 = vmatpush.bf16.msrb.mxu0 %v5268_v16 }
0x1e23   : > { %5312 = vmatpush.bf16.msrb.mxu1 %v5269_v62 }
0x1e25   : > { %10339 = vmatmul.msk.bf16.vlgmr.msrb.gmra.mxu0 %vm16042_vm12, %v11351_v13  ;;  %vm16050_vm12 = vmmov %vm16035_vm0 }
0x1e26   : > { %10340 = vmatmul.msk.bf16.vlgmr.msrb.gmra.mxu1 %vm16043_vm15, %v11351_v13  ;;  %vm16051_vm15 = vmmov %vm16035_vm0 }
0x1ea2   : > { %v5300_v23 = vpop.f32.mrf.mxu0 }
0x1ea3   : > { %v5301_v34 = vadd.f32 %v5300_v23, %v5276_v10  ;;  %v5314_v61 = vpop.f32.mrf.mxu1 }
0x1ea4   : > { %v5315_v28 = vadd.f32 %v5314_v61, %v5276_v10 }
0x1ea5   : > { %v13845_v33 = vadd.f32 %v5301_v34, %v13818_v49  ;;  %v11352_v49 = vld [vmem:[%s15878_s29 + $0x160] sm:$0xff] }
0x1ea6   : > { %v13848_v40 = vadd.f32 %v5315_v28, %v13821_v25  ;;  %v11353_v25 = vld [vmem:[%s15878_s29 + $0x168] sm:$0xff] }
0x1eaa   : > { %v5302_v58 = vpop.f32.mrf.mxu0 }
0x1eab   : > { %v5303_v45 = vadd.f32 %v5302_v58, %v5281_v18  ;;  %v5316_v26 = vpop.f32.mrf.mxu1 }
0x1eac   : > { %v5317_v30 = vadd.f32 %v5316_v26, %v5281_v18 }
0x1ead   : > { %v13851_v3 = vadd.f32 %v5303_v45, %v13824_v56  ;;  %v5323_v5 = vpack.c.bf16 %v5303_v45, %v5301_v34 }
0x1eae   : > { %v13854_v8 = vadd.f32 %v5317_v30, %v13827_v11  ;;  %v5324_v9 = vpack.c.bf16 %v5317_v30, %v5315_v28 }
0x1eaf   : > { %5378 = vmatpush.bf16.msra.mxu0 %v5323_v5 }
0x1eb0   : > { %5397 = vmatpush.bf16.msra.mxu1 %v5324_v9 }
0x1eb2   : > { %10357 = vmatmul.msk.bf16.vlgmr.msra.gmra.mxu0 %vm16035_vm0, %v11352_v49 }
0x1eb3   : > { %10359 = vmatmul.msk.bf16.vlgmr.msra.gmra.mxu1 %vm16044_vm14, %v11352_v49  ;;  %vm5684_vm14 = vcmask 261120  }
0x1ec2   : > { %10358 = vmatmul.msk.bf16.gmra.mxu0 %vm16045_vm13, %v11353_v25  ;;  %vm16054_vm13 = vcmp.lt.s32.totalorder %v12525_v21, 1 }
0x1ec3   : > { %10360 = vmatmul.msk.bf16.gmra.mxu1 %vm16046_vm11, %v11353_v25  ;;  %vm16055_vm11 = vmmov %vm16054_vm13 }
0x1f2f   : > { %v5380_v56 = vpop.f32.mrf.mxu0 }
0x1f30   : > { %v5399_v11 = vpop.f32.mrf.mxu1  ;;  %v5381_v39 = vadd.f32 %v5380_v56, %v5338_v50 }
0x1f31   : > { %v5400_v42 = vadd.f32 %v5399_v11, %v5338_v50 }
0x1f37   : > { %v5382_v1 = vpop.f32.mrf.mxu0 }
0x1f38   : > { %v5401_v55 = vpop.f32.mrf.mxu1  ;;  %v5383_v35 = vadd.f32 %v5382_v1, %v5343_v57 }
0x1f39   : > { %v5402_v48 = vadd.f32 %v5401_v55, %v5343_v57  ;;  %v11354_v55 = vld [vmem:[%s15695_s12 + $0x38] sm:$0xff] }
0x1f3f   : > { %v5385_v54 = vpop.f32.mrf.mxu0 }
0x1f40   : > { %v5386_v53 = vadd.f32 %v5385_v54, %v5348_v51  ;;  %v5404_v46 = vpop.f32.mrf.mxu1 }
0x1f41   : > { %v5405_v41 = vadd.f32 %v5404_v46, %v5348_v51 }
0x1f42   : > { %v5413_v4 = vmul.f32 0.5, %v5386_v53  ;;  %v5444_v53 = vpop.permute.xlu2 %5443 }
0x1f43   : > { %v5414_v32 = vmul.f32 0.5, %v5405_v41  ;;  %v5449_v41 = vpop.permute.xlu0 %5448 }
0x1f44   : > { %12114 = vtanh.f32 %v5413_v4 }
0x1f45   : > { %12116 = vtanh.f32 %v5414_v32 }
0x1f47   : > { %v5387_v19 = vpop.f32.mrf.mxu0 }
0x1f48   : > { %v5388_v38 = vadd.f32 %v5387_v19, %v5353_v47  ;;  %v5406_v24 = vpop.f32.mrf.mxu1 }
0x1f49   : > { %v5407_v12 = vadd.f32 %v5406_v24, %v5353_v47 }
0x1f4a   : > { %v5415_v6 = vmul.f32 0.5, %v5388_v38  ;;  %v12115_v20 = vpop.eup %12114 }
0x1f4b   : > { %v5416_v15 = vmul.f32 0.5, %v5407_v12  ;;  %v12117_v2 = vpop.eup %12116  ;;  %v5421_v16 = vmul.f32 0.5, %v12115_v20 }
0x1f4c   : > { %12118 = vtanh.f32 %v5415_v6  ;;  %v5422_v62 = vmul.f32 0.5, %v12117_v2 }
0x1f4d   : > { %12120 = vtanh.f32 %v5416_v15  ;;  %v5425_v23 = vadd.f32 0.5, %v5421_v16  ;;  %v5504_v15 = vpop.permute.xlu0 %5503 }
0x1f4e   : > { %12122 = vtanh.f32 %v5381_v39  ;;  %v5426_v28 = vadd.f32 0.5, %v5422_v62 }
0x1f4f   : > { %12124 = vtanh.f32 %v5400_v42  ;;  %v11355_v42 = vld [vmem:[%s15697_s14] sm:$0xff] }
0x1f50   : > { %12126 = vtanh.f32 %v5383_v35 }
0x1f51   : > { %12128 = vtanh.f32 %v5402_v48 }
0x1f52   : > { %v12119_v13 = vpop.eup %12118 }
0x1f53   : > { %v12121_v10 = vpop.eup %12120  ;;  %v5423_v34 = vmul.f32 0.5, %v12119_v13 }
0x1f54   : > { %v12123_v61 = vpop.eup %12122  ;;  %v5424_v18 = vmul.f32 0.5, %v12121_v10 }
0x1f55   : > { %v12125_v58 = vpop.eup %12124  ;;  %v5427_v45 = vadd.f32 0.5, %v5423_v34  ;;  %v5432_v9 = vmul.f32 %v12123_v61, %v5425_v23  ;;  %v5519_v23 = vpop.permute.xlu2 %5518 }
0x1f56   : > { %v12127_v26 = vpop.eup %12126  ;;  %v5428_v30 = vadd.f32 0.5, %v5424_v18  ;;  %v5433_v25 = vmul.f32 %v12125_v58, %v5426_v28 }
0x1f57   : > { %v12129_v5 = vpop.eup %12128  ;;  %v5434_v49 = vmul.f32 %v12127_v26, %v5427_v45 }
0x1f58   : > { %v5435_v56 = vmul.f32 %v12129_v5, %v5428_v30 }
0x1f59   : > { %v5436_v11 = vpack.c.bf16 %v5434_v49, %v5432_v9 }
0x1f5a   : > { %v5437_v1 = vpack.c.bf16 %v5435_v56, %v5433_v25 }
0x1f5b   : > { %5466 = vmatpush.bf16.msrb.mxu2 %v5436_v11 }
0x1f5c   : > { %5480 = vmatpush.bf16.msrb.mxu3 %v5437_v1 }
0x1f5e   : > { %10369 = vmatmul.msk.bf16.vlgmr.msrb.gmra.mxu2 %vm16047_vm7, %v11354_v55  ;;  %vm16056_vm7 = vmmov %vm16055_vm11 }
0x1f5f   : > { %10370 = vmatmul.msk.bf16.vlgmr.msrb.gmra.mxu3 %vm16048_vm8, %v11354_v55  ;;  %v5970_v55 = vld [vmem:[%s15700_s17 + $0x30] sm:$0xff]  ;;  %vm16057_vm8 = vmmov %vm16056_vm7 }
0x1fe1   : > { %v5468_v51 = vpop.f32.mrf.mxu2 }
0x1fe2   : > { %v5482_v54 = vpop.f32.mrf.mxu3  ;;  %v5469_v46 = vadd.f32 %v5468_v51, %v5444_v53  ;;  %v5969_v51 = vld [vmem:[%s15700_s17 + $0x28] sm:$0xff] }
0x1fe3   : > { %v5483_v4 = vadd.f32 %v5482_v54, %v5444_v53  ;;  %v5971_v54 = vld [vmem:[%s15700_s17 + $0x38] sm:$0xff]  ;;  %v5968_v53 = vld [vmem:[%s15700_s17 + $0x20] sm:$0xff] }
0x1fe4   : > { %v5487_v24 = vadd.f32 %v5469_v46, %v13845_v33  ;;  %v11356_v33 = vld [vmem:[%s15697_s14 + $0x8] sm:$0xff]  ;;  %v5964_v46 = vld [vmem:[%s15700_s17] sm:$0xff] }
0x1fe5   : > { %v5488_v12 = vadd.f32 %v5483_v4, %v13848_v40  ;;  %v5514_v40 = vpop.permute.xlu1 %5513  ;;  %v5967_v4 = vld [vmem:[%s15700_s17 + $0x18] sm:$0xff] }
0x1fe9   : > { %v5470_v32 = vpop.f32.mrf.mxu2 }
0x1fea   : > { %v5471_v47 = vadd.f32 %v5470_v32, %v5449_v41  ;;  %v5484_v19 = vpop.f32.mrf.mxu3  ;;  %v6087_v32 = vld [vmem:[%s15702_s19 + $0x18] sm:$0xff] }
0x1feb   : > { %v5485_v38 = vadd.f32 %v5484_v19, %v5449_v41  ;;  %v5966_v41 = vld [vmem:[%s15700_s17 + $0x10] sm:$0xff] }
0x1fec   : > { %v5489_v50 = vadd.f32 %v5471_v47, %v13851_v3  ;;  %v5965_v47 = vld [vmem:[%s15700_s17 + $0x8] sm:$0xff]  ;;  %v6086_v19 = vld [vmem:[%s15702_s19 + $0x10] sm:$0xff] }
0x1fed   : > { %v5490_v39 = vadd.f32 %v5485_v38, %v13854_v8  ;;  %v5509_v20 = vpop.permute.xlu1 %5508  ;;  %v6084_v38 = vld [vmem:[%s15702_s19] sm:$0xff] }
0x1fee   : > { %v5495_v6 = vpack.c.bf16 %v5489_v50, %v5487_v24  ;;  %v6085_v24 = vld [vmem:[%s15702_s19 + $0x8] sm:$0xff]  ;;  %v11357_v50 = vld [vmem:[%s15699_s16 + $0x20] sm:$0xff] }
0x1fef   : > { %v5496_v57 = vpack.c.bf16 %v5490_v39, %v5488_v12  ;;  %v11358_v39 = vld [vmem:[%s15699_s16 + $0x28] sm:$0xff] }
0x1ff0   : > { %5544 = vmatpush.bf16.msra.mxu2 %v5495_v6 }
0x1ff1   : > { %5563 = vmatpush.bf16.msra.mxu3 %v5496_v57 }
0x1ff3   : > { %10379 = vmatmul.msk.bf16.vlgmr.msra.gmra.mxu2 %vm16049_vm2, %v11355_v42  ;;  %vm16058_vm2 = vmmov %vm16056_vm7 }
0x1ff4   : > { %10381 = vmatmul.msk.bf16.vlgmr.msra.gmra.mxu3 %vm16050_vm12, %v11355_v42  ;;  %vm16059_vm12 = vmmov %vm16058_vm2 }
0x2003   : > { %10380 = vmatmul.msk.bf16.gmra.mxu2 %vm16051_vm15, %v11356_v33  ;;  %vm16060_vm15 = vmmov %vm16058_vm2 }
0x2004   : > { %10382 = vmatmul.msk.bf16.gmra.mxu3 %vm16035_vm0, %v11356_v33  ;;  %vm16061_vm0 = vmmov %vm16058_vm2 }
0x2076   : > { %v5546_v3 = vpop.f32.mrf.mxu2 }
0x2077   : > { %v5565_v8 = vpop.f32.mrf.mxu3  ;;  %v13885_v2 = vadd.f32 %v5546_v3, %v5504_v15 }
0x2078   : > { %v13911_v25 = vadd.f32 %v5565_v8, %v5504_v15 }
0x207e   : > { %v5548_v35 = vpop.f32.mrf.mxu2 }
0x207f   : > { %v13887_v48 = vadd.f32 %v5548_v35, %v5509_v20  ;;  %v5567_v16 = vpop.f32.mrf.mxu3 }
0x2080   : > { %v13904_v5 = vadd.f32 %v5567_v16, %v5509_v20 }
0x2081   : > { %v11676_v62 = vpack.i.bf16 %v13887_v48, %v13885_v2  ;;  %v5575_v56 = vpack.c.bf16 %v13887_v48, %v13885_v2 }
0x2082   : > { %v5576_v11 = vpack.c.bf16 %v13904_v5, %v13911_v25  ;;  %v11681_v1 = vpack.i.bf16 %v13904_v5, %v13911_v25 }
0x2083   : > { %11677 = vrot.lane.b32.xlu1 %v11676_v62, %s15877_s7 }
0x2086   : > { %v5551_v13 = vpop.f32.mrf.mxu2 }
0x2087   : > { %v5570_v10 = vpop.f32.mrf.mxu3  ;;  %v13892_v61 = vadd.f32 %v5551_v13, %v5514_v40 }
0x2088   : > { %v13896_v58 = vadd.f32 %v5570_v10, %v5514_v40 }
0x208e   : > { %v5553_v34 = vpop.f32.mrf.mxu2 }
0x208f   : > { %v13894_v28 = vadd.f32 %v5553_v34, %v5519_v23  ;;  %v5572_v18 = vpop.f32.mrf.mxu3 }
0x2090   : > { %v13898_v45 = vadd.f32 %v5572_v18, %v5519_v23 }
0x2091   : > { %16052 = vst [vmem:[#allocation17_spill] sm:$0xff] %v13894_v28  ;;  %v11666_v26 = vpack.i.bf16 %v13894_v28, %v13892_v61  ;;  %v5577_v30 = vpack.c.bf16 %v13894_v28, %v13892_v61 }
0x2092   : > { %16053 = vst [vmem:[#allocation18_spill] sm:$0xff] %v13898_v45  ;;  %v11671_v9 = vpack.i.bf16 %v13898_v45, %v13896_v58  ;;  %v5578_v49 = vpack.c.bf16 %v13898_v45, %v13896_v58 }
0x2093   : > { %11667 = vrot.lane.b32.xlu2 %v11666_v26, %s15877_s7  ;;  %5793 = vmatpush.bf16.msrb.mxu2 %v5577_v30 }
0x2094   : > { %11672 = vrot.lane.b32.xlu0 %v11671_v9, %s15877_s7  ;;  %5822 = vmatpush.bf16.msrb.mxu3 %v5578_v49 }
0x2095   : > { %11692 = vrot.lane.b32.xlu1 %v11671_v9, %s15876_s1 }
0x2097   : > { %5794 = vmatpush.bf16.msrb.mxu2 %v5575_v56 }
0x2098   : > { %5823 = vmatpush.bf16.msrb.mxu3 %v5576_v11 }
0x209a   : > { %10443 = vmatmul.msk.bf16.vlgmr.msrb.gmra.mxu2 %vm5684_vm14, %v11357_v50 }
0x209b   : > { %11682 = vrot.lane.b32.xlu2 %v11681_v1, %s15877_s7  ;;  %10447 = vmatmul.msk.bf16.vlgmr.msrb.gmra.mxu3 %vm5684_vm14, %v11357_v50 }
0x209c   : > { %11687 = vrot.lane.b32.xlu0 %v11666_v26, %s15876_s1  ;;  %v11359_v26 = vld [vmem:[%s15699_s16 + $0x30] sm:$0xff] }
0x209d   : > { %6004 = vperm.xlu1 %11505, %v5970_v55  }
0x20a3   : > { %11697 = vrot.lane.b32.xlu2 %v11676_v62, %s15876_s1 }
0x20a4   : > { %11702 = vrot.lane.b32.xlu0 %v11681_v1, %s15876_s1 }
0x20a5   : > { %5999 = vperm.xlu1 %11505, %v5969_v51  }
0x20aa   : > { %10444 = vmatmul.msk.bf16.gmra.mxu2 %vm5684_vm14, %v11358_v39 }
0x20ab   : > { %6009 = vperm.xlu2 %11494, %v5971_v54   ;;  %10448 = vmatmul.msk.bf16.gmra.mxu3 %vm5684_vm14, %v11358_v39 }
0x20ac   : > { %5994 = vperm.xlu0 %11483, %v5968_v53  }
0x20ad   : > { %5974 = vperm.xlu1 %11505, %v5964_v46  }
0x20b3   : > { %5984 = vperm.xlu2 %11494, %v5966_v41  }
0x20b4   : > { %5989 = vperm.xlu0 %11483, %v5967_v4   ;;  %v11361_v4 = vld [vmem:[%s15699_s16] sm:$0xff] }
0x20b5   : > { %6105 = vperm.xlu1 %11505, %v6087_v32  }
0x20ba   : > { %10445 = vmatmul.msk.bf16.gmra.mxu2 %vm5684_vm14, %v11359_v26 }
0x20bb   : > { %5979 = vperm.xlu2 %11494, %v5965_v47   ;;  %10449 = vmatmul.msk.bf16.gmra.mxu3 %vm5684_vm14, %v11359_v26  ;;  %v11368_v26 = vld [vmem:[%s15699_s16 + $0x58] sm:$0xff] }
0x20bc   : > { %6100 = vperm.xlu0 %11483, %v6086_v19  }
0x20c3   : > { %6090 = vperm.xlu2 %11494, %v6084_v38  }
0x20c4   : > { %6095 = vperm.xlu0 %11483, %v6085_v24  }
0x20ed   : > { %v11668_v12 = vpop.permute.xlu2 %11667 }
0x20ee   : > { %v11670_v42 = vunpack.i.h.bf16 %v11668_v12  ;;  %v11669_v33 = vunpack.i.l.bf16 %v11668_v12 }
0x20f5   : > { %v11683_v6 = vpop.permute.xlu2 %11682  ;;  %v11678_v57 = vpop.permute.xlu1 %11677 }
0x20f6   : > { %v11685_v40 = vunpack.i.h.bf16 %v11683_v6  ;;  %v11684_v3 = vunpack.i.l.bf16 %v11683_v6  ;;  %v11680_v15 = vunpack.i.h.bf16 %v11678_v57  ;;  %v11679_v20 = vunpack.i.l.bf16 %v11678_v57 }
0x20f8   : > { %v5605_v30 = vsel %vm16058_vm2, %v11680_v15, %v11685_v40  ;;  %v5609_v9 = vsel %vm16059_vm12, %v11685_v40, %v11680_v15  ;;  %v5604_v49 = vsel %vm16060_vm15, %v11679_v20, %v11684_v3  ;;  %v5608_v56 = vsel %vm16061_vm0, %v11684_v3, %v11679_v20 }
0x20f9   : > { %v10411_v1 = vpack.c.bf16 %v5609_v9, %v5608_v56  ;;  %v10421_v55 = vpack.c.bf16 %v5605_v30, %v5604_v49 }
0x20fd   : > { %v11698_v12 = vpop.permute.xlu2 %11697 }
0x20fe   : > { %v11700_v6 = vunpack.i.h.bf16 %v11698_v12  ;;  %v11699_v57 = vunpack.i.l.bf16 %v11698_v12 }
0x2106   : > { %v11673_v8 = vpop.permute.xlu0 %11672 }
0x2107   : > { %v11675_v35 = vunpack.i.h.bf16 %v11673_v8  ;;  %v11674_v16 = vunpack.i.l.bf16 %v11673_v8  ;;  %v11693_v11 = vpop.permute.xlu1 %11692 }
0x2108   : > { %v11695_v54 = vunpack.i.h.bf16 %v11693_v11  ;;  %v11694_v53 = vunpack.i.l.bf16 %v11693_v11 }
0x2109   : > { %v5606_v62 = vsel %vm16054_vm13, %v11669_v33, %v11674_v16  ;;  %v5607_v13 = vsel %vm16055_vm11, %v11670_v42, %v11675_v35  ;;  %v5610_v10 = vsel %vm16056_vm7, %v11674_v16, %v11669_v33  ;;  %v5611_v23 = vsel %vm16057_vm8, %v11675_v35, %v11670_v42  ;;  %v11360_v16 = vld [vmem:[%s15699_s16 + $0x38] sm:$0xff] }
0x210a   : > { %v10408_v34 = vpack.c.bf16 %v5611_v23, %v5610_v10  ;;  %v10418_v18 = vpack.c.bf16 %v5607_v13, %v5606_v62  ;;  %vm16062_vm13 = vcmp.lt.s32.totalorder %v12525_v21, 127  ;;  %10446 = vmatmul.msk.bf16.gmra.mxu2 %vm5684_vm14, %v11360_v16  ;;  %10450 = vmatmul.msk.bf16.gmra.mxu3 %vm5684_vm14, %v11360_v16  ;;  %v11362_v62 = vld [vmem:[%s15699_s16 + $0x8] sm:$0xff]  ;;  %v11363_v13 = vld [vmem:[%s15699_s16 + $0x10] sm:$0xff]  ;;  %v11364_v10 = vld [vmem:[%s15699_s16 + $0x18] sm:$0xff] }
0x210b   : > { %vm16063_vm11 = vmmov %vm16062_vm13  ;;  %v11365_v23 = vld [vmem:[%s15699_s16 + $0x40] sm:$0xff] }
0x210c   : > { %10409 = vmatpush.bf16.msk.msrb.mxu0 %vm13124_vm1, %v10408_v34  ;;  %10419 = vmatpush.bf16.msk.msrb.mxu1 %vm13131_vm9, %v10418_v18  ;;  %vm16064_vm7 = vmmov %vm16063_vm11  ;;  %v11366_v34 = vld [vmem:[%s15699_s16 + $0x48] sm:$0xff]  ;;  %v11367_v18 = vld [vmem:[%s15699_s16 + $0x50] sm:$0xff] }
0x210d   : > { %vm16065_vm8 = vmmov %vm16064_vm7 }
0x210e   : > { %v11688_v51 = vpop.permute.xlu0 %11687  ;;  %vm16066_vm2 = vmmov %vm16064_vm7 }
0x210f   : > { %v11690_v46 = vunpack.i.h.bf16 %v11688_v51  ;;  %v11689_v41 = vunpack.i.l.bf16 %v11688_v51  ;;  %vm16067_vm12 = vmmov %vm16066_vm2 }
0x2110   : > { %10412 = vmatpush.bf16.msk.msrb.mxu0 %vm13124_vm1, %v10411_v1  ;;  %10422 = vmatpush.bf16.msk.msrb.mxu1 %vm13131_vm9, %v10421_v55  ;;  %vm16068_vm15 = vmmov %vm16066_vm2 }
0x2111   : > { %v5638_v32 = vsel %vm16062_vm13, %v11689_v41, %v11694_v53  ;;  %v5639_v47 = vsel %vm16063_vm11, %v11690_v46, %v11695_v54  ;;  %v5642_v19 = vsel %vm16064_vm7, %v11694_v53, %v11689_v41  ;;  %v5643_v38 = vsel %vm16065_vm8, %v11695_v54, %v11690_v46  ;;  %vm16069_vm0 = vmmov %vm16066_vm2 }
0x2112   : > { %v10476_v24 = vpack.c.bf16 %v5639_v47, %v5638_v32  ;;  %v10486_v50 = vpack.c.bf16 %v5643_v38, %v5642_v19  ;;  %vm16073_vm13 = vcmp.lt.s32.totalorder %v12525_v21, 2 }
0x2113   : > { %10413 = vmatmul.msk.bf16.vlgmr.msrb.gmra.mxu0 %vm5684_vm14, %v11361_v4  ;;  %10423 = vmatmul.msk.bf16.vlgmr.msrb.gmra.mxu1 %vm5684_vm14, %v11361_v4  ;;  %vm16074_vm11 = vmmov %vm16073_vm13 }
0x2114   : > { %10477 = vmatpush.bf16.msk.msra.mxu0 %vm13155_vm3, %v10476_v24  ;;  %10487 = vmatpush.bf16.msk.msra.mxu1 %vm13162_vm4, %v10486_v50  ;;  %vm16075_vm7 = vmmov %vm16074_vm11 }
0x2115   : > { %vm16076_vm8 = vmmov %vm16075_vm7 }
0x2116   : > { %v11703_v39 = vpop.permute.xlu0 %11702 }
0x2117   : > { %v11705_v42 = vunpack.i.h.bf16 %v11703_v39  ;;  %v11704_v33 = vunpack.i.l.bf16 %v11703_v39 }
0x2119   : > { %v5636_v40 = vsel %vm16066_vm2, %v11699_v57, %v11704_v33  ;;  %v5637_v3 = vsel %vm16067_vm12, %v11700_v6, %v11705_v42  ;;  %v5640_v8 = vsel %vm16068_vm15, %v11704_v33, %v11699_v57  ;;  %v5641_v15 = vsel %vm16069_vm0, %v11705_v42, %v11700_v6 }
0x211a   : > { %v10479_v20 = vpack.c.bf16 %v5637_v3, %v5636_v40  ;;  %v10489_v35 = vpack.c.bf16 %v5641_v15, %v5640_v8  ;;  %vm16077_vm2 = vcmp.lt.s32.totalorder %v12525_v21, 126 }
0x211b   : > { %vm16078_vm12 = vmmov %vm16077_vm2 }
0x211c   : > { %10480 = vmatpush.bf16.msk.msra.mxu0 %vm13155_vm3, %v10479_v20  ;;  %10490 = vmatpush.bf16.msk.msra.mxu1 %vm13162_vm4, %v10489_v35  ;;  %vm16079_vm15 = vmmov %vm16077_vm2 }
0x211d   : > { %v5796_v30 = vpop.f32.mrf.mxu2  ;;  %vm16080_vm0 = vmmov %vm16077_vm2 }
0x211e   : > { %v5825_v9 = vpop.f32.mrf.mxu3  ;;  %v5995_v59 = vpop.permute.xlu0 %5994 }
0x2123   : > { %10414 = vmatmul.msk.bf16.gmra.mxu0 %vm5684_vm14, %v11362_v62  ;;  %10424 = vmatmul.msk.bf16.gmra.mxu1 %vm5684_vm14, %v11362_v62 }
0x2125   : > { %v14079_v50 = vpop.f32.mrf.mxu2 }
0x2126   : > { %v14081_v12 = vpop.f32.mrf.mxu3 }
0x212d   : > { %v5801_v33 = vpop.f32.mrf.mxu2 }
0x212e   : > { %v5830_v40 = vpop.f32.mrf.mxu3 }
0x2133   : > { %10415 = vmatmul.msk.bf16.gmra.mxu0 %vm5684_vm14, %v11363_v13  ;;  %10425 = vmatmul.msk.bf16.gmra.mxu1 %vm5684_vm14, %v11363_v13 }
0x2135   : > { %v14091_v35 = vpop.f32.mrf.mxu2 }
0x2136   : > { %v14093_v16 = vpop.f32.mrf.mxu3 }
0x2143   : > { %10416 = vmatmul.msk.bf16.gmra.mxu0 %vm5684_vm14, %v11364_v10  ;;  %10426 = vmatmul.msk.bf16.gmra.mxu1 %vm5684_vm14, %v11364_v10  ;;  %v6005_v10 = vpop.permute.xlu1 %6004 }
0x2153   : > { %10481 = vmatmul.msk.bf16.vlgmr.msra.gmra.mxu0 %vm5684_vm14, %v11365_v23  ;;  %10491 = vmatmul.msk.bf16.vlgmr.msra.gmra.mxu1 %vm5684_vm14, %v11365_v23  ;;  %v5806_v23 = vpop.f32.mrf.mxu2 }
0x2163   : > { %10482 = vmatmul.msk.bf16.gmra.mxu0 %vm5684_vm14, %v11366_v34  ;;  %10492 = vmatmul.msk.bf16.gmra.mxu1 %vm5684_vm14, %v11366_v34  ;;  %v5835_v34 = vpop.f32.mrf.mxu3 }
0x2173   : > { %10483 = vmatmul.msk.bf16.gmra.mxu0 %vm5684_vm14, %v11367_v18  ;;  %10493 = vmatmul.msk.bf16.gmra.mxu1 %vm5684_vm14, %v11367_v18 }
0x2183   : > { %10484 = vmatmul.msk.bf16.gmra.mxu0 %vm5684_vm14, %v11368_v26  ;;  %10494 = vmatmul.msk.bf16.gmra.mxu1 %vm5684_vm14, %v11368_v26 }
0x2190   : > { %v5706_v49 = vpop.f32.mrf.mxu0  ;;  %v5735_v56 = vpop.f32.mrf.mxu1 }
0x2191   : > { %v5797_v11 = vadd.f32 %v5796_v30, %v5706_v49  ;;  %v5826_v1 = vadd.f32 %v5825_v9, %v5735_v56  ;;  %v6000_v30 = vpop.permute.xlu1 %5999  ;;  %v5808_v49 = vpop.f32.mrf.mxu2 }
0x2198   : > { %v14069_v55 = vpop.f32.mrf.mxu0  ;;  %v14071_v51 = vpop.f32.mrf.mxu1 }
0x2199   : > { %v5975_v63 = vpop.permute.xlu1 %5974 }
0x21a0   : > { %v5711_v54 = vpop.f32.mrf.mxu0  ;;  %v14073_v53 = vpop.f32.mrf.mxu1 }
0x21a8   : > { %v14075_v46 = vpop.f32.mrf.mxu0  ;;  %v14077_v41 = vpop.f32.mrf.mxu1 }
0x21b0   : > { %v5716_v4 = vpop.f32.mrf.mxu0  ;;  %v5745_v32 = vpop.f32.mrf.mxu1 }
0x21b1   : > { %v5807_v9 = vadd.f32 %v5806_v23, %v5716_v4  ;;  %v5836_v56 = vadd.f32 %v5835_v34, %v5745_v32  ;;  %v6010_v4 = vpop.permute.xlu2 %6009  ;;  %v5811_v23 = vpop.f32.mrf.mxu2 }
0x21b8   : > { %v5718_v47 = vpop.f32.mrf.mxu0  ;;  %v5747_v19 = vpop.f32.mrf.mxu1 }
0x21c0   : > { %v5721_v38 = vpop.f32.mrf.mxu0  ;;  %v5750_v24 = vpop.f32.mrf.mxu1 }
0x21c8   : > { %v14083_v39 = vpop.f32.mrf.mxu0  ;;  %v14085_v6 = vpop.f32.mrf.mxu1 }
0x21d0   : > { %v5899_v57 = vpop.f32.mrf.mxu0  ;;  %v5928_v42 = vpop.f32.mrf.mxu1 }
0x21d1   : > { %v5948_v3 = vadd.f32 %v5899_v57, %v5797_v11  ;;  %v5949_v8 = vadd.f32 %v5928_v42, %v5826_v1  ;;  %v5837_v11 = vpop.f32.mrf.mxu3 }
0x21d3   : > { %v6012_v52 = vadd.f32 %v5975_v63, %v5948_v3  ;;  %v6013_v29 = vadd.f32 %v5975_v63, %v5949_v8  ;;  %v5831_v63 = vadd.f32 %v5830_v40, %v14073_v53  ;;  %v5813_v53 = vpop.f32.mrf.mxu2 }
0x21d8   : > { %v14087_v15 = vpop.f32.mrf.mxu0  ;;  %v14089_v20 = vpop.f32.mrf.mxu1 }
0x21d9   : > { %v5840_v32 = vpop.f32.mrf.mxu3 }
0x21e0   : > { %v5904_v62 = vpop.f32.mrf.mxu0  ;;  %v5933_v13 = vpop.f32.mrf.mxu1 }
0x21e1   : > { %v5842_v40 = vpop.f32.mrf.mxu3 }
0x21e8   : > { %v14095_v18 = vpop.f32.mrf.mxu0  ;;  %v14097_v26 = vpop.f32.mrf.mxu1 }
0x21f0   : > { %v5909_v1 = vpop.f32.mrf.mxu0  ;;  %v5938_v57 = vpop.f32.mrf.mxu1 }
0x21f1   : > { %v5956_v42 = vadd.f32 %v5909_v1, %v5807_v9  ;;  %v5957_v60 = vadd.f32 %v5938_v57, %v5836_v56  ;;  %v5809_v9 = vadd.f32 %v5808_v49, %v5718_v47  ;;  %v5802_v1 = vadd.f32 %v5801_v33, %v5711_v54 }
0x21f2   : > { %v5838_v57 = vadd.f32 %v5837_v11, %v5747_v19  ;;  %v5953_v49 = vadd.f32 %v5933_v13, %v5831_v63  ;;  %v5985_v19 = vpop.permute.xlu2 %5984 }
0x21f3   : > { %v6020_v44 = vadd.f32 %v5995_v59, %v5956_v42  ;;  %v6021_v43 = vadd.f32 %v5995_v59, %v5957_v60  ;;  %v5952_v45 = vadd.f32 %v5904_v62, %v5802_v1 }
0x21f4   : > { %v6017_v62 = vadd.f32 %v5985_v19, %v5953_v49 }
0x21f5   : > { %v6036_v22 = vmul.f32 0.5, %v6020_v44  ;;  %v6037_v37 = vmul.f32 0.5, %v6021_v43  ;;  %v5812_v44 = vadd.f32 %v5811_v23, %v5721_v38  ;;  %v5841_v43 = vadd.f32 %v5840_v32, %v5750_v24 }
0x21f6   : > { %v6016_v11 = vadd.f32 %v5985_v19, %v5952_v45  ;;  %v5799_v45 = vadd.f32 %v14079_v50, %v14069_v55 }
0x21f7   : > { %12130 = vtanh.f32 %v6036_v22 }
0x21f8   : > { %12132 = vtanh.f32 %v6037_v37  ;;  %v5911_v14 = vpop.f32.mrf.mxu0  ;;  %v5940_v7 = vpop.f32.mrf.mxu1 }
0x21f9   : > { %12134 = vtanh.f32 %v6012_v52  ;;  %v5958_v3 = vadd.f32 %v5911_v14, %v5809_v9  ;;  %v5959_v22 = vadd.f32 %v5940_v7, %v5838_v57  ;;  %v5843_v9 = vadd.f32 %v5842_v40, %v14085_v6 }
0x21fa   : > { %12136 = vtanh.f32 %v6013_v29 }
0x21fb   : > { %v6022_v38 = vadd.f32 %v6000_v30, %v5958_v3  ;;  %v6023_v7 = vadd.f32 %v6000_v30, %v5959_v22  ;;  %v5990_v3 = vpop.permute.xlu0 %5989  ;;  %v5980_v22 = vpop.permute.xlu2 %5979 }
0x21fd   : > { %v12131_v34 = vpop.eup %12130  ;;  %v6038_v13 = vmul.f32 0.5, %v6022_v38 }
0x21fe   : > { %v12133_v56 = vpop.eup %12132  ;;  %v6052_v59 = vmul.f32 0.5, %v12131_v34  ;;  %v5814_v34 = vadd.f32 %v5813_v53, %v14083_v39  ;;  %v5833_v39 = vadd.f32 %v14093_v16, %v14077_v41 }
0x21ff   : > { %v6053_v60 = vmul.f32 0.5, %v12133_v56  ;;  %v12135_v0 = vpop.eup %12134 }
0x2200   : > { %v6060_v37 = vadd.f32 0.5, %v6052_v59  ;;  %v5914_v8 = vpop.f32.mrf.mxu0  ;;  %v5943_v42 = vpop.f32.mrf.mxu1 }
0x2201   : > { %v6061_v52 = vadd.f32 0.5, %v6053_v60  ;;  %v5960_v29 = vadd.f32 %v5914_v8, %v5812_v44  ;;  %v5961_v28 = vadd.f32 %v5943_v42, %v5841_v43  ;;  %v12137_v47 = vpop.eup %12136  ;;  %v5828_v44 = vadd.f32 %v14081_v12, %v14071_v51 }
0x2202   : > { %v14100_v54 = vmul.f32 %v12135_v0, %v6060_v37  ;;  %v6039_v0 = vmul.f32 0.5, %v6023_v7  ;;  %v5950_v43 = vadd.f32 %v14087_v15, %v5799_v45  ;;  %v11369_v45 = vld [vmem:[%s15701_s18] sm:$0xff] }
0x2203   : > { %v6024_v24 = vadd.f32 %v6005_v10, %v5960_v29  ;;  %v6025_v33 = vadd.f32 %v6005_v10, %v5961_v28  ;;  %v14102_v14 = vmul.f32 %v12137_v47, %v6061_v52  ;;  %v5804_v28 = vadd.f32 %v14091_v35, %v14075_v46 }
0x2204   : > { %v5955_v46 = vadd.f32 %v14097_v26, %v5833_v39  ;;  %v5951_v41 = vadd.f32 %v14089_v20, %v5828_v44  ;;  %v6014_v8 = vadd.f32 %v5980_v22, %v5950_v43  ;;  %v11370_v39 = vld [vmem:[%s15701_s18 + $0x8] sm:$0xff] }
0x2205   : > { %v6040_v23 = vmul.f32 0.5, %v6024_v24  ;;  %v6041_v32 = vmul.f32 0.5, %v6025_v33  ;;  %v5954_v6 = vadd.f32 %v14095_v18, %v5804_v28 }
0x2206   : > { %v6019_v51 = vadd.f32 %v5990_v3, %v5955_v46  ;;  %v6015_v52 = vadd.f32 %v5980_v22, %v5951_v41 }
0x2207   : > { %12138 = vtanh.f32 %v6040_v23  ;;  %v6018_v63 = vadd.f32 %v5990_v3, %v5954_v6  ;;  %v6106_v3 = vpop.permute.xlu1 %6105 }
0x2208   : > { %12140 = vtanh.f32 %v6041_v32  ;;  %v5916_v56 = vpop.f32.mrf.mxu0  ;;  %v5945_v1 = vpop.f32.mrf.mxu1 }
0x2209   : > { %12142 = vtanh.f32 %v6016_v11  ;;  %v5962_v10 = vadd.f32 %v5916_v56, %v5814_v34  ;;  %v5963_v30 = vadd.f32 %v5945_v1, %v5843_v9 }
0x220a   : > { %12144 = vtanh.f32 %v6017_v62 }
0x220b   : > { %12146 = vtanh.f32 %v6038_v13  ;;  %v6026_v57 = vadd.f32 %v6010_v4, %v5962_v10  ;;  %v6027_v59 = vadd.f32 %v6010_v4, %v5963_v30 }
0x220c   : > { %12148 = vtanh.f32 %v6039_v0 }
0x220d   : > { %v12139_v35 = vpop.eup %12138  ;;  %v6042_v60 = vmul.f32 0.5, %v6026_v57  ;;  %v6043_v55 = vmul.f32 0.5, %v6027_v59  ;;  %v6091_v57 = vpop.permute.xlu2 %6090 }
0x220e   : > { %v12141_v50 = vpop.eup %12140  ;;  %v6056_v16 = vmul.f32 0.5, %v12139_v35 }
0x220f   : > { %v12143_v18 = vpop.eup %12142  ;;  %v6057_v37 = vmul.f32 0.5, %v12141_v50  ;;  %12150 = vtanh.f32 %v6042_v60 }
0x2210   : > { %v12145_v4 = vpop.eup %12144  ;;  %v6064_v12 = vadd.f32 0.5, %v6056_v16  ;;  %12152 = vtanh.f32 %v6043_v55 }
0x2211   : > { %v12147_v26 = vpop.eup %12146  ;;  %v6065_v42 = vadd.f32 0.5, %v6057_v37  ;;  %12154 = vtanh.f32 %v6018_v63 }
0x2212   : > { %v12149_v15 = vpop.eup %12148  ;;  %v6076_v29 = vmul.f32 %v12143_v18, %v6064_v12  ;;  %12156 = vtanh.f32 %v6019_v51  ;;  %v6054_v20 = vmul.f32 0.5, %v12147_v26 }
0x2213   : > { %v6077_v47 = vmul.f32 %v12145_v4, %v6065_v42  ;;  %12158 = vtanh.f32 %v6014_v8  ;;  %v6055_v19 = vmul.f32 0.5, %v12149_v15 }
0x2214   : > { %12160 = vtanh.f32 %v6015_v52  ;;  %v6062_v53 = vadd.f32 0.5, %v6054_v20  ;;  %v10632_v20 = vld [vmem:[%s15700_s17 + $0x68] sm:$0xff] }
0x2215   : > { %v12151_v49 = vpop.eup %12150  ;;  %v6063_v11 = vadd.f32 0.5, %v6055_v19  ;;  %v10631_v19 = vld [vmem:[%s15700_s17 + $0x60] sm:$0xff] }
0x2216   : > { %v12153_v38 = vpop.eup %12152  ;;  %v6058_v24 = vmul.f32 0.5, %v12151_v49  ;;  %v10634_v49 = vld [vmem:[%s15700_s17 + $0x78] sm:$0xff] }
0x2217   : > { %v6059_v33 = vmul.f32 0.5, %v12153_v38  ;;  %v12155_v7 = vpop.eup %12154  ;;  %v10627_v38 = vld [vmem:[%s15700_s17 + $0x40] sm:$0xff] }
0x2218   : > { %v6066_v40 = vadd.f32 0.5, %v6058_v24  ;;  %v12157_v32 = vpop.eup %12156  ;;  %v10629_v24 = vld [vmem:[%s15700_s17 + $0x50] sm:$0xff] }
0x2219   : > { %v6067_v23 = vadd.f32 0.5, %v6059_v33  ;;  %v12159_v34 = vpop.eup %12158  ;;  %v10630_v33 = vld [vmem:[%s15700_s17 + $0x58] sm:$0xff] }
0x221a   : > { %v6078_v62 = vmul.f32 %v12155_v7, %v6066_v40  ;;  %v12161_v13 = vpop.eup %12160  ;;  %v6074_v56 = vmul.f32 %v12159_v34, %v6062_v53  ;;  %v10642_v53 = vld [vmem:[%s15702_s19 + $0x38] sm:$0xff]  ;;  %v10628_v40 = vld [vmem:[%s15700_s17 + $0x48] sm:$0xff]  ;;  %v10641_v7 = vld [vmem:[%s15702_s19 + $0x30] sm:$0xff] }
0x221b   : > { %v6079_v9 = vmul.f32 %v12157_v32, %v6067_v23  ;;  %v6075_v28 = vmul.f32 %v12161_v13, %v6063_v11  ;;  %v10639_v11 = vld [vmem:[%s15702_s19 + $0x20] sm:$0xff]  ;;  %v10640_v23 = vld [vmem:[%s15702_s19 + $0x28] sm:$0xff] }
0x221c   : > { %v6082_v0 = vpack.c.bf16 %v6078_v62, %v6076_v29  ;;  %v6080_v10 = vpack.c.bf16 %v6074_v56, %v14100_v54  ;;  %v6101_v54 = vpop.permute.xlu0 %6100  ;;  %v11371_v32 = vld [vmem:[%s15699_s16 + $0x80] sm:$0xff] }
0x221d   : > { %v6083_v1 = vpack.c.bf16 %v6079_v9, %v6077_v47  ;;  %v6081_v30 = vpack.c.bf16 %v6075_v28, %v14102_v14  ;;  %v10633_v47 = vld [vmem:[%s15700_s17 + $0x70] sm:$0xff] }
0x221e   : > { %6130 = vmatpush.bf16.msra.mxu2 %v6082_v0 }
0x221f   : > { %6149 = vmatpush.bf16.msra.mxu3 %v6083_v1 }
0x2222   : > { %6131 = vmatpush.bf16.msra.mxu2 %v6080_v10 }
0x2223   : > { %6150 = vmatpush.bf16.msra.mxu3 %v6081_v30 }
0x2224   : > { %v6096_v59 = vpop.permute.xlu0 %6095 }
0x2225   : > { %10503 = vmatmul.msk.bf16.vlgmr.msra.gmra.mxu2 %vm5684_vm14, %v11369_v45 }
0x2226   : > { %10505 = vmatmul.msk.bf16.vlgmr.msra.gmra.mxu3 %vm5684_vm14, %v11369_v45 }
0x2235   : > { %10504 = vmatmul.msk.bf16.gmra.mxu2 %vm5684_vm14, %v11370_v39 }
0x2236   : > { %10506 = vmatmul.msk.bf16.gmra.mxu3 %vm5684_vm14, %v11370_v39 }
0x22a8   : > { %v6133_v14 = vpop.f32.mrf.mxu2 }
0x22a9   : > { %v6152_v6 = vpop.f32.mrf.mxu3  ;;  %v14130_v46 = vadd.f32 %v6133_v14, %v6091_v57 }
0x22aa   : > { %v14156_v42 = vadd.f32 %v6152_v6, %v6091_v57  ;;  %v11372_v57 = vld [vmem:[%s15699_s16 + $0x88] sm:$0xff] }
0x22b0   : > { %v6135_v44 = vpop.f32.mrf.mxu2 }
0x22b1   : > { %v14132_v35 = vadd.f32 %v6135_v44, %v6096_v59  ;;  %v6154_v43 = vpop.f32.mrf.mxu3 }
0x22b2   : > { %v14149_v12 = vadd.f32 %v6154_v43, %v6096_v59 }
0x22b3   : > { %v11716_v60 = vpack.i.bf16 %v14132_v35, %v14130_v46  ;;  %v6170_v15 = vpack.c.bf16 %v14132_v35, %v14130_v46 }
0x22b4   : > { %v6171_v52 = vpack.c.bf16 %v14149_v12, %v14156_v42  ;;  %v11721_v29 = vpack.i.bf16 %v14149_v12, %v14156_v42 }
0x22b5   : > { %11717 = vrot.lane.b32.xlu0 %v11716_v60, %s15892_s10 }
0x22b8   : > { %v6138_v55 = vpop.f32.mrf.mxu2 }
0x22b9   : > { %v6157_v50 = vpop.f32.mrf.mxu3  ;;  %v14137_v16 = vadd.f32 %v6138_v55, %v6101_v54 }
0x22ba   : > { %v14141_v37 = vadd.f32 %v6157_v50, %v6101_v54 }
0x22bc   : > { %16071 = vst [vmem:[#allocation20_spill] sm:$0xff] %v14141_v37 }
0x22c0   : > { %v6140_v41 = vpop.f32.mrf.mxu2 }
0x22c1   : > { %v14139_v18 = vadd.f32 %v6140_v41, %v6106_v3  ;;  %v6159_v63 = vpop.f32.mrf.mxu3 }
0x22c2   : > { %v14143_v4 = vadd.f32 %v6159_v63, %v6106_v3 }
0x22c3   : > { %16070 = vst [vmem:[#allocation19_spill] sm:$0xff] %v14139_v18  ;;  %v11706_v22 = vpack.i.bf16 %v14139_v18, %v14137_v16  ;;  %v6172_v51 = vpack.c.bf16 %v14139_v18, %v14137_v16 }
0x22c4   : > { %16072 = vst [vmem:[#allocation21_spill] sm:$0xff] %v14143_v4  ;;  %v11711_v26 = vpack.i.bf16 %v14143_v4, %v14141_v37  ;;  %v6173_v8 = vpack.c.bf16 %v14143_v4, %v14141_v37 }
0x22c5   : > { %11707 = vrot.lane.b32.xlu1 %v11706_v22, %s15892_s10  ;;  %6388 = vmatpush.bf16.msrb.mxu0 %v6172_v51 }
0x22c6   : > { %11712 = vrot.lane.b32.xlu2 %v11711_v26, %s15892_s10  ;;  %6417 = vmatpush.bf16.msrb.mxu1 %v6173_v8 }
0x22c7   : > { %11732 = vrot.lane.b32.xlu0 %v11711_v26, %s15891_s5 }
0x22c9   : > { %6389 = vmatpush.bf16.msrb.mxu0 %v6170_v15 }
0x22ca   : > { %6418 = vmatpush.bf16.msrb.mxu1 %v6171_v52 }
0x22cc   : > { %10575 = vmatmul.msk.bf16.vlgmr.msrb.gmra.mxu0 %vm5684_vm14, %v11371_v32 }
0x22cd   : > { %11722 = vrot.lane.b32.xlu1 %v11721_v29, %s15892_s10  ;;  %10579 = vmatmul.msk.bf16.vlgmr.msrb.gmra.mxu1 %vm5684_vm14, %v11371_v32  ;;  %s16211_s10 = sld [smem:[#allocation3_spill]] }
0x22ce   : > { %11727 = vrot.lane.b32.xlu2 %v11706_v22, %s15891_s5 }
0x22cf   : > { %6600 = vperm.xlu0 %11483, %v10633_v47  }
0x22d3   : > { %s9612_s8 = sshll.u32 %s16211_s10, 2 }
0x22d4   : > { %p786_p4 = scmp.lt.s32.totalorder %s9612_s8, 7 }
0x22d5   : > { %11737 = vrot.lane.b32.xlu1 %v11716_v60, %s15891_s5 }
0x22d6   : > { %11742 = vrot.lane.b32.xlu2 %v11721_v29, %s15891_s5  ;;  %s16196_s5 = sld [smem:[#allocation36_spill]]  ;;  %s16248_s8 = smov (!%p786_p4, %s9612_s8), 7 }
0x22d7   : > { %6595 = vperm.xlu0 %11483, %v10632_v20   ;;  %s11281_s25 = sshll.u32 %s16248_s8, 6 }
0x22dc   : > { %10576 = vmatmul.msk.bf16.gmra.mxu0 %vm5684_vm14, %v11372_v57 }
0x22dd   : > { %6605 = vperm.xlu1 %11505, %v10634_v49   ;;  %10580 = vmatmul.msk.bf16.gmra.mxu1 %vm5684_vm14, %v11372_v57 }
0x22de   : > { %6590 = vperm.xlu2 %11494, %v10631_v19  }
0x22df   : > { %6570 = vperm.xlu0 %11483, %v10627_v38  }
0x22e5   : > { %6580 = vperm.xlu1 %11505, %v10629_v24   ;;  %v11375_v24 = vld [vmem:[%s15699_s16 + $0x60] sm:$0xff] }
0x22e6   : > { %6585 = vperm.xlu2 %11494, %v10630_v33  }
0x22e7   : > { %6703 = vperm.xlu0 %11483, %v10642_v53  }
0x22ed   : > { %6575 = vperm.xlu1 %11505, %v10628_v40  }
0x22ee   : > { %6698 = vperm.xlu2 %11494, %v10641_v7  }
0x22f5   : > { %6688 = vperm.xlu1 %11505, %v10639_v11  }
0x22f6   : > { %6693 = vperm.xlu2 %11494, %v10640_v23  }
0x2320   : > { %v11713_v62 = vpop.permute.xlu2 %11712 }
0x2321   : > { %v11715_v13 = vunpack.i.h.bf16 %v11713_v62  ;;  %v11714_v0 = vunpack.i.l.bf16 %v11713_v62 }
0x2327   : > { %v11718_v34 = vpop.permute.xlu0 %11717 }
0x2328   : > { %v11728_v54 = vpop.permute.xlu2 %11727  ;;  %v11720_v50 = vunpack.i.h.bf16 %v11718_v34  ;;  %v11719_v3 = vunpack.i.l.bf16 %v11718_v34 }
0x2329   : > { %v11730_v43 = vunpack.i.h.bf16 %v11728_v54  ;;  %v11729_v60 = vunpack.i.l.bf16 %v11728_v54 }
0x2330   : > { %v11743_v33 = vpop.permute.xlu2 %11742 }
0x2331   : > { %v11745_v40 = vunpack.i.h.bf16 %v11743_v33  ;;  %v11744_v7 = vunpack.i.l.bf16 %v11743_v33 }
0x2337   : > { %v11708_v9 = vpop.permute.xlu1 %11707 }
0x2338   : > { %v11710_v56 = vunpack.i.h.bf16 %v11708_v9  ;;  %v11709_v1 = vunpack.i.l.bf16 %v11708_v9 }
0x2339   : > { %v11733_v39 = vpop.permute.xlu0 %11732 }
0x233a   : > { %v6202_v28 = vsel %vm16073_vm13, %v11710_v56, %v11715_v13  ;;  %v6206_v10 = vsel %vm16074_vm11, %v11715_v13, %v11710_v56  ;;  %v6201_v30 = vsel %vm16075_vm7, %v11709_v1, %v11714_v0  ;;  %v6205_v45 = vsel %vm16076_vm8, %v11714_v0, %v11709_v1  ;;  %vm16081_vm13 = vmmov %vm16075_vm7  ;;  %v11373_v13 = vld [vmem:[%s15699_s16 + $0x90] sm:$0xff]  ;;  %v11376_v0 = vld [vmem:[%s15699_s16 + $0x68] sm:$0xff] }
0x233b   : > { %v10540_v14 = vpack.c.bf16 %v6206_v10, %v6205_v45  ;;  %v10550_v6 = vpack.c.bf16 %v6202_v28, %v6201_v30  ;;  %v11735_v59 = vunpack.i.h.bf16 %v11733_v39  ;;  %v11734_v44 = vunpack.i.l.bf16 %v11733_v39  ;;  %vm16082_vm11 = vmmov %vm16075_vm7  ;;  %10577 = vmatmul.msk.bf16.gmra.mxu0 %vm5684_vm14, %v11373_v13  ;;  %10581 = vmatmul.msk.bf16.gmra.mxu1 %vm5684_vm14, %v11373_v13  ;;  %v11378_v56 = vld [vmem:[%s15699_s16 + $0x78] sm:$0xff]  ;;  %v11379_v1 = vld [vmem:[%s15699_s16 + $0xa0] sm:$0xff] }
0x233c   : > { %vm16083_vm8 = vmmov %vm16075_vm7  ;;  %v11380_v28 = vld [vmem:[%s15699_s16 + $0xa8] sm:$0xff]  ;;  %v11381_v10 = vld [vmem:[%s15699_s16 + $0xb0] sm:$0xff] }
0x233d   : > { %10541 = vmatpush.bf16.msk.msrb.mxu2 %vm13249_vm6, %v10540_v14  ;;  %10551 = vmatpush.bf16.msk.msrb.mxu3 %vm13264_vm5, %v10550_v6  ;;  %v6234_v22 = vsel %vm16077_vm2, %v11730_v43, %v11735_v59  ;;  %v6238_v51 = vsel %vm16078_vm12, %v11735_v59, %v11730_v43  ;;  %v6233_v26 = vsel %vm16079_vm15, %v11729_v60, %v11734_v44  ;;  %vm16087_vm12 = vmmov %vm16080_vm0  ;;  %v11382_v30 = vld [vmem:[%s15699_s16 + $0xb8] sm:$0xff] }
0x233e   : > { %v6237_v8 = vsel %vm16080_vm0, %v11734_v44, %v11729_v60  ;;  %v10608_v19 = vpack.c.bf16 %v6234_v22, %v6233_v26  ;;  %vm16084_vm2 = vnez %v15907_v36  ;;  %vm16088_vm15 = vmmov %vm16080_vm0  ;;  %v11377_v36 = vld [vmem:[%s15699_s16 + $0x70] sm:$0xff] }
0x233f   : > { %v11723_v55 = vpop.permute.xlu1 %11722  ;;  %v10618_v38 = vpack.c.bf16 %v6238_v51, %v6237_v8 }
0x2340   : > { %v11725_v41 = vunpack.i.h.bf16 %v11723_v55  ;;  %v11724_v63 = vunpack.i.l.bf16 %v11723_v55 }
0x2342   : > { %v6199_v15 = vsel %vm16081_vm13, %v11719_v3, %v11724_v63  ;;  %v6200_v52 = vsel %vm16082_vm11, %v11720_v50, %v11725_v41  ;;  %v6203_v29 = vsel %vm16075_vm7, %v11724_v63, %v11719_v3  ;;  %v6204_v47 = vsel %vm16083_vm8, %v11725_v41, %v11720_v50 }
0x2343   : > { %v10543_v20 = vpack.c.bf16 %v6204_v47, %v6203_v29  ;;  %v10553_v49 = vpack.c.bf16 %v6200_v52, %v6199_v15 }
0x2345   : > { %10544 = vmatpush.bf16.msk.msrb.mxu2 %vm13249_vm6, %v10543_v20  ;;  %10554 = vmatpush.bf16.msk.msrb.mxu3 %vm13264_vm5, %v10553_v49  ;;  %vm16085_vm6 = vmmov %vm16080_vm0 }
0x2346   : > { %vm16086_vm5 = vmmov %vm16080_vm0 }
0x2347   : > { %v11738_v53 = vpop.permute.xlu1 %11737 }
0x2348   : > { %v11740_v11 = vunpack.i.h.bf16 %v11738_v53  ;;  %v11739_v23 = vunpack.i.l.bf16 %v11738_v53  ;;  %10545 = vmatmul.msk.bf16.vlgmr.msrb.gmra.mxu2 %vm5684_vm14, %v11375_v24  ;;  %10555 = vmatmul.msk.bf16.vlgmr.msrb.gmra.mxu3 %vm5684_vm14, %v11375_v24 }
0x2349   : > { %10609 = vmatpush.bf16.msk.msra.mxu2 %vm13279_vm10, %v10608_v19  ;;  %10619 = vmatpush.bf16.msk.msra.mxu3 %vm16084_vm2, %v10618_v38  ;;  %v6391_v45 = vpop.f32.mrf.mxu0 }
0x234a   : > { %v6232_v31 = vsel %vm16085_vm6, %v11740_v11, %v11745_v40  ;;  %v6236_v17 = vsel %vm16086_vm5, %v11745_v40, %v11740_v11  ;;  %v6231_v32 = vsel %vm16087_vm12, %v11739_v23, %v11744_v7  ;;  %v6235_v62 = vsel %vm16088_vm15, %v11744_v7, %v11739_v23  ;;  %v6420_v39 = vpop.f32.mrf.mxu1 }
0x234b   : > { %v10611_v34 = vpack.c.bf16 %v6232_v31, %v6231_v32  ;;  %v10621_v9 = vpack.c.bf16 %v6236_v17, %v6235_v62  ;;  %10578 = vmatmul.msk.bf16.gmra.mxu0 %vm5684_vm14, %v11374_v27  ;;  %10582 = vmatmul.msk.bf16.gmra.mxu1 %vm5684_vm14, %v11374_v27  ;;  %v6601_v31 = vpop.permute.xlu0 %6600 }
0x234d   : > { %10612 = vmatpush.bf16.msk.msra.mxu2 %vm13279_vm10, %v10611_v34  ;;  %10622 = vmatpush.bf16.msk.msra.mxu3 %vm16084_vm2, %v10621_v9 }
0x2351   : > { %v14324_v8 = vpop.f32.mrf.mxu0 }
0x2352   : > { %v14326_v15 = vpop.f32.mrf.mxu1 }
0x2353   : > { %v6596_v9 = vpop.permute.xlu0 %6595 }
0x2358   : > { %10546 = vmatmul.msk.bf16.gmra.mxu2 %vm5684_vm14, %v11376_v0  ;;  %10556 = vmatmul.msk.bf16.gmra.mxu3 %vm5684_vm14, %v11376_v0 }
0x2359   : > { %v6396_v49 = vpop.f32.mrf.mxu0 }
0x235a   : > { %v6425_v19 = vpop.f32.mrf.mxu1 }
0x2361   : > { %v14336_v40 = vpop.f32.mrf.mxu0 }
0x2362   : > { %v14338_v7 = vpop.f32.mrf.mxu1 }
0x2368   : > { %10547 = vmatmul.msk.bf16.gmra.mxu2 %vm5684_vm14, %v11377_v36  ;;  %10557 = vmatmul.msk.bf16.gmra.mxu3 %vm5684_vm14, %v11377_v36 }
0x2378   : > { %10548 = vmatmul.msk.bf16.gmra.mxu2 %vm5684_vm14, %v11378_v56  ;;  %10558 = vmatmul.msk.bf16.gmra.mxu3 %vm5684_vm14, %v11378_v56 }
0x2388   : > { %10613 = vmatmul.msk.bf16.vlgmr.msra.gmra.mxu2 %vm5684_vm14, %v11379_v1  ;;  %10623 = vmatmul.msk.bf16.vlgmr.msra.gmra.mxu3 %vm5684_vm14, %v11379_v1 }
0x2398   : > { %10614 = vmatmul.msk.bf16.gmra.mxu2 %vm5684_vm14, %v11380_v28  ;;  %10624 = vmatmul.msk.bf16.gmra.mxu3 %vm5684_vm14, %v11380_v28 }
0x23a8   : > { %10615 = vmatmul.msk.bf16.gmra.mxu2 %vm5684_vm14, %v11381_v10  ;;  %10625 = vmatmul.msk.bf16.gmra.mxu3 %vm5684_vm14, %v11381_v10 }
0x23b8   : > { %10616 = vmatmul.msk.bf16.gmra.mxu2 %vm5684_vm14, %v11382_v30  ;;  %10626 = vmatmul.msk.bf16.gmra.mxu3 %vm5684_vm14, %v11382_v30  ;;  %v6401_v17 = vpop.f32.mrf.mxu0  ;;  %v6430_v32 = vpop.f32.mrf.mxu1 }
0x23b9   : > { %v6591_v30 = vpop.permute.xlu2 %6590 }
0x23c0   : > { %v6403_v27 = vpop.f32.mrf.mxu0  ;;  %v6432_v36 = vpop.f32.mrf.mxu1 }
0x23cb   : > { %v6301_v54 = vpop.f32.mrf.mxu2  ;;  %v6330_v14 = vpop.f32.mrf.mxu3 }
0x23cc   : > { %v6392_v6 = vadd.f32 %v6391_v45, %v6301_v54  ;;  %v6421_v57 = vadd.f32 %v6420_v39, %v6330_v14 }
0x23d3   : > { %v14314_v59 = vpop.f32.mrf.mxu2  ;;  %v14316_v44 = vpop.f32.mrf.mxu3 }
0x23db   : > { %v6306_v43 = vpop.f32.mrf.mxu2  ;;  %v14318_v60 = vpop.f32.mrf.mxu3 }
0x23e3   : > { %v14320_v55 = vpop.f32.mrf.mxu2  ;;  %v14322_v50 = vpop.f32.mrf.mxu3 }
0x23eb   : > { %v6311_v3 = vpop.f32.mrf.mxu2  ;;  %v6340_v41 = vpop.f32.mrf.mxu3 }
0x23ec   : > { %v6402_v13 = vadd.f32 %v6401_v17, %v6311_v3  ;;  %v6431_v0 = vadd.f32 %v6430_v32, %v6340_v41  ;;  %v6606_v3 = vpop.permute.xlu1 %6605  ;;  %v6406_v41 = vpop.f32.mrf.mxu0 }
0x23ed   : > { %v6435_v17 = vpop.f32.mrf.mxu1 }
0x23f3   : > { %v6313_v63 = vpop.f32.mrf.mxu2  ;;  %v6342_v22 = vpop.f32.mrf.mxu3 }
0x23fb   : > { %v6316_v51 = vpop.f32.mrf.mxu2  ;;  %v6345_v26 = vpop.f32.mrf.mxu3 }
0x2403   : > { %v14328_v52 = vpop.f32.mrf.mxu2  ;;  %v14330_v29 = vpop.f32.mrf.mxu3 }
0x240b   : > { %v6494_v47 = vpop.f32.mrf.mxu2  ;;  %v6523_v20 = vpop.f32.mrf.mxu3 }
0x240c   : > { %v6543_v38 = vadd.f32 %v6494_v47, %v6392_v6  ;;  %v6544_v24 = vadd.f32 %v6523_v20, %v6421_v57  ;;  %v6571_v6 = vpop.permute.xlu0 %6570 }
0x240e   : > { %v6608_v57 = vadd.f32 %v6571_v6, %v6543_v38  ;;  %v6609_v47 = vadd.f32 %v6571_v6, %v6544_v24  ;;  %v6426_v24 = vadd.f32 %v6425_v19, %v14318_v60  ;;  %v6408_v60 = vpop.f32.mrf.mxu0  ;;  %v6437_v19 = vpop.f32.mrf.mxu1 }
0x2413   : > { %v14332_v33 = vpop.f32.mrf.mxu2  ;;  %v14334_v53 = vpop.f32.mrf.mxu3 }
0x241b   : > { %v6499_v11 = vpop.f32.mrf.mxu2  ;;  %v6528_v23 = vpop.f32.mrf.mxu3 }
0x2423   : > { %v14340_v62 = vpop.f32.mrf.mxu2  ;;  %v14342_v34 = vpop.f32.mrf.mxu3 }
0x242b   : > { %v6504_v56 = vpop.f32.mrf.mxu2  ;;  %v6533_v1 = vpop.f32.mrf.mxu3 }
0x242c   : > { %v6551_v28 = vadd.f32 %v6504_v56, %v6402_v13  ;;  %v6552_v10 = vadd.f32 %v6533_v1, %v6431_v0  ;;  %v6404_v13 = vadd.f32 %v6403_v27, %v6313_v63  ;;  %v6397_v56 = vadd.f32 %v6396_v49, %v6306_v43 }
0x242d   : > { %v6433_v1 = vadd.f32 %v6432_v36, %v6342_v22  ;;  %v6548_v27 = vadd.f32 %v6528_v23, %v6426_v24  ;;  %v6581_v22 = vpop.permute.xlu1 %6580 }
0x242e   : > { %v6616_v45 = vadd.f32 %v6591_v30, %v6551_v28  ;;  %v6617_v39 = vadd.f32 %v6591_v30, %v6552_v10  ;;  %v6407_v10 = vadd.f32 %v6406_v41, %v6316_v51  ;;  %v6436_v30 = vadd.f32 %v6435_v17, %v6345_v26 }
0x242f   : > { %v6547_v18 = vadd.f32 %v6499_v11, %v6397_v56  ;;  %v6613_v11 = vadd.f32 %v6581_v22, %v6548_v27 }
0x2430   : > { %v6632_v54 = vmul.f32 0.5, %v6616_v45  ;;  %v6633_v14 = vmul.f32 0.5, %v6617_v39 }
0x2432   : > { %12162 = vtanh.f32 %v6632_v54 }
0x2433   : > { %12164 = vtanh.f32 %v6633_v14  ;;  %v6506_v20 = vpop.f32.mrf.mxu2  ;;  %v6535_v21 = vpop.f32.mrf.mxu3 }
0x2434   : > { %12166 = vtanh.f32 %v6608_v57  ;;  %v6553_v38 = vadd.f32 %v6506_v20, %v6404_v13  ;;  %v6554_v54 = vadd.f32 %v6535_v21, %v6433_v1  ;;  %v6612_v20 = vadd.f32 %v6581_v22, %v6547_v18 }
0x2435   : > { %12168 = vtanh.f32 %v6609_v47  ;;  %v6438_v13 = vadd.f32 %v6437_v19, %v14330_v29  ;;  %v6394_v18 = vadd.f32 %v14324_v8, %v14314_v59 }
0x2436   : > { %v6618_v51 = vadd.f32 %v6596_v9, %v6553_v38  ;;  %v6619_v21 = vadd.f32 %v6596_v9, %v6554_v54  ;;  %v6586_v38 = vpop.permute.xlu2 %6585  ;;  %v6576_v54 = vpop.permute.xlu1 %6575 }
0x2438   : > { %v12163_v32 = vpop.eup %12162  ;;  %v6634_v23 = vmul.f32 0.5, %v6618_v51 }
0x2439   : > { %v12165_v0 = vpop.eup %12164  ;;  %v6648_v28 = vmul.f32 0.5, %v12163_v32  ;;  %v6409_v32 = vadd.f32 %v6408_v60, %v14328_v52  ;;  %v6428_v52 = vadd.f32 %v14338_v7, %v14322_v50 }
0x243a   : > { %v6649_v45 = vmul.f32 0.5, %v12165_v0  ;;  %v12167_v4 = vpop.eup %12166 }
0x243b   : > { %v6656_v39 = vadd.f32 0.5, %v6648_v28  ;;  %v6509_v14 = vpop.f32.mrf.mxu2  ;;  %v6538_v6 = vpop.f32.mrf.mxu3 }
0x243c   : > { %v6657_v57 = vadd.f32 0.5, %v6649_v45  ;;  %v6555_v47 = vadd.f32 %v6509_v14, %v6407_v10  ;;  %v6556_v37 = vadd.f32 %v6538_v6, %v6436_v30  ;;  %v12169_v63 = vpop.eup %12168  ;;  %v6423_v10 = vadd.f32 %v14326_v15, %v14316_v44 }
0x243d   : > { %v14345_v43 = vmul.f32 %v12167_v4, %v6656_v39  ;;  %v6635_v4 = vmul.f32 0.5, %v6619_v21  ;;  %v6545_v30 = vadd.f32 %v14332_v33, %v6394_v18  ;;  %v11383_v18 = vld [vmem:[%s15701_s18 + $0x10] sm:$0xff] }
0x243e   : > { %v6620_v26 = vadd.f32 %v6601_v31, %v6555_v47  ;;  %v6621_v49 = vadd.f32 %v6601_v31, %v6556_v37  ;;  %v14347_v36 = vmul.f32 %v12169_v63, %v6657_v57  ;;  %v6399_v37 = vadd.f32 %v14336_v40, %v14320_v55 }
0x243f   : > { %v6550_v55 = vadd.f32 %v14342_v34, %v6428_v52  ;;  %v6546_v50 = vadd.f32 %v14334_v53, %v6423_v10  ;;  %v6610_v14 = vadd.f32 %v6576_v54, %v6545_v30  ;;  %v11384_v52 = vld [vmem:[%s15701_s18 + $0x18] sm:$0xff]  ;;  %v6162_v10 = vadd.f32 %v14130_v46, %v13885_v2 }
0x2440   : > { %v6636_v41 = vmul.f32 0.5, %v6620_v26  ;;  %v6637_v17 = vmul.f32 0.5, %v6621_v49  ;;  %v6549_v29 = vadd.f32 %v14340_v62, %v6399_v37 }
0x2441   : > { %v6615_v44 = vadd.f32 %v6586_v38, %v6550_v55  ;;  %v6611_v57 = vadd.f32 %v6576_v54, %v6546_v50  ;;  %v6166_v54 = vadd.f32 %v14137_v16, %v13892_v61 }
0x2442   : > { %12170 = vtanh.f32 %v6636_v41  ;;  %v6614_v24 = vadd.f32 %v6586_v38, %v6549_v29 }
0x2443   : > { %12172 = vtanh.f32 %v6637_v17  ;;  %v6511_v0 = vpop.f32.mrf.mxu2  ;;  %v6540_v56 = vpop.f32.mrf.mxu3 }
0x2444   : > { %12174 = vtanh.f32 %v6612_v20  ;;  %v6557_v31 = vadd.f32 %v6511_v0, %v6409_v32  ;;  %v6558_v9 = vadd.f32 %v6540_v56, %v6438_v13 }
0x2445   : > { %12176 = vtanh.f32 %v6613_v11 }
0x2446   : > { %12178 = vtanh.f32 %v6634_v23  ;;  %v6622_v1 = vadd.f32 %v6606_v3, %v6557_v31  ;;  %v6623_v28 = vadd.f32 %v6606_v3, %v6558_v9 }
0x2447   : > { %12180 = vtanh.f32 %v6635_v4 }
0x2448   : > { %v12171_v40 = vpop.eup %12170  ;;  %v6638_v45 = vmul.f32 0.5, %v6622_v1  ;;  %v6639_v59 = vmul.f32 0.5, %v6623_v28 }
0x2449   : > { %v12173_v8 = vpop.eup %12172  ;;  %v6652_v7 = vmul.f32 0.5, %v12171_v40  ;;  %v6163_v40 = vadd.f32 %v14156_v42, %v13911_v25 }
0x244a   : > { %v12175_v62 = vpop.eup %12174  ;;  %v6653_v39 = vmul.f32 0.5, %v12173_v8  ;;  %12182 = vtanh.f32 %v6638_v45 }
0x244b   : > { %v12177_v3 = vpop.eup %12176  ;;  %v6660_v15 = vadd.f32 0.5, %v6652_v7  ;;  %12184 = vtanh.f32 %v6639_v59  ;;  %v6164_v7 = vadd.f32 %v14132_v35, %v13887_v48  ;;  %v16089_v48 = vld [vmem:[#allocation20_spill] sm:$0xff] }
0x244c   : > { %v12179_v34 = vpop.eup %12178  ;;  %v6661_v6 = vadd.f32 0.5, %v6653_v39  ;;  %12186 = vtanh.f32 %v6614_v24  ;;  %v6165_v24 = vadd.f32 %v14149_v12, %v13904_v5  ;;  %v6167_v35 = vadd.f32 %v16089_v48, %v13896_v58  ;;  %v6704_v12 = vpop.permute.xlu0 %6703 }
0x244d   : > { %v12181_v33 = vpop.eup %12180  ;;  %v6673_v47 = vmul.f32 %v12175_v62, %v6660_v15  ;;  %12188 = vtanh.f32 %v6615_v44  ;;  %v6650_v53 = vmul.f32 0.5, %v12179_v34 }
0x244e   : > { %v6674_v63 = vmul.f32 %v12177_v3, %v6661_v6  ;;  %12190 = vtanh.f32 %v6610_v14  ;;  %v6651_v22 = vmul.f32 0.5, %v12181_v33  ;;  %v16090_v33 = vld [vmem:[#allocation17_spill] sm:$0xff] }
0x244f   : > { %12192 = vtanh.f32 %v6611_v57  ;;  %v6658_v60 = vadd.f32 0.5, %v6650_v53  ;;  %v16091_v57 = vld [vmem:[#allocation19_spill] sm:$0xff]  ;;  %v16092_v53 = vld [vmem:[#allocation18_spill] sm:$0xff] }
0x2450   : > { %v12183_v27 = vpop.eup %12182  ;;  %v6659_v20 = vadd.f32 0.5, %v6651_v22 }
0x2451   : > { %v12185_v51 = vpop.eup %12184  ;;  %v6654_v26 = vmul.f32 0.5, %v12183_v27  ;;  %v16093_v27 = vld [vmem:[#allocation21_spill] sm:$0xff] }
0x2452   : > { %v6655_v49 = vmul.f32 0.5, %v12185_v51  ;;  %v12187_v21 = vpop.eup %12186  ;;  %v6169_v22 = vadd.f32 %v16093_v27, %v16092_v53 }
0x2453   : > { %v6662_v19 = vadd.f32 0.5, %v6654_v26  ;;  %v12189_v17 = vpop.eup %12188 }
0x2454   : > { %v6663_v41 = vadd.f32 0.5, %v6655_v49  ;;  %v12191_v32 = vpop.eup %12190 }
0x2455   : > { %v6675_v11 = vmul.f32 %v12187_v21, %v6662_v19  ;;  %v12193_v23 = vpop.eup %12192  ;;  %v6671_v0 = vmul.f32 %v12191_v32, %v6658_v60  ;;  %v10775_v32 = vld [vmem:[%s15700_s17 + $0x80] sm:$0xff] }
0x2456   : > { %v6676_v13 = vmul.f32 %v12189_v17, %v6663_v41  ;;  %v6672_v37 = vmul.f32 %v12193_v23, %v6659_v20  ;;  %v10781_v20 = vld [vmem:[%s15700_s17 + $0xb0] sm:$0xff]  ;;  %v10780_v41 = vld [vmem:[%s15700_s17 + $0xa8] sm:$0xff]  ;;  %v10782_v17 = vld [vmem:[%s15700_s17 + $0xb8] sm:$0xff] }
0x2457   : > { %v6679_v4 = vpack.c.bf16 %v6675_v11, %v6673_v47  ;;  %v6677_v31 = vpack.c.bf16 %v6671_v0, %v14345_v43  ;;  %v6699_v43 = vpop.permute.xlu2 %6698  ;;  %v6168_v47 = vadd.f32 %v16091_v57, %v16090_v33  ;;  %v10779_v11 = vld [vmem:[%s15700_s17 + $0xa0] sm:$0xff]  ;;  %v10778_v23 = vld [vmem:[%s15700_s17 + $0x98] sm:$0xff]  ;;  %v10776_v0 = vld [vmem:[%s15700_s17 + $0x88] sm:$0xff] }
0x2458   : > { %v6680_v56 = vpack.c.bf16 %v6676_v13, %v6674_v63  ;;  %v6678_v9 = vpack.c.bf16 %v6672_v37, %v14347_v36  ;;  %v6689_v36 = vpop.permute.xlu1 %6688  ;;  %v10777_v13 = vld [vmem:[%s15700_s17 + $0x90] sm:$0xff]  ;;  %v10787_v37 = vld [vmem:[%s15702_s19 + $0x40] sm:$0xff] }
0x2459   : > { %6728 = vmatpush.bf16.msra.mxu0 %v6679_v4  ;;  %v10790_v4 = vld [vmem:[%s15702_s19 + $0x58] sm:$0xff] }
0x245a   : > { %6747 = vmatpush.bf16.msra.mxu1 %v6680_v56  ;;  %v10789_v56 = vld [vmem:[%s15702_s19 + $0x50] sm:$0xff] }
0x245d   : > { %6729 = vmatpush.bf16.msra.mxu0 %v6677_v31  ;;  %v10788_v31 = vld [vmem:[%s15702_s19 + $0x48] sm:$0xff] }
0x245e   : > { %6748 = vmatpush.bf16.msra.mxu1 %v6678_v9  ;;  %v11385_v9 = vld [vmem:[%s15699_s16 + $0xe0] sm:$0xff] }
0x245f   : > { %v6694_v59 = vpop.permute.xlu2 %6693 }
0x2460   : > { %10651 = vmatmul.msk.bf16.vlgmr.msra.gmra.mxu0 %vm5684_vm14, %v11383_v18 }
0x2461   : > { %10653 = vmatmul.msk.bf16.vlgmr.msra.gmra.mxu1 %vm5684_vm14, %v11383_v18  ;;  %v11386_v18 = vld [vmem:[%s15699_s16 + $0xe8] sm:$0xff] }
0x2470   : > { %10652 = vmatmul.msk.bf16.gmra.mxu0 %vm5684_vm14, %v11384_v52 }
0x2471   : > { %10654 = vmatmul.msk.bf16.gmra.mxu1 %vm5684_vm14, %v11384_v52 }
0x24dd   : > { %v6731_v29 = vpop.f32.mrf.mxu0 }
0x24de   : > { %v6732_v1 = vadd.f32 %v6731_v29, %v6689_v36  ;;  %v6750_v28 = vpop.f32.mrf.mxu1 }
0x24df   : > { %v6751_v55 = vadd.f32 %v6750_v28, %v6689_v36 }
0x24e0   : > { %v14379_v30 = vadd.f32 %v6732_v1, %v6162_v10 }
0x24e1   : > { %v14381_v45 = vadd.f32 %v6751_v55, %v6163_v40 }
0x24e5   : > { %v6733_v8 = vpop.f32.mrf.mxu0 }
0x24e6   : > { %v6734_v38 = vadd.f32 %v6733_v8, %v6694_v59  ;;  %v6752_v50 = vpop.f32.mrf.mxu1 }
0x24e7   : > { %v6753_v62 = vadd.f32 %v6752_v50, %v6694_v59 }
0x24e8   : > { %v11756_v2 = vpack.i.bf16 %v6734_v38, %v6732_v1  ;;  %v14387_v46 = vadd.f32 %v6734_v38, %v6164_v7  ;;  %v6768_v60 = vpack.c.bf16 %v6734_v38, %v6732_v1 }
0x24e9   : > { %v14389_v39 = vadd.f32 %v6753_v62, %v6165_v24  ;;  %v6769_v19 = vpack.c.bf16 %v6753_v62, %v6751_v55  ;;  %v11761_v21 = vpack.i.bf16 %v6753_v62, %v6751_v55  ;;  %v16094_v55 = vld [vmem:[#allocation4_spill] sm:$0xff]  ;;  %v16099_v24 = vld [vmem:[#allocation9_spill] sm:$0xff] }
0x24ea   : > { %11757 = vrot.lane.b32.xlu2 %v11756_v2, %s15909_s9  ;;  %vm16095_vm10 = vcmp.lt.s32.totalorder %v16094_v55, 4  ;;  %vm16100_vm7 = vnez %v16099_v24  ;;  %vm16107_vm15 = vcmp.lt.s32.totalorder %v16094_v55, 124 }
0x24eb   : > { %vm16096_vm0 = vmmov %vm16095_vm10 }
0x24ec   : > { %vm16097_vm13 = vmmov %vm16096_vm0 }
0x24ed   : > { %v6736_v25 = vpop.f32.mrf.mxu0  ;;  %vm16098_vm11 = vmmov %vm16096_vm0 }
0x24ee   : > { %v6737_v42 = vadd.f32 %v6736_v25, %v6699_v43  ;;  %v6755_v3 = vpop.f32.mrf.mxu1  ;;  %vm16103_vm2 = vmmov %vm16096_vm0 }
0x24ef   : > { %v6756_v44 = vadd.f32 %v6755_v3, %v6699_v43  ;;  %vm16104_vm6 = vmmov %vm16096_vm0 }
0x24f0   : > { %v14396_v15 = vadd.f32 %v6737_v42, %v6166_v54  ;;  %vm16105_vm5 = vmmov %vm16096_vm0 }
0x24f1   : > { %v14398_v5 = vadd.f32 %v6756_v44, %v6167_v35  ;;  %vm16106_vm12 = vmmov %vm16096_vm0 }
0x24f5   : > { %v6738_v34 = vpop.f32.mrf.mxu0 }
0x24f6   : > { %v6739_v14 = vadd.f32 %v6738_v34, %v6704_v12  ;;  %v6757_v6 = vpop.f32.mrf.mxu1 }
0x24f7   : > { %v6758_v63 = vadd.f32 %v6757_v6, %v6704_v12  ;;  %v11387_v6 = vld [vmem:[%s15699_s16 + $0xf0] sm:$0xff] }
0x24f8   : > { %v11746_v61 = vpack.i.bf16 %v6739_v14, %v6737_v42  ;;  %v6770_v16 = vpack.c.bf16 %v6739_v14, %v6737_v42  ;;  %v14404_v51 = vadd.f32 %v6739_v14, %v6168_v47 }
0x24f9   : > { %v11751_v58 = vpack.i.bf16 %v6758_v63, %v6756_v44  ;;  %v6771_v26 = vpack.c.bf16 %v6758_v63, %v6756_v44  ;;  %v14406_v49 = vadd.f32 %v6758_v63, %v6169_v22 }
0x24fa   : > { %11747 = vrot.lane.b32.xlu0 %v11746_v61, %s15909_s9  ;;  %6986 = vmatpush.bf16.msrb.mxu2 %v6770_v16 }
0x24fb   : > { %11752 = vrot.lane.b32.xlu1 %v11751_v58, %s15909_s9  ;;  %7015 = vmatpush.bf16.msrb.mxu3 %v6771_v26 }
0x24fc   : > { %11772 = vrot.lane.b32.xlu2 %v11751_v58, %s15908_s6 }
0x24fe   : > { %6987 = vmatpush.bf16.msrb.mxu2 %v6768_v60 }
0x24ff   : > { %7016 = vmatpush.bf16.msrb.mxu3 %v6769_v19  ;;  %v11389_v19 = vld [vmem:[%s15699_s16 + $0xc0] sm:$0xff] }
0x2501   : > { %10723 = vmatmul.msk.bf16.vlgmr.msrb.gmra.mxu2 %vm5684_vm14, %v11385_v9 }
0x2502   : > { %11762 = vrot.lane.b32.xlu0 %v11761_v21, %s15909_s9  ;;  %10727 = vmatmul.msk.bf16.vlgmr.msrb.gmra.mxu3 %vm5684_vm14, %v11385_v9  ;;  %s12343_s9 = smov 64  }
0x2503   : > { %11767 = vrot.lane.b32.xlu1 %v11746_v61, %s15908_s6 }
0x2504   : > { %7198 = vperm.xlu2 %11494, %v10781_v20   ;;  %v16113_v20 = vld [vmem:[#allocation12_spill] sm:$0xff] }
0x250a   : > { %11777 = vrot.lane.b32.xlu0 %v11756_v2, %s15908_s6  ;;  %v16101_v2 = vld [vmem:[#allocation10_spill] sm:$0xff] }
0x250b   : > { %11782 = vrot.lane.b32.xlu1 %v11761_v21, %s15908_s6  ;;  %vm16102_vm8 = vnez %v16101_v2  ;;  %v16111_v21 = vld [vmem:[#allocation11_spill] sm:$0xff] }
0x250c   : > { %7193 = vperm.xlu2 %11494, %v10780_v41  }
0x2511   : > { %10724 = vmatmul.msk.bf16.gmra.mxu2 %vm5684_vm14, %v11386_v18 }
0x2512   : > { %7203 = vperm.xlu0 %11483, %v10782_v17   ;;  %10728 = vmatmul.msk.bf16.gmra.mxu3 %vm5684_vm14, %v11386_v18  ;;  %v11388_v18 = vld [vmem:[%s15699_s16 + $0xf8] sm:$0xff] }
0x2513   : > { %7188 = vperm.xlu1 %11505, %v10779_v11  }
0x2514   : > { %7168 = vperm.xlu2 %11494, %v10775_v32  }
0x251a   : > { %7178 = vperm.xlu0 %11483, %v10777_v13  }
0x251b   : > { %7183 = vperm.xlu1 %11505, %v10778_v23  }
0x251c   : > { %7301 = vperm.xlu2 %11494, %v10790_v4  }
0x2521   : > { %10725 = vmatmul.msk.bf16.gmra.mxu2 %vm5684_vm14, %v11387_v6 }
0x2522   : > { %7173 = vperm.xlu0 %11483, %v10776_v0   ;;  %10729 = vmatmul.msk.bf16.gmra.mxu3 %vm5684_vm14, %v11387_v6 }
0x2523   : > { %7296 = vperm.xlu1 %11505, %v10789_v56  }
0x252a   : > { %7286 = vperm.xlu0 %11483, %v10787_v37  }
0x252b   : > { %7291 = vperm.xlu1 %11505, %v10788_v31  }
0x2531   : > { %10726 = vmatmul.msk.bf16.gmra.mxu2 %vm5684_vm14, %v11388_v18 }
0x2532   : > { %10730 = vmatmul.msk.bf16.gmra.mxu3 %vm5684_vm14, %v11388_v18 }
0x2544   : > { %v11758_v52 = vpop.permute.xlu2 %11757 }
0x2545   : > { %v11760_v42 = vunpack.i.h.bf16 %v11758_v52  ;;  %v11759_v3 = vunpack.i.l.bf16 %v11758_v52  ;;  %v11390_v52 = vld [vmem:[%s15699_s16 + $0xc8] sm:$0xff] }
0x2556   : > { %v11773_v62 = vpop.permute.xlu2 %11772 }
0x2557   : > { %v11775_v35 = vunpack.i.h.bf16 %v11773_v62  ;;  %v11774_v12 = vunpack.i.l.bf16 %v11773_v62 }
0x256c   : > { %v11748_v43 = vpop.permute.xlu0 %11747 }
0x256d   : > { %v11753_v36 = vpop.permute.xlu1 %11752  ;;  %v11750_v29 = vunpack.i.h.bf16 %v11748_v43  ;;  %v11749_v1 = vunpack.i.l.bf16 %v11748_v43  ;;  %v11391_v43 = vld [vmem:[%s15699_s16 + $0xd0] sm:$0xff] }
0x256e   : > { %v11755_v28 = vunpack.i.h.bf16 %v11753_v36  ;;  %v11754_v10 = vunpack.i.l.bf16 %v11753_v36  ;;  %v11392_v36 = vld [vmem:[%s15699_s16 + $0xd8] sm:$0xff] }
0x2570   : > { %v6800_v40 = vsel %vm16095_vm10, %v11750_v29, %v11755_v28  ;;  %v6804_v59 = vsel %vm16096_vm0, %v11755_v28, %v11750_v29  ;;  %v6799_v8 = vsel %vm16097_vm13, %v11749_v1, %v11754_v10  ;;  %v6803_v38 = vsel %vm16098_vm11, %v11754_v10, %v11749_v1  ;;  %vm16108_vm10 = vmmov %vm16107_vm15  ;;  %v11393_v29 = vld [vmem:[%s15699_s16 + $0x100] sm:$0xff]  ;;  %v11394_v1 = vld [vmem:[%s15699_s16 + $0x108] sm:$0xff] }
0x2571   : > { %v10688_v50 = vpack.c.bf16 %v6804_v59, %v6803_v38  ;;  %v10698_v7 = vpack.c.bf16 %v6800_v40, %v6799_v8  ;;  %vm16109_vm0 = vmmov %vm16108_vm10  ;;  %vm16112_vm11 = vnez %v16111_v21  ;;  %v11395_v28 = vld [vmem:[%s15699_s16 + $0x110] sm:$0xff]  ;;  %v11396_v10 = vld [vmem:[%s15699_s16 + $0x118] sm:$0xff] }
0x2572   : > { %vm16110_vm13 = vmmov %vm16109_vm0 }
0x2573   : > { %10689 = vmatpush.bf16.msk.msrb.mxu0 %vm16100_vm7, %v10688_v50  ;;  %10699 = vmatpush.bf16.msk.msrb.mxu1 %vm16102_vm8, %v10698_v7 }
0x2574   : > { %v11763_v25 = vpop.permute.xlu0 %11762 }
0x2575   : > { %v11768_v54 = vpop.permute.xlu1 %11767  ;;  %v11765_v44 = vunpack.i.h.bf16 %v11763_v25  ;;  %v11764_v48 = vunpack.i.l.bf16 %v11763_v25 }
0x2576   : > { %v11770_v34 = vunpack.i.h.bf16 %v11768_v54  ;;  %v11769_v14 = vunpack.i.l.bf16 %v11768_v54 }
0x2577   : > { %v6797_v33 = vsel %vm16103_vm2, %v11759_v3, %v11764_v48  ;;  %v6798_v57 = vsel %vm16104_vm6, %v11760_v42, %v11765_v44  ;;  %v6801_v47 = vsel %vm16105_vm5, %v11764_v48, %v11759_v3  ;;  %v6802_v63 = vsel %vm16106_vm12, %v11765_v44, %v11760_v42  ;;  %vm16117_vm6 = vmmov %vm16109_vm0 }
0x2578   : > { %v6831_v53 = vsel %vm16107_vm15, %v11769_v14, %v11774_v12  ;;  %v6832_v27 = vsel %vm16108_vm10, %v11770_v34, %v11775_v35  ;;  %v6835_v22 = vsel %vm16109_vm0, %v11774_v12, %v11769_v14  ;;  %v6836_v61 = vsel %vm16110_vm13, %v11775_v35, %v11770_v34  ;;  %vm16118_vm5 = vmmov %vm16109_vm0 }
0x2579   : > { %v10756_v16 = vpack.c.bf16 %v6832_v27, %v6831_v53  ;;  %v10766_v58 = vpack.c.bf16 %v6836_v61, %v6835_v22  ;;  %v10691_v26 = vpack.c.bf16 %v6802_v63, %v6801_v47  ;;  %v10701_v60 = vpack.c.bf16 %v6798_v57, %v6797_v33 }
0x257a   : > { %vm16114_vm2 = vnez %v16113_v20  ;;  %v7199_v20 = vpop.permute.xlu2 %7198  ;;  %vm16119_vm12 = vcmp.lt.s32.totalorder %v16094_v55, 8 }
0x257b   : > { %10692 = vmatpush.bf16.msk.msrb.mxu0 %vm16100_vm7, %v10691_v26  ;;  %10702 = vmatpush.bf16.msk.msrb.mxu1 %vm16102_vm8, %v10701_v60  ;;  %vm16115_vm7 = vmmov %vm16109_vm0 }
0x257c   : > { %v11778_v41 = vpop.permute.xlu0 %11777  ;;  %vm16116_vm8 = vmmov %vm16109_vm0 }
0x257d   : > { %v11783_v17 = vpop.permute.xlu1 %11782  ;;  %v11780_v11 = vunpack.i.h.bf16 %v11778_v41  ;;  %v11779_v32 = vunpack.i.l.bf16 %v11778_v41  ;;  %vm16120_vm15 = vmmov %vm16119_vm12 }
0x257e   : > { %v11785_v13 = vunpack.i.h.bf16 %v11783_v17  ;;  %v11784_v23 = vunpack.i.l.bf16 %v11783_v17  ;;  %10693 = vmatmul.msk.bf16.vlgmr.msrb.gmra.mxu0 %vm5684_vm14, %v11389_v19  ;;  %10703 = vmatmul.msk.bf16.vlgmr.msrb.gmra.mxu1 %vm5684_vm14, %v11389_v19  ;;  %vm16121_vm10 = vmmov %vm16119_vm12 }
0x257f   : > { %10757 = vmatpush.bf16.msk.msra.mxu0 %vm16112_vm11, %v10756_v16  ;;  %10767 = vmatpush.bf16.msk.msra.mxu1 %vm16114_vm2, %v10766_v58  ;;  %vm16122_vm0 = vmmov %vm16121_vm10 }
0x2580   : > { %v6830_v4 = vsel %vm16115_vm7, %v11780_v11, %v11785_v13  ;;  %v6834_v0 = vsel %vm16116_vm8, %v11785_v13, %v11780_v11  ;;  %v6829_v56 = vsel %vm16117_vm6, %v11779_v32, %v11784_v23  ;;  %v6833_v37 = vsel %vm16118_vm5, %v11784_v23, %v11779_v32  ;;  %vm16123_vm13 = vmmov %vm16122_vm0 }
0x2581   : > { %v10759_v31 = vpack.c.bf16 %v6830_v4, %v6829_v56  ;;  %v10769_v9 = vpack.c.bf16 %v6834_v0, %v6833_v37  ;;  %vm16126_vm7 = vmmov %vm16122_vm0  ;;  %vm16131_vm5 = vcmp.lt.s32.totalorder %v16094_v55, 120 }
0x2582   : > { %v7194_v13 = vpop.permute.xlu2 %7193 }
0x2583   : > { %10760 = vmatpush.bf16.msk.msra.mxu0 %vm16112_vm11, %v10759_v31  ;;  %10770 = vmatpush.bf16.msk.msra.mxu1 %vm16114_vm2, %v10769_v9  ;;  %vm16124_vm11 = vmmov %vm16122_vm0 }
0x2584   : > { %v6989_v59 = vpop.f32.mrf.mxu2  ;;  %vm16125_vm2 = vmmov %vm16122_vm0 }
0x2585   : > { %v7018_v40 = vpop.f32.mrf.mxu3 }
0x258c   : > { %v14571_v6 = vpop.f32.mrf.mxu2 }
0x258d   : > { %v14569_v14 = vpop.f32.mrf.mxu3 }
0x258e   : > { %10694 = vmatmul.msk.bf16.gmra.mxu0 %vm5684_vm14, %v11390_v52  ;;  %10704 = vmatmul.msk.bf16.gmra.mxu1 %vm5684_vm14, %v11390_v52  ;;  %v7189_v52 = vpop.permute.xlu1 %7188 }
0x2594   : > { %v6994_v27 = vpop.f32.mrf.mxu2 }
0x2595   : > { %v7023_v53 = vpop.f32.mrf.mxu3 }
0x259c   : > { %v14583_v60 = vpop.f32.mrf.mxu2 }
0x259d   : > { %v14581_v26 = vpop.f32.mrf.mxu3 }
0x259e   : > { %10695 = vmatmul.msk.bf16.gmra.mxu0 %vm5684_vm14, %v11391_v43  ;;  %10705 = vmatmul.msk.bf16.gmra.mxu1 %vm5684_vm14, %v11391_v43 }
0x25a4   : > { %v6999_v17 = vpop.f32.mrf.mxu2 }
0x25a5   : > { %v7028_v41 = vpop.f32.mrf.mxu3 }
0x25ac   : > { %v7001_v56 = vpop.f32.mrf.mxu2 }
0x25ad   : > { %v7030_v4 = vpop.f32.mrf.mxu3 }
0x25ae   : > { %10696 = vmatmul.msk.bf16.gmra.mxu0 %vm5684_vm14, %v11392_v36  ;;  %10706 = vmatmul.msk.bf16.gmra.mxu1 %vm5684_vm14, %v11392_v36 }
0x25be   : > { %10761 = vmatmul.msk.bf16.vlgmr.msra.gmra.mxu0 %vm5684_vm14, %v11393_v29  ;;  %10771 = vmatmul.msk.bf16.vlgmr.msra.gmra.mxu1 %vm5684_vm14, %v11393_v29 }
0x25ce   : > { %10762 = vmatmul.msk.bf16.gmra.mxu0 %vm5684_vm14, %v11394_v1  ;;  %10772 = vmatmul.msk.bf16.gmra.mxu1 %vm5684_vm14, %v11394_v1 }
0x25de   : > { %10763 = vmatmul.msk.bf16.gmra.mxu0 %vm5684_vm14, %v11395_v28  ;;  %10773 = vmatmul.msk.bf16.gmra.mxu1 %vm5684_vm14, %v11395_v28  ;;  %v7169_v28 = vpop.permute.xlu2 %7168 }
0x25ee   : > { %10764 = vmatmul.msk.bf16.gmra.mxu0 %vm5684_vm14, %v11396_v10  ;;  %10774 = vmatmul.msk.bf16.gmra.mxu1 %vm5684_vm14, %v11396_v10 }
0x25fb   : > { %v6899_v8 = vpop.f32.mrf.mxu0  ;;  %v6928_v38 = vpop.f32.mrf.mxu1 }
0x25fc   : > { %v7019_v50 = vadd.f32 %v7018_v40, %v6928_v38  ;;  %v6990_v7 = vadd.f32 %v6989_v59, %v6899_v8  ;;  %v7204_v38 = vpop.permute.xlu0 %7203 }
0x2603   : > { %v14559_v62 = vpop.f32.mrf.mxu0  ;;  %v14561_v24 = vpop.f32.mrf.mxu1 }
0x260b   : > { %v6904_v2 = vpop.f32.mrf.mxu0  ;;  %v14563_v25 = vpop.f32.mrf.mxu1 }
0x2613   : > { %v14565_v42 = vpop.f32.mrf.mxu0  ;;  %v14567_v3 = vpop.f32.mrf.mxu1 }
0x261b   : > { %v6909_v54 = vpop.f32.mrf.mxu0  ;;  %v6938_v44 = vpop.f32.mrf.mxu1 }
0x261c   : > { %v7029_v23 = vadd.f32 %v7028_v41, %v6938_v44  ;;  %v7000_v0 = vadd.f32 %v6999_v17, %v6909_v54 }
0x2623   : > { %v6911_v48 = vpop.f32.mrf.mxu0  ;;  %v6940_v35 = vpop.f32.mrf.mxu1 }
0x2624   : > { %v7002_v44 = vadd.f32 %v7001_v56, %v6911_v48  ;;  %v7031_v41 = vadd.f32 %v7030_v4, %v6940_v35  ;;  %v7179_v35 = vpop.permute.xlu0 %7178 }
0x262b   : > { %v6914_v12 = vpop.f32.mrf.mxu0  ;;  %v6943_v34 = vpop.f32.mrf.mxu1 }
0x2633   : > { %v14573_v33 = vpop.f32.mrf.mxu0  ;;  %v14575_v57 = vpop.f32.mrf.mxu1 }
0x263b   : > { %v7092_v47 = vpop.f32.mrf.mxu0  ;;  %v7121_v63 = vpop.f32.mrf.mxu1 }
0x263c   : > { %v7141_v22 = vadd.f32 %v7092_v47, %v6990_v7  ;;  %v7142_v61 = vadd.f32 %v7121_v63, %v7019_v50  ;;  %v7033_v50 = vpop.f32.mrf.mxu3  ;;  %v7004_v7 = vpop.f32.mrf.mxu2  ;;  %v6995_v63 = vadd.f32 %v6994_v27, %v6904_v2 }
0x263e   : > { %v7206_v10 = vadd.f32 %v7169_v28, %v7141_v22  ;;  %v7207_v40 = vadd.f32 %v7169_v28, %v7142_v61  ;;  %v7024_v61 = vadd.f32 %v7023_v53, %v14563_v25 }
0x2643   : > { %v14577_v16 = vpop.f32.mrf.mxu0  ;;  %v14579_v58 = vpop.f32.mrf.mxu1 }
0x2644   : > { %v7035_v25 = vpop.f32.mrf.mxu3  ;;  %v7006_v53 = vpop.f32.mrf.mxu2 }
0x264b   : > { %v7097_v19 = vpop.f32.mrf.mxu0  ;;  %v7126_v21 = vpop.f32.mrf.mxu1 }
0x264c   : > { %v7146_v56 = vadd.f32 %v7126_v21, %v7024_v61  ;;  %v7184_v61 = vpop.permute.xlu1 %7183 }
0x2653   : > { %v14585_v11 = vpop.f32.mrf.mxu0  ;;  %v14587_v32 = vpop.f32.mrf.mxu1 }
0x265b   : > { %v7102_v37 = vpop.f32.mrf.mxu0  ;;  %v7131_v31 = vpop.f32.mrf.mxu1 }
0x265c   : > { %v7149_v9 = vadd.f32 %v7102_v37, %v7000_v0  ;;  %v7150_v18 = vadd.f32 %v7131_v31, %v7029_v23  ;;  %v7034_v23 = vadd.f32 %v7033_v50, %v6943_v34  ;;  %v7005_v0 = vadd.f32 %v7004_v7, %v6914_v12 }
0x265d   : > { %v7036_v50 = vadd.f32 %v7035_v25, %v14575_v57  ;;  %v7007_v7 = vadd.f32 %v7006_v53, %v14573_v33  ;;  %v7026_v57 = vadd.f32 %v14581_v26, %v14567_v3 }
0x265e   : > { %v7214_v43 = vadd.f32 %v7189_v52, %v7149_v9  ;;  %v7215_v36 = vadd.f32 %v7189_v52, %v7150_v18 }
0x2660   : > { %v7230_v29 = vmul.f32 0.5, %v7214_v43  ;;  %v7231_v1 = vmul.f32 0.5, %v7215_v36  ;;  %v7145_v36 = vadd.f32 %v7097_v19, %v6995_v63  ;;  %v7211_v19 = vadd.f32 %v7179_v35, %v7146_v56 }
0x2662   : > { %12194 = vtanh.f32 %v7230_v29 }
0x2663   : > { %12196 = vtanh.f32 %v7231_v1  ;;  %v7104_v59 = vpop.f32.mrf.mxu0  ;;  %v7133_v8 = vpop.f32.mrf.mxu1 }
0x2664   : > { %12198 = vtanh.f32 %v7206_v10  ;;  %v7151_v22 = vadd.f32 %v7104_v59, %v7002_v44  ;;  %v7152_v9 = vadd.f32 %v7133_v8, %v7031_v41  ;;  %v6992_v41 = vadd.f32 %v14571_v6, %v14559_v62 }
0x2665   : > { %12200 = vtanh.f32 %v7207_v40  ;;  %v7210_v40 = vadd.f32 %v7179_v35, %v7145_v36 }
0x2666   : > { %v7216_v34 = vadd.f32 %v7194_v13, %v7151_v22  ;;  %v7217_v10 = vadd.f32 %v7194_v13, %v7152_v9 }
0x2668   : > { %v12195_v54 = vpop.eup %12194  ;;  %v7232_v21 = vmul.f32 0.5, %v7216_v34 }
0x2669   : > { %v12197_v47 = vpop.eup %12196  ;;  %v7246_v17 = vmul.f32 0.5, %v12195_v54  ;;  %v7233_v54 = vmul.f32 0.5, %v7217_v10 }
0x266a   : > { %v7247_v37 = vmul.f32 0.5, %v12197_v47  ;;  %v12199_v43 = vpop.eup %12198 }
0x266b   : > { %v7254_v31 = vadd.f32 0.5, %v7246_v17  ;;  %v7107_v18 = vpop.f32.mrf.mxu0  ;;  %v7136_v52 = vpop.f32.mrf.mxu1 }
0x266c   : > { %v7255_v29 = vadd.f32 0.5, %v7247_v37  ;;  %v7153_v1 = vadd.f32 %v7107_v18, %v7005_v0  ;;  %v7154_v28 = vadd.f32 %v7136_v52, %v7034_v23  ;;  %v12201_v48 = vpop.eup %12200  ;;  %v7021_v0 = vadd.f32 %v14569_v14, %v14561_v24  ;;  %v7174_v18 = vpop.permute.xlu0 %7173 }
0x266d   : > { %v14590_v2 = vmul.f32 %v12199_v43, %v7254_v31  ;;  %v7143_v37 = vadd.f32 %v14577_v16, %v6992_v41 }
0x266e   : > { %v7218_v12 = vadd.f32 %v7199_v20, %v7153_v1  ;;  %v7219_v27 = vadd.f32 %v7199_v20, %v7154_v28  ;;  %v14592_v4 = vmul.f32 %v12201_v48, %v7255_v29  ;;  %v6997_v20 = vadd.f32 %v14583_v60, %v14565_v42 }
0x266f   : > { %v7148_v42 = vadd.f32 %v14587_v32, %v7026_v57  ;;  %v7144_v3 = vadd.f32 %v14579_v58, %v7021_v0  ;;  %v7208_v52 = vadd.f32 %v7174_v18, %v7143_v37 }
0x2670   : > { %v7234_v59 = vmul.f32 0.5, %v7218_v12  ;;  %v7235_v8 = vmul.f32 0.5, %v7219_v27  ;;  %v7147_v33 = vadd.f32 %v14585_v11, %v6997_v20 }
0x2671   : > { %v7213_v24 = vadd.f32 %v7184_v61, %v7148_v42  ;;  %v7209_v36 = vadd.f32 %v7174_v18, %v7144_v3 }
0x2672   : > { %12202 = vtanh.f32 %v7234_v59  ;;  %v7212_v31 = vadd.f32 %v7184_v61, %v7147_v33 }
0x2673   : > { %12204 = vtanh.f32 %v7235_v8  ;;  %v7109_v44 = vpop.f32.mrf.mxu0  ;;  %v7138_v47 = vpop.f32.mrf.mxu1 }
0x2674   : > { %12206 = vtanh.f32 %v7210_v40  ;;  %v7155_v63 = vadd.f32 %v7109_v44, %v7007_v7  ;;  %v7156_v13 = vadd.f32 %v7138_v47, %v7036_v50 }
0x2675   : > { %12208 = vtanh.f32 %v7211_v19 }
0x2676   : > { %12210 = vtanh.f32 %v7232_v21  ;;  %v7220_v17 = vadd.f32 %v7204_v38, %v7155_v63  ;;  %v7221_v23 = vadd.f32 %v7204_v38, %v7156_v13  ;;  %v11397_v63 = vld [vmem:[%s15701_s18 + $0x20] sm:$0xff]  ;;  %v11398_v13 = vld [vmem:[%s15701_s18 + $0x28] sm:$0xff] }
0x2677   : > { %12212 = vtanh.f32 %v7233_v54 }
0x2678   : > { %v12203_v60 = vpop.eup %12202  ;;  %v7236_v22 = vmul.f32 0.5, %v7220_v17  ;;  %v7237_v62 = vmul.f32 0.5, %v7221_v23 }
0x2679   : > { %v12205_v6 = vpop.eup %12204  ;;  %v7250_v26 = vmul.f32 0.5, %v12203_v60 }
0x267a   : > { %v12207_v11 = vpop.eup %12206  ;;  %v7251_v9 = vmul.f32 0.5, %v12205_v6  ;;  %12214 = vtanh.f32 %v7236_v22 }
0x267b   : > { %v12209_v38 = vpop.eup %12208  ;;  %v7258_v14 = vadd.f32 0.5, %v7250_v26  ;;  %12216 = vtanh.f32 %v7237_v62 }
0x267c   : > { %v12211_v32 = vpop.eup %12210  ;;  %v7259_v43 = vadd.f32 0.5, %v7251_v9  ;;  %12218 = vtanh.f32 %v7212_v31 }
0x267d   : > { %v12213_v16 = vpop.eup %12212  ;;  %v7271_v29 = vmul.f32 %v12207_v11, %v7258_v14  ;;  %12220 = vtanh.f32 %v7213_v24  ;;  %v7248_v58 = vmul.f32 0.5, %v12211_v32 }
0x267e   : > { %v7272_v1 = vmul.f32 %v12209_v38, %v7259_v43  ;;  %12222 = vtanh.f32 %v7208_v52  ;;  %v7249_v48 = vmul.f32 0.5, %v12213_v16  ;;  %v7302_v38 = vpop.permute.xlu2 %7301 }
0x267f   : > { %12224 = vtanh.f32 %v7209_v36  ;;  %v7256_v12 = vadd.f32 0.5, %v7248_v58  ;;  %v10927_v58 = vld [vmem:[%s15700_s17 + $0xe0] sm:$0xff] }
0x2680   : > { %v12215_v28 = vpop.eup %12214  ;;  %v7257_v53 = vadd.f32 0.5, %v7249_v48  ;;  %v10925_v48 = vld [vmem:[%s15700_s17 + $0xd0] sm:$0xff] }
0x2681   : > { %v12217_v56 = vpop.eup %12216  ;;  %v7252_v35 = vmul.f32 0.5, %v12215_v28  ;;  %v10923_v28 = vld [vmem:[%s15700_s17 + $0xc0] sm:$0xff] }
0x2682   : > { %v7253_v34 = vmul.f32 0.5, %v12217_v56  ;;  %v12219_v25 = vpop.eup %12218  ;;  %v10926_v56 = vld [vmem:[%s15700_s17 + $0xd8] sm:$0xff] }
0x2683   : > { %v7260_v27 = vadd.f32 0.5, %v7252_v35  ;;  %v12221_v40 = vpop.eup %12220  ;;  %v10938_v35 = vld [vmem:[%s15702_s19 + $0x78] sm:$0xff] }
0x2684   : > { %v7261_v10 = vadd.f32 0.5, %v7253_v34  ;;  %v12223_v8 = vpop.eup %12222  ;;  %v10924_v34 = vld [vmem:[%s15700_s17 + $0xc8] sm:$0xff] }
0x2685   : > { %v7273_v59 = vmul.f32 %v12219_v25, %v7260_v27  ;;  %v12225_v50 = vpop.eup %12224  ;;  %v7269_v21 = vmul.f32 %v12223_v8, %v7256_v12  ;;  %v10937_v12 = vld [vmem:[%s15702_s19 + $0x70] sm:$0xff]  ;;  %v10935_v25 = vld [vmem:[%s15702_s19 + $0x60] sm:$0xff] }
0x2686   : > { %v7274_v19 = vmul.f32 %v12221_v40, %v7261_v10  ;;  %v7270_v44 = vmul.f32 %v12225_v50, %v7257_v53  ;;  %v7982_v27 = vld [vmem:[%s15704_s21 + $0x30] sm:$0xff]  ;;  %v10936_v53 = vld [vmem:[%s15702_s19 + $0x68] sm:$0xff]  ;;  %v7983_v40 = vld [vmem:[%s15704_s21 + $0x38] sm:$0xff] }
0x2687   : > { %v7277_v7 = vpack.c.bf16 %v7273_v59, %v7271_v29  ;;  %v7275_v47 = vpack.c.bf16 %v7269_v21, %v14590_v2  ;;  %v7297_v2 = vpop.permute.xlu1 %7296  ;;  %v7981_v10 = vld [vmem:[%s15704_s21 + $0x28] sm:$0xff]  ;;  %v7980_v59 = vld [vmem:[%s15704_s21 + $0x20] sm:$0xff]  ;;  %v7979_v50 = vld [vmem:[%s15704_s21 + $0x18] sm:$0xff] }
0x2688   : > { %v7278_v54 = vpack.c.bf16 %v7274_v19, %v7272_v1  ;;  %v7276_v20 = vpack.c.bf16 %v7270_v44, %v14592_v4  ;;  %v7287_v4 = vpop.permute.xlu0 %7286  ;;  %v10930_v1 = vld [vmem:[%s15700_s17 + $0xf8] sm:$0xff]  ;;  %v7976_v8 = vld [vmem:[%s15704_s21] sm:$0xff]  ;;  %v7978_v19 = vld [vmem:[%s15704_s21 + $0x10] sm:$0xff] }
0x2689   : > { %7326 = vmatpush.bf16.msra.mxu2 %v7277_v7  ;;  %v7977_v7 = vld [vmem:[%s15704_s21 + $0x8] sm:$0xff]  ;;  %v11399_v21 = vld [vmem:[%s15699_s16 + $0x140] sm:$0xff] }
0x268a   : > { %7345 = vmatpush.bf16.msra.mxu3 %v7278_v54 }
0x268d   : > { %7327 = vmatpush.bf16.msra.mxu2 %v7275_v47 }
0x268e   : > { %7346 = vmatpush.bf16.msra.mxu3 %v7276_v20 }
0x268f   : > { %v7292_v42 = vpop.permute.xlu1 %7291 }
0x2690   : > { %10799 = vmatmul.msk.bf16.vlgmr.msra.gmra.mxu2 %vm5684_vm14, %v11397_v63 }
0x2691   : > { %10801 = vmatmul.msk.bf16.vlgmr.msra.gmra.mxu3 %vm5684_vm14, %v11397_v63 }
0x26a0   : > { %10800 = vmatmul.msk.bf16.gmra.mxu2 %vm5684_vm14, %v11398_v13 }
0x26a1   : > { %10802 = vmatmul.msk.bf16.gmra.mxu3 %vm5684_vm14, %v11398_v13 }
0x2713   : > { %v7329_v41 = vpop.f32.mrf.mxu2 }
0x2714   : > { %v7330_v57 = vadd.f32 %v7329_v41, %v7287_v4  ;;  %v7348_v33 = vpop.f32.mrf.mxu3 }
0x2715   : > { %v7349_v17 = vadd.f32 %v7348_v33, %v7287_v4 }
0x2716   : > { %v14621_v23 = vadd.f32 %v7330_v57, %v14379_v30 }
0x2717   : > { %v14624_v0 = vadd.f32 %v7349_v17, %v14381_v45 }
0x271b   : > { %v7331_v60 = vpop.f32.mrf.mxu2 }
0x271c   : > { %v7332_v37 = vadd.f32 %v7331_v60, %v7292_v42  ;;  %v7350_v22 = vpop.f32.mrf.mxu3 }
0x271d   : > { %v7351_v62 = vadd.f32 %v7350_v22, %v7292_v42  ;;  %v11400_v42 = vld [vmem:[%s15699_s16 + $0x148] sm:$0xff] }
0x271e   : > { %v11796_v6 = vpack.i.bf16 %v7332_v37, %v7330_v57  ;;  %v14627_v61 = vadd.f32 %v7332_v37, %v14387_v46 }
0x271f   : > { %v14630_v3 = vadd.f32 %v7351_v62, %v14389_v39  ;;  %v11801_v29 = vpack.i.bf16 %v7351_v62, %v7349_v17 }
0x2720   : > { %11797 = vrot.lane.b32.xlu1 %v11796_v6, %s15944_s3 }
0x2723   : > { %v7334_v26 = vpop.f32.mrf.mxu2 }
0x2724   : > { %v7335_v30 = vadd.f32 %v7334_v26, %v7297_v2  ;;  %v7353_v11 = vpop.f32.mrf.mxu3 }
0x2725   : > { %v7354_v31 = vadd.f32 %v7353_v11, %v7297_v2 }
0x2726   : > { %v14634_v45 = vadd.f32 %v7335_v30, %v14396_v15  ;;  %v7366_v15 = vpack.c.bf16 %v7332_v37, %v7330_v57 }
0x2727   : > { %v14637_v9 = vadd.f32 %v7354_v31, %v14398_v5  ;;  %v7367_v5 = vpack.c.bf16 %v7351_v62, %v7349_v17 }
0x272b   : > { %v7336_v18 = vpop.f32.mrf.mxu2 }
0x272c   : > { %v7337_v24 = vadd.f32 %v7336_v18, %v7302_v38  ;;  %v7355_v46 = vpop.f32.mrf.mxu3 }
0x272d   : > { %v7356_v14 = vadd.f32 %v7355_v46, %v7302_v38  ;;  %v16129_v46 = vld [vmem:[#allocation14_spill] sm:$0xff] }
0x272e   : > { %v11786_v32 = vpack.i.bf16 %v7337_v24, %v7335_v30  ;;  %v7368_v39 = vpack.c.bf16 %v7337_v24, %v7335_v30  ;;  %v14640_v52 = vadd.f32 %v7337_v24, %v14404_v51  ;;  %v10929_v51 = vld [vmem:[%s15700_s17 + $0xf0] sm:$0xff]  ;;  %v16127_v24 = vld [vmem:[#allocation13_spill] sm:$0xff]  ;;  %vm16130_vm6 = vnez %v16129_v46 }
0x272f   : > { %v11791_v43 = vpack.i.bf16 %v7356_v14, %v7354_v31  ;;  %v7369_v16 = vpack.c.bf16 %v7356_v14, %v7354_v31  ;;  %v14643_v36 = vadd.f32 %v7356_v14, %v14406_v49  ;;  %v10928_v49 = vld [vmem:[%s15700_s17 + $0xe8] sm:$0xff]  ;;  %vm16128_vm8 = vnez %v16127_v24 }
0x2730   : > { %11787 = vrot.lane.b32.xlu2 %v11786_v32, %s15944_s3  ;;  %7584 = vmatpush.bf16.msrb.mxu0 %v7368_v39 }
0x2731   : > { %11792 = vrot.lane.b32.xlu0 %v11791_v43, %s15944_s3  ;;  %7613 = vmatpush.bf16.msrb.mxu1 %v7369_v16 }
0x2732   : > { %11812 = vrot.lane.b32.xlu1 %v11791_v43, %s15943_s24 }
0x2734   : > { %7585 = vmatpush.bf16.msrb.mxu0 %v7366_v15 }
0x2735   : > { %7614 = vmatpush.bf16.msrb.mxu1 %v7367_v5 }
0x2737   : > { %10871 = vmatmul.msk.bf16.vlgmr.msrb.gmra.mxu0 %vm5684_vm14, %v11399_v21 }
0x2738   : > { %11802 = vrot.lane.b32.xlu2 %v11801_v29, %s15944_s3  ;;  %10875 = vmatmul.msk.bf16.vlgmr.msrb.gmra.mxu1 %vm5684_vm14, %v11399_v21  ;;  %s16214_s3 = sld [smem:[#allocation38_spill]] }
0x2739   : > { %11807 = vrot.lane.b32.xlu0 %v11786_v32, %s15943_s24 }
0x273a   : > { %7796 = vperm.xlu1 %11505, %v10929_v51  }
0x273e   : > { %s15602_s30 = scalar_lea.vmem %s16214_s3, %s11281_s25 }
0x2740   : > { %11817 = vrot.lane.b32.xlu2 %v11796_v6, %s15943_s24 }
0x2741   : > { %11822 = vrot.lane.b32.xlu0 %v11801_v29, %s15943_s24  ;;  %v11403_v29 = vld [vmem:[%s15699_s16 + $0x120] sm:$0xff] }
0x2742   : > { %7791 = vperm.xlu1 %11505, %v10928_v49  }
0x2747   : > { %10872 = vmatmul.msk.bf16.gmra.mxu0 %vm5684_vm14, %v11400_v42 }
0x2748   : > { %7801 = vperm.xlu2 %11494, %v10930_v1   ;;  %10876 = vmatmul.msk.bf16.gmra.mxu1 %vm5684_vm14, %v11400_v42 }
0x2749   : > { %7786 = vperm.xlu0 %11483, %v10927_v58  }
0x274a   : > { %7766 = vperm.xlu1 %11505, %v10923_v28  }
0x2750   : > { %7776 = vperm.xlu2 %11494, %v10925_v48  }
0x2751   : > { %7781 = vperm.xlu0 %11483, %v10926_v56  }
0x2752   : > { %7899 = vperm.xlu1 %11505, %v10938_v35   ;;  %v16135_v35 = vld [vmem:[#allocation15_spill] sm:$0xff] }
0x2758   : > { %7771 = vperm.xlu2 %11494, %v10924_v34   ;;  %v16137_v34 = vld [vmem:[#allocation16_spill] sm:$0xff] }
0x2759   : > { %7894 = vperm.xlu0 %11483, %v10937_v12  }
0x275a   : > { %8016 = vperm.xlu1 %11505, %v7982_v27  }
0x2760   : > { %7884 = vperm.xlu2 %11494, %v10935_v25  }
0x2761   : > { %7889 = vperm.xlu0 %11483, %v10936_v53  }
0x2762   : > { %8011 = vperm.xlu1 %11505, %v7981_v10  }
0x2768   : > { %8021 = vperm.xlu2 %11494, %v7983_v40   ;;  %v11401_v40 = vld [vmem:[%s15699_s16 + $0x150] sm:$0xff] }
0x2769   : > { %8006 = vperm.xlu0 %11483, %v7980_v59   ;;  %10873 = vmatmul.msk.bf16.gmra.mxu0 %vm5684_vm14, %v11401_v40 }
0x276a   : > { %7986 = vperm.xlu1 %11505, %v7976_v8   ;;  %10877 = vmatmul.msk.bf16.gmra.mxu1 %vm5684_vm14, %v11401_v40 }
0x2770   : > { %7996 = vperm.xlu2 %11494, %v7978_v19  }
0x2771   : > { %8001 = vperm.xlu0 %11483, %v7979_v50  }
0x2778   : > { %7991 = vperm.xlu2 %11494, %v7977_v7  }
0x278a   : > { %v11788_v54 = vpop.permute.xlu2 %11787 }
0x278b   : > { %v11790_v20 = vunpack.i.h.bf16 %v11788_v54  ;;  %v11789_v63 = vunpack.i.l.bf16 %v11788_v54  ;;  %v11404_v54 = vld [vmem:[%s15699_s16 + $0x128] sm:$0xff] }
0x2792   : > { %v11803_v44 = vpop.permute.xlu2 %11802  ;;  %v11798_v47 = vpop.permute.xlu1 %11797 }
0x2793   : > { %v11805_v13 = vunpack.i.h.bf16 %v11803_v44  ;;  %v11804_v2 = vunpack.i.l.bf16 %v11803_v44  ;;  %v11800_v41 = vunpack.i.h.bf16 %v11798_v47  ;;  %v11799_v57 = vunpack.i.l.bf16 %v11798_v47  ;;  %v11402_v44 = vld [vmem:[%s15699_s16 + $0x158] sm:$0xff]  ;;  %v11405_v47 = vld [vmem:[%s15699_s16 + $0x130] sm:$0xff] }
0x2794   : > { %10874 = vmatmul.msk.bf16.gmra.mxu0 %vm5684_vm14, %v11402_v44  ;;  %10878 = vmatmul.msk.bf16.gmra.mxu1 %vm5684_vm14, %v11402_v44 }
0x2795   : > { %v7396_v30 = vsel %vm16123_vm13, %v11800_v41, %v11805_v13  ;;  %v7400_v11 = vsel %vm16124_vm11, %v11805_v13, %v11800_v41  ;;  %v7395_v31 = vsel %vm16125_vm2, %v11799_v57, %v11804_v2  ;;  %v7399_v38 = vsel %vm16126_vm7, %v11804_v2, %v11799_v57  ;;  %vm16139_vm11 = vmmov %vm16131_vm5  ;;  %v11408_v13 = vld [vmem:[%s15699_s16 + $0x168] sm:$0xff]  ;;  %v11409_v2 = vld [vmem:[%s15699_s16 + $0x170] sm:$0xff] }
0x2796   : > { %v10839_v14 = vpack.c.bf16 %v7400_v11, %v7399_v38  ;;  %v10849_v32 = vpack.c.bf16 %v7396_v30, %v7395_v31  ;;  %vm16138_vm13 = vnez %v16137_v34  ;;  %vm16140_vm2 = vmmov %vm16131_vm5 }
0x2797   : > { %vm16141_vm7 = vmmov %vm16140_vm2 }
0x279a   : > { %v11818_v56 = vpop.permute.xlu2 %11817 }
0x279b   : > { %v11820_v27 = vunpack.i.h.bf16 %v11818_v56  ;;  %v11819_v25 = vunpack.i.l.bf16 %v11818_v56 }
0x27a3   : > { %v11793_v4 = vpop.permute.xlu0 %11792 }
0x27a4   : > { %v11795_v33 = vunpack.i.h.bf16 %v11793_v4  ;;  %v11794_v17 = vunpack.i.l.bf16 %v11793_v4  ;;  %v11813_v18 = vpop.permute.xlu1 %11812  ;;  %v11410_v4 = vld [vmem:[%s15699_s16 + $0x178] sm:$0xff] }
0x27a5   : > { %v11815_v43 = vunpack.i.h.bf16 %v11813_v18  ;;  %v11814_v16 = vunpack.i.l.bf16 %v11813_v18 }
0x27a6   : > { %v7397_v60 = vsel %vm16119_vm12, %v11789_v63, %v11794_v17  ;;  %v7398_v37 = vsel %vm16120_vm15, %v11790_v20, %v11795_v33  ;;  %v7401_v22 = vsel %vm16121_vm10, %v11794_v17, %v11789_v63  ;;  %v7402_v62 = vsel %vm16122_vm0, %v11795_v33, %v11790_v20  ;;  %vm16132_vm12 = vmmov %vm16131_vm5  ;;  %v11406_v20 = vld [vmem:[%s15699_s16 + $0x138] sm:$0xff]  ;;  %v11407_v63 = vld [vmem:[%s15699_s16 + $0x160] sm:$0xff] }
0x27a7   : > { %v10836_v6 = vpack.c.bf16 %v7402_v62, %v7401_v22  ;;  %v10846_v26 = vpack.c.bf16 %v7398_v37, %v7397_v60  ;;  %vm16133_vm15 = vmmov %vm16131_vm5  ;;  %vm16136_vm0 = vnez %v16135_v35 }
0x27a8   : > { %vm16134_vm10 = vmmov %vm16131_vm5 }
0x27a9   : > { %10837 = vmatpush.bf16.msk.msrb.mxu2 %vm16128_vm8, %v10836_v6  ;;  %10847 = vmatpush.bf16.msk.msrb.mxu3 %vm16130_vm6, %v10846_v26 }
0x27ab   : > { %v11808_v39 = vpop.permute.xlu0 %11807 }
0x27ac   : > { %v11810_v15 = vunpack.i.h.bf16 %v11808_v39  ;;  %v11809_v5 = vunpack.i.l.bf16 %v11808_v39  ;;  %v7797_v34 = vpop.permute.xlu1 %7796 }
0x27ad   : > { %10840 = vmatpush.bf16.msk.msrb.mxu2 %vm16128_vm8, %v10839_v14  ;;  %10850 = vmatpush.bf16.msk.msrb.mxu3 %vm16130_vm6, %v10849_v32  ;;  %vm16142_vm8 = vmmov %vm16140_vm2  ;;  %vm16161_vm6 = vcmp.lt.s32.totalorder %v16094_v55, 1 }
0x27ae   : > { %v7429_v51 = vsel %vm16131_vm5, %v11809_v5, %v11814_v16  ;;  %v7430_v49 = vsel %vm16132_vm12, %v11810_v15, %v11815_v43  ;;  %v7433_v1 = vsel %vm16133_vm15, %v11814_v16, %v11809_v5  ;;  %v7434_v58 = vsel %vm16134_vm10, %v11815_v43, %v11810_v15  ;;  %vm16162_vm5 = vmmov %vm16161_vm6 }
0x27af   : > { %v10904_v28 = vpack.c.bf16 %v7430_v49, %v7429_v51  ;;  %v10914_v48 = vpack.c.bf16 %v7434_v58, %v7433_v1  ;;  %vm16163_vm12 = vmmov %vm16162_vm5 }
0x27b0   : > { %10841 = vmatmul.msk.bf16.vlgmr.msrb.gmra.mxu2 %vm5684_vm14, %v11403_v29  ;;  %10851 = vmatmul.msk.bf16.vlgmr.msrb.gmra.mxu3 %vm5684_vm14, %v11403_v29  ;;  %vm16164_vm15 = vmmov %vm16162_vm5 }
0x27b1   : > { %10905 = vmatpush.bf16.msk.msra.mxu2 %vm16136_vm0, %v10904_v28  ;;  %10915 = vmatpush.bf16.msk.msra.mxu3 %vm16138_vm13, %v10914_v48  ;;  %vm16167_vm10 = vmmov %vm16162_vm5 }
0x27b3   : > { %v11823_v12 = vpop.permute.xlu0 %11822 }
0x27b4   : > { %v11825_v53 = vunpack.i.h.bf16 %v11823_v12  ;;  %v11824_v10 = vunpack.i.l.bf16 %v11823_v12  ;;  %v7587_v41 = vpop.f32.mrf.mxu0 }
0x27b5   : > { %v7616_v57 = vpop.f32.mrf.mxu1 }
0x27b6   : > { %v7427_v59 = vsel %vm16139_vm11, %v11819_v25, %v11824_v10  ;;  %v7428_v8 = vsel %vm16140_vm2, %v11820_v27, %v11825_v53  ;;  %v7431_v19 = vsel %vm16141_vm7, %v11824_v10, %v11819_v25  ;;  %v7432_v50 = vsel %vm16142_vm8, %v11825_v53, %v11820_v27  ;;  %v7792_v10 = vpop.permute.xlu1 %7791 }
0x27b7   : > { %v10907_v7 = vpack.c.bf16 %v7428_v8, %v7427_v59  ;;  %v10917_v21 = vpack.c.bf16 %v7432_v50, %v7431_v19 }
0x27b9   : > { %10908 = vmatpush.bf16.msk.msra.mxu2 %vm16136_vm0, %v10907_v7  ;;  %10918 = vmatpush.bf16.msk.msra.mxu3 %vm16138_vm13, %v10917_v21  ;;  %vm16168_vm0 = vmmov %vm16162_vm5 }
0x27ba   : > { %vm16169_vm13 = vmmov %vm16168_vm0 }
0x27bb   : > { %v7787_v44 = vpop.permute.xlu0 %7786  ;;  %vm16170_vm11 = vmmov %vm16168_vm0 }
0x27bc   : > { %v14830_v14 = vpop.f32.mrf.mxu0  ;;  %vm16171_vm2 = vmmov %vm16168_vm0 }
0x27bd   : > { %v14832_v32 = vpop.f32.mrf.mxu1  ;;  %vm16172_vm7 = vmmov %vm16168_vm0 }
0x27be   : > { %vm16173_vm8 = vmmov %vm16168_vm0 }
0x27c0   : > { %10842 = vmatmul.msk.bf16.gmra.mxu2 %vm5684_vm14, %v11404_v54  ;;  %10852 = vmatmul.msk.bf16.gmra.mxu3 %vm5684_vm14, %v11404_v54 }
0x27c4   : > { %v7592_v5 = vpop.f32.mrf.mxu0 }
0x27c5   : > { %v7621_v29 = vpop.f32.mrf.mxu1 }
0x27cc   : > { %v14842_v28 = vpop.f32.mrf.mxu0 }
0x27cd   : > { %v14844_v48 = vpop.f32.mrf.mxu1 }
0x27d0   : > { %10843 = vmatmul.msk.bf16.gmra.mxu2 %vm5684_vm14, %v11405_v47  ;;  %10853 = vmatmul.msk.bf16.gmra.mxu3 %vm5684_vm14, %v11405_v47 }
0x27e0   : > { %10844 = vmatmul.msk.bf16.gmra.mxu2 %vm5684_vm14, %v11406_v20  ;;  %10854 = vmatmul.msk.bf16.gmra.mxu3 %vm5684_vm14, %v11406_v20 }
0x27e6   : > { %v7597_v12 = vpop.f32.mrf.mxu0 }
0x27e7   : > { %v7626_v27 = vpop.f32.mrf.mxu1 }
0x27ee   : > { %v7599_v8 = vpop.f32.mrf.mxu0 }
0x27ef   : > { %v7628_v19 = vpop.f32.mrf.mxu1 }
0x27f0   : > { %10909 = vmatmul.msk.bf16.vlgmr.msra.gmra.mxu2 %vm5684_vm14, %v11407_v63  ;;  %10919 = vmatmul.msk.bf16.vlgmr.msra.gmra.mxu3 %vm5684_vm14, %v11407_v63 }
0x2800   : > { %10910 = vmatmul.msk.bf16.gmra.mxu2 %vm5684_vm14, %v11408_v13  ;;  %10920 = vmatmul.msk.bf16.gmra.mxu3 %vm5684_vm14, %v11408_v13 }
0x2810   : > { %10911 = vmatmul.msk.bf16.gmra.mxu2 %vm5684_vm14, %v11409_v2  ;;  %10921 = vmatmul.msk.bf16.gmra.mxu3 %vm5684_vm14, %v11409_v2  ;;  %v7767_v2 = vpop.permute.xlu1 %7766 }
0x2820   : > { %10912 = vmatmul.msk.bf16.gmra.mxu2 %vm5684_vm14, %v11410_v4  ;;  %10922 = vmatmul.msk.bf16.gmra.mxu3 %vm5684_vm14, %v11410_v4 }
0x2833   : > { %v7497_v33 = vpop.f32.mrf.mxu2  ;;  %v7526_v17 = vpop.f32.mrf.mxu3 }
0x2834   : > { %v7588_v42 = vadd.f32 %v7587_v41, %v7497_v33  ;;  %v7617_v60 = vadd.f32 %v7616_v57, %v7526_v17  ;;  %v7802_v17 = vpop.permute.xlu2 %7801 }
0x283b   : > { %v14820_v37 = vpop.f32.mrf.mxu2  ;;  %v14822_v22 = vpop.f32.mrf.mxu3 }
0x2843   : > { %v7502_v62 = vpop.f32.mrf.mxu2  ;;  %v14824_v6 = vpop.f32.mrf.mxu3 }
0x284b   : > { %v14826_v26 = vpop.f32.mrf.mxu2  ;;  %v14828_v30 = vpop.f32.mrf.mxu3 }
0x2853   : > { %v7507_v11 = vpop.f32.mrf.mxu2  ;;  %v7536_v31 = vpop.f32.mrf.mxu3 }
0x2854   : > { %v7598_v40 = vadd.f32 %v7597_v12, %v7507_v11  ;;  %v7627_v59 = vadd.f32 %v7626_v27, %v7536_v31 }
0x285b   : > { %v7509_v38 = vpop.f32.mrf.mxu2  ;;  %v7538_v18 = vpop.f32.mrf.mxu3 }
0x285c   : > { %v7600_v31 = vadd.f32 %v7599_v8, %v7509_v38  ;;  %v7629_v12 = vadd.f32 %v7628_v19, %v7538_v18  ;;  %v7777_v18 = vpop.permute.xlu2 %7776 }
0x2863   : > { %v7512_v24 = vpop.f32.mrf.mxu2  ;;  %v7541_v46 = vpop.f32.mrf.mxu3 }
0x286b   : > { %v14834_v39 = vpop.f32.mrf.mxu2  ;;  %v14836_v43 = vpop.f32.mrf.mxu3 }
0x2873   : > { %v7690_v16 = vpop.f32.mrf.mxu2  ;;  %v7719_v15 = vpop.f32.mrf.mxu3 }
0x2874   : > { %v7739_v51 = vadd.f32 %v7690_v16, %v7588_v42  ;;  %v7740_v49 = vadd.f32 %v7719_v15, %v7617_v60  ;;  %v7602_v42 = vpop.f32.mrf.mxu0  ;;  %v7631_v60 = vpop.f32.mrf.mxu1  ;;  %v7593_v15 = vadd.f32 %v7592_v5, %v7502_v62 }
0x2876   : > { %v7804_v4 = vadd.f32 %v7767_v2, %v7739_v51  ;;  %v7805_v41 = vadd.f32 %v7767_v2, %v7740_v49  ;;  %v7622_v49 = vadd.f32 %v7621_v29, %v14824_v6 }
0x287b   : > { %v14838_v1 = vpop.f32.mrf.mxu2  ;;  %v14840_v58 = vpop.f32.mrf.mxu3 }
0x287c   : > { %v7604_v6 = vpop.f32.mrf.mxu0  ;;  %v7633_v29 = vpop.f32.mrf.mxu1 }
0x2883   : > { %v7695_v56 = vpop.f32.mrf.mxu2  ;;  %v7724_v35 = vpop.f32.mrf.mxu3 }
0x2884   : > { %v7744_v8 = vadd.f32 %v7724_v35, %v7622_v49  ;;  %v7782_v49 = vpop.permute.xlu0 %7781 }
0x288b   : > { %v14846_v25 = vpop.f32.mrf.mxu2  ;;  %v14848_v53 = vpop.f32.mrf.mxu3 }
0x2893   : > { %v7700_v50 = vpop.f32.mrf.mxu2  ;;  %v7729_v7 = vpop.f32.mrf.mxu3 }
0x2894   : > { %v7747_v21 = vadd.f32 %v7700_v50, %v7598_v40  ;;  %v7748_v54 = vadd.f32 %v7729_v7, %v7627_v59  ;;  %v7603_v40 = vadd.f32 %v7602_v42, %v7512_v24  ;;  %v7632_v59 = vadd.f32 %v7631_v60, %v7541_v46 }
0x2895   : > { %v7605_v42 = vadd.f32 %v7604_v6, %v14834_v39  ;;  %v7634_v60 = vadd.f32 %v7633_v29, %v14836_v43  ;;  %v7624_v39 = vadd.f32 %v14844_v48, %v14828_v30 }
0x2896   : > { %v7812_v47 = vadd.f32 %v7787_v44, %v7747_v21  ;;  %v7813_v20 = vadd.f32 %v7787_v44, %v7748_v54 }
0x2898   : > { %v7828_v63 = vmul.f32 0.5, %v7812_v47  ;;  %v7829_v13 = vmul.f32 0.5, %v7813_v20  ;;  %v7743_v20 = vadd.f32 %v7695_v56, %v7593_v15  ;;  %v7809_v56 = vadd.f32 %v7777_v18, %v7744_v8 }
0x289a   : > { %12226 = vtanh.f32 %v7828_v63 }
0x289b   : > { %12228 = vtanh.f32 %v7829_v13  ;;  %v7702_v57 = vpop.f32.mrf.mxu2  ;;  %v7731_v33 = vpop.f32.mrf.mxu3 }
0x289c   : > { %12230 = vtanh.f32 %v7804_v4  ;;  %v7749_v51 = vadd.f32 %v7702_v57, %v7600_v31  ;;  %v7750_v21 = vadd.f32 %v7731_v33, %v7629_v12  ;;  %v7590_v12 = vadd.f32 %v14830_v14, %v14820_v37 }
0x289d   : > { %12232 = vtanh.f32 %v7805_v41  ;;  %v7808_v41 = vadd.f32 %v7777_v18, %v7743_v20 }
0x289e   : > { %v7814_v24 = vadd.f32 %v7792_v10, %v7749_v51  ;;  %v7815_v4 = vadd.f32 %v7792_v10, %v7750_v21 }
0x28a0   : > { %v12227_v11 = vpop.eup %12226  ;;  %v7830_v35 = vmul.f32 0.5, %v7814_v24 }
0x28a1   : > { %v12229_v16 = vpop.eup %12228  ;;  %v7844_v27 = vmul.f32 0.5, %v12227_v11  ;;  %v7831_v11 = vmul.f32 0.5, %v7815_v4 }
0x28a2   : > { %v7845_v50 = vmul.f32 0.5, %v12229_v16  ;;  %v12231_v47 = vpop.eup %12230 }
0x28a3   : > { %v7852_v7 = vadd.f32 0.5, %v7844_v27  ;;  %v7705_v54 = vpop.f32.mrf.mxu2  ;;  %v7734_v44 = vpop.f32.mrf.mxu3 }
0x28a4   : > { %v7853_v63 = vadd.f32 0.5, %v7845_v50  ;;  %v7751_v13 = vadd.f32 %v7705_v54, %v7603_v40  ;;  %v7752_v2 = vadd.f32 %v7734_v44, %v7632_v59  ;;  %v12233_v38 = vpop.eup %12232  ;;  %v7619_v59 = vadd.f32 %v14832_v32, %v14822_v22  ;;  %v7772_v54 = vpop.permute.xlu2 %7771 }
0x28a5   : > { %v14851_v62 = vmul.f32 %v12231_v47, %v7852_v7  ;;  %v7741_v50 = vadd.f32 %v14838_v1, %v7590_v12 }
0x28a6   : > { %v7816_v46 = vadd.f32 %v7797_v34, %v7751_v13  ;;  %v7817_v5 = vadd.f32 %v7797_v34, %v7752_v2  ;;  %v14853_v19 = vmul.f32 %v12233_v38, %v7853_v63  ;;  %v7595_v34 = vadd.f32 %v14842_v28, %v14826_v26 }
0x28a7   : > { %v7746_v26 = vadd.f32 %v14848_v53, %v7624_v39  ;;  %v7742_v30 = vadd.f32 %v14840_v58, %v7619_v59  ;;  %v7806_v44 = vadd.f32 %v7772_v54, %v7741_v50 }
0x28a8   : > { %v7832_v57 = vmul.f32 0.5, %v7816_v46  ;;  %v7833_v33 = vmul.f32 0.5, %v7817_v5  ;;  %v7745_v43 = vadd.f32 %v14846_v25, %v7595_v34 }
0x28a9   : > { %v7811_v22 = vadd.f32 %v7782_v49, %v7746_v26  ;;  %v7807_v20 = vadd.f32 %v7772_v54, %v7742_v30 }
0x28aa   : > { %12234 = vtanh.f32 %v7832_v57  ;;  %v7810_v7 = vadd.f32 %v7782_v49, %v7745_v43 }
0x28ab   : > { %12236 = vtanh.f32 %v7833_v33  ;;  %v7707_v31 = vpop.f32.mrf.mxu2  ;;  %v7736_v16 = vpop.f32.mrf.mxu3 }
0x28ac   : > { %12238 = vtanh.f32 %v7808_v41  ;;  %v7753_v15 = vadd.f32 %v7707_v31, %v7605_v42  ;;  %v7754_v10 = vadd.f32 %v7736_v16, %v7634_v60  ;;  %v7885_v39 = vpop.permute.xlu2 %7884 }
0x28ad   : > { %12240 = vtanh.f32 %v7809_v56 }
0x28ae   : > { %12242 = vtanh.f32 %v7830_v35  ;;  %v7818_v27 = vadd.f32 %v7802_v17, %v7753_v15  ;;  %v7819_v40 = vadd.f32 %v7802_v17, %v7754_v10  ;;  %v11411_v15 = vld [vmem:[%s15701_s18 + $0x30] sm:$0xff]  ;;  %v11412_v10 = vld [vmem:[%s15701_s18 + $0x38] sm:$0xff] }
0x28af   : > { %12244 = vtanh.f32 %v7831_v11 }
0x28b0   : > { %v12235_v28 = vpop.eup %12234  ;;  %v7834_v51 = vmul.f32 0.5, %v7818_v27  ;;  %v7835_v37 = vmul.f32 0.5, %v7819_v40 }
0x28b1   : > { %v12237_v14 = vpop.eup %12236  ;;  %v7848_v48 = vmul.f32 0.5, %v12235_v28 }
0x28b2   : > { %v12239_v25 = vpop.eup %12238  ;;  %v7849_v21 = vmul.f32 0.5, %v12237_v14  ;;  %12246 = vtanh.f32 %v7834_v51 }
0x28b3   : > { %v12241_v17 = vpop.eup %12240  ;;  %v7856_v32 = vadd.f32 0.5, %v7848_v48  ;;  %12248 = vtanh.f32 %v7835_v37 }
0x28b4   : > { %v12243_v53 = vpop.eup %12242  ;;  %v7857_v47 = vadd.f32 0.5, %v7849_v21  ;;  %12250 = vtanh.f32 %v7810_v7 }
0x28b5   : > { %v12245_v1 = vpop.eup %12244  ;;  %v7869_v63 = vmul.f32 %v12239_v25, %v7856_v32  ;;  %12252 = vtanh.f32 %v7811_v22  ;;  %v7846_v58 = vmul.f32 0.5, %v12243_v53 }
0x28b6   : > { %v7870_v13 = vmul.f32 %v12241_v17, %v7857_v47  ;;  %12254 = vtanh.f32 %v7806_v44  ;;  %v7847_v38 = vmul.f32 0.5, %v12245_v1  ;;  %v7900_v17 = vpop.permute.xlu1 %7899 }
0x28b7   : > { %12256 = vtanh.f32 %v7807_v20  ;;  %v7854_v46 = vadd.f32 0.5, %v7846_v58  ;;  %v11413_v20 = vld [vmem:[%s15703_s20] sm:$0xff] }
0x28b8   : > { %v12247_v2 = vpop.eup %12246  ;;  %v7855_v29 = vadd.f32 0.5, %v7847_v38 }
0x28b9   : > { %v12249_v8 = vpop.eup %12248  ;;  %v7850_v18 = vmul.f32 0.5, %v12247_v2 }
0x28ba   : > { %v7851_v24 = vmul.f32 0.5, %v12249_v8  ;;  %v12251_v6 = vpop.eup %12250 }
0x28bb   : > { %v7858_v5 = vadd.f32 0.5, %v7850_v18  ;;  %v12253_v41 = vpop.eup %12252 }
0x28bc   : > { %v7859_v4 = vadd.f32 0.5, %v7851_v24  ;;  %v12255_v33 = vpop.eup %12254 }
0x28bd   : > { %v7871_v57 = vmul.f32 %v12251_v6, %v7858_v5  ;;  %v12257_v42 = vpop.eup %12256  ;;  %v7867_v35 = vmul.f32 %v12255_v33, %v7854_v46 }
0x28be   : > { %v7872_v56 = vmul.f32 %v12253_v41, %v7859_v4  ;;  %v7868_v31 = vmul.f32 %v12257_v42, %v7855_v29  ;;  %v8017_v24 = vpop.permute.xlu1 %8016  ;;  %v8022_v29 = vpop.permute.xlu2 %8021 }
0x28bf   : > { %v7875_v60 = vpack.c.bf16 %v7871_v57, %v7869_v63  ;;  %v7873_v16 = vpack.c.bf16 %v7867_v35, %v14851_v62  ;;  %v7895_v62 = vpop.permute.xlu0 %7894 }
0x28c0   : > { %v7876_v11 = vpack.c.bf16 %v7872_v56, %v7870_v13  ;;  %v7874_v34 = vpack.c.bf16 %v7868_v31, %v14853_v19 }
0x28c1   : > { %7924 = vmatpush.bf16.msra.mxu0 %v7875_v60 }
0x28c2   : > { %7943 = vmatpush.bf16.msra.mxu1 %v7876_v11 }
0x28c5   : > { %7925 = vmatpush.bf16.msra.mxu0 %v7873_v16 }
0x28c6   : > { %7944 = vmatpush.bf16.msra.mxu1 %v7874_v34  ;;  %v8012_v4 = vpop.permute.xlu1 %8011  ;;  %v7997_v11 = vpop.permute.xlu2 %7996 }
0x28c7   : > { %v7890_v27 = vpop.permute.xlu0 %7889 }
0x28c8   : > { %10947 = vmatmul.msk.bf16.vlgmr.msra.gmra.mxu0 %vm5684_vm14, %v11411_v15 }
0x28c9   : > { %10949 = vmatmul.msk.bf16.vlgmr.msra.gmra.mxu1 %vm5684_vm14, %v11411_v15 }
0x28cf   : > { %v8007_v6 = vpop.permute.xlu0 %8006 }
0x28d7   : > { %v8002_v60 = vpop.permute.xlu0 %8001 }
0x28d8   : > { %10948 = vmatmul.msk.bf16.gmra.mxu0 %vm5684_vm14, %v11412_v10 }
0x28d9   : > { %10950 = vmatmul.msk.bf16.gmra.mxu1 %vm5684_vm14, %v11412_v10 }
0x2945   : > { %v7927_v19 = vpop.f32.mrf.mxu0 }
0x2946   : > { %v7946_v12 = vpop.f32.mrf.mxu1  ;;  %v7928_v43 = vadd.f32 %v7927_v19, %v7885_v39 }
0x2947   : > { %v7947_v40 = vadd.f32 %v7946_v12, %v7885_v39 }
0x2948   : > { %v7956_v51 = vadd.f32 %v7928_v43, %v14621_v23 }
0x2949   : > { %v7957_v14 = vadd.f32 %v7947_v40, %v14624_v0 }
0x294d   : > { %v7929_v59 = vpop.f32.mrf.mxu0 }
0x294e   : > { %v7930_v26 = vadd.f32 %v7929_v59, %v7890_v27  ;;  %v7948_v28 = vpop.f32.mrf.mxu1 }
0x294f   : > { %v7949_v50 = vadd.f32 %v7948_v28, %v7890_v27 }
0x2950   : > { %v7958_v37 = vadd.f32 %v7930_v26, %v14627_v61 }
0x2951   : > { %v7959_v49 = vadd.f32 %v7949_v50, %v14630_v3 }
0x2952   : > { %v7972_v30 = vpack.c.bf16 %v7958_v37, %v7956_v51 }
0x2953   : > { %v7973_v48 = vpack.c.bf16 %v7959_v49, %v7957_v14 }
0x2955   : > { %v7932_v25 = vpop.f32.mrf.mxu0 }
0x2956   : > { %v7951_v7 = vpop.f32.mrf.mxu1  ;;  %v7933_v21 = vadd.f32 %v7932_v25, %v7895_v62 }
0x2957   : > { %v7952_v54 = vadd.f32 %v7951_v7, %v7895_v62 }
0x2958   : > { %v7960_v47 = vadd.f32 %v7933_v21, %v14634_v45  ;;  %v11414_v45 = vld [vmem:[%s15703_s20 + $0x8] sm:$0xff]  ;;  %v7987_v21 = vpop.permute.xlu1 %7986 }
0x2959   : > { %v7961_v61 = vadd.f32 %v7952_v54, %v14637_v9  ;;  %v11415_v9 = vld [vmem:[%s15703_s20 + $0x10] sm:$0xff] }
0x295d   : > { %v7934_v22 = vpop.f32.mrf.mxu0 }
0x295e   : > { %v7935_v32 = vadd.f32 %v7934_v22, %v7900_v17  ;;  %v7953_v53 = vpop.f32.mrf.mxu1 }
0x295f   : > { %v7954_v44 = vadd.f32 %v7953_v53, %v7900_v17 }
0x2960   : > { %v7962_v23 = vadd.f32 %v7935_v32, %v14640_v52  ;;  %v11416_v52 = vld [vmem:[%s15703_s20 + $0x18] sm:$0xff] }
0x2961   : > { %v7963_v0 = vadd.f32 %v7954_v44, %v14643_v36 }
0x2962   : > { %v7974_v3 = vpack.c.bf16 %v7962_v23, %v7960_v47 }
0x2963   : > { %v7975_v1 = vpack.c.bf16 %v7963_v0, %v7961_v61  ;;  %v8850_v0 = vld [vmem:[%s16158_s22 + $0x78] sm:$0xff] }
0x2964   : > { %8062 = vmatpush.bf16.msrb.mxu0 %v7974_v3  ;;  %v8841_v3 = vld [vmem:[%s16158_s22 + $0x30] sm:$0xff] }
0x2965   : > { %8091 = vmatpush.bf16.msrb.mxu1 %v7975_v1  ;;  %v8849_v1 = vld [vmem:[%s16158_s22 + $0x70] sm:$0xff] }
0x2968   : > { %8063 = vmatpush.bf16.msrb.mxu0 %v7972_v30  ;;  %v7992_v30 = vpop.permute.xlu2 %7991 }
0x2969   : > { %8092 = vmatpush.bf16.msrb.mxu1 %v7973_v48 }
0x296b   : > { %10967 = vmatmul.msk.bf16.vlgmr.msrb.gmra.mxu0 %vm5684_vm14, %v11413_v20 }
0x296c   : > { %10971 = vmatmul.msk.bf16.vlgmr.msrb.gmra.mxu1 %vm5684_vm14, %v11413_v20  ;;  %v8846_v20 = vld [vmem:[%s16158_s22 + $0x58] sm:$0xff] }
0x297b   : > { %10968 = vmatmul.msk.bf16.gmra.mxu0 %vm5684_vm14, %v11414_v45 }
0x297c   : > { %10972 = vmatmul.msk.bf16.gmra.mxu1 %vm5684_vm14, %v11414_v45  ;;  %v8847_v45 = vld [vmem:[%s16158_s22 + $0x60] sm:$0xff] }
0x298b   : > { %10969 = vmatmul.msk.bf16.gmra.mxu0 %vm5684_vm14, %v11415_v9 }
0x298c   : > { %10973 = vmatmul.msk.bf16.gmra.mxu1 %vm5684_vm14, %v11415_v9  ;;  %v8848_v9 = vld [vmem:[%s16158_s22 + $0x68] sm:$0xff] }
0x299b   : > { %10970 = vmatmul.msk.bf16.gmra.mxu0 %vm5684_vm14, %v11416_v52 }
0x299c   : > { %10974 = vmatmul.msk.bf16.gmra.mxu1 %vm5684_vm14, %v11416_v52  ;;  %v8843_v52 = vld [vmem:[%s16158_s22 + $0x40] sm:$0xff]  ;;  %vm8331_vm14 = vcmask 523264  }
0x29e8   : > { %v8065_v36 = vpop.f32.mrf.mxu0 }
0x29e9   : > { %v8094_v63 = vpop.f32.mrf.mxu1  ;;  %v14966_v32 = vadd.f32 %v8065_v36, %v7987_v21  ;;  %v8842_v36 = vld [vmem:[%s16158_s22 + $0x38] sm:$0xff] }
0x29ea   : > { %v14969_v53 = vadd.f32 %v8094_v63, %v7987_v21  ;;  %v8845_v63 = vld [vmem:[%s16158_s22 + $0x50] sm:$0xff] }
0x29ec   : > { %16157 = vst [vmem:[#allocation22_spill] sm:$0xff] %v14969_v53 }
0x29f0   : > { %v8067_v13 = vpop.f32.mrf.mxu0 }
0x29f1   : > { %v8096_v58 = vpop.f32.mrf.mxu1  ;;  %v14954_v48 = vadd.f32 %v8067_v13, %v7992_v30  ;;  %v8838_v13 = vld [vmem:[%s16158_s22 + $0x18] sm:$0xff] }
0x29f2   : > { %v14960_v17 = vadd.f32 %v8096_v58, %v7992_v30  ;;  %v8839_v58 = vld [vmem:[%s16158_s22 + $0x20] sm:$0xff] }
0x29f3   : > { %16155 = vst [vmem:[#allocation15_spill] sm:$0xff] %v14954_v48  ;;  %v8114_v44 = vpack.c.bf16 %v14954_v48, %v14966_v32  ;;  %v11856_v23 = vpack.i.bf16 %v14954_v48, %v14966_v32 }
0x29f4   : > { %16156 = vst [vmem:[#allocation16_spill] sm:$0xff] %v14960_v17  ;;  %v8115_v47 = vpack.c.bf16 %v14960_v17, %v14969_v53  ;;  %v11861_v61 = vpack.i.bf16 %v14960_v17, %v14969_v53 }
0x29f8   : > { %v8070_v2 = vpop.f32.mrf.mxu0 }
0x29f9   : > { %v8099_v38 = vpop.f32.mrf.mxu1  ;;  %v14952_v49 = vadd.f32 %v8070_v2, %v7997_v11  ;;  %v8840_v2 = vld [vmem:[%s16158_s22 + $0x28] sm:$0xff] }
0x29fa   : > { %v14918_v16 = vadd.f32 %v8099_v38, %v7997_v11  ;;  %v9075_v38 = vld [vmem:[%s16159_s28] sm:$0xff] }
0x29fb   : > { %16154 = vst [vmem:[#allocation14_spill] sm:$0xff] %v14952_v49 }
0x29fc   : > { %16146 = vst [vmem:[#allocation18_spill] sm:$0xff] %v14918_v16 }
0x2a00   : > { %v8072_v8 = vpop.f32.mrf.mxu0 }
0x2a01   : > { %v8101_v18 = vpop.f32.mrf.mxu1  ;;  %v14945_v51 = vadd.f32 %v8072_v8, %v8002_v60  ;;  %v8844_v8 = vld [vmem:[%s16158_s22 + $0x48] sm:$0xff] }
0x2a02   : > { %v14916_v35 = vadd.f32 %v8101_v18, %v8002_v60  ;;  %v8837_v18 = vld [vmem:[%s16158_s22 + $0x10] sm:$0xff]  ;;  %v9082_v60 = vld [vmem:[%s16159_s28 + $0x38] sm:$0xff] }
0x2a03   : > { %16153 = vst [vmem:[#allocation13_spill] sm:$0xff] %v14945_v51  ;;  %v8116_v7 = vpack.c.bf16 %v14945_v51, %v14952_v49  ;;  %v11846_v22 = vpack.i.bf16 %v14945_v51, %v14952_v49 }
0x2a04   : > { %16145 = vst [vmem:[#allocation19_spill] sm:$0xff] %v14916_v35  ;;  %v11851_v15 = vpack.i.bf16 %v14916_v35, %v14918_v16  ;;  %v8117_v54 = vpack.c.bf16 %v14916_v35, %v14918_v16 }
0x2a08   : > { %v8075_v46 = vpop.f32.mrf.mxu0 }
0x2a09   : > { %v8104_v5 = vpop.f32.mrf.mxu1  ;;  %v14909_v57 = vadd.f32 %v8075_v46, %v8007_v6  ;;  %v8835_v46 = vld [vmem:[%s16158_s22] sm:$0xff] }
0x2a0a   : > { %v14942_v50 = vadd.f32 %v8104_v5, %v8007_v6  ;;  %v8836_v5 = vld [vmem:[%s16158_s22 + $0x8] sm:$0xff] }
0x2a0b   : > { %16143 = vst [vmem:[#allocation20_spill] sm:$0xff] %v14909_v57  ;;  %v9076_v6 = vld [vmem:[%s16159_s28 + $0x8] sm:$0xff] }
0x2a0c   : > { %16152 = vst [vmem:[#allocation12_spill] sm:$0xff] %v14942_v50 }
0x2a10   : > { %v8077_v41 = vpop.f32.mrf.mxu0 }
0x2a11   : > { %v14911_v33 = vadd.f32 %v8077_v41, %v8012_v4  ;;  %v8106_v56 = vpop.f32.mrf.mxu1  ;;  %v9080_v41 = vld [vmem:[%s16159_s28 + $0x28] sm:$0xff] }
0x2a12   : > { %v14935_v59 = vadd.f32 %v8106_v56, %v8012_v4  ;;  %v9079_v4 = vld [vmem:[%s16159_s28 + $0x20] sm:$0xff]  ;;  %v9081_v56 = vld [vmem:[%s16159_s28 + $0x30] sm:$0xff] }
0x2a13   : > { %16144 = vst [vmem:[#allocation17_spill] sm:$0xff] %v14911_v33  ;;  %v11826_v42 = vpack.i.bf16 %v14911_v33, %v14909_v57  ;;  %v8118_v37 = vpack.c.bf16 %v14911_v33, %v14909_v57 }
0x2a14   : > { %16151 = vst [vmem:[#allocation11_spill] sm:$0xff] %v14935_v59  ;;  %v8119_v14 = vpack.c.bf16 %v14935_v59, %v14942_v50  ;;  %v11836_v25 = vpack.i.bf16 %v14935_v59, %v14942_v50 }
0x2a15   : > { %11827 = vrot.lane.b32.xlu2 %v11826_v42, %s15877_s7 }
0x2a18   : > { %v8080_v31 = vpop.f32.mrf.mxu0 }
0x2a19   : > { %v8109_v34 = vpop.f32.mrf.mxu1  ;;  %v14923_v62 = vadd.f32 %v8080_v31, %v8017_v24 }
0x2a1a   : > { %v14927_v39 = vadd.f32 %v8109_v34, %v8017_v24  ;;  %v9078_v24 = vld [vmem:[%s16159_s28 + $0x18] sm:$0xff] }
0x2a1b   : > { %16147 = vst [vmem:[#allocation21_spill] sm:$0xff] %v14923_v62 }
0x2a1c   : > { %16149 = vst [vmem:[#allocation9_spill] sm:$0xff] %v14927_v39 }
0x2a1d   : > { %11852 = vrot.lane.b32.xlu2 %v11851_v15, %s15877_s7 }
0x2a20   : > { %v8082_v10 = vpop.f32.mrf.mxu0 }
0x2a21   : > { %v14925_v19 = vadd.f32 %v8082_v10, %v8022_v29  ;;  %v8111_v12 = vpop.f32.mrf.mxu1 }
0x2a22   : > { %v14929_v43 = vadd.f32 %v8111_v12, %v8022_v29  ;;  %v9077_v29 = vld [vmem:[%s16159_s28 + $0x10] sm:$0xff] }
0x2a23   : > { %16148 = vst [vmem:[#allocation4_spill] sm:$0xff] %v14925_v19  ;;  %v11831_v27 = vpack.i.bf16 %v14925_v19, %v14923_v62  ;;  %v8120_v40 = vpack.c.bf16 %v14925_v19, %v14923_v62 }
0x2a24   : > { %16150 = vst [vmem:[#allocation10_spill] sm:$0xff] %v14929_v43  ;;  %v11841_v26 = vpack.i.bf16 %v14929_v43, %v14927_v39  ;;  %v8121_v28 = vpack.c.bf16 %v14929_v43, %v14927_v39 }
0x2a25   : > { %11832 = vrot.lane.b32.xlu0 %v11831_v27, %s15877_s7  ;;  %8522 = vmatpush.bf16.msra.mxu0 %v8120_v40 }
0x2a26   : > { %11842 = vrot.lane.b32.xlu1 %v11841_v26, %s15877_s7  ;;  %8571 = vmatpush.bf16.msra.mxu1 %v8121_v28 }
0x2a27   : > { %11872 = vrot.lane.b32.xlu2 %v11831_v27, %s15876_s1 }
0x2a29   : > { %8523 = vmatpush.bf16.msra.mxu0 %v8118_v37 }
0x2a2a   : > { %8572 = vmatpush.bf16.msra.mxu1 %v8119_v14 }
0x2a2d   : > { %11837 = vrot.lane.b32.xlu0 %v11836_v25, %s15877_s7  ;;  %8524 = vmatpush.bf16.msra.mxu0 %v8116_v7 }
0x2a2e   : > { %8573 = vmatpush.bf16.msra.mxu1 %v8117_v54  ;;  %11847 = vrot.lane.b32.xlu1 %v11846_v22, %s15877_s7 }
0x2a2f   : > { %11877 = vrot.lane.b32.xlu2 %v11836_v25, %s15876_s1 }
0x2a31   : > { %8525 = vmatpush.bf16.msra.mxu0 %v8114_v44 }
0x2a32   : > { %8574 = vmatpush.bf16.msra.mxu1 %v8115_v47 }
0x2a35   : > { %11857 = vrot.lane.b32.xlu0 %v11856_v23, %s15877_s7 }
0x2a36   : > { %11862 = vrot.lane.b32.xlu1 %v11861_v61, %s15877_s7  ;;  %s16197_s7 = sld [smem:[#allocation24_spill]] }
0x2a37   : > { %11897 = vrot.lane.b32.xlu2 %v11856_v23, %s15876_s1 }
0x2a3d   : > { %11882 = vrot.lane.b32.xlu0 %v11841_v26, %s15876_s1 }
0x2a3e   : > { %11867 = vrot.lane.b32.xlu1 %v11826_v42, %s15876_s1 }
0x2a3f   : > { %8928 = vperm.xlu2 %11494, %v8850_v0  }
0x2a45   : > { %11887 = vrot.lane.b32.xlu0 %v11846_v22, %s15876_s1 }
0x2a46   : > { %11892 = vrot.lane.b32.xlu1 %v11851_v15, %s15876_s1 }
0x2a47   : > { %8883 = vperm.xlu2 %11494, %v8841_v3  }
0x2a4d   : > { %11902 = vrot.lane.b32.xlu0 %v11861_v61, %s15876_s1  ;;  %s16160_s1 = sld [smem:[#allocation34_spill]] }
0x2a4e   : > { %8923 = vperm.xlu1 %11505, %v8849_v1  }
0x2a4f   : > { %8908 = vperm.xlu2 %11494, %v8846_v20  }
0x2a53   : > { %v11417_v11 = vld [vmem:[%s16160_s1 + $0x40] sm:$0xff] }
0x2a54   : > { %11095 = vmatmul.msk.bf16.vlgmr.msra.gmra.mxu0 %vm8331_vm14, %v11417_v11  ;;  %11103 = vmatmul.msk.bf16.vlgmr.msra.gmra.mxu1 %vm8331_vm14, %v11417_v11 }
0x2a55   : > { %8913 = vperm.xlu0 %11483, %v8847_v45  }
0x2a56   : > { %8918 = vperm.xlu1 %11505, %v8848_v9  }
0x2a57   : > { %8893 = vperm.xlu2 %11494, %v8843_v52  }
0x2a5d   : > { %8888 = vperm.xlu0 %11483, %v8842_v36  }
0x2a5e   : > { %8903 = vperm.xlu1 %11505, %v8845_v63  }
0x2a5f   : > { %8868 = vperm.xlu2 %11494, %v8838_v13  }
0x2a65   : > { %8873 = vperm.xlu0 %11483, %v8839_v58  }
0x2a66   : > { %8878 = vperm.xlu1 %11505, %v8840_v2  }
0x2a67   : > { %9085 = vperm.xlu2 %11494, %v9075_v38  }
0x2a6d   : > { %8898 = vperm.xlu0 %11483, %v8844_v8  }
0x2a6e   : > { %8863 = vperm.xlu1 %11505, %v8837_v18   ;;  %v11418_v18 = vld [vmem:[%s16160_s1 + $0x48] sm:$0xff] }
0x2a6f   : > { %9100 = vperm.xlu2 %11494, %v9078_v24   ;;  %v11828_v42 = vpop.permute.xlu2 %11827  ;;  %11096 = vmatmul.msk.bf16.gmra.mxu0 %vm8331_vm14, %v11418_v18 }
0x2a70   : > { %v11830_v22 = vunpack.i.h.bf16 %v11828_v42  ;;  %v11829_v44 = vunpack.i.l.bf16 %v11828_v42  ;;  %11104 = vmatmul.msk.bf16.gmra.mxu1 %vm8331_vm14, %v11418_v18 }
0x2a75   : > { %8853 = vperm.xlu0 %11483, %v8835_v46  }
0x2a76   : > { %8858 = vperm.xlu1 %11505, %v8836_v5  }
0x2a77   : > { %v11853_v14 = vpop.permute.xlu2 %11852 }
0x2a78   : > { %v11855_v0 = vunpack.i.h.bf16 %v11853_v14  ;;  %v11854_v3 = vunpack.i.l.bf16 %v11853_v14 }
0x2a7d   : > { %9090 = vperm.xlu0 %11483, %v9076_v6  }
0x2a7e   : > { %9095 = vperm.xlu1 %11505, %v9077_v29  }
0x2a81   : > { %v11873_v24 = vpop.permute.xlu2 %11872 }
0x2a85   : > { %9105 = vperm.xlu0 %11483, %v9079_v4  }
0x2a86   : > { %9110 = vperm.xlu1 %11505, %v9080_v41  }
0x2a8d   : > { %9115 = vperm.xlu0 %11483, %v9081_v56  }
0x2a95   : > { %9120 = vperm.xlu0 %11483, %v9082_v60  }
0x2a97   : > { %v11833_v31 = vpop.permute.xlu0 %11832 }
0x2a98   : > { %v11843_v34 = vpop.permute.xlu1 %11842  ;;  %v11835_v15 = vunpack.i.h.bf16 %v11833_v31  ;;  %v11834_v10 = vunpack.i.l.bf16 %v11833_v31 }
0x2a99   : > { %v11845_v12 = vunpack.i.h.bf16 %v11843_v34  ;;  %v11844_v27 = vunpack.i.l.bf16 %v11843_v34 }
0x2a9b   : > { %v8178_v40 = vsel %vm16161_vm6, %v11835_v15, %v11845_v12  ;;  %v8186_v26 = vsel %vm16162_vm5, %v11845_v12, %v11835_v15  ;;  %v8177_v28 = vsel %vm16163_vm12, %v11834_v10, %v11844_v27  ;;  %v8185_v37 = vsel %vm16164_vm15, %v11844_v27, %v11834_v10  ;;  %vm16174_vm6 = vmmov %vm16168_vm0  ;;  %v11425_v12 = vld [vmem:[%s16160_s1] sm:$0xff] }
0x2a9c   : > { %v11024_v30 = vpack.c.bf16 %v8186_v26, %v8185_v37  ;;  %v11044_v25 = vpack.c.bf16 %v8178_v40, %v8177_v28  ;;  %vm16175_vm5 = vmmov %vm16168_vm0  ;;  %v11875_v40 = vunpack.i.h.bf16 %v11873_v24  ;;  %v11874_v26 = vunpack.i.l.bf16 %v11873_v24  ;;  %v11878_v28 = vpop.permute.xlu2 %11877 }
0x2a9d   : > { %vm16176_vm12 = vmmov %vm16168_vm0 }
0x2a9e   : > { %11025 = vmatpush.bf16.msk.msrb.mxu2 %vm13124_vm1, %v11024_v30  ;;  %11045 = vmatpush.bf16.msk.msrb.mxu3 %vm13131_vm9, %v11044_v25  ;;  %vm16177_vm15 = vmmov %vm16168_vm0 }
0x2a9f   : > { %v11838_v54 = vpop.permute.xlu0 %11837 }
0x2aa0   : > { %v11840_v47 = vunpack.i.h.bf16 %v11838_v54  ;;  %v11839_v23 = vunpack.i.l.bf16 %v11838_v54  ;;  %v11848_v61 = vpop.permute.xlu1 %11847 }
0x2aa1   : > { %v11850_v1 = vunpack.i.h.bf16 %v11848_v61  ;;  %v11849_v20 = vunpack.i.l.bf16 %v11848_v61 }
0x2aa2   : > { %v8175_v45 = vsel %vm16167_vm10, %v11829_v44, %v11839_v23  ;;  %v8176_v9 = vsel %vm16168_vm0, %v11830_v22, %v11840_v47  ;;  %v8183_v52 = vsel %vm16169_vm13, %v11839_v23, %v11829_v44  ;;  %v8184_v36 = vsel %vm16170_vm11, %v11840_v47, %v11830_v22  ;;  %vm16178_vm10 = vmmov %vm16168_vm0 }
0x2aa3   : > { %v11027_v63 = vpack.c.bf16 %v8184_v36, %v8183_v52  ;;  %v11047_v13 = vpack.c.bf16 %v8176_v9, %v8175_v45  ;;  %v8174_v58 = vsel %vm16171_vm2, %v11850_v1, %v11855_v0  ;;  %v8182_v2 = vsel %vm16172_vm7, %v11855_v0, %v11850_v1 }
0x2aa4   : > { %v8173_v38 = vsel %vm16173_vm8, %v11849_v20, %v11854_v3  ;;  %v8181_v8 = vsel %vm16174_vm6, %v11854_v3, %v11849_v20  ;;  %vm16179_vm0 = vcmp.lt.s32.totalorder %v16094_v55, 127  ;;  %v11880_v47 = vunpack.i.h.bf16 %v11878_v28  ;;  %v11419_v3 = vld [vmem:[%s16160_s1 + $0x50] sm:$0xff] }
0x2aa5   : > { %11028 = vmatpush.bf16.msk.msrb.mxu2 %vm13124_vm1, %v11027_v63  ;;  %11048 = vmatpush.bf16.msk.msrb.mxu3 %vm13131_vm9, %v11047_v13  ;;  %v11030_v46 = vpack.c.bf16 %v8182_v2, %v8181_v8  ;;  %v11050_v5 = vpack.c.bf16 %v8174_v58, %v8173_v38  ;;  %vm16182_vm13 = vmmov %vm16179_vm0  ;;  %v11879_v23 = vunpack.i.l.bf16 %v11878_v28  ;;  %v11427_v55 = vld [vmem:[%s16160_s1 + $0x10] sm:$0xff] }
0x2aa6   : > { %vm16183_vm11 = vmmov %vm16179_vm0  ;;  %11097 = vmatmul.msk.bf16.gmra.mxu0 %vm8331_vm14, %v11419_v3  ;;  %11105 = vmatmul.msk.bf16.gmra.mxu1 %vm8331_vm14, %v11419_v3 }
0x2aa7   : > { %v11858_v6 = vpop.permute.xlu0 %11857  ;;  %vm16184_vm2 = vmmov %vm16179_vm0 }
0x2aa8   : > { %v11863_v29 = vpop.permute.xlu1 %11862  ;;  %v11860_v4 = vunpack.i.h.bf16 %v11858_v6  ;;  %v11859_v41 = vunpack.i.l.bf16 %v11858_v6  ;;  %vm16185_vm7 = vmmov %vm16179_vm0 }
0x2aa9   : > { %v11865_v56 = vunpack.i.h.bf16 %v11863_v29  ;;  %v11864_v42 = vunpack.i.l.bf16 %v11863_v29  ;;  %11031 = vmatpush.bf16.msk.msrb.mxu2 %vm13124_vm1, %v11030_v46  ;;  %11051 = vmatpush.bf16.msk.msrb.mxu3 %vm13131_vm9, %v11050_v5  ;;  %vm16186_vm8 = vmmov %vm16179_vm0 }
0x2aaa   : > { %vm16189_vm6 = vmmov %vm16179_vm0 }
0x2aab   : > { %v8172_v60 = vsel %vm16175_vm5, %v11860_v4, %v11865_v56  ;;  %v8180_v11 = vsel %vm16176_vm12, %v11865_v56, %v11860_v4  ;;  %v8171_v31 = vsel %vm16177_vm15, %v11859_v41, %v11864_v42  ;;  %v8179_v34 = vsel %vm16178_vm10, %v11864_v42, %v11859_v41  ;;  %vm16190_vm5 = vmmov %vm16179_vm0  ;;  %v11898_v56 = vpop.permute.xlu2 %11897  ;;  %v11426_v42 = vld [vmem:[%s16160_s1 + $0x8] sm:$0xff] }
0x2aac   : > { %v11033_v15 = vpack.c.bf16 %v8180_v11, %v8179_v34  ;;  %v11053_v10 = vpack.c.bf16 %v8172_v60, %v8171_v31  ;;  %vm16191_vm12 = vmmov %vm16179_vm0  ;;  %v11900_v11 = vunpack.i.h.bf16 %v11898_v56  ;;  %v11899_v31 = vunpack.i.l.bf16 %v11898_v56 }
0x2aad   : > { %vm16192_vm15 = vmmov %vm16179_vm0 }
0x2aae   : > { %11034 = vmatpush.bf16.msk.msrb.mxu2 %vm13124_vm1, %v11033_v15  ;;  %11054 = vmatpush.bf16.msk.msrb.mxu3 %vm13131_vm9, %v11053_v10  ;;  %vm16180_vm1 = vmmov %vm16179_vm0 }
0x2aaf   : > { %v11883_v27 = vpop.permute.xlu0 %11882  ;;  %vm16181_vm9 = vmmov %vm16179_vm0 }
0x2ab0   : > { %v11868_v37 = vpop.permute.xlu1 %11867  ;;  %v11885_v14 = vunpack.i.h.bf16 %v11883_v27  ;;  %v11884_v30 = vunpack.i.l.bf16 %v11883_v27  ;;  %vm16193_vm10 = vmmov %vm16179_vm0 }
0x2ab1   : > { %v11870_v25 = vunpack.i.h.bf16 %v11868_v37  ;;  %v11869_v54 = vunpack.i.l.bf16 %v11868_v37  ;;  %11035 = vmatmul.msk.bf16.vlgmr.msrb.gmra.mxu2 %vm8331_vm14, %v11425_v12  ;;  %11055 = vmatmul.msk.bf16.vlgmr.msrb.gmra.mxu3 %vm8331_vm14, %v11425_v12  ;;  %v11420_v37 = vld [vmem:[%s16160_s1 + $0x58] sm:$0xff] }
0x2ab2   : > { %v8242_v7 = vsel %vm16179_vm0, %v11875_v40, %v11885_v14  ;;  %v8250_v21 = vsel %vm16180_vm1, %v11885_v14, %v11875_v40  ;;  %v8241_v22 = vsel %vm16181_vm9, %v11874_v26, %v11884_v30  ;;  %v8249_v44 = vsel %vm16182_vm13, %v11884_v30, %v11874_v26  ;;  %vm16194_vm1 = vmmov %vm16179_vm0  ;;  %v11421_v14 = vld [vmem:[%s16160_s1 + $0x60] sm:$0xff]  ;;  %v11428_v30 = vld [vmem:[%s16160_s1 + $0x18] sm:$0xff] }
0x2ab3   : > { %v11160_v61 = vpack.c.bf16 %v8242_v7, %v8241_v22  ;;  %v11180_v0 = vpack.c.bf16 %v8250_v21, %v8249_v44  ;;  %v8240_v1 = vsel %vm16183_vm11, %v11870_v25, %v11880_v47  ;;  %v8248_v20 = vsel %vm16184_vm2, %v11880_v47, %v11870_v25  ;;  %vm16195_vm9 = vmmov %vm16179_vm0  ;;  %v11422_v25 = vld [vmem:[%s16160_s1 + $0x68] sm:$0xff]  ;;  %v11423_v7 = vld [vmem:[%s16160_s1 + $0x70] sm:$0xff] }
0x2ab4   : > { %v8239_v45 = vsel %vm16185_vm7, %v11869_v54, %v11879_v23  ;;  %v8247_v9 = vsel %vm16186_vm8, %v11879_v23, %v11869_v54  ;;  %v11429_v54 = vld [vmem:[%s16160_s1 + $0x20] sm:$0xff]  ;;  %v11430_v21 = vld [vmem:[%s16160_s1 + $0x28] sm:$0xff]  ;;  %v11424_v22 = vld [vmem:[%s16160_s1 + $0x78] sm:$0xff] }
0x2ab5   : > { %11161 = vmatpush.bf16.msk.msra.mxu2 %vm13155_vm3, %v11160_v61  ;;  %11181 = vmatpush.bf16.msk.msra.mxu3 %vm13162_vm4, %v11180_v0  ;;  %v11163_v13 = vpack.c.bf16 %v8240_v1, %v8239_v45  ;;  %v11183_v58 = vpack.c.bf16 %v8248_v20, %v8247_v9  ;;  %v11431_v44 = vld [vmem:[%s16160_s1 + $0x30] sm:$0xff]  ;;  %v11432_v47 = vld [vmem:[%s16160_s1 + $0x38] sm:$0xff]  ;;  %v11433_v23 = vld [vmem:[%s16160_s1 + $0x80] sm:$0xff] }
0x2ab6   : > { %11098 = vmatmul.msk.bf16.gmra.mxu0 %vm8331_vm14, %v11420_v37  ;;  %11106 = vmatmul.msk.bf16.gmra.mxu1 %vm8331_vm14, %v11420_v37  ;;  %v11434_v20 = vld [vmem:[%s16160_s1 + $0x88] sm:$0xff] }
0x2ab7   : > { %v11888_v63 = vpop.permute.xlu0 %11887 }
0x2ab8   : > { %v11893_v2 = vpop.permute.xlu1 %11892  ;;  %v11890_v38 = vunpack.i.h.bf16 %v11888_v63  ;;  %v11889_v8 = vunpack.i.l.bf16 %v11888_v63  ;;  %v11435_v63 = vld [vmem:[%s16160_s1 + $0x90] sm:$0xff] }
0x2ab9   : > { %v11895_v18 = vunpack.i.h.bf16 %v11893_v2  ;;  %v11894_v24 = vunpack.i.l.bf16 %v11893_v2  ;;  %11164 = vmatpush.bf16.msk.msra.mxu2 %vm13155_vm3, %v11163_v13  ;;  %11184 = vmatpush.bf16.msk.msra.mxu3 %vm13162_vm4, %v11183_v58 }
0x2abb   : > { %v8238_v46 = vsel %vm16189_vm6, %v11890_v38, %v11895_v18  ;;  %v8246_v5 = vsel %vm16190_vm5, %v11895_v18, %v11890_v38  ;;  %v8237_v6 = vsel %vm16191_vm12, %v11889_v8, %v11894_v24  ;;  %v8245_v29 = vsel %vm16192_vm15, %v11894_v24, %v11889_v8  ;;  %v11436_v8 = vld [vmem:[%s16160_s1 + $0x98] sm:$0xff] }
0x2abc   : > { %v11166_v4 = vpack.c.bf16 %v8238_v46, %v8237_v6  ;;  %v11186_v41 = vpack.c.bf16 %v8246_v5, %v8245_v29  ;;  %v11437_v6 = vld [vmem:[%s16160_s1 + $0xa0] sm:$0xff] }
0x2abe   : > { %11167 = vmatpush.bf16.msk.msra.mxu2 %vm13155_vm3, %v11166_v4  ;;  %11187 = vmatpush.bf16.msk.msra.mxu3 %vm13162_vm4, %v11186_v41 }
0x2abf   : > { %v11903_v60 = vpop.permute.xlu0 %11902 }
0x2ac0   : > { %v11905_v34 = vunpack.i.h.bf16 %v11903_v60  ;;  %v11904_v15 = vunpack.i.l.bf16 %v11903_v60 }
0x2ac1   : > { %11036 = vmatmul.msk.bf16.gmra.mxu2 %vm8331_vm14, %v11426_v42  ;;  %11056 = vmatmul.msk.bf16.gmra.mxu3 %vm8331_vm14, %v11426_v42  ;;  %v11438_v42 = vld [vmem:[%s16160_s1 + $0xa8] sm:$0xff] }
0x2ac2   : > { %v8236_v10 = vsel %vm16193_vm10, %v11900_v11, %v11905_v34  ;;  %v8244_v12 = vsel %vm16179_vm0, %v11905_v34, %v11900_v11  ;;  %v8235_v27 = vsel %vm16194_vm1, %v11899_v31, %v11904_v15  ;;  %v8243_v40 = vsel %vm16195_vm9, %v11904_v15, %v11899_v31  ;;  %v11439_v15 = vld [vmem:[%s16160_s1 + $0xb0] sm:$0xff] }
0x2ac3   : > { %v11169_v26 = vpack.c.bf16 %v8236_v10, %v8235_v27  ;;  %v11189_v28 = vpack.c.bf16 %v8244_v12, %v8243_v40 }
0x2ac5   : > { %11170 = vmatpush.bf16.msk.msra.mxu2 %vm13155_vm3, %v11169_v26  ;;  %11190 = vmatpush.bf16.msk.msra.mxu3 %vm13162_vm4, %v11189_v28  ;;  %vm16215_vm3 = vcmask 130048  }
0x2ac6   : > { %11099 = vmatmul.msk.bf16.gmra.mxu0 %vm8331_vm14, %v11421_v14  ;;  %11107 = vmatmul.msk.bf16.gmra.mxu1 %vm8331_vm14, %v11421_v14  ;;  %v11440_v14 = vld [vmem:[%s16160_s1 + $0xb8] sm:$0xff]  ;;  %vm16216_vm4 = vmmov %vm16215_vm3 }
0x2ac7   : > { %vm16217_vm13 = vmmov %vm16215_vm3 }
0x2ac8   : > { %vm16218_vm11 = vmmov %vm16215_vm3 }
0x2ac9   : > { %vm16219_vm2 = vmmov %vm16215_vm3 }
0x2aca   : > { %vm16220_vm7 = vmmov %vm16219_vm2 }
0x2acb   : > { %vm16221_vm8 = vmmov %vm16219_vm2 }
0x2acc   : > { %vm16222_vm6 = vmmov %vm16219_vm2 }
0x2acd   : > { %vm16223_vm5 = vmmov %vm16219_vm2 }
0x2ace   : > { %vm16224_vm12 = vmmov %vm16219_vm2 }
0x2acf   : > { %vm16226_vm15 = vmmov %vm16219_vm2 }
0x2ad0   : > { %vm16227_vm10 = vmmov %vm16219_vm2 }
0x2ad1   : > { %11037 = vmatmul.msk.bf16.gmra.mxu2 %vm8331_vm14, %v11427_v55  ;;  %11057 = vmatmul.msk.bf16.gmra.mxu3 %vm8331_vm14, %v11427_v55  ;;  %v8527_v10 = vpop.f32.mrf.mxu0  ;;  %v8576_v12 = vpop.f32.mrf.mxu1  ;;  %vm16228_vm0 = vmmov %vm16219_vm2 }
0x2ad2   : > { %vm16229_vm1 = vmmov %vm16228_vm0 }
0x2ad3   : > { %vm16230_vm9 = vmmov %vm16228_vm0 }
0x2ad6   : > { %11100 = vmatmul.msk.bf16.gmra.mxu0 %vm8331_vm14, %v11422_v25  ;;  %11108 = vmatmul.msk.bf16.gmra.mxu1 %vm8331_vm14, %v11422_v25 }
0x2ad9   : > { %v8529_v26 = vpop.f32.mrf.mxu0  ;;  %v8578_v28 = vpop.f32.mrf.mxu1 }
0x2ae1   : > { %11038 = vmatmul.msk.bf16.gmra.mxu2 %vm8331_vm14, %v11428_v30  ;;  %11058 = vmatmul.msk.bf16.gmra.mxu3 %vm8331_vm14, %v11428_v30 }
0x2ae6   : > { %11101 = vmatmul.msk.bf16.gmra.mxu0 %vm8331_vm14, %v11423_v7  ;;  %11109 = vmatmul.msk.bf16.gmra.mxu1 %vm8331_vm14, %v11423_v7 }
0x2aed   : > { %v8581_v7 = vpop.f32.mrf.mxu1 }
0x2af1   : > { %11039 = vmatmul.msk.bf16.gmra.mxu2 %vm8331_vm14, %v11429_v54  ;;  %11059 = vmatmul.msk.bf16.gmra.mxu3 %vm8331_vm14, %v11429_v54  ;;  %v8532_v54 = vpop.f32.mrf.mxu0 }
0x2af6   : > { %11102 = vmatmul.msk.bf16.gmra.mxu0 %vm8331_vm14, %v11424_v22  ;;  %11110 = vmatmul.msk.bf16.gmra.mxu1 %vm8331_vm14, %v11424_v22 }
0x2b01   : > { %11040 = vmatmul.msk.bf16.gmra.mxu2 %vm8331_vm14, %v11430_v21  ;;  %11060 = vmatmul.msk.bf16.gmra.mxu3 %vm8331_vm14, %v11430_v21 }
0x2b11   : > { %11041 = vmatmul.msk.bf16.gmra.mxu2 %vm8331_vm14, %v11431_v44  ;;  %11061 = vmatmul.msk.bf16.gmra.mxu3 %vm8331_vm14, %v11431_v44  ;;  %v8534_v44 = vpop.f32.mrf.mxu0 }
0x2b21   : > { %11042 = vmatmul.msk.bf16.gmra.mxu2 %vm8331_vm14, %v11432_v47  ;;  %11062 = vmatmul.msk.bf16.gmra.mxu3 %vm8331_vm14, %v11432_v47  ;;  %v8583_v47 = vpop.f32.mrf.mxu1 }
0x2b31   : > { %11171 = vmatmul.msk.bf16.vlgmr.msra.gmra.mxu2 %vm8331_vm14, %v11433_v23  ;;  %11191 = vmatmul.msk.bf16.vlgmr.msra.gmra.mxu3 %vm8331_vm14, %v11433_v23 }
0x2b34   : > { %v8365_v61 = vpop.f32.mrf.mxu2  ;;  %v8414_v0 = vpop.f32.mrf.mxu3 }
0x2b35   : > { %v8528_v23 = vadd.f32 %v8527_v10, %v8365_v61 }
0x2b3c   : > { %v15242_v3 = vpop.f32.mrf.mxu2  ;;  %v15244_v1 = vpop.f32.mrf.mxu3 }
0x2b3d   : > { %v8530_v53 = vadd.f32 %v8529_v26, %v15242_v3  ;;  %v8579_v43 = vadd.f32 %v8578_v28, %v15244_v1  ;;  %v15361_v28 = vpop.permute.xlu0 %8913 }
0x2b41   : > { %11172 = vmatmul.msk.bf16.gmra.mxu2 %vm8331_vm14, %v11434_v20  ;;  %11192 = vmatmul.msk.bf16.gmra.mxu3 %vm8331_vm14, %v11434_v20  ;;  %v8577_v20 = vadd.f32 %v8576_v12, %v8414_v0 }
0x2b44   : > { %v15251_v45 = vpop.f32.mrf.mxu2  ;;  %v15253_v9 = vpop.f32.mrf.mxu3 }
0x2b45   : > { %v8533_v61 = vadd.f32 %v8532_v54, %v15251_v45  ;;  %v8582_v0 = vadd.f32 %v8581_v7, %v15253_v9  ;;  %v15359_v9 = vpop.permute.xlu1 %8923 }
0x2b4c   : > { %v15255_v52 = vpop.f32.mrf.mxu2  ;;  %v15257_v36 = vpop.f32.mrf.mxu3 }
0x2b4d   : > { %v8535_v3 = vadd.f32 %v8534_v44, %v15255_v52  ;;  %v8584_v1 = vadd.f32 %v8583_v47, %v15257_v36  ;;  %v15369_v47 = vpop.permute.xlu2 %8928 }
0x2b51   : > { %11173 = vmatmul.msk.bf16.gmra.mxu2 %vm8331_vm14, %v11435_v63  ;;  %11193 = vmatmul.msk.bf16.gmra.mxu3 %vm8331_vm14, %v11435_v63 }
0x2b54   : > { %v15264_v13 = vpop.f32.mrf.mxu2  ;;  %v15266_v58 = vpop.f32.mrf.mxu3 }
0x2b5c   : > { %v15268_v2 = vpop.f32.mrf.mxu2  ;;  %v15270_v38 = vpop.f32.mrf.mxu3 }
0x2b61   : > { %11174 = vmatmul.msk.bf16.gmra.mxu2 %vm8331_vm14, %v11436_v8  ;;  %11194 = vmatmul.msk.bf16.gmra.mxu3 %vm8331_vm14, %v11436_v8 }
0x2b64   : > { %v15277_v18 = vpop.f32.mrf.mxu2  ;;  %v15279_v24 = vpop.f32.mrf.mxu3 }
0x2b6c   : > { %v15281_v46 = vpop.f32.mrf.mxu2  ;;  %v15283_v5 = vpop.f32.mrf.mxu3 }
0x2b71   : > { %11175 = vmatmul.msk.bf16.gmra.mxu2 %vm8331_vm14, %v11437_v6  ;;  %11195 = vmatmul.msk.bf16.gmra.mxu3 %vm8331_vm14, %v11437_v6 }
0x2b74   : > { %v15290_v29 = vpop.f32.mrf.mxu2  ;;  %v15292_v4 = vpop.f32.mrf.mxu3 }
0x2b7c   : > { %v15294_v41 = vpop.f32.mrf.mxu2  ;;  %v15296_v56 = vpop.f32.mrf.mxu3 }
0x2b81   : > { %11176 = vmatmul.msk.bf16.gmra.mxu2 %vm8331_vm14, %v11438_v42  ;;  %11196 = vmatmul.msk.bf16.gmra.mxu3 %vm8331_vm14, %v11438_v42 }
0x2b84   : > { %v15303_v60 = vpop.f32.mrf.mxu2  ;;  %v15305_v11 = vpop.f32.mrf.mxu3 }
0x2b8c   : > { %v15307_v31 = vpop.f32.mrf.mxu2  ;;  %v15309_v34 = vpop.f32.mrf.mxu3 }
0x2b91   : > { %11177 = vmatmul.msk.bf16.gmra.mxu2 %vm8331_vm14, %v11439_v15  ;;  %11197 = vmatmul.msk.bf16.gmra.mxu3 %vm8331_vm14, %v11439_v15  ;;  %v8537_v15 = vpop.f32.mrf.mxu0 }
0x2b92   : > { %v8538_v54 = vadd.f32 %v8537_v15, %v15264_v13 }
0x2b94   : > { %v15316_v27 = vpop.f32.mrf.mxu2  ;;  %v15318_v40 = vpop.f32.mrf.mxu3 }
0x2b99   : > { %v8539_v10 = vpop.f32.mrf.mxu0 }
0x2b9c   : > { %v15320_v37 = vpop.f32.mrf.mxu2  ;;  %v15322_v55 = vpop.f32.mrf.mxu3 }
0x2ba1   : > { %11178 = vmatmul.msk.bf16.gmra.mxu2 %vm8331_vm14, %v11440_v14  ;;  %11198 = vmatmul.msk.bf16.gmra.mxu3 %vm8331_vm14, %v11440_v14  ;;  %v8586_v14 = vpop.f32.mrf.mxu1 }
0x2ba2   : > { %v8587_v7 = vadd.f32 %v8586_v14, %v15266_v58 }
0x2ba4   : > { %v15329_v30 = vpop.f32.mrf.mxu2  ;;  %v15331_v25 = vpop.f32.mrf.mxu3 }
0x2ba9   : > { %v8588_v12 = vpop.f32.mrf.mxu1 }
0x2baa   : > { %v8589_v13 = vadd.f32 %v8588_v12, %v15270_v38 }
0x2bac   : > { %v15333_v21 = vpop.f32.mrf.mxu2  ;;  %v15335_v22 = vpop.f32.mrf.mxu3 }
0x2bb4   : > { %v8714_v63 = vpop.f32.mrf.mxu2  ;;  %v8763_v8 = vpop.f32.mrf.mxu3 }
0x2bb5   : > { %v15337_v6 = vadd.f32 %v8714_v63, %v8528_v23  ;;  %v15339_v42 = vadd.f32 %v8763_v8, %v8577_v20 }
0x2bbc   : > { %v8716_v19 = vpop.f32.mrf.mxu2  ;;  %v8765_v39 = vpop.f32.mrf.mxu3 }
0x2bbd   : > { %v15343_v62 = vadd.f32 %v8716_v19, %v8530_v53  ;;  %v15345_v59 = vadd.f32 %v8765_v39, %v8579_v43  ;;  %v8542_v39 = vpop.f32.mrf.mxu0  ;;  %v8591_v43 = vpop.f32.mrf.mxu1 }
0x2bbe   : > { %v8592_v33 = vadd.f32 %v8591_v43, %v15279_v24 }
0x2bc4   : > { %v8719_v23 = vpop.f32.mrf.mxu2  ;;  %v8768_v20 = vpop.f32.mrf.mxu3 }
0x2bc5   : > { %v15349_v63 = vadd.f32 %v8719_v23, %v8533_v61  ;;  %v15351_v8 = vadd.f32 %v8768_v20, %v8582_v0  ;;  %v8544_v0 = vpop.f32.mrf.mxu0  ;;  %v8593_v23 = vpop.f32.mrf.mxu1 }
0x2bc6   : > { %v15371_v20 = vpop.permute.xlu1 %8918 }
0x2bcc   : > { %v8721_v19 = vpop.f32.mrf.mxu2  ;;  %v8770_v53 = vpop.f32.mrf.mxu3 }
0x2bcd   : > { %v15355_v26 = vadd.f32 %v8721_v19, %v8535_v3  ;;  %v15357_v45 = vadd.f32 %v8770_v53, %v8584_v1  ;;  %v15373_v3 = vpop.permute.xlu0 %8888  ;;  %v8540_v1 = vadd.f32 %v8539_v10, %v15268_v2  ;;  %v15381_v53 = vpop.permute.xlu2 %8883 }
0x2bd4   : > { %v8724_v61 = vpop.f32.mrf.mxu2  ;;  %v8773_v52 = vpop.f32.mrf.mxu3 }
0x2bd5   : > { %v15365_v44 = vadd.f32 %v8724_v61, %v8538_v54  ;;  %v15367_v36 = vadd.f32 %v8773_v52, %v8587_v7  ;;  %v8547_v54 = vpop.f32.mrf.mxu0  ;;  %v8596_v7 = vpop.f32.mrf.mxu1  ;;  %v8543_v52 = vadd.f32 %v8542_v39, %v15277_v18 }
0x2bd6   : > { %v15383_v61 = vpop.permute.xlu1 %8903  ;;  %v15391_v12 = vpop.permute.xlu0 %8873  ;;  %v8548_v43 = vadd.f32 %v8547_v54, %v15290_v29 }
0x2bdc   : > { %v8726_v15 = vpop.f32.mrf.mxu2  ;;  %v8775_v58 = vpop.f32.mrf.mxu3 }
0x2bdd   : > { %v15377_v14 = vadd.f32 %v8726_v15, %v8540_v1  ;;  %v15379_v19 = vadd.f32 %v8775_v58, %v8589_v13  ;;  %v15393_v1 = vpop.permute.xlu2 %8908  ;;  %v8545_v13 = vadd.f32 %v8544_v0, %v15281_v46  ;;  %v8594_v15 = vadd.f32 %v8593_v23, %v15283_v5  ;;  %v8549_v58 = vpop.f32.mrf.mxu0 }
0x2bde   : > { %v8598_v57 = vpop.f32.mrf.mxu1  ;;  %v8550_v48 = vadd.f32 %v8549_v58, %v15294_v41 }
0x2bdf   : > { %v8599_v29 = vadd.f32 %v8598_v57, %v15296_v56 }
0x2be4   : > { %v8729_v50 = vpop.f32.mrf.mxu2  ;;  %v8778_v2 = vpop.f32.mrf.mxu3 }
0x2be5   : > { %v15387_v10 = vadd.f32 %v8729_v50, %v8543_v52  ;;  %v15389_v38 = vadd.f32 %v8778_v2, %v8592_v33  ;;  %v15401_v50 = vpop.permute.xlu1 %8878  ;;  %v8899_v33 = vpop.permute.xlu0 %8898  ;;  %v8597_v52 = vadd.f32 %v8596_v7, %v15292_v4 }
0x2be6   : > { %v8552_v46 = vpop.f32.mrf.mxu0  ;;  %v8601_v0 = vpop.f32.mrf.mxu1 }
0x2be7   : > { %v8894_v16 = vpop.permute.xlu2 %8893 }
0x2bec   : > { %v8731_v35 = vpop.f32.mrf.mxu2  ;;  %v8780_v18 = vpop.f32.mrf.mxu3 }
0x2bed   : > { %v15397_v39 = vadd.f32 %v8731_v35, %v8545_v13  ;;  %v15399_v24 = vadd.f32 %v8780_v18, %v8594_v15  ;;  %v15405_v35 = vpop.permute.xlu1 %8863  ;;  %v8854_v18 = vpop.permute.xlu0 %8853 }
0x2bee   : > { %v8931_v4 = vadd.f32 %v8854_v18, %v15337_v6  ;;  %v8932_v54 = vadd.f32 %v8854_v18, %v15339_v42  ;;  %v8553_v6 = vadd.f32 %v8552_v46, %v15303_v60  ;;  %v8602_v42 = vadd.f32 %v8601_v0, %v15305_v11 }
0x2bf4   : > { %v8734_v2 = vpop.f32.mrf.mxu2  ;;  %v8783_v51 = vpop.f32.mrf.mxu3 }
0x2bf5   : > { %v8819_v5 = vadd.f32 %v8734_v2, %v8548_v43  ;;  %v8820_v23 = vadd.f32 %v8783_v51, %v8597_v52  ;;  %v8603_v2 = vpop.f32.mrf.mxu1  ;;  %v8859_v56 = vpop.permute.xlu1 %8858 }
0x2bf7   : > { %v8947_v49 = vadd.f32 %v8894_v16, %v8819_v5  ;;  %v8948_v17 = vadd.f32 %v8894_v16, %v8820_v23  ;;  %v8554_v16 = vpop.f32.mrf.mxu0 }
0x2bf9   : > { %v8979_v13 = vmul.f32 0.5, %v8947_v49  ;;  %v8980_v15 = vmul.f32 0.5, %v8948_v17 }
0x2bfb   : > { %12258 = vtanh.f32 %v8979_v13  ;;  %v8933_v13 = vadd.f32 %v8859_v56, %v15343_v62 }
0x2bfc   : > { %12260 = vtanh.f32 %v8980_v15  ;;  %v8736_v7 = vpop.f32.mrf.mxu2  ;;  %v8785_v51 = vpop.f32.mrf.mxu3  ;;  %v8934_v15 = vadd.f32 %v8859_v56, %v15345_v59 }
0x2bfd   : > { %v8821_v43 = vadd.f32 %v8736_v7, %v8550_v48  ;;  %v8822_v52 = vadd.f32 %v8785_v51, %v8599_v29  ;;  %12262 = vtanh.f32 %v8931_v4  ;;  %v8606_v0 = vpop.f32.mrf.mxu1 }
0x2bfe   : > { %12264 = vtanh.f32 %v8932_v54 }
0x2bff   : > { %v8949_v49 = vadd.f32 %v8899_v33, %v8821_v43  ;;  %v8950_v17 = vadd.f32 %v8899_v33, %v8822_v52  ;;  %v8557_v46 = vpop.f32.mrf.mxu0 }
0x2c01   : > { %v12259_v5 = vpop.eup %12258  ;;  %v8981_v41 = vmul.f32 0.5, %v8949_v49  ;;  %v8982_v58 = vmul.f32 0.5, %v8950_v17 }
0x2c02   : > { %v12261_v57 = vpop.eup %12260  ;;  %v9011_v23 = vmul.f32 0.5, %v12259_v5 }
0x2c03   : > { %v9012_v48 = vmul.f32 0.5, %v12261_v57  ;;  %12266 = vtanh.f32 %v8981_v41  ;;  %v12263_v4 = vpop.eup %12262  ;;  %v8604_v57 = vadd.f32 %v8603_v2, %v15309_v34 }
0x2c04   : > { %v9027_v18 = vadd.f32 0.5, %v9011_v23  ;;  %12268 = vtanh.f32 %v8982_v58  ;;  %v8739_v33 = vpop.f32.mrf.mxu2  ;;  %v8788_v29 = vpop.f32.mrf.mxu3  ;;  %v8555_v58 = vadd.f32 %v8554_v16, %v15307_v31  ;;  %v8935_v16 = vadd.f32 %v15405_v35, %v15349_v63 }
0x2c05   : > { %v9028_v54 = vadd.f32 0.5, %v9012_v48  ;;  %v8823_v7 = vadd.f32 %v8739_v33, %v8553_v6  ;;  %v8824_v51 = vadd.f32 %v8788_v29, %v8602_v42  ;;  %v12265_v43 = vpop.eup %12264  ;;  %12270 = vtanh.f32 %v8933_v13 }
0x2c06   : > { %v15415_v52 = vmul.f32 %v12263_v4, %v9027_v18  ;;  %12272 = vtanh.f32 %v8934_v15 }
0x2c07   : > { %v8951_v60 = vadd.f32 %v15383_v61, %v8823_v7  ;;  %v8952_v62 = vadd.f32 %v15383_v61, %v8824_v51  ;;  %v15419_v11 = vmul.f32 %v12265_v43, %v9028_v54  ;;  %v8869_v51 = vpop.permute.xlu2 %8868  ;;  %v8936_v43 = vadd.f32 %v15405_v35, %v15351_v8 }
0x2c09   : > { %v12267_v59 = vpop.eup %12266  ;;  %v8983_v49 = vmul.f32 0.5, %v8951_v60  ;;  %v8984_v41 = vmul.f32 0.5, %v8952_v62  ;;  %v8607_v62 = vadd.f32 %v8606_v0, %v15318_v40 }
0x2c0a   : > { %v12269_v17 = vpop.eup %12268  ;;  %v9013_v5 = vmul.f32 0.5, %v12267_v59  ;;  %v8559_v59 = vpop.f32.mrf.mxu0 }
0x2c0b   : > { %v9014_v56 = vmul.f32 0.5, %v12269_v17  ;;  %v12271_v13 = vpop.eup %12270  ;;  %12274 = vtanh.f32 %v8983_v49  ;;  %v8608_v49 = vpop.f32.mrf.mxu1  ;;  %v8937_v17 = vadd.f32 %v8869_v51, %v15355_v26 }
0x2c0c   : > { %v9029_v6 = vadd.f32 0.5, %v9013_v5  ;;  %v8741_v23 = vpop.f32.mrf.mxu2  ;;  %v8790_v42 = vpop.f32.mrf.mxu3  ;;  %12276 = vtanh.f32 %v8984_v41  ;;  %v8938_v5 = vadd.f32 %v8869_v51, %v15357_v45 }
0x2c0d   : > { %v9030_v61 = vadd.f32 0.5, %v9014_v56  ;;  %v8825_v48 = vadd.f32 %v8741_v23, %v8555_v58  ;;  %v8826_v15 = vadd.f32 %v8790_v42, %v8604_v57  ;;  %v12273_v18 = vpop.eup %12272 }
0x2c0e   : > { %v15423_v33 = vmul.f32 %v12271_v13, %v9029_v6  ;;  %v8560_v13 = vadd.f32 %v8559_v59, %v15320_v37 }
0x2c0f   : > { %v8953_v29 = vadd.f32 %v15393_v1, %v8825_v48  ;;  %v8954_v4 = vadd.f32 %v15393_v1, %v8826_v15  ;;  %v15427_v31 = vmul.f32 %v12273_v18, %v9030_v61  ;;  %v8558_v1 = vadd.f32 %v8557_v46, %v15316_v27 }
0x2c10   : > { %v9067_v34 = vpack.c.bf16 %v15423_v33, %v15415_v52  ;;  %v8609_v61 = vadd.f32 %v8608_v49, %v15322_v55  ;;  %v9236_v52 = vld [vmem:[%s16197_s7 + $0x38] sm:$0xff]  ;;  %v9234_v33 = vld [vmem:[%s16197_s7 + $0x28] sm:$0xff] }
0x2c11   : > { %v8985_v2 = vmul.f32 0.5, %v8953_v29  ;;  %v8986_v54 = vmul.f32 0.5, %v8954_v4  ;;  %v9068_v7 = vpack.c.bf16 %v15427_v31, %v15419_v11  ;;  %v12275_v60 = vpop.eup %12274  ;;  %v9235_v11 = vld [vmem:[%s16197_s7 + $0x30] sm:$0xff]  ;;  %11445 = vmatpush.msrb.mxu2 %v9236_v52  ;;  %11453 = vmatpush.msrb.mxu3 %v9236_v52  ;;  %v9233_v31 = vld [vmem:[%s16197_s7 + $0x20] sm:$0xff] }
0x2c12   : > { %v12277_v63 = vpop.eup %12276  ;;  %v9015_v8 = vmul.f32 0.5, %v12275_v60  ;;  %v8562_v60 = vpop.f32.mrf.mxu0 }
0x2c13   : > { %12278 = vtanh.f32 %v8985_v2  ;;  %v9016_v27 = vmul.f32 0.5, %v12277_v63  ;;  %11446 = vmatpush.msrb.mxu2 %v9235_v11  ;;  %11454 = vmatpush.msrb.mxu3 %v9235_v11 }
0x2c14   : > { %12280 = vtanh.f32 %v8986_v54  ;;  %v8744_v41 = vpop.f32.mrf.mxu2  ;;  %v8793_v58 = vpop.f32.mrf.mxu3  ;;  %v9031_v6 = vadd.f32 0.5, %v9015_v8 }
0x2c15   : > { %12282 = vtanh.f32 %v8935_v16  ;;  %v8827_v57 = vadd.f32 %v8744_v41, %v8558_v1  ;;  %v8828_v56 = vadd.f32 %v8793_v58, %v8607_v62  ;;  %v9032_v48 = vadd.f32 0.5, %v9016_v27  ;;  %v8611_v1 = vpop.f32.mrf.mxu1  ;;  %11447 = vmatpush.msrb.mxu2 %v9234_v33  ;;  %11455 = vmatpush.msrb.mxu3 %v9234_v33 }
0x2c16   : > { %12284 = vtanh.f32 %v8936_v43  ;;  %v8612_v27 = vadd.f32 %v8611_v1, %v15331_v25 }
0x2c17   : > { %12286 = vtanh.f32 %v8937_v17  ;;  %v8955_v40 = vadd.f32 %v15361_v28, %v8827_v57  ;;  %v8956_v35 = vadd.f32 %v15361_v28, %v8828_v56  ;;  %v8940_v56 = vadd.f32 %v15391_v12, %v15367_v36  ;;  %11448 = vmatpush.msrb.mxu2 %v9233_v31  ;;  %11456 = vmatpush.msrb.mxu3 %v9233_v31 }
0x2c18   : > { %12288 = vtanh.f32 %v8938_v5  ;;  %v8939_v5 = vadd.f32 %v15391_v12, %v15365_v44  ;;  %v8942_v44 = vadd.f32 %v15401_v50, %v15379_v19 }
0x2c19   : > { %v12279_v26 = vpop.eup %12278  ;;  %v8987_v46 = vmul.f32 0.5, %v8955_v40  ;;  %v8988_v23 = vmul.f32 0.5, %v8956_v35  ;;  %v8941_v40 = vadd.f32 %v15401_v50, %v15377_v14 }
0x2c1a   : > { %v12281_v0 = vpop.eup %12280  ;;  %v9017_v45 = vmul.f32 0.5, %v12279_v26  ;;  %v8564_v14 = vpop.f32.mrf.mxu0 }
0x2c1b   : > { %v12283_v42 = vpop.eup %12282  ;;  %v9018_v15 = vmul.f32 0.5, %v12281_v0  ;;  %12290 = vtanh.f32 %v8987_v46 }
0x2c1c   : > { %v12285_v18 = vpop.eup %12284  ;;  %v9033_v29 = vadd.f32 0.5, %v9017_v45  ;;  %v8746_v4 = vpop.f32.mrf.mxu2  ;;  %12292 = vtanh.f32 %v8988_v23  ;;  %v15445_v62 = vmul.f32 %v12283_v42, %v9031_v6 }
0x2c1d   : > { %v8795_v16 = vpop.f32.mrf.mxu3  ;;  %v12287_v2 = vpop.eup %12286  ;;  %v9034_v28 = vadd.f32 0.5, %v9018_v15  ;;  %v8829_v54 = vadd.f32 %v8746_v4, %v8560_v13  ;;  %v15451_v49 = vmul.f32 %v12285_v18, %v9032_v48  ;;  %v8565_v15 = vadd.f32 %v8564_v14, %v15333_v21 }
0x2c1e   : > { %v8830_v51 = vadd.f32 %v8795_v16, %v8609_v61  ;;  %v12289_v43 = vpop.eup %12288  ;;  %v15447_v37 = vmul.f32 %v12287_v2, %v9033_v29  ;;  %v8613_v45 = vpop.f32.mrf.mxu1 }
0x2c1f   : > { %v8957_v55 = vadd.f32 %v15371_v20, %v8829_v54  ;;  %v15453_v17 = vmul.f32 %v12289_v43, %v9034_v28  ;;  %v8614_v18 = vadd.f32 %v8613_v45, %v15335_v22 }
0x2c20   : > { %v8958_v59 = vadd.f32 %v15371_v20, %v8830_v51  ;;  %v9069_v63 = vpack.c.bf16 %v15447_v37, %v15445_v62  ;;  %v8563_v20 = vadd.f32 %v8562_v60, %v15329_v30  ;;  %v11442_v62 = vld [vmem:[%s16196_s5 + $0x8] sm:$0xff]  ;;  %v11444_v37 = vld [vmem:[%s16196_s5 + $0x18] sm:$0xff] }
0x2c21   : > { %v8989_v41 = vmul.f32 0.5, %v8957_v55  ;;  %v9070_v57 = vpack.c.bf16 %v15453_v17, %v15451_v49  ;;  %v12291_v8 = vpop.eup %12290  ;;  %v9231_v49 = vld [vmem:[%s16197_s7 + $0x10] sm:$0xff]  ;;  %v9230_v17 = vld [vmem:[%s16197_s7 + $0x8] sm:$0xff] }
0x2c22   : > { %v8990_v58 = vmul.f32 0.5, %v8958_v59  ;;  %v12293_v35 = vpop.eup %12292  ;;  %v9019_v36 = vmul.f32 0.5, %v12291_v8 }
0x2c23   : > { %12294 = vtanh.f32 %v8989_v41  ;;  %v9020_v30 = vmul.f32 0.5, %v12293_v35 }
0x2c24   : > { %12296 = vtanh.f32 %v8990_v58  ;;  %v8749_v26 = vpop.f32.mrf.mxu2  ;;  %v9035_v50 = vadd.f32 0.5, %v9019_v36 }
0x2c25   : > { %v8798_v46 = vpop.f32.mrf.mxu3  ;;  %12298 = vtanh.f32 %v8939_v5  ;;  %v8831_v0 = vadd.f32 %v8749_v26, %v8563_v20  ;;  %v9036_v29 = vadd.f32 0.5, %v9020_v30 }
0x2c26   : > { %v8832_v6 = vadd.f32 %v8798_v46, %v8612_v27  ;;  %12300 = vtanh.f32 %v8940_v56  ;;  %v8943_v56 = vadd.f32 %v15381_v53, %v15387_v10 }
0x2c27   : > { %12302 = vtanh.f32 %v8941_v40  ;;  %v8959_v25 = vadd.f32 %v15359_v9, %v8831_v0  ;;  %v8944_v40 = vadd.f32 %v15381_v53, %v15389_v38 }
0x2c28   : > { %v8960_v12 = vadd.f32 %v15359_v9, %v8832_v6  ;;  %12304 = vtanh.f32 %v8942_v44  ;;  %v8945_v44 = vadd.f32 %v15373_v3, %v15397_v39 }
0x2c29   : > { %v12295_v23 = vpop.eup %12294  ;;  %v8991_v42 = vmul.f32 0.5, %v8959_v25 }
0x2c2a   : > { %v12297_v19 = vpop.eup %12296  ;;  %v9021_v13 = vmul.f32 0.5, %v12295_v23  ;;  %v8992_v61 = vmul.f32 0.5, %v8960_v12 }
0x2c2b   : > { %v12299_v48 = vpop.eup %12298  ;;  %v9022_v4 = vmul.f32 0.5, %v12297_v19  ;;  %12306 = vtanh.f32 %v8991_v42 }
0x2c2c   : > { %v12301_v16 = vpop.eup %12300  ;;  %v9037_v2 = vadd.f32 0.5, %v9021_v13  ;;  %v8751_v28 = vpop.f32.mrf.mxu2  ;;  %12308 = vtanh.f32 %v8992_v61  ;;  %v9059_v55 = vmul.f32 %v12299_v48, %v9035_v50  ;;  %v11441_v61 = vld [vmem:[%s16196_s5] sm:$0xff] }
0x2c2d   : > { %v8800_v9 = vpop.f32.mrf.mxu3  ;;  %v12303_v54 = vpop.eup %12302  ;;  %v9038_v51 = vadd.f32 0.5, %v9022_v4  ;;  %v8833_v43 = vadd.f32 %v8751_v28, %v8565_v15  ;;  %v9060_v22 = vmul.f32 %v12301_v16, %v9036_v29 }
0x2c2e   : > { %v8834_v60 = vadd.f32 %v8800_v9, %v8614_v18  ;;  %v12305_v1 = vpop.eup %12304  ;;  %v9061_v59 = vmul.f32 %v12303_v54, %v9037_v2  ;;  %v9091_v4 = vpop.permute.xlu0 %9090  ;;  %v16198_v54 = vld [vmem:[#allocation15_spill] sm:$0xff] }
0x2c2f   : > { %v8961_v5 = vadd.f32 %v15369_v47, %v8833_v43  ;;  %v9062_v41 = vmul.f32 %v12305_v1, %v9038_v51  ;;  %v16199_v43 = vld [vmem:[#allocation16_spill] sm:$0xff] }
0x2c30   : > { %v8962_v21 = vadd.f32 %v15369_v47, %v8834_v60  ;;  %v9071_v58 = vpack.c.bf16 %v9061_v59, %v9059_v55  ;;  %v8946_v47 = vadd.f32 %v15373_v3, %v15399_v24 }
0x2c31   : > { %v8993_v8 = vmul.f32 0.5, %v8961_v5  ;;  %v9072_v27 = vpack.c.bf16 %v9062_v41, %v9060_v22  ;;  %v12307_v35 = vpop.eup %12306  ;;  %v16201_v41 = vld [vmem:[#allocation18_spill] sm:$0xff] }
0x2c32   : > { %v8994_v20 = vmul.f32 0.5, %v8962_v21  ;;  %v12309_v26 = vpop.eup %12308  ;;  %v9023_v46 = vmul.f32 0.5, %v12307_v35  ;;  %v16200_v21 = vld [vmem:[#allocation14_spill] sm:$0xff]  ;;  %v16202_v35 = vld [vmem:[#allocation13_spill] sm:$0xff] }
0x2c33   : > { %12310 = vtanh.f32 %v8993_v8  ;;  %v9024_v10 = vmul.f32 0.5, %v12309_v26  ;;  %v16203_v26 = vld [vmem:[#allocation19_spill] sm:$0xff] }
0x2c34   : > { %12312 = vtanh.f32 %v8994_v20  ;;  %v9039_v36 = vadd.f32 0.5, %v9023_v46 }
0x2c35   : > { %12314 = vtanh.f32 %v8943_v56  ;;  %v9040_v30 = vadd.f32 0.5, %v9024_v10 }
0x2c36   : > { %12316 = vtanh.f32 %v8944_v40  ;;  %v9106_v46 = vpop.permute.xlu0 %9105 }
0x2c37   : > { %12318 = vtanh.f32 %v8945_v44 }
0x2c38   : > { %12320 = vtanh.f32 %v8946_v47 }
0x2c39   : > { %v12311_v0 = vpop.eup %12310 }
0x2c3a   : > { %v12313_v6 = vpop.eup %12312  ;;  %v9025_v53 = vmul.f32 0.5, %v12311_v0 }
0x2c3b   : > { %v12315_v38 = vpop.eup %12314  ;;  %v9026_v25 = vmul.f32 0.5, %v12313_v6 }
0x2c3c   : > { %v12317_v39 = vpop.eup %12316  ;;  %v9041_v12 = vadd.f32 0.5, %v9025_v53  ;;  %v9063_v3 = vmul.f32 %v12315_v38, %v9039_v36  ;;  %v16204_v53 = vld [vmem:[#allocation20_spill] sm:$0xff] }
0x2c3d   : > { %v12319_v14 = vpop.eup %12318  ;;  %v9042_v45 = vadd.f32 0.5, %v9026_v25  ;;  %v9064_v42 = vmul.f32 %v12317_v39, %v9040_v30  ;;  %v16205_v30 = vld [vmem:[#allocation12_spill] sm:$0xff] }
0x2c3e   : > { %v12321_v23 = vpop.eup %12320  ;;  %v9065_v24 = vmul.f32 %v12319_v14, %v9041_v12 }
0x2c3f   : > { %v9066_v19 = vmul.f32 %v12321_v23, %v9042_v45 }
0x2c40   : > { %v9073_v50 = vpack.c.bf16 %v9065_v24, %v9063_v3  ;;  %v16206_v3 = vld [vmem:[#allocation17_spill] sm:$0xff] }
0x2c41   : > { %v9074_v13 = vpack.c.bf16 %v9066_v19, %v9064_v42  ;;  %v16207_v42 = vld [vmem:[#allocation11_spill] sm:$0xff] }
0x2c42   : > { %9159 = vmatpush.bf16.msrb.mxu0 %v9073_v50  ;;  %v9116_v50 = vpop.permute.xlu0 %9115 }
0x2c43   : > { %9188 = vmatpush.bf16.msrb.mxu1 %v9074_v13 }
0x2c46   : > { %9160 = vmatpush.bf16.msrb.mxu0 %v9071_v58 }
0x2c47   : > { %9189 = vmatpush.bf16.msrb.mxu1 %v9072_v27 }
0x2c4a   : > { %9161 = vmatpush.bf16.msrb.mxu0 %v9069_v63  ;;  %v9229_v63 = vld [vmem:[%s16197_s7] sm:$0xff] }
0x2c4b   : > { %9190 = vmatpush.bf16.msrb.mxu1 %v9070_v57  ;;  %v15539_v57 = vpop.permute.xlu2 %9085 }
0x2c4e   : > { %9162 = vmatpush.bf16.msrb.mxu0 %v9067_v34  ;;  %v9232_v34 = vld [vmem:[%s16197_s7 + $0x18] sm:$0xff] }
0x2c4f   : > { %9191 = vmatpush.bf16.msrb.mxu1 %v9068_v7  ;;  %11449 = vmatpush.msrb.mxu2 %v9232_v34  ;;  %v11443_v7 = vld [vmem:[%s16196_s5 + $0x10] sm:$0xff] }
0x2c50   : > { %11457 = vmatpush.msrb.mxu3 %v9232_v34 }
0x2c51   : > { %11215 = vmatmul.msk.bf16.vlgmr.msrb.gmra.mxu0 %vm8331_vm14, %v11441_v61  ;;  %11450 = vmatpush.msrb.mxu2 %v9231_v49 }
0x2c52   : > { %11219 = vmatmul.msk.bf16.vlgmr.msrb.gmra.mxu1 %vm8331_vm14, %v11441_v61  ;;  %9269 = vmatpush.msra.mxu0 %v9236_v52 }
0x2c53   : > { %9350 = vmatpush.msra.mxu1 %v9236_v52  ;;  %11458 = vmatpush.msrb.mxu3 %v9231_v49  ;;  %v9101_v56 = vpop.permute.xlu2 %9100 }
0x2c54   : > { %9270 = vmatpush.msra.mxu0 %v9235_v11  ;;  %11451 = vmatpush.msrb.mxu2 %v9230_v17 }
0x2c55   : > { %9351 = vmatpush.msra.mxu1 %v9235_v11  ;;  %11459 = vmatpush.msrb.mxu3 %v9230_v17 }
0x2c56   : > { %9271 = vmatpush.msra.mxu0 %v9234_v33  ;;  %11452 = vmatpush.msrb.mxu2 %v9229_v63 }
0x2c57   : > { %9352 = vmatpush.msra.mxu1 %v9234_v33  ;;  %11460 = vmatpush.msrb.mxu3 %v9229_v63 }
0x2c58   : > { %9272 = vmatpush.msra.mxu0 %v9233_v31 }
0x2c59   : > { %9353 = vmatpush.msra.mxu1 %v9233_v31 }
0x2c5a   : > { %9273 = vmatpush.msra.mxu0 %v9232_v34 }
0x2c5b   : > { %9354 = vmatpush.msra.mxu1 %v9232_v34 }
0x2c5c   : > { %9274 = vmatpush.msra.mxu0 %v9231_v49 }
0x2c5d   : > { %9355 = vmatpush.msra.mxu1 %v9231_v49 }
0x2c5e   : > { %9275 = vmatpush.msra.mxu0 %v9230_v17 }
0x2c5f   : > { %9356 = vmatpush.msra.mxu1 %v9230_v17 }
0x2c60   : > { %9276 = vmatpush.msra.mxu0 %v9229_v63 }
0x2c61   : > { %11216 = vmatmul.msk.bf16.gmra.mxu0 %vm8331_vm14, %v11442_v62  ;;  %9357 = vmatpush.msra.mxu1 %v9229_v63 }
0x2c62   : > { %11220 = vmatmul.msk.bf16.gmra.mxu1 %vm8331_vm14, %v11442_v62  ;;  %9424 = vmatpush.msrb.mxu0 %v9236_v52 }
0x2c63   : > { %9506 = vmatpush.msrb.mxu1 %v9236_v52 }
0x2c64   : > { %9425 = vmatpush.msrb.mxu0 %v9235_v11 }
0x2c65   : > { %9507 = vmatpush.msrb.mxu1 %v9235_v11  ;;  %v16208_v11 = vld [vmem:[#allocation21_spill] sm:$0xff] }
0x2c66   : > { %9426 = vmatpush.msrb.mxu0 %v9234_v33 }
0x2c67   : > { %9508 = vmatpush.msrb.mxu1 %v9234_v33 }
0x2c68   : > { %9427 = vmatpush.msrb.mxu0 %v9233_v31 }
0x2c69   : > { %9509 = vmatpush.msrb.mxu1 %v9233_v31  ;;  %v16209_v31 = vld [vmem:[#allocation9_spill] sm:$0xff] }
0x2c6a   : > { %9428 = vmatpush.msrb.mxu0 %v9232_v34 }
0x2c6b   : > { %9510 = vmatpush.msrb.mxu1 %v9232_v34 }
0x2c6c   : > { %9429 = vmatpush.msrb.mxu0 %v9231_v49 }
0x2c6d   : > { %9511 = vmatpush.msrb.mxu1 %v9231_v49 }
0x2c6e   : > { %9430 = vmatpush.msrb.mxu0 %v9230_v17 }
0x2c6f   : > { %9512 = vmatpush.msrb.mxu1 %v9230_v17 }
0x2c70   : > { %9431 = vmatpush.msrb.mxu0 %v9229_v63 }
0x2c71   : > { %11217 = vmatmul.msk.bf16.gmra.mxu0 %vm8331_vm14, %v11443_v7  ;;  %9513 = vmatpush.msrb.mxu1 %v9229_v63 }
0x2c72   : > { %11221 = vmatmul.msk.bf16.gmra.mxu1 %vm8331_vm14, %v11443_v7  ;;  %v9121_v7 = vpop.permute.xlu0 %9120 }
0x2c81   : > { %11218 = vmatmul.msk.bf16.gmra.mxu0 %vm8331_vm14, %v11444_v37 }
0x2c82   : > { %11222 = vmatmul.msk.bf16.gmra.mxu1 %vm8331_vm14, %v11444_v37 }
0x2cce   : > { %v9164_v48 = vpop.f32.mrf.mxu0 }
0x2ccf   : > { %v9165_v15 = vadd.f32 %v9164_v48, %v15539_v57  ;;  %v15542_v18 = vpop.f32.mrf.mxu1 }
0x2cd0   : > { %v9194_v49 = vadd.f32 %v15542_v18, %v15539_v57 }
0x2cd1   : > { %v9213_v29 = vadd.f32 %v9165_v15, %v14966_v32  ;;  %v9096_v32 = vpop.permute.xlu1 %9095  ;;  %v16210_v15 = vld [vmem:[#allocation4_spill] sm:$0xff] }
0x2cd3   : > { %9310 = vrot.lane.b32.xlu2 %v9213_v29, %s12343_s9  ;;  %11223 = vmatmul.msk.f32.vlgmr.msra.gmra.mxu0 %vm8331_vm14, %v9213_v29 }
0x2cd6   : > { %v9166_v16 = vpop.f32.mrf.mxu0 }
0x2cd7   : > { %v9167_v2 = vadd.f32 %v9166_v16, %v9091_v4  ;;  %v9195_v28 = vpop.f32.mrf.mxu1 }
0x2cd8   : > { %v9196_v9 = vadd.f32 %v9195_v28, %v9091_v4  ;;  %v16212_v4 = vld [vmem:[#allocation10_spill] sm:$0xff] }
0x2cd9   : > { %v9215_v51 = vadd.f32 %v9167_v2, %v16198_v54  ;;  %v9111_v39 = vpop.permute.xlu1 %9110  ;;  %v16213_v2 = vld [vmem:[#allocation22_spill] sm:$0xff] }
0x2cda   : > { %v9216_v60 = vadd.f32 %v9196_v9, %v16199_v43  ;;  %v9214_v28 = vadd.f32 %v9194_v49, %v16213_v2 }
0x2cdb   : > { %9312 = vrot.lane.b32.xlu1 %v9215_v51, %s12343_s9  ;;  %11224 = vmatmul.msk.f32.gmra.mxu0 %vm8331_vm14, %v9215_v51 }
0x2cdc   : > { %11248 = vmatmul.msk.f32.vlgmr.msrb.gmra.mxu2 %vm8331_vm14, %v9216_v60  ;;  %9468 = vrot.lane.b32.xlu2 %v9216_v60, %s12343_s9 }
0x2cde   : > { %v9169_v1 = vpop.f32.mrf.mxu0 }
0x2cdf   : > { %v9170_v55 = vadd.f32 %v9169_v1, %v9096_v32  ;;  %v9198_v59 = vpop.f32.mrf.mxu1 }
0x2ce0   : > { %v9199_v5 = vadd.f32 %v9198_v59, %v9096_v32 }
0x2ce1   : > { %v9217_v22 = vadd.f32 %v9170_v55, %v16200_v21 }
0x2ce2   : > { %v9218_v58 = vadd.f32 %v9199_v5, %v16201_v41 }
0x2ce3   : > { %9314 = vrot.lane.b32.xlu1 %v9217_v22, %s12343_s9  ;;  %11225 = vmatmul.msk.f32.gmra.mxu0 %vm8331_vm14, %v9217_v22 }
0x2ce4   : > { %11249 = vmatmul.msk.f32.gmra.mxu2 %vm8331_vm14, %v9218_v58  ;;  %9470 = vrot.lane.b32.xlu2 %v9218_v58, %s12343_s9 }
0x2ce6   : > { %v9171_v8 = vpop.f32.mrf.mxu0 }
0x2ce7   : > { %v9172_v20 = vadd.f32 %v9171_v8, %v9101_v56  ;;  %v9200_v27 = vpop.f32.mrf.mxu1 }
0x2ce8   : > { %v9201_v40 = vadd.f32 %v9200_v27, %v9101_v56 }
0x2ce9   : > { %v9219_v44 = vadd.f32 %v9172_v20, %v16202_v35 }
0x2cea   : > { %v9220_v47 = vadd.f32 %v9201_v40, %v16203_v26 }
0x2ceb   : > { %9316 = vrot.lane.b32.xlu0 %v9219_v44, %s12343_s9  ;;  %11226 = vmatmul.msk.f32.gmra.mxu0 %vm8331_vm14, %v9219_v44 }
0x2cec   : > { %11250 = vmatmul.msk.f32.gmra.mxu2 %vm8331_vm14, %v9220_v47  ;;  %9472 = vrot.lane.b32.xlu1 %v9220_v47, %s12343_s9 }
0x2cee   : > { %v9174_v10 = vpop.f32.mrf.mxu0 }
0x2cef   : > { %v9175_v0 = vadd.f32 %v9174_v10, %v9106_v46  ;;  %v9203_v6 = vpop.f32.mrf.mxu1 }
0x2cf0   : > { %v9204_v36 = vadd.f32 %v9203_v6, %v9106_v46 }
0x2cf1   : > { %v9221_v38 = vadd.f32 %v9175_v0, %v16204_v53 }
0x2cf2   : > { %v9222_v25 = vadd.f32 %v9204_v36, %v16205_v30 }
0x2cf3   : > { %9318 = vrot.lane.b32.xlu2 %v9221_v38, %s12343_s9  ;;  %11227 = vmatmul.msk.f32.gmra.mxu0 %vm8331_vm14, %v9221_v38 }
0x2cf4   : > { %11251 = vmatmul.msk.f32.gmra.mxu2 %vm8331_vm14, %v9222_v25  ;;  %9474 = vrot.lane.b32.xlu0 %v9222_v25, %s12343_s9 }
0x2cf6   : > { %v9176_v12 = vpop.f32.mrf.mxu0 }
0x2cf7   : > { %v9177_v14 = vadd.f32 %v9176_v12, %v9111_v39  ;;  %v9205_v45 = vpop.f32.mrf.mxu1 }
0x2cf8   : > { %v9206_v23 = vadd.f32 %v9205_v45, %v9111_v39 }
0x2cf9   : > { %v9223_v24 = vadd.f32 %v9177_v14, %v16206_v3 }
0x2cfa   : > { %v9224_v19 = vadd.f32 %v9206_v23, %v16207_v42 }
0x2cfb   : > { %9320 = vrot.lane.b32.xlu1 %v9223_v24, %s12343_s9  ;;  %11228 = vmatmul.msk.f32.gmra.mxu0 %vm8331_vm14, %v9223_v24 }
0x2cfc   : > { %11252 = vmatmul.msk.f32.gmra.mxu2 %vm8331_vm14, %v9224_v19  ;;  %9476 = vrot.lane.b32.xlu2 %v9224_v19, %s12343_s9 }
0x2cfe   : > { %v9179_v13 = vpop.f32.mrf.mxu0 }
0x2cff   : > { %v9180_v61 = vadd.f32 %v9179_v13, %v9116_v50  ;;  %v9208_v62 = vpop.f32.mrf.mxu1 }
0x2d00   : > { %v9209_v52 = vadd.f32 %v9208_v62, %v9116_v50 }
0x2d01   : > { %v9225_v33 = vadd.f32 %v9180_v61, %v16208_v11 }
0x2d02   : > { %v9226_v34 = vadd.f32 %v9209_v52, %v16209_v31 }
0x2d03   : > { %9322 = vrot.lane.b32.xlu0 %v9225_v33, %s12343_s9  ;;  %11229 = vmatmul.msk.f32.gmra.mxu0 %vm8331_vm14, %v9225_v33 }
0x2d04   : > { %11253 = vmatmul.msk.f32.gmra.mxu2 %vm8331_vm14, %v9226_v34  ;;  %9478 = vrot.lane.b32.xlu1 %v9226_v34, %s12343_s9 }
0x2d06   : > { %v9181_v37 = vpop.f32.mrf.mxu0 }
0x2d07   : > { %v9182_v17 = vadd.f32 %v9181_v37, %v9121_v7  ;;  %v9210_v63 = vpop.f32.mrf.mxu1 }
0x2d08   : > { %v9211_v48 = vadd.f32 %v9210_v63, %v9121_v7 }
0x2d09   : > { %v9227_v29 = vadd.f32 %v9182_v17, %v16210_v15 }
0x2d0a   : > { %v9228_v16 = vadd.f32 %v9211_v48, %v16212_v4 }
0x2d0b   : > { %9324 = vrot.lane.b32.xlu2 %v9227_v29, %s12343_s9  ;;  %11230 = vmatmul.msk.f32.gmra.mxu0 %vm8331_vm14, %v9227_v29 }
0x2d0c   : > { %11254 = vmatmul.msk.f32.gmra.mxu2 %vm8331_vm14, %v9228_v16  ;;  %9480 = vrot.lane.b32.xlu0 %v9228_v16, %s12343_s9 }
0x2d0d   : > { %9466 = vrot.lane.b32.xlu1 %v9214_v28, %s12343_s9 }
0x2d13   : > { %11247 = vmatmul.msk.f32.vlgmr.msrb.gmra.mxu0 %vm8331_vm14, %v9214_v28 }
0x2d2d   : > { %v9311_v57 = vpop.permute.xlu2 %9310 }
0x2d2e   : > { %11231 = vmatmul.msk.f32.vlgmr.msra.gmra.mxu1 %vm8331_vm14, %v9311_v57 }
0x2d36   : > { %v9469_v18 = vpop.permute.xlu2 %9468 }
0x2d37   : > { %11264 = vmatmul.msk.f32.vlgmr.msrb.gmra.mxu3 %vm8331_vm14, %v9469_v18 }
0x2d3e   : > { %v9471_v9 = vpop.permute.xlu2 %9470 }
0x2d3f   : > { %11265 = vmatmul.msk.f32.gmra.mxu3 %vm8331_vm14, %v9471_v9 }
0x2d4d   : > { %v9313_v54 = vpop.permute.xlu1 %9312  ;;  %v9319_v59 = vpop.permute.xlu2 %9318 }
0x2d4e   : > { %11232 = vmatmul.msk.f32.gmra.mxu1 %vm8331_vm14, %v9313_v54 }
0x2d50   : > { %v9278_v51 = vpop.f32.mrf.mxu0 }
0x2d51   : > { %9302 = vst.msk [vmem:[%s15602_s30] sm:$0xff] %vm16215_vm3, %v9278_v51  ;;  %vm16231_vm3 = vmmov %vm16228_vm0 }
0x2d55   : > { %v9315_v43 = vpop.permute.xlu1 %9314 }
0x2d56   : > { %11233 = vmatmul.msk.f32.gmra.mxu1 %vm8331_vm14, %v9315_v43  ;;  %v9477_v41 = vpop.permute.xlu2 %9476 }
0x2d58   : > { %v9281_v60 = vpop.f32.mrf.mxu0 }
0x2d59   : > { %9303 = vst.msk [vmem:[%s15602_s30 + $0x8] sm:$0xff] %vm16216_vm4, %v9281_v60  ;;  %vm16232_vm4 = vmmov %vm16228_vm0 }
0x2d5d   : > { %v9317_v32 = vpop.permute.xlu0 %9316 }
0x2d5e   : > { %v9473_v1 = vpop.permute.xlu1 %9472  ;;  %11234 = vmatmul.msk.f32.gmra.mxu1 %vm8331_vm14, %v9317_v32 }
0x2d5f   : > { %11266 = vmatmul.msk.f32.gmra.mxu3 %vm8331_vm14, %v9473_v1  ;;  %v9436_v10 = vpop.f32.mrf.mxu2 }
0x2d60   : > { %v9284_v55 = vpop.f32.mrf.mxu0  ;;  %11256 = vst.msk [vmem:[%s15602_s30 + $0x88] sm:$0xff] %vm16226_vm15, %v9436_v10  ;;  %vm16242_vm15 = vmmov %vm16228_vm0 }
0x2d61   : > { %9304 = vst.msk [vmem:[%s15602_s30 + $0x10] sm:$0xff] %vm16217_vm13, %v9284_v55  ;;  %vm16233_vm13 = vmmov %vm16228_vm0 }
0x2d65   : > { %v9325_v27 = vpop.permute.xlu2 %9324 }
0x2d66   : > { %v9475_v5 = vpop.permute.xlu0 %9474  ;;  %11235 = vmatmul.msk.f32.gmra.mxu1 %vm8331_vm14, %v9319_v59 }
0x2d67   : > { %11267 = vmatmul.msk.f32.gmra.mxu3 %vm8331_vm14, %v9475_v5  ;;  %v9439_v0 = vpop.f32.mrf.mxu2 }
0x2d68   : > { %v9287_v21 = vpop.f32.mrf.mxu0  ;;  %11257 = vst.msk [vmem:[%s15602_s30 + $0x90] sm:$0xff] %vm16229_vm1, %v9439_v0  ;;  %vm16244_vm1 = vmmov %vm16228_vm0 }
0x2d69   : > { %9305 = vst.msk [vmem:[%s15602_s30 + $0x18] sm:$0xff] %vm16218_vm11, %v9287_v21  ;;  %vm16234_vm11 = vmmov %vm16228_vm0 }
0x2d6d   : > { %v9321_v22 = vpop.permute.xlu1 %9320 }
0x2d6e   : > { %11236 = vmatmul.msk.f32.gmra.mxu1 %vm8331_vm14, %v9321_v22 }
0x2d6f   : > { %11268 = vmatmul.msk.f32.gmra.mxu3 %vm8331_vm14, %v9477_v41  ;;  %v9442_v38 = vpop.f32.mrf.mxu2 }
0x2d70   : > { %v9290_v58 = vpop.f32.mrf.mxu0  ;;  %11258 = vst.msk [vmem:[%s15602_s30 + $0x98] sm:$0xff] %vm16232_vm4, %v9442_v38 }
0x2d71   : > { %9306 = vst.msk [vmem:[%s15602_s30 + $0x20] sm:$0xff] %vm16219_vm2, %v9290_v58 }
0x2d75   : > { %v9323_v56 = vpop.permute.xlu0 %9322 }
0x2d76   : > { %v9479_v8 = vpop.permute.xlu1 %9478  ;;  %11237 = vmatmul.msk.f32.gmra.mxu1 %vm8331_vm14, %v9323_v56 }
0x2d77   : > { %11269 = vmatmul.msk.f32.gmra.mxu3 %vm8331_vm14, %v9479_v8  ;;  %v9445_v39 = vpop.f32.mrf.mxu2 }
0x2d78   : > { %v9293_v20 = vpop.f32.mrf.mxu0 }
0x2d79   : > { %9307 = vst.msk [vmem:[%s15602_s30 + $0x28] sm:$0xff] %vm16220_vm7, %v9293_v20  ;;  %vm16236_vm7 = vmmov %vm16228_vm0 }
0x2d7e   : > { %v9481_v40 = vpop.permute.xlu0 %9480  ;;  %11238 = vmatmul.msk.f32.gmra.mxu1 %vm8331_vm14, %v9325_v27 }
0x2d7f   : > { %11270 = vmatmul.msk.f32.gmra.mxu3 %vm8331_vm14, %v9481_v40  ;;  %v9467_v44 = vpop.permute.xlu1 %9466  ;;  %v9448_v45 = vpop.f32.mrf.mxu2 }
0x2d80   : > { %v9296_v35 = vpop.f32.mrf.mxu0 }
0x2d81   : > { %9308 = vst.msk [vmem:[%s15602_s30 + $0x30] sm:$0xff] %vm16221_vm8, %v9296_v35  ;;  %vm16237_vm8 = vmmov %vm16228_vm0 }
0x2d86   : > { %11263 = vmatmul.msk.f32.vlgmr.msrb.gmra.mxu1 %vm8331_vm14, %v9467_v44  ;;  %vm16225_vm14 = vmmov %vm16219_vm2 }
0x2d87   : > { %vm16235_vm2 = vmmov %vm16228_vm0  ;;  %v9451_v24 = vpop.f32.mrf.mxu2 }
0x2d88   : > { %v9299_v26 = vpop.f32.mrf.mxu0  ;;  %11259 = vst.msk [vmem:[%s15602_s30 + $0xa0] sm:$0xff] %vm16235_vm2, %v9445_v39 }
0x2d89   : > { %9309 = vst.msk [vmem:[%s15602_s30 + $0x38] sm:$0xff] %vm16222_vm6, %v9299_v26  ;;  %vm16238_vm6 = vmmov %vm16228_vm0 }
0x2d8a   : > { %11260 = vst.msk [vmem:[%s15602_s30 + $0xa8] sm:$0xff] %vm16238_vm6, %v9448_v45 }
0x2d8f   : > { %v9454_v61 = vpop.f32.mrf.mxu2 }
0x2d90   : > { %v9433_v46 = vpop.f32.mrf.mxu0  ;;  %11262 = vst.msk [vmem:[%s15602_s30 + $0xb8] sm:$0xff] %vm16228_vm0, %v9454_v61 }
0x2d91   : > { %11255 = vst.msk [vmem:[%s15602_s30 + $0x80] sm:$0xff] %vm16224_vm12, %v9433_v46  ;;  %vm16240_vm12 = vmmov %vm16228_vm0 }
0x2dab   : > { %v9359_v47 = vpop.f32.mrf.mxu1 }
0x2dac   : > { %11239 = vst.msk [vmem:[%s15602_s30 + $0x40] sm:$0xff] %vm16223_vm5, %v9359_v47  ;;  %vm16239_vm5 = vmmov %vm16228_vm0 }
0x2dba   : > { %v9518_v6 = vpop.f32.mrf.mxu3 }
0x2dbb   : > { %11272 = vst.msk [vmem:[%s15602_s30 + $0xc8] sm:$0xff] %vm16227_vm10, %v9518_v6  ;;  %vm16243_vm10 = vmmov %vm16228_vm0 }
0x2dc2   : > { %v9521_v30 = vpop.f32.mrf.mxu3 }
0x2dc3   : > { %11273 = vst.msk [vmem:[%s15602_s30 + $0xd0] sm:$0xff] %vm16230_vm9, %v9521_v30  ;;  %vm16245_vm9 = vmmov %vm16228_vm0 }
0x2dcb   : > { %v9362_v36 = vpop.f32.mrf.mxu1 }
0x2dcc   : > { %11240 = vst.msk [vmem:[%s15602_s30 + $0x48] sm:$0xff] %vm16225_vm14, %v9362_v36  ;;  %vm16241_vm14 = vmmov %vm16228_vm0 }
0x2dcd   : > { %11261 = vst.msk [vmem:[%s15602_s30 + $0xb0] sm:$0xff] %vm16241_vm14, %v9451_v24 }
0x2dd3   : > { %v9365_v53 = vpop.f32.mrf.mxu1 }
0x2dd4   : > { %11241 = vst.msk [vmem:[%s15602_s30 + $0x50] sm:$0xff] %vm16228_vm0, %v9365_v53 }
0x2ddb   : > { %v9368_v25 = vpop.f32.mrf.mxu1 }
0x2ddc   : > { %11242 = vst.msk [vmem:[%s15602_s30 + $0x58] sm:$0xff] %vm16231_vm3, %v9368_v25 }
0x2de2   : > { %v9524_v12 = vpop.f32.mrf.mxu3 }
0x2de3   : > { %11274 = vst.msk [vmem:[%s15602_s30 + $0xd8] sm:$0xff] %vm16233_vm13, %v9524_v12  ;;  %v9371_v14 = vpop.f32.mrf.mxu1 }
0x2de4   : > { %11243 = vst.msk [vmem:[%s15602_s30 + $0x60] sm:$0xff] %vm16234_vm11, %v9371_v14 }
0x2dea   : > { %v9527_v23 = vpop.f32.mrf.mxu3 }
0x2deb   : > { %11275 = vst.msk [vmem:[%s15602_s30 + $0xe0] sm:$0xff] %vm16236_vm7, %v9527_v23  ;;  %v9374_v3 = vpop.f32.mrf.mxu1 }
0x2dec   : > { %11244 = vst.msk [vmem:[%s15602_s30 + $0x68] sm:$0xff] %vm16237_vm8, %v9374_v3 }
0x2df2   : > { %v9530_v42 = vpop.f32.mrf.mxu3 }
0x2df3   : > { %11276 = vst.msk [vmem:[%s15602_s30 + $0xe8] sm:$0xff] %vm16239_vm5, %v9530_v42  ;;  %v9377_v19 = vpop.f32.mrf.mxu1 }
0x2df4   : > { %11245 = vst.msk [vmem:[%s15602_s30 + $0x70] sm:$0xff] %vm16240_vm12, %v9377_v19 }
0x2dfa   : > { %v9533_v50 = vpop.f32.mrf.mxu3 }
0x2dfb   : > { %11277 = vst.msk [vmem:[%s15602_s30 + $0xf0] sm:$0xff] %vm16242_vm15, %v9533_v50  ;;  %v9380_v13 = vpop.f32.mrf.mxu1 }
0x2dfc   : > { %11246 = vst.msk [vmem:[%s15602_s30 + $0x78] sm:$0xff] %vm16243_vm10, %v9380_v13 }
0x2e02   : > { %v9536_v62 = vpop.f32.mrf.mxu3 }
0x2e03   : > { %11278 = vst.msk [vmem:[%s15602_s30 + $0xf8] sm:$0xff] %vm16244_vm1, %v9536_v62  ;;  %v9515_v52 = vpop.f32.mrf.mxu1 }
0x2e04   : > { %11271 = vst.msk [vmem:[%s15602_s30 + $0xc0] sm:$0xff] %vm16245_vm9, %v9515_v52 }
0x2e05 PF: > { %s16246_s4 = sld [smem:[#allocation2_spill]] }
0x2e0b   : > { %s36_s27 = sadd.s32 1, %s16246_s4  }
0x2e0c   : > { %p33_p5 = scmp.ge.s32.totalorder %s36_s27, 4  }
0x2e0e   :  { %35 = sbr.rel (!%p33_p5) target bundleno = 17 (0x11), region = 275 }

</bundles_post_ra>
